<compile_context>
chip_gen: v5e
topology: v5e:2x2
jax: 0.10.0
libtpu: 0.0.40
codegen_flags: <defaults>
</compile_context>

<pallas_src>
import numpy as np

import jax
import jax.numpy as jnp
from jax.experimental import pallas as pl
from jax.experimental.pallas import tpu as pltpu


# ----------------------------------------------------------------------------
# Static network configuration
# ----------------------------------------------------------------------------
CIN, F, COUT = 4, 8, 1
H, W = 16, 16                 # must be even: 2x upsample + crop == exact resize
HO, WO = H // 2, W // 2       # low-res (after maxpool 3x3 / stride 2 / pad 1)
HP, WP = H + 2, W + 2         # reflection-padded full-res
HOP, WOP = HO + 2, WO + 2     # reflection-padded low-res
C2, CCAT = 2 * F, 3 * F       # process channels, skip-concat channels


# ----------------------------------------------------------------------------
# In-kernel helpers (operate on VMEM scratch refs)
# ----------------------------------------------------------------------------
def _reflect_finish(pad, h, w, c):
    """Fill the 1-pixel reflection border of a channel-interleaved padded
    buffer (h+2, (w+2)*c).  The interior (rows 1..h, pixel-cols 1..w) must
    already be written.  Matches torch.nn.ReflectionPad2d(1) incl. corners."""
    pad[1:h + 1, 0:c] = pad[1:h + 1, 2 * c:3 * c]                       # left
    pad[1:h + 1, (w + 1) * c:(w + 2) * c] = pad[1:h + 1, (w - 1) * c:w * c]  # right
    pad[0:1, :] = pad[2:3, :]                                           # top
    pad[h + 1:h + 2, :] = pad[h - 1:h, :]                               # bottom


def _conv3x3(pad, t_ref, b_ref, h_rows, relu=True):
    """3x3 conv over a reflection-padded, channel-interleaved buffer.

    pad   : (h_rows + 2, Wp*Cin) scratch ref
    t_ref : (3, Wp*Cin, Wout*Cout) Toeplitz weights (one slab per tap row dy)
    b_ref : (1, Wout*Cout) bias tiled over output pixels
    returns (h_rows, Wout*Cout) value (lane-dense).
    """
    acc = jnp.dot(pad[0:h_rows, :], t_ref[0], preferred_element_type=jnp.float32)
    acc = acc + jnp.dot(pad[1:h_rows + 1, :], t_ref[1],
                        preferred_element_type=jnp.float32)
    acc = acc + jnp.dot(pad[2:h_rows + 2, :], t_ref[2],
                        preferred_element_type=jnp.float32)
    acc = acc + b_ref[...]
    if relu:
        acc = jnp.maximum(acc, 0.0)
    return acc


# ----------------------------------------------------------------------------
# The fused forward kernel (one grid step == one batch image)
# ----------------------------------------------------------------------------
def _fused_forward_kernel(
        x_ref,
        t_pre1, b_pre1, t_pre2, b_pre2,
        t_proc1, b_proc1, t_proc2, b_proc2,
        t_head1, b_head1, t_head2, b_head2,
        out_ref,
        x_pad, f1_pad, f_pad, rmax, low_pad, p1_pad, p_lo, p_up,
        cat_pad, h1_pad):
    # ---- pre -------------------------------------------------------------
    x_pad[1:H + 1, CIN:(W + 1) * CIN] = x_ref[0]
    _reflect_finish(x_pad, H, W, CIN)

    a = _conv3x3(x_pad, t_pre1, b_pre1, H)               # (H, W*F)
    f1_pad[1:H + 1, F:(W + 1) * F] = a
    _reflect_finish(f1_pad, H, W, F)

    a = _conv3x3(f1_pad, t_pre2, b_pre2, H)              # features, (H, W*F)
    f_pad[1:H + 1, F:(W + 1) * F] = a
    _reflect_finish(f_pad, H, W, F)

    # ---- maxpool 3x3 / stride 2 / pad 1 ------------------------------------
    # (reading from the reflection-padded buffer is equivalent to -inf padding
    #  here: every reflected border value is a duplicate of an in-window value)
    for i in range(HO):
        row = jnp.maximum(
            jnp.maximum(f_pad[2 * i:2 * i + 1, :], f_pad[2 * i + 1:2 * i + 2, :]),
            f_pad[2 * i + 2:2 * i + 3, :])
        rmax[i:i + 1, :] = row
    for j in range(WO):
        c0 = rmax[:, (2 * j) * F:(2 * j + 1) * F]
        c1 = rmax[:, (2 * j + 1) * F:(2 * j + 2) * F]
        c2 = rmax[:, (2 * j + 2) * F:(2 * j + 3) * F]
        low_pad[1:HO + 1, (j + 1) * F:(j + 2) * F] = jnp.maximum(
            jnp.maximum(c0, c1), c2)
    _reflect_finish(low_pad, HO, WO, F)

    # ---- process (low resolution) ------------------------------------------
    a = _conv3x3(low_pad, t_proc1, b_proc1, HO)          # (HO, WO*2F)
    p1_pad[1:HO + 1, C2:(WO + 1) * C2] = a
    _reflect_finish(p1_pad, HO, WO, C2)

    p_lo[...] = _conv3x3(p1_pad, t_proc2, b_proc2, HO)   # lower_features

    # ---- bilinear 2x upsample (align_corners=False): rows, then columns ----
    for k in range(HO):
        km, kp = max(k - 1, 0), min(k + 1, HO - 1)
        cur = p_lo[k:k + 1, :]
        p_up[2 * k:2 * k + 1, :] = 0.25 * p_lo[km:km + 1, :] + 0.75 * cur
        p_up[2 * k + 1:2 * k + 2, :] = 0.75 * cur + 0.25 * p_lo[kp:kp + 1, :]

    # ---- cat((features, upsampled)) written straight into a padded buffer --
    for c in range(W):
        base = (c + 1) * CCAT
        # skip-connection channels [0, F)
        cat_pad[1:H + 1, base:base + F] = f_pad[1:H + 1, (c + 1) * F:(c + 2) * F]
        # upsampled channels [F, 3F): column-direction bilinear blend
        j = c // 2
        if c % 2 == 0:
            jm = max(j - 1, 0)
            up = (0.25 * p_up[:, jm * C2:(jm + 1) * C2] +
                  0.75 * p_up[:, j * C2:(j + 1) * C2])
        else:
            jp = min(j + 1, WO - 1)
            up = (0.75 * p_up[:, j * C2:(j + 1) * C2] +
                  0.25 * p_up[:, jp * C2:(jp + 1) * C2])
        cat_pad[1:H + 1, base + F:base + CCAT] = up
    _reflect_finish(cat_pad, H, W, CCAT)

    # ---- fused post / uncertainty heads ------------------------------------
    a = _conv3x3(cat_pad, t_head1, b_head1, H)           # (H, W*2F): [post F | unc F]
    h1_pad[1:H + 1, C2:(W + 1) * C2] = a
    _reflect_finish(h1_pad, H, W, C2)

    out_ref[0] = _conv3x3(h1_pad, t_head2, b_head2, H)   # (H, 2*W*COUT)


# ----------------------------------------------------------------------------
# Host-side parameter preprocessing (done once, plain NumPy)
# ----------------------------------------------------------------------------
def _toeplitz(w_hwio, w_out, w_pad):
    """(3,3,Cin,Cout) HWIO conv weight -> (3, w_pad*Cin, w_out*Cout) banded
    weight so the conv becomes 3 dots over the channel-interleaved rows."""
    _, _, cin, cout = w_hwio.shape
    t = np.zeros((3, w_pad * cin, w_out * cout), np.float32)
    for dy in range(3):
        for dx in range(3):
            for c in range(w_out):
                q = c + dx  # padded pixel column feeding output column c
                t[dy, q * cin:(q + 1) * cin, c * cout:(c + 1) * cout] = w_hwio[dy, dx]
    return jnp.asarray(t)


def _toeplitz_head2(w_post, w_unc, w_out, w_pad):
    """Fused post2/unc2: input is 2F interleaved ([0:F]=post path, [F:2F]=unc
    path); output columns [0:W*Cout]=post, [W*Cout:2*W*Cout]=uncertainty."""
    _, _, f, cout = w_post.shape
    cin = 2 * f
    t = np.zeros((3, w_pad * cin, 2 * w_out * cout), np.float32)
    for dy in range(3):
        for dx in range(3):
            for c in range(w_out):
                q = c + dx
                t[dy, q * cin:q * cin + f, c * cout:(c + 1) * cout] = w_post[dy, dx]
                t[dy, q * cin + f:q * cin + 2 * f,
                  w_out * cout + c * cout:w_out * cout + (c + 1) * cout] = w_unc[dy, dx]
    return jnp.asarray(t)


def _bias_row(b, w_out):
    return jnp.asarray(np.tile(np.asarray(b, np.float32), w_out)[None, :])


def prepare_params(raw):
    """Raw HWIO conv weights + biases -> the 12 kernel operands."""
    w_h1 = np.concatenate([raw["post1_w"], raw["unc1_w"]], axis=-1)   # (3,3,3F,2F)
    b_h1 = np.concatenate([raw["post1_b"], raw["unc1_b"]], axis=-1)
    b_h2 = np.concatenate([np.tile(np.asarray(raw["post2_b"], np.float32), W),
                           np.tile(np.asarray(raw["unc2_b"], np.float32), W)])
    return [
        _toeplitz(raw["pre1_w"], W, WP),    _bias_row(raw["pre1_b"], W),
        _toeplitz(raw["pre2_w"], W, WP),    _bias_row(raw["pre2_b"], W),
        _toeplitz(raw["proc1_w"], WO, WOP), _bias_row(raw["proc1_b"], WO),
        _toeplitz(raw["proc2_w"], WO, WOP), _bias_row(raw["proc2_b"], WO),
        _toeplitz(w_h1, W, WP),             _bias_row(b_h1, W),
        _toeplitz_head2(raw["post2_w"], raw["unc2_w"], W, WP),
        jnp.asarray(b_h2[None, :]),
    ]


# ----------------------------------------------------------------------------
# Forward wrapper
# ----------------------------------------------------------------------------
@jax.jit
def confidence_routing_forward(x_nchw, *kernel_params):
    # TODO(synk): H, W must be even; exactly-odd output sizes would need the
    # exact PyTorch interpolate-to-size semantics instead of 2x-upsample+crop.
    n = x_nchw.shape[0]
    x2d = jnp.transpose(x_nchw, (0, 2, 3, 1)).reshape(n, H, W * CIN)
    x2d = x2d.astype(jnp.float32)

    weight_specs = [
        pl.BlockSpec(p.shape, (lambda i, nd=p.ndim: (0,) * nd))
        for p in kernel_params
    ]

    y2d = pl.pallas_call(
        _fused_forward_kernel,
        out_shape=jax.ShapeDtypeStruct((n, H, 2 * W * COUT), jnp.float32),
        grid=(n,),
        in_specs=[pl.BlockSpec((1, H, W * CIN), lambda i: (i, 0, 0))] + weight_specs,
        out_specs=pl.BlockSpec((1, H, 2 * W * COUT), lambda i: (i, 0, 0)),
        scratch_shapes=[
            pltpu.VMEM((HP, WP * CIN), jnp.float32),     # x_pad
            pltpu.VMEM((HP, WP * F), jnp.float32),       # f1_pad
            pltpu.VMEM((HP, WP * F), jnp.float32),       # f_pad (features)
            pltpu.VMEM((HO, WP * F), jnp.float32),       # rmax (pool row-max)
            pltpu.VMEM((HOP, WOP * F), jnp.float32),     # low_pad
            pltpu.VMEM((HOP, WOP * C2), jnp.float32),    # p1_pad
            pltpu.VMEM((HO, WO * C2), jnp.float32),      # p_lo (lower_features)
            pltpu.VMEM((H, WO * C2), jnp.float32),       # p_up (row-upsampled)
            pltpu.VMEM((HP, WP * CCAT), jnp.float32),    # cat_pad
            pltpu.VMEM((HP, WP * C2), jnp.float32),      # h1_pad
        ],
        compiler_params=pltpu.CompilerParams(
            dimension_semantics=("parallel",)),
    )(x2d, *kernel_params)

    # (n, H, [post c*Cout+co | unc ...]) -> (n, 2*Cout, H, W), NCHW like torch
    y = y2d.reshape(n, H, 2, W, COUT)
    return jnp.transpose(y, (0, 2, 4, 1, 3)).reshape(n, 2 * COUT, H, W)


# ----------------------------------------------------------------------------
# Pure-JAX reference (mirrors the PyTorch module) for a correctness check
# ----------------------------------------------------------------------------
@jax.jit
def _reference_forward(x_nchw, raw):
    def conv(x, w, b):
        xp = jnp.pad(x, ((0, 0), (1, 1), (1, 1), (0, 0)), mode="reflect")
        y = jax.lax.conv_general_dilated(
            xp, jnp.asarray(w), window_strides=(1, 1), padding="VALID",
            dimension_numbers=("NHWC", "HWIO", "NHWC"),
            precision=jax.lax.Precision.HIGHEST)
        return jnp.maximum(y + jnp.asarray(b), 0.0)

    def maxpool(x):
        return jax.lax.reduce_window(
            x, -jnp.inf, jax.lax.max, (1, 3, 3, 1), (1, 2, 2, 1),
            ((0, 0), (1, 1), (1, 1), (0, 0)))

    def up2x(a):
        def up1d(a, axis):
            n = a.shape[axis]
            prev = jnp.concatenate([jax.lax.slice_in_dim(a, 0, 1, axis=axis),
                                    jax.lax.slice_in_dim(a, 0, n - 1, axis=axis)],
                                   axis=axis)
            nxt = jnp.concatenate([jax.lax.slice_in_dim(a, 1, n, axis=axis),
                                   jax.lax.slice_in_dim(a, n - 1, n, axis=axis)],
                                  axis=axis)
            even = 0.25 * prev + 0.75 * a
            odd = 0.75 * a + 0.25 * nxt
            stacked = jnp.stack([even, odd], axis=axis + 1)
            shape = list(a.shape)
            shape[axis] = 2 * n
            return stacked.reshape(shape)
        return up1d(up1d(a, 1), 2)

    x = jnp.transpose(x_nchw, (0, 2, 3, 1)).astype(jnp.float32)
    f = conv(x, raw["pre1_w"], raw["pre1_b"])
    f = conv(f, raw["pre2_w"], raw["pre2_b"])
    low = maxpool(f)
    p = conv(low, raw["proc1_w"], raw["proc1_b"])
    p = conv(p, raw["proc2_w"], raw["proc2_b"])
    up = up2x(p)[:, :H, :W, :]
    cat = jnp.concatenate([f, up], axis=-1)
    out = conv(conv(cat, raw["post1_w"], raw["post1_b"]),
               raw["post2_w"], raw["post2_b"])
    unc = conv(conv(cat, raw["unc1_w"], raw["unc1_b"]),
               raw["unc2_w"], raw["unc2_b"])
    y = jnp.concatenate([out, unc], axis=-1)
    return jnp.transpose(y, (0, 3, 1, 2))


# ----------------------------------------------------------------------------
# Synthetic parameters + driver
# ----------------------------------------------------------------------------
def init_raw_params(key):
    shapes = {
        "pre1": (CIN, F), "pre2": (F, F),
        "proc1": (F, 2 * F), "proc2": (2 * F, 2 * F),
        "post1": (3 * F, F), "post2": (F, COUT),
        "unc1": (3 * F, F), "unc2": (F, COUT),
    }
    raw = {}
    keys = jax.random.split(key, 2 * len(shapes))
    for i, (name, (ci, co)) in enumerate(shapes.items()):
        raw[name + "_w"] = np.asarray(
            0.1 * jax.random.normal(keys[2 * i], (3, 3, ci, co), dtype=jnp.float32))
        raw[name + "_b"] = np.asarray(
            0.05 * jax.random.normal(keys[2 * i + 1], (co,), dtype=jnp.float32))
    return raw


if __name__ == "__main__":
    # ConfidenceRouting(Cin=4, F=8, Cout=1, depth=1, batchnorms=False)
    N = 2
    key = jax.random.PRNGKey(0)
    k_x, k_p = jax.random.split(key)
    x = jax.random.normal(k_x, (N, CIN, H, W), dtype=jnp.float32)   # NCHW input
    raw = init_raw_params(k_p)
    kernel_params = prepare_params(raw)

    y = confidence_routing_forward(x, *kernel_params)
    y = jax.block_until_ready(y)

    assert y.shape == (N, 2 * COUT, H, W), y.shape
    assert bool(jnp.all(jnp.isfinite(y)))

    y_ref = jax.block_until_ready(_reference_forward(x, raw))
    max_err = float(jnp.max(jnp.abs(y - y_ref)))
    assert max_err < 5e-3, f"mismatch vs reference: max abs err {max_err}"

    print("KERNEL_OK")
</pallas_src>

<mosaic_0001>
module attributes {stable_mosaic.version = 11 : i64} {
  func.func @_fused_forward_kernel(%arg0: i32, %arg1: memref<1x16x64xf32, #tpu.memory_space<vmem>>, %arg2: memref<3x72x128xf32, #tpu.memory_space<vmem>>, %arg3: memref<1x128xf32, #tpu.memory_space<vmem>>, %arg4: memref<3x144x128xf32, #tpu.memory_space<vmem>>, %arg5: memref<1x128xf32, #tpu.memory_space<vmem>>, %arg6: memref<3x80x128xf32, #tpu.memory_space<vmem>>, %arg7: memref<1x128xf32, #tpu.memory_space<vmem>>, %arg8: memref<3x160x128xf32, #tpu.memory_space<vmem>>, %arg9: memref<1x128xf32, #tpu.memory_space<vmem>>, %arg10: memref<3x432x256xf32, #tpu.memory_space<vmem>>, %arg11: memref<1x256xf32, #tpu.memory_space<vmem>>, %arg12: memref<3x288x32xf32, #tpu.memory_space<vmem>>, %arg13: memref<1x32xf32, #tpu.memory_space<vmem>>, %arg14: memref<1x16x32xf32, #tpu.memory_space<vmem>>, %arg15: memref<18x72xf32, #tpu.memory_space<vmem>>, %arg16: memref<18x144xf32, #tpu.memory_space<vmem>>, %arg17: memref<18x144xf32, #tpu.memory_space<vmem>>, %arg18: memref<8x144xf32, #tpu.memory_space<vmem>>, %arg19: memref<10x80xf32, #tpu.memory_space<vmem>>, %arg20: memref<10x160xf32, #tpu.memory_space<vmem>>, %arg21: memref<8x128xf32, #tpu.memory_space<vmem>>, %arg22: memref<16x128xf32, #tpu.memory_space<vmem>>, %arg23: memref<18x432xf32, #tpu.memory_space<vmem>>, %arg24: memref<18x288xf32, #tpu.memory_space<vmem>>) attributes {dimension_semantics = [#tpu.dimension_semantics<parallel>], iteration_bounds = array<i64: 2>, scalar_prefetch = 0 : i64, scratch_operands = 10 : i64, tpu.core_type = #tpu.core_type<tc>, window_params = [{transform_indices = @transform_0, window_bounds = array<i64: 1, 16, 64>}, {pipeline_mode = #tpu.pipeline_mode<synchronous>, transform_indices = @transform_1, window_bounds = array<i64: 3, 72, 128>}, {pipeline_mode = #tpu.pipeline_mode<synchronous>, transform_indices = @transform_2, window_bounds = array<i64: 1, 128>}, {pipeline_mode = #tpu.pipeline_mode<synchronous>, transform_indices = @transform_3, window_bounds = array<i64: 3, 144, 128>}, {pipeline_mode = #tpu.pipeline_mode<synchronous>, transform_indices = @transform_4, window_bounds = array<i64: 1, 128>}, {pipeline_mode = #tpu.pipeline_mode<synchronous>, transform_indices = @transform_5, window_bounds = array<i64: 3, 80, 128>}, {pipeline_mode = #tpu.pipeline_mode<synchronous>, transform_indices = @transform_6, window_bounds = array<i64: 1, 128>}, {pipeline_mode = #tpu.pipeline_mode<synchronous>, transform_indices = @transform_7, window_bounds = array<i64: 3, 160, 128>}, {pipeline_mode = #tpu.pipeline_mode<synchronous>, transform_indices = @transform_8, window_bounds = array<i64: 1, 128>}, {pipeline_mode = #tpu.pipeline_mode<synchronous>, transform_indices = @transform_9, window_bounds = array<i64: 3, 432, 256>}, {pipeline_mode = #tpu.pipeline_mode<synchronous>, transform_indices = @transform_10, window_bounds = array<i64: 1, 256>}, {pipeline_mode = #tpu.pipeline_mode<synchronous>, transform_indices = @transform_11, window_bounds = array<i64: 3, 288, 32>}, {pipeline_mode = #tpu.pipeline_mode<synchronous>, transform_indices = @transform_12, window_bounds = array<i64: 1, 32>}, {transform_indices = @transform_13, window_bounds = array<i64: 1, 16, 32>}]} {
    %c0 = arith.constant 0 : index
    %c0_0 = arith.constant 0 : index
    %c0_1 = arith.constant 0 : index
    %0 = vector.load %arg1[%c0, %c0_0, %c0_1] : memref<1x16x64xf32, #tpu.memory_space<vmem>>, vector<1x16x64xf32>
    %1 = vector.shape_cast %0 : vector<1x16x64xf32> to vector<16x64xf32>
    %c1 = arith.constant 1 : index
    %c4 = arith.constant 4 : index
    %2 = vector.load %arg15[%c1, %c4] : memref<18x72xf32, #tpu.memory_space<vmem>>, vector<16x64xf32>
    tpu.vector_store %arg15[%c1, %c4], %1 {strides = array<i32>} : memref<18x72xf32, #tpu.memory_space<vmem>>, vector<16x64xf32>,
    %c1_2 = arith.constant 1 : index
    %c8 = arith.constant 8 : index
    %3 = vector.load %arg15[%c1_2, %c8] : memref<18x72xf32, #tpu.memory_space<vmem>>, vector<16x4xf32>
    %c1_3 = arith.constant 1 : index
    %c0_4 = arith.constant 0 : index
    %4 = vector.load %arg15[%c1_3, %c0_4] : memref<18x72xf32, #tpu.memory_space<vmem>>, vector<16x4xf32>
    tpu.vector_store %arg15[%c1_3, %c0_4], %3 {strides = array<i32>} : memref<18x72xf32, #tpu.memory_space<vmem>>, vector<16x4xf32>,
    %c1_5 = arith.constant 1 : index
    %c60 = arith.constant 60 : index
    %5 = vector.load %arg15[%c1_5, %c60] : memref<18x72xf32, #tpu.memory_space<vmem>>, vector<16x4xf32>
    %c1_6 = arith.constant 1 : index
    %c68 = arith.constant 68 : index
    %6 = vector.load %arg15[%c1_6, %c68] : memref<18x72xf32, #tpu.memory_space<vmem>>, vector<16x4xf32>
    tpu.vector_store %arg15[%c1_6, %c68], %5 {strides = array<i32>} : memref<18x72xf32, #tpu.memory_space<vmem>>, vector<16x4xf32>,
    %c2 = arith.constant 2 : index
    %c0_7 = arith.constant 0 : index
    %7 = vector.load %arg15[%c2, %c0_7] : memref<18x72xf32, #tpu.memory_space<vmem>>, vector<1x72xf32>
    %c0_8 = arith.constant 0 : index
    %c0_9 = arith.constant 0 : index
    %8 = vector.load %arg15[%c0_8, %c0_9] : memref<18x72xf32, #tpu.memory_space<vmem>>, vector<1x72xf32>
    tpu.vector_store %arg15[%c0_8, %c0_9], %7 {strides = array<i32>} : memref<18x72xf32, #tpu.memory_space<vmem>>, vector<1x72xf32>,
    %c15 = arith.constant 15 : index
    %c0_10 = arith.constant 0 : index
    %9 = vector.load %arg15[%c15, %c0_10] : memref<18x72xf32, #tpu.memory_space<vmem>>, vector<1x72xf32>
    %c17 = arith.constant 17 : index
    %c0_11 = arith.constant 0 : index
    %10 = vector.load %arg15[%c17, %c0_11] : memref<18x72xf32, #tpu.memory_space<vmem>>, vector<1x72xf32>
    tpu.vector_store %arg15[%c17, %c0_11], %9 {strides = array<i32>} : memref<18x72xf32, #tpu.memory_space<vmem>>, vector<1x72xf32>,
    %c0_12 = arith.constant 0 : index
    %c0_13 = arith.constant 0 : index
    %11 = vector.load %arg15[%c0_12, %c0_13] : memref<18x72xf32, #tpu.memory_space<vmem>>, vector<16x72xf32>
    %c0_14 = arith.constant 0 : index
    %c0_15 = arith.constant 0 : index
    %c0_16 = arith.constant 0 : index
    %12 = vector.load %arg2[%c0_14, %c0_15, %c0_16] : memref<3x72x128xf32, #tpu.memory_space<vmem>>, vector<1x72x128xf32>
    %13 = vector.shape_cast %12 : vector<1x72x128xf32> to vector<72x128xf32>
    %cst = arith.constant dense<0.000000e+00> : vector<16x128xf32>
    %14 = tpu.matmul %11, %13, %cst {dimension_numbers = #tpu.dot_dimension_numbers<[1], [0], [0], [1], [0, 0, 1, 1], [], []>} : vector<16x72xf32>, vector<72x128xf32>, vector<16x128xf32> -> vector<16x128xf32>
    %c1_17 = arith.constant 1 : index
    %c0_18 = arith.constant 0 : index
    %15 = vector.load %arg15[%c1_17, %c0_18] : memref<18x72xf32, #tpu.memory_space<vmem>>, vector<16x72xf32>
    %c1_19 = arith.constant 1 : index
    %c0_20 = arith.constant 0 : index
    %c0_21 = arith.constant 0 : index
    %16 = vector.load %arg2[%c1_19, %c0_20, %c0_21] : memref<3x72x128xf32, #tpu.memory_space<vmem>>, vector<1x72x128xf32>
    %17 = vector.shape_cast %16 : vector<1x72x128xf32> to vector<72x128xf32>
    %cst_22 = arith.constant dense<0.000000e+00> : vector<16x128xf32>
    %18 = tpu.matmul %15, %17, %cst_22 {dimension_numbers = #tpu.dot_dimension_numbers<[1], [0], [0], [1], [0, 0, 1, 1], [], []>} : vector<16x72xf32>, vector<72x128xf32>, vector<16x128xf32> -> vector<16x128xf32>
    %19 = arith.addf %14, %18 : vector<16x128xf32>
    %c2_23 = arith.constant 2 : index
    %c0_24 = arith.constant 0 : index
    %20 = vector.load %arg15[%c2_23, %c0_24] : memref<18x72xf32, #tpu.memory_space<vmem>>, vector<16x72xf32>
    %c2_25 = arith.constant 2 : index
    %c0_26 = arith.constant 0 : index
    %c0_27 = arith.constant 0 : index
    %21 = vector.load %arg2[%c2_25, %c0_26, %c0_27] : memref<3x72x128xf32, #tpu.memory_space<vmem>>, vector<1x72x128xf32>
    %22 = vector.shape_cast %21 : vector<1x72x128xf32> to vector<72x128xf32>
    %cst_28 = arith.constant dense<0.000000e+00> : vector<16x128xf32>
    %23 = tpu.matmul %20, %22, %cst_28 {dimension_numbers = #tpu.dot_dimension_numbers<[1], [0], [0], [1], [0, 0, 1, 1], [], []>} : vector<16x72xf32>, vector<72x128xf32>, vector<16x128xf32> -> vector<16x128xf32>
    %24 = arith.addf %19, %23 : vector<16x128xf32>
    %c0_29 = arith.constant 0 : index
    %c0_30 = arith.constant 0 : index
    %25 = vector.load %arg3[%c0_29, %c0_30] : memref<1x128xf32, #tpu.memory_space<vmem>>, vector<1x128xf32>
    %26 = vector.broadcast %25 : vector<1x128xf32> to vector<16x128xf32>
    %27 = arith.addf %24, %26 : vector<16x128xf32>
    %cst_31 = arith.constant 0.000000e+00 : f32
    %28 = vector.broadcast %cst_31 : f32 to vector<16x128xf32>
    %29 = arith.maximumf %27, %28 : vector<16x128xf32>
    %c1_32 = arith.constant 1 : index
    %c8_33 = arith.constant 8 : index
    %30 = vector.load %arg16[%c1_32, %c8_33] : memref<18x144xf32, #tpu.memory_space<vmem>>, vector<16x128xf32>
    tpu.vector_store %arg16[%c1_32, %c8_33], %29 {strides = array<i32>} : memref<18x144xf32, #tpu.memory_space<vmem>>, vector<16x128xf32>,
    %c1_34 = arith.constant 1 : index
    %c16 = arith.constant 16 : index
    %31 = vector.load %arg16[%c1_34, %c16] : memref<18x144xf32, #tpu.memory_space<vmem>>, vector<16x8xf32>
    %c1_35 = arith.constant 1 : index
    %c0_36 = arith.constant 0 : index
    %32 = vector.load %arg16[%c1_35, %c0_36] : memref<18x144xf32, #tpu.memory_space<vmem>>, vector<16x8xf32>
    tpu.vector_store %arg16[%c1_35, %c0_36], %31 {strides = array<i32>} : memref<18x144xf32, #tpu.memory_space<vmem>>, vector<16x8xf32>,
    %c1_37 = arith.constant 1 : index
    %c120 = arith.constant 120 : index
    %33 = vector.load %arg16[%c1_37, %c120] : memref<18x144xf32, #tpu.memory_space<vmem>>, vector<16x8xf32>
    %c1_38 = arith.constant 1 : index
    %c136 = arith.constant 136 : index
    %34 = vector.load %arg16[%c1_38, %c136] : memref<18x144xf32, #tpu.memory_space<vmem>>, vector<16x8xf32>
    tpu.vector_store %arg16[%c1_38, %c136], %33 {strides = array<i32>} : memref<18x144xf32, #tpu.memory_space<vmem>>, vector<16x8xf32>,
    %c2_39 = arith.constant 2 : index
    %c0_40 = arith.constant 0 : index
    %35 = vector.load %arg16[%c2_39, %c0_40] : memref<18x144xf32, #tpu.memory_space<vmem>>, vector<1x144xf32>
    %c0_41 = arith.constant 0 : index
    %c0_42 = arith.constant 0 : index
    %36 = vector.load %arg16[%c0_41, %c0_42] : memref<18x144xf32, #tpu.memory_space<vmem>>, vector<1x144xf32>
    tpu.vector_store %arg16[%c0_41, %c0_42], %35 {strides = array<i32>} : memref<18x144xf32, #tpu.memory_space<vmem>>, vector<1x144xf32>,
    %c15_43 = arith.constant 15 : index
    %c0_44 = arith.constant 0 : index
    %37 = vector.load %arg16[%c15_43, %c0_44] : memref<18x144xf32, #tpu.memory_space<vmem>>, vector<1x144xf32>
    %c17_45 = arith.constant 17 : index
    %c0_46 = arith.constant 0 : index
    %38 = vector.load %arg16[%c17_45, %c0_46] : memref<18x144xf32, #tpu.memory_space<vmem>>, vector<1x144xf32>
    tpu.vector_store %arg16[%c17_45, %c0_46], %37 {strides = array<i32>} : memref<18x144xf32, #tpu.memory_space<vmem>>, vector<1x144xf32>,
    %c0_47 = arith.constant 0 : index
    %c0_48 = arith.constant 0 : index
    %39 = vector.load %arg16[%c0_47, %c0_48] : memref<18x144xf32, #tpu.memory_space<vmem>>, vector<16x144xf32>
    %c0_49 = arith.constant 0 : index
    %c0_50 = arith.constant 0 : index
    %c0_51 = arith.constant 0 : index
    %40 = vector.load %arg4[%c0_49, %c0_50, %c0_51] : memref<3x144x128xf32, #tpu.memory_space<vmem>>, vector<1x144x128xf32>
    %41 = vector.shape_cast %40 : vector<1x144x128xf32> to vector<144x128xf32>
    %cst_52 = arith.constant dense<0.000000e+00> : vector<16x128xf32>
    %42 = tpu.matmul %39, %41, %cst_52 {dimension_numbers = #tpu.dot_dimension_numbers<[1], [0], [0], [1], [0, 0, 1, 1], [], []>} : vector<16x144xf32>, vector<144x128xf32>, vector<16x128xf32> -> vector<16x128xf32>
    %c1_53 = arith.constant 1 : index
    %c0_54 = arith.constant 0 : index
    %43 = vector.load %arg16[%c1_53, %c0_54] : memref<18x144xf32, #tpu.memory_space<vmem>>, vector<16x144xf32>
    %c1_55 = arith.constant 1 : index
    %c0_56 = arith.constant 0 : index
    %c0_57 = arith.constant 0 : index
    %44 = vector.load %arg4[%c1_55, %c0_56, %c0_57] : memref<3x144x128xf32, #tpu.memory_space<vmem>>, vector<1x144x128xf32>
    %45 = vector.shape_cast %44 : vector<1x144x128xf32> to vector<144x128xf32>
    %cst_58 = arith.constant dense<0.000000e+00> : vector<16x128xf32>
    %46 = tpu.matmul %43, %45, %cst_58 {dimension_numbers = #tpu.dot_dimension_numbers<[1], [0], [0], [1], [0, 0, 1, 1], [], []>} : vector<16x144xf32>, vector<144x128xf32>, vector<16x128xf32> -> vector<16x128xf32>
    %47 = arith.addf %42, %46 : vector<16x128xf32>
    %c2_59 = arith.constant 2 : index
    %c0_60 = arith.constant 0 : index
    %48 = vector.load %arg16[%c2_59, %c0_60] : memref<18x144xf32, #tpu.memory_space<vmem>>, vector<16x144xf32>
    %c2_61 = arith.constant 2 : index
    %c0_62 = arith.constant 0 : index
    %c0_63 = arith.constant 0 : index
    %49 = vector.load %arg4[%c2_61, %c0_62, %c0_63] : memref<3x144x128xf32, #tpu.memory_space<vmem>>, vector<1x144x128xf32>
    %50 = vector.shape_cast %49 : vector<1x144x128xf32> to vector<144x128xf32>
    %cst_64 = arith.constant dense<0.000000e+00> : vector<16x128xf32>
    %51 = tpu.matmul %48, %50, %cst_64 {dimension_numbers = #tpu.dot_dimension_numbers<[1], [0], [0], [1], [0, 0, 1, 1], [], []>} : vector<16x144xf32>, vector<144x128xf32>, vector<16x128xf32> -> vector<16x128xf32>
    %52 = arith.addf %47, %51 : vector<16x128xf32>
    %c0_65 = arith.constant 0 : index
    %c0_66 = arith.constant 0 : index
    %53 = vector.load %arg5[%c0_65, %c0_66] : memref<1x128xf32, #tpu.memory_space<vmem>>, vector<1x128xf32>
    %54 = vector.broadcast %53 : vector<1x128xf32> to vector<16x128xf32>
    %55 = arith.addf %52, %54 : vector<16x128xf32>
    %cst_67 = arith.constant 0.000000e+00 : f32
    %56 = vector.broadcast %cst_67 : f32 to vector<16x128xf32>
    %57 = arith.maximumf %55, %56 : vector<16x128xf32>
    %c1_68 = arith.constant 1 : index
    %c8_69 = arith.constant 8 : index
    %58 = vector.load %arg17[%c1_68, %c8_69] : memref<18x144xf32, #tpu.memory_space<vmem>>, vector<16x128xf32>
    tpu.vector_store %arg17[%c1_68, %c8_69], %57 {strides = array<i32>} : memref<18x144xf32, #tpu.memory_space<vmem>>, vector<16x128xf32>,
    %c1_70 = arith.constant 1 : index
    %c16_71 = arith.constant 16 : index
    %59 = vector.load %arg17[%c1_70, %c16_71] : memref<18x144xf32, #tpu.memory_space<vmem>>, vector<16x8xf32>
    %c1_72 = arith.constant 1 : index
    %c0_73 = arith.constant 0 : index
    %60 = vector.load %arg17[%c1_72, %c0_73] : memref<18x144xf32, #tpu.memory_space<vmem>>, vector<16x8xf32>
    tpu.vector_store %arg17[%c1_72, %c0_73], %59 {strides = array<i32>} : memref<18x144xf32, #tpu.memory_space<vmem>>, vector<16x8xf32>,
    %c1_74 = arith.constant 1 : index
    %c120_75 = arith.constant 120 : index
    %61 = vector.load %arg17[%c1_74, %c120_75] : memref<18x144xf32, #tpu.memory_space<vmem>>, vector<16x8xf32>
    %c1_76 = arith.constant 1 : index
    %c136_77 = arith.constant 136 : index
    %62 = vector.load %arg17[%c1_76, %c136_77] : memref<18x144xf32, #tpu.memory_space<vmem>>, vector<16x8xf32>
    tpu.vector_store %arg17[%c1_76, %c136_77], %61 {strides = array<i32>} : memref<18x144xf32, #tpu.memory_space<vmem>>, vector<16x8xf32>,
    %c2_78 = arith.constant 2 : index
    %c0_79 = arith.constant 0 : index
    %63 = vector.load %arg17[%c2_78, %c0_79] : memref<18x144xf32, #tpu.memory_space<vmem>>, vector<1x144xf32>
    %c0_80 = arith.constant 0 : index
    %c0_81 = arith.constant 0 : index
    %64 = vector.load %arg17[%c0_80, %c0_81] : memref<18x144xf32, #tpu.memory_space<vmem>>, vector<1x144xf32>
    tpu.vector_store %arg17[%c0_80, %c0_81], %63 {strides = array<i32>} : memref<18x144xf32, #tpu.memory_space<vmem>>, vector<1x144xf32>,
    %c15_82 = arith.constant 15 : index
    %c0_83 = arith.constant 0 : index
    %65 = vector.load %arg17[%c15_82, %c0_83] : memref<18x144xf32, #tpu.memory_space<vmem>>, vector<1x144xf32>
    %c17_84 = arith.constant 17 : index
    %c0_85 = arith.constant 0 : index
    %66 = vector.load %arg17[%c17_84, %c0_85] : memref<18x144xf32, #tpu.memory_space<vmem>>, vector<1x144xf32>
    tpu.vector_store %arg17[%c17_84, %c0_85], %65 {strides = array<i32>} : memref<18x144xf32, #tpu.memory_space<vmem>>, vector<1x144xf32>,
    %c0_86 = arith.constant 0 : index
    %c0_87 = arith.constant 0 : index
    %67 = vector.load %arg17[%c0_86, %c0_87] : memref<18x144xf32, #tpu.memory_space<vmem>>, vector<1x144xf32>
    %c1_88 = arith.constant 1 : index
    %c0_89 = arith.constant 0 : index
    %68 = vector.load %arg17[%c1_88, %c0_89] : memref<18x144xf32, #tpu.memory_space<vmem>>, vector<1x144xf32>
    %69 = arith.maximumf %67, %68 : vector<1x144xf32>
    %c2_90 = arith.constant 2 : index
    %c0_91 = arith.constant 0 : index
    %70 = vector.load %arg17[%c2_90, %c0_91] : memref<18x144xf32, #tpu.memory_space<vmem>>, vector<1x144xf32>
    %71 = arith.maximumf %69, %70 : vector<1x144xf32>
    %c0_92 = arith.constant 0 : index
    %c0_93 = arith.constant 0 : index
    %72 = vector.load %arg18[%c0_92, %c0_93] : memref<8x144xf32, #tpu.memory_space<vmem>>, vector<1x144xf32>
    tpu.vector_store %arg18[%c0_92, %c0_93], %71 {strides = array<i32>} : memref<8x144xf32, #tpu.memory_space<vmem>>, vector<1x144xf32>,
    %c2_94 = arith.constant 2 : index
    %c0_95 = arith.constant 0 : index
    %73 = vector.load %arg17[%c2_94, %c0_95] : memref<18x144xf32, #tpu.memory_space<vmem>>, vector<1x144xf32>
    %c3 = arith.constant 3 : index
    %c0_96 = arith.constant 0 : index
    %74 = vector.load %arg17[%c3, %c0_96] : memref<18x144xf32, #tpu.memory_space<vmem>>, vector<1x144xf32>
    %75 = arith.maximumf %73, %74 : vector<1x144xf32>
    %c4_97 = arith.constant 4 : index
    %c0_98 = arith.constant 0 : index
    %76 = vector.load %arg17[%c4_97, %c0_98] : memref<18x144xf32, #tpu.memory_space<vmem>>, vector<1x144xf32>
    %77 = arith.maximumf %75, %76 : vector<1x144xf32>
    %c1_99 = arith.constant 1 : index
    %c0_100 = arith.constant 0 : index
    %78 = vector.load %arg18[%c1_99, %c0_100] : memref<8x144xf32, #tpu.memory_space<vmem>>, vector<1x144xf32>
    tpu.vector_store %arg18[%c1_99, %c0_100], %77 {strides = array<i32>} : memref<8x144xf32, #tpu.memory_space<vmem>>, vector<1x144xf32>,
    %c4_101 = arith.constant 4 : index
    %c0_102 = arith.constant 0 : index
    %79 = vector.load %arg17[%c4_101, %c0_102] : memref<18x144xf32, #tpu.memory_space<vmem>>, vector<1x144xf32>
    %c5 = arith.constant 5 : index
    %c0_103 = arith.constant 0 : index
    %80 = vector.load %arg17[%c5, %c0_103] : memref<18x144xf32, #tpu.memory_space<vmem>>, vector<1x144xf32>
    %81 = arith.maximumf %79, %80 : vector<1x144xf32>
    %c6 = arith.constant 6 : index
    %c0_104 = arith.constant 0 : index
    %82 = vector.load %arg17[%c6, %c0_104] : memref<18x144xf32, #tpu.memory_space<vmem>>, vector<1x144xf32>
    %83 = arith.maximumf %81, %82 : vector<1x144xf32>
    %c2_105 = arith.constant 2 : index
    %c0_106 = arith.constant 0 : index
    %84 = vector.load %arg18[%c2_105, %c0_106] : memref<8x144xf32, #tpu.memory_space<vmem>>, vector<1x144xf32>
    tpu.vector_store %arg18[%c2_105, %c0_106], %83 {strides = array<i32>} : memref<8x144xf32, #tpu.memory_space<vmem>>, vector<1x144xf32>,
    %c6_107 = arith.constant 6 : index
    %c0_108 = arith.constant 0 : index
    %85 = vector.load %arg17[%c6_107, %c0_108] : memref<18x144xf32, #tpu.memory_space<vmem>>, vector<1x144xf32>
    %c7 = arith.constant 7 : index
    %c0_109 = arith.constant 0 : index
    %86 = vector.load %arg17[%c7, %c0_109] : memref<18x144xf32, #tpu.memory_space<vmem>>, vector<1x144xf32>
    %87 = arith.maximumf %85, %86 : vector<1x144xf32>
    %c8_110 = arith.constant 8 : index
    %c0_111 = arith.constant 0 : index
    %88 = vector.load %arg17[%c8_110, %c0_111] : memref<18x144xf32, #tpu.memory_space<vmem>>, vector<1x144xf32>
    %89 = arith.maximumf %87, %88 : vector<1x144xf32>
    %c3_112 = arith.constant 3 : index
    %c0_113 = arith.constant 0 : index
    %90 = vector.load %arg18[%c3_112, %c0_113] : memref<8x144xf32, #tpu.memory_space<vmem>>, vector<1x144xf32>
    tpu.vector_store %arg18[%c3_112, %c0_113], %89 {strides = array<i32>} : memref<8x144xf32, #tpu.memory_space<vmem>>, vector<1x144xf32>,
    %c8_114 = arith.constant 8 : index
    %c0_115 = arith.constant 0 : index
    %91 = vector.load %arg17[%c8_114, %c0_115] : memref<18x144xf32, #tpu.memory_space<vmem>>, vector<1x144xf32>
    %c9 = arith.constant 9 : index
    %c0_116 = arith.constant 0 : index
    %92 = vector.load %arg17[%c9, %c0_116] : memref<18x144xf32, #tpu.memory_space<vmem>>, vector<1x144xf32>
    %93 = arith.maximumf %91, %92 : vector<1x144xf32>
    %c10 = arith.constant 10 : index
    %c0_117 = arith.constant 0 : index
    %94 = vector.load %arg17[%c10, %c0_117] : memref<18x144xf32, #tpu.memory_space<vmem>>, vector<1x144xf32>
    %95 = arith.maximumf %93, %94 : vector<1x144xf32>
    %c4_118 = arith.constant 4 : index
    %c0_119 = arith.constant 0 : index
    %96 = vector.load %arg18[%c4_118, %c0_119] : memref<8x144xf32, #tpu.memory_space<vmem>>, vector<1x144xf32>
    tpu.vector_store %arg18[%c4_118, %c0_119], %95 {strides = array<i32>} : memref<8x144xf32, #tpu.memory_space<vmem>>, vector<1x144xf32>,
    %c10_120 = arith.constant 10 : index
    %c0_121 = arith.constant 0 : index
    %97 = vector.load %arg17[%c10_120, %c0_121] : memref<18x144xf32, #tpu.memory_space<vmem>>, vector<1x144xf32>
    %c11 = arith.constant 11 : index
    %c0_122 = arith.constant 0 : index
    %98 = vector.load %arg17[%c11, %c0_122] : memref<18x144xf32, #tpu.memory_space<vmem>>, vector<1x144xf32>
    %99 = arith.maximumf %97, %98 : vector<1x144xf32>
    %c12 = arith.constant 12 : index
    %c0_123 = arith.constant 0 : index
    %100 = vector.load %arg17[%c12, %c0_123] : memref<18x144xf32, #tpu.memory_space<vmem>>, vector<1x144xf32>
    %101 = arith.maximumf %99, %100 : vector<1x144xf32>
    %c5_124 = arith.constant 5 : index
    %c0_125 = arith.constant 0 : index
    %102 = vector.load %arg18[%c5_124, %c0_125] : memref<8x144xf32, #tpu.memory_space<vmem>>, vector<1x144xf32>
    tpu.vector_store %arg18[%c5_124, %c0_125], %101 {strides = array<i32>} : memref<8x144xf32, #tpu.memory_space<vmem>>, vector<1x144xf32>,
    %c12_126 = arith.constant 12 : index
    %c0_127 = arith.constant 0 : index
    %103 = vector.load %arg17[%c12_126, %c0_127] : memref<18x144xf32, #tpu.memory_space<vmem>>, vector<1x144xf32>
    %c13 = arith.constant 13 : index
    %c0_128 = arith.constant 0 : index
    %104 = vector.load %arg17[%c13, %c0_128] : memref<18x144xf32, #tpu.memory_space<vmem>>, vector<1x144xf32>
    %105 = arith.maximumf %103, %104 : vector<1x144xf32>
    %c14 = arith.constant 14 : index
    %c0_129 = arith.constant 0 : index
    %106 = vector.load %arg17[%c14, %c0_129] : memref<18x144xf32, #tpu.memory_space<vmem>>, vector<1x144xf32>
    %107 = arith.maximumf %105, %106 : vector<1x144xf32>
    %c6_130 = arith.constant 6 : index
    %c0_131 = arith.constant 0 : index
    %108 = vector.load %arg18[%c6_130, %c0_131] : memref<8x144xf32, #tpu.memory_space<vmem>>, vector<1x144xf32>
    tpu.vector_store %arg18[%c6_130, %c0_131], %107 {strides = array<i32>} : memref<8x144xf32, #tpu.memory_space<vmem>>, vector<1x144xf32>,
    %c14_132 = arith.constant 14 : index
    %c0_133 = arith.constant 0 : index
    %109 = vector.load %arg17[%c14_132, %c0_133] : memref<18x144xf32, #tpu.memory_space<vmem>>, vector<1x144xf32>
    %c15_134 = arith.constant 15 : index
    %c0_135 = arith.constant 0 : index
    %110 = vector.load %arg17[%c15_134, %c0_135] : memref<18x144xf32, #tpu.memory_space<vmem>>, vector<1x144xf32>
    %111 = arith.maximumf %109, %110 : vector<1x144xf32>
    %c16_136 = arith.constant 16 : index
    %c0_137 = arith.constant 0 : index
    %112 = vector.load %arg17[%c16_136, %c0_137] : memref<18x144xf32, #tpu.memory_space<vmem>>, vector<1x144xf32>
    %113 = arith.maximumf %111, %112 : vector<1x144xf32>
    %c7_138 = arith.constant 7 : index
    %c0_139 = arith.constant 0 : index
    %114 = vector.load %arg18[%c7_138, %c0_139] : memref<8x144xf32, #tpu.memory_space<vmem>>, vector<1x144xf32>
    tpu.vector_store %arg18[%c7_138, %c0_139], %113 {strides = array<i32>} : memref<8x144xf32, #tpu.memory_space<vmem>>, vector<1x144xf32>,
    %c0_140 = arith.constant 0 : index
    %c0_141 = arith.constant 0 : index
    %115 = vector.load %arg18[%c0_140, %c0_141] : memref<8x144xf32, #tpu.memory_space<vmem>>, vector<8x8xf32>
    %c0_142 = arith.constant 0 : index
    %c8_143 = arith.constant 8 : index
    %116 = vector.load %arg18[%c0_142, %c8_143] : memref<8x144xf32, #tpu.memory_space<vmem>>, vector<8x8xf32>
    %c0_144 = arith.constant 0 : index
    %c16_145 = arith.constant 16 : index
    %117 = vector.load %arg18[%c0_144, %c16_145] : memref<8x144xf32, #tpu.memory_space<vmem>>, vector<8x8xf32>
    %118 = arith.maximumf %115, %116 : vector<8x8xf32>
    %119 = arith.maximumf %118, %117 : vector<8x8xf32>
    %c1_146 = arith.constant 1 : index
    %c8_147 = arith.constant 8 : index
    %120 = vector.load %arg19[%c1_146, %c8_147] : memref<10x80xf32, #tpu.memory_space<vmem>>, vector<8x8xf32>
    tpu.vector_store %arg19[%c1_146, %c8_147], %119 {strides = array<i32>} : memref<10x80xf32, #tpu.memory_space<vmem>>, vector<8x8xf32>,
    %c0_148 = arith.constant 0 : index
    %c16_149 = arith.constant 16 : index
    %121 = vector.load %arg18[%c0_148, %c16_149] : memref<8x144xf32, #tpu.memory_space<vmem>>, vector<8x8xf32>
    %c0_150 = arith.constant 0 : index
    %c24 = arith.constant 24 : index
    %122 = vector.load %arg18[%c0_150, %c24] : memref<8x144xf32, #tpu.memory_space<vmem>>, vector<8x8xf32>
    %c0_151 = arith.constant 0 : index
    %c32 = arith.constant 32 : index
    %123 = vector.load %arg18[%c0_151, %c32] : memref<8x144xf32, #tpu.memory_space<vmem>>, vector<8x8xf32>
    %124 = arith.maximumf %121, %122 : vector<8x8xf32>
    %125 = arith.maximumf %124, %123 : vector<8x8xf32>
    %c1_152 = arith.constant 1 : index
    %c16_153 = arith.constant 16 : index
    %126 = vector.load %arg19[%c1_152, %c16_153] : memref<10x80xf32, #tpu.memory_space<vmem>>, vector<8x8xf32>
    tpu.vector_store %arg19[%c1_152, %c16_153], %125 {strides = array<i32>} : memref<10x80xf32, #tpu.memory_space<vmem>>, vector<8x8xf32>,
    %c0_154 = arith.constant 0 : index
    %c32_155 = arith.constant 32 : index
    %127 = vector.load %arg18[%c0_154, %c32_155] : memref<8x144xf32, #tpu.memory_space<vmem>>, vector<8x8xf32>
    %c0_156 = arith.constant 0 : index
    %c40 = arith.constant 40 : index
    %128 = vector.load %arg18[%c0_156, %c40] : memref<8x144xf32, #tpu.memory_space<vmem>>, vector<8x8xf32>
    %c0_157 = arith.constant 0 : index
    %c48 = arith.constant 48 : index
    %129 = vector.load %arg18[%c0_157, %c48] : memref<8x144xf32, #tpu.memory_space<vmem>>, vector<8x8xf32>
    %130 = arith.maximumf %127, %128 : vector<8x8xf32>
    %131 = arith.maximumf %130, %129 : vector<8x8xf32>
    %c1_158 = arith.constant 1 : index
    %c24_159 = arith.constant 24 : index
    %132 = vector.load %arg19[%c1_158, %c24_159] : memref<10x80xf32, #tpu.memory_space<vmem>>, vector<8x8xf32>
    tpu.vector_store %arg19[%c1_158, %c24_159], %131 {strides = array<i32>} : memref<10x80xf32, #tpu.memory_space<vmem>>, vector<8x8xf32>,
    %c0_160 = arith.constant 0 : index
    %c48_161 = arith.constant 48 : index
    %133 = vector.load %arg18[%c0_160, %c48_161] : memref<8x144xf32, #tpu.memory_space<vmem>>, vector<8x8xf32>
    %c0_162 = arith.constant 0 : index
    %c56 = arith.constant 56 : index
    %134 = vector.load %arg18[%c0_162, %c56] : memref<8x144xf32, #tpu.memory_space<vmem>>, vector<8x8xf32>
    %c0_163 = arith.constant 0 : index
    %c64 = arith.constant 64 : index
    %135 = vector.load %arg18[%c0_163, %c64] : memref<8x144xf32, #tpu.memory_space<vmem>>, vector<8x8xf32>
    %136 = arith.maximumf %133, %134 : vector<8x8xf32>
    %137 = arith.maximumf %136, %135 : vector<8x8xf32>
    %c1_164 = arith.constant 1 : index
    %c32_165 = arith.constant 32 : index
    %138 = vector.load %arg19[%c1_164, %c32_165] : memref<10x80xf32, #tpu.memory_space<vmem>>, vector<8x8xf32>
    tpu.vector_store %arg19[%c1_164, %c32_165], %137 {strides = array<i32>} : memref<10x80xf32, #tpu.memory_space<vmem>>, vector<8x8xf32>,
    %c0_166 = arith.constant 0 : index
    %c64_167 = arith.constant 64 : index
    %139 = vector.load %arg18[%c0_166, %c64_167] : memref<8x144xf32, #tpu.memory_space<vmem>>, vector<8x8xf32>
    %c0_168 = arith.constant 0 : index
    %c72 = arith.constant 72 : index
    %140 = vector.load %arg18[%c0_168, %c72] : memref<8x144xf32, #tpu.memory_space<vmem>>, vector<8x8xf32>
    %c0_169 = arith.constant 0 : index
    %c80 = arith.constant 80 : index
    %141 = vector.load %arg18[%c0_169, %c80] : memref<8x144xf32, #tpu.memory_space<vmem>>, vector<8x8xf32>
    %142 = arith.maximumf %139, %140 : vector<8x8xf32>
    %143 = arith.maximumf %142, %141 : vector<8x8xf32>
    %c1_170 = arith.constant 1 : index
    %c40_171 = arith.constant 40 : index
    %144 = vector.load %arg19[%c1_170, %c40_171] : memref<10x80xf32, #tpu.memory_space<vmem>>, vector<8x8xf32>
    tpu.vector_store %arg19[%c1_170, %c40_171], %143 {strides = array<i32>} : memref<10x80xf32, #tpu.memory_space<vmem>>, vector<8x8xf32>,
    %c0_172 = arith.constant 0 : index
    %c80_173 = arith.constant 80 : index
    %145 = vector.load %arg18[%c0_172, %c80_173] : memref<8x144xf32, #tpu.memory_space<vmem>>, vector<8x8xf32>
    %c0_174 = arith.constant 0 : index
    %c88 = arith.constant 88 : index
    %146 = vector.load %arg18[%c0_174, %c88] : memref<8x144xf32, #tpu.memory_space<vmem>>, vector<8x8xf32>
    %c0_175 = arith.constant 0 : index
    %c96 = arith.constant 96 : index
    %147 = vector.load %arg18[%c0_175, %c96] : memref<8x144xf32, #tpu.memory_space<vmem>>, vector<8x8xf32>
    %148 = arith.maximumf %145, %146 : vector<8x8xf32>
    %149 = arith.maximumf %148, %147 : vector<8x8xf32>
    %c1_176 = arith.constant 1 : index
    %c48_177 = arith.constant 48 : index
    %150 = vector.load %arg19[%c1_176, %c48_177] : memref<10x80xf32, #tpu.memory_space<vmem>>, vector<8x8xf32>
    tpu.vector_store %arg19[%c1_176, %c48_177], %149 {strides = array<i32>} : memref<10x80xf32, #tpu.memory_space<vmem>>, vector<8x8xf32>,
    %c0_178 = arith.constant 0 : index
    %c96_179 = arith.constant 96 : index
    %151 = vector.load %arg18[%c0_178, %c96_179] : memref<8x144xf32, #tpu.memory_space<vmem>>, vector<8x8xf32>
    %c0_180 = arith.constant 0 : index
    %c104 = arith.constant 104 : index
    %152 = vector.load %arg18[%c0_180, %c104] : memref<8x144xf32, #tpu.memory_space<vmem>>, vector<8x8xf32>
    %c0_181 = arith.constant 0 : index
    %c112 = arith.constant 112 : index
    %153 = vector.load %arg18[%c0_181, %c112] : memref<8x144xf32, #tpu.memory_space<vmem>>, vector<8x8xf32>
    %154 = arith.maximumf %151, %152 : vector<8x8xf32>
    %155 = arith.maximumf %154, %153 : vector<8x8xf32>
    %c1_182 = arith.constant 1 : index
    %c56_183 = arith.constant 56 : index
    %156 = vector.load %arg19[%c1_182, %c56_183] : memref<10x80xf32, #tpu.memory_space<vmem>>, vector<8x8xf32>
    tpu.vector_store %arg19[%c1_182, %c56_183], %155 {strides = array<i32>} : memref<10x80xf32, #tpu.memory_space<vmem>>, vector<8x8xf32>,
    %c0_184 = arith.constant 0 : index
    %c112_185 = arith.constant 112 : index
    %157 = vector.load %arg18[%c0_184, %c112_185] : memref<8x144xf32, #tpu.memory_space<vmem>>, vector<8x8xf32>
    %c0_186 = arith.constant 0 : index
    %c120_187 = arith.constant 120 : index
    %158 = vector.load %arg18[%c0_186, %c120_187] : memref<8x144xf32, #tpu.memory_space<vmem>>, vector<8x8xf32>
    %c0_188 = arith.constant 0 : index
    %c128 = arith.constant 128 : index
    %159 = vector.load %arg18[%c0_188, %c128] : memref<8x144xf32, #tpu.memory_space<vmem>>, vector<8x8xf32>
    %160 = arith.maximumf %157, %158 : vector<8x8xf32>
    %161 = arith.maximumf %160, %159 : vector<8x8xf32>
    %c1_189 = arith.constant 1 : index
    %c64_190 = arith.constant 64 : index
    %162 = vector.load %arg19[%c1_189, %c64_190] : memref<10x80xf32, #tpu.memory_space<vmem>>, vector<8x8xf32>
    tpu.vector_store %arg19[%c1_189, %c64_190], %161 {strides = array<i32>} : memref<10x80xf32, #tpu.memory_space<vmem>>, vector<8x8xf32>,
    %c1_191 = arith.constant 1 : index
    %c16_192 = arith.constant 16 : index
    %163 = vector.load %arg19[%c1_191, %c16_192] : memref<10x80xf32, #tpu.memory_space<vmem>>, vector<8x8xf32>
    %c1_193 = arith.constant 1 : index
    %c0_194 = arith.constant 0 : index
    %164 = vector.load %arg19[%c1_193, %c0_194] : memref<10x80xf32, #tpu.memory_space<vmem>>, vector<8x8xf32>
    tpu.vector_store %arg19[%c1_193, %c0_194], %163 {strides = array<i32>} : memref<10x80xf32, #tpu.memory_space<vmem>>, vector<8x8xf32>,
    %c1_195 = arith.constant 1 : index
    %c56_196 = arith.constant 56 : index
    %165 = vector.load %arg19[%c1_195, %c56_196] : memref<10x80xf32, #tpu.memory_space<vmem>>, vector<8x8xf32>
    %c1_197 = arith.constant 1 : index
    %c72_198 = arith.constant 72 : index
    %166 = vector.load %arg19[%c1_197, %c72_198] : memref<10x80xf32, #tpu.memory_space<vmem>>, vector<8x8xf32>
    tpu.vector_store %arg19[%c1_197, %c72_198], %165 {strides = array<i32>} : memref<10x80xf32, #tpu.memory_space<vmem>>, vector<8x8xf32>,
    %c2_199 = arith.constant 2 : index
    %c0_200 = arith.constant 0 : index
    %167 = vector.load %arg19[%c2_199, %c0_200] : memref<10x80xf32, #tpu.memory_space<vmem>>, vector<1x80xf32>
    %c0_201 = arith.constant 0 : index
    %c0_202 = arith.constant 0 : index
    %168 = vector.load %arg19[%c0_201, %c0_202] : memref<10x80xf32, #tpu.memory_space<vmem>>, vector<1x80xf32>
    tpu.vector_store %arg19[%c0_201, %c0_202], %167 {strides = array<i32>} : memref<10x80xf32, #tpu.memory_space<vmem>>, vector<1x80xf32>,
    %c7_203 = arith.constant 7 : index
    %c0_204 = arith.constant 0 : index
    %169 = vector.load %arg19[%c7_203, %c0_204] : memref<10x80xf32, #tpu.memory_space<vmem>>, vector<1x80xf32>
    %c9_205 = arith.constant 9 : index
    %c0_206 = arith.constant 0 : index
    %170 = vector.load %arg19[%c9_205, %c0_206] : memref<10x80xf32, #tpu.memory_space<vmem>>, vector<1x80xf32>
    tpu.vector_store %arg19[%c9_205, %c0_206], %169 {strides = array<i32>} : memref<10x80xf32, #tpu.memory_space<vmem>>, vector<1x80xf32>,
    %c0_207 = arith.constant 0 : index
    %c0_208 = arith.constant 0 : index
    %171 = vector.load %arg19[%c0_207, %c0_208] : memref<10x80xf32, #tpu.memory_space<vmem>>, vector<8x80xf32>
    %c0_209 = arith.constant 0 : index
    %c0_210 = arith.constant 0 : index
    %c0_211 = arith.constant 0 : index
    %172 = vector.load %arg6[%c0_209, %c0_210, %c0_211] : memref<3x80x128xf32, #tpu.memory_space<vmem>>, vector<1x80x128xf32>
    %173 = vector.shape_cast %172 : vector<1x80x128xf32> to vector<80x128xf32>
    %cst_212 = arith.constant dense<0.000000e+00> : vector<8x128xf32>
    %174 = tpu.matmul %171, %173, %cst_212 {dimension_numbers = #tpu.dot_dimension_numbers<[1], [0], [0], [1], [0, 0, 1, 1], [], []>} : vector<8x80xf32>, vector<80x128xf32>, vector<8x128xf32> -> vector<8x128xf32>
    %c1_213 = arith.constant 1 : index
    %c0_214 = arith.constant 0 : index
    %175 = vector.load %arg19[%c1_213, %c0_214] : memref<10x80xf32, #tpu.memory_space<vmem>>, vector<8x80xf32>
    %c1_215 = arith.constant 1 : index
    %c0_216 = arith.constant 0 : index
    %c0_217 = arith.constant 0 : index
    %176 = vector.load %arg6[%c1_215, %c0_216, %c0_217] : memref<3x80x128xf32, #tpu.memory_space<vmem>>, vector<1x80x128xf32>
    %177 = vector.shape_cast %176 : vector<1x80x128xf32> to vector<80x128xf32>
    %cst_218 = arith.constant dense<0.000000e+00> : vector<8x128xf32>
    %178 = tpu.matmul %175, %177, %cst_218 {dimension_numbers = #tpu.dot_dimension_numbers<[1], [0], [0], [1], [0, 0, 1, 1], [], []>} : vector<8x80xf32>, vector<80x128xf32>, vector<8x128xf32> -> vector<8x128xf32>
    %179 = arith.addf %174, %178 : vector<8x128xf32>
    %c2_219 = arith.constant 2 : index
    %c0_220 = arith.constant 0 : index
    %180 = vector.load %arg19[%c2_219, %c0_220] : memref<10x80xf32, #tpu.memory_space<vmem>>, vector<8x80xf32>
    %c2_221 = arith.constant 2 : index
    %c0_222 = arith.constant 0 : index
    %c0_223 = arith.constant 0 : index
    %181 = vector.load %arg6[%c2_221, %c0_222, %c0_223] : memref<3x80x128xf32, #tpu.memory_space<vmem>>, vector<1x80x128xf32>
    %182 = vector.shape_cast %181 : vector<1x80x128xf32> to vector<80x128xf32>
    %cst_224 = arith.constant dense<0.000000e+00> : vector<8x128xf32>
    %183 = tpu.matmul %180, %182, %cst_224 {dimension_numbers = #tpu.dot_dimension_numbers<[1], [0], [0], [1], [0, 0, 1, 1], [], []>} : vector<8x80xf32>, vector<80x128xf32>, vector<8x128xf32> -> vector<8x128xf32>
    %184 = arith.addf %179, %183 : vector<8x128xf32>
    %c0_225 = arith.constant 0 : index
    %c0_226 = arith.constant 0 : index
    %185 = vector.load %arg7[%c0_225, %c0_226] : memref<1x128xf32, #tpu.memory_space<vmem>>, vector<1x128xf32>
    %186 = vector.broadcast %185 : vector<1x128xf32> to vector<8x128xf32>
    %187 = arith.addf %184, %186 : vector<8x128xf32>
    %cst_227 = arith.constant 0.000000e+00 : f32
    %188 = vector.broadcast %cst_227 : f32 to vector<8x128xf32>
    %189 = arith.maximumf %187, %188 : vector<8x128xf32>
    %c1_228 = arith.constant 1 : index
    %c16_229 = arith.constant 16 : index
    %190 = vector.load %arg20[%c1_228, %c16_229] : memref<10x160xf32, #tpu.memory_space<vmem>>, vector<8x128xf32>
    tpu.vector_store %arg20[%c1_228, %c16_229], %189 {strides = array<i32>} : memref<10x160xf32, #tpu.memory_space<vmem>>, vector<8x128xf32>,
    %c1_230 = arith.constant 1 : index
    %c32_231 = arith.constant 32 : index
    %191 = vector.load %arg20[%c1_230, %c32_231] : memref<10x160xf32, #tpu.memory_space<vmem>>, vector<8x16xf32>
    %c1_232 = arith.constant 1 : index
    %c0_233 = arith.constant 0 : index
    %192 = vector.load %arg20[%c1_232, %c0_233] : memref<10x160xf32, #tpu.memory_space<vmem>>, vector<8x16xf32>
    tpu.vector_store %arg20[%c1_232, %c0_233], %191 {strides = array<i32>} : memref<10x160xf32, #tpu.memory_space<vmem>>, vector<8x16xf32>,
    %c1_234 = arith.constant 1 : index
    %c112_235 = arith.constant 112 : index
    %193 = vector.load %arg20[%c1_234, %c112_235] : memref<10x160xf32, #tpu.memory_space<vmem>>, vector<8x16xf32>
    %c1_236 = arith.constant 1 : index
    %c144 = arith.constant 144 : index
    %194 = vector.load %arg20[%c1_236, %c144] : memref<10x160xf32, #tpu.memory_space<vmem>>, vector<8x16xf32>
    tpu.vector_store %arg20[%c1_236, %c144], %193 {strides = array<i32>} : memref<10x160xf32, #tpu.memory_space<vmem>>, vector<8x16xf32>,
    %c2_237 = arith.constant 2 : index
    %c0_238 = arith.constant 0 : index
    %195 = vector.load %arg20[%c2_237, %c0_238] : memref<10x160xf32, #tpu.memory_space<vmem>>, vector<1x160xf32>
    %c0_239 = arith.constant 0 : index
    %c0_240 = arith.constant 0 : index
    %196 = vector.load %arg20[%c0_239, %c0_240] : memref<10x160xf32, #tpu.memory_space<vmem>>, vector<1x160xf32>
    tpu.vector_store %arg20[%c0_239, %c0_240], %195 {strides = array<i32>} : memref<10x160xf32, #tpu.memory_space<vmem>>, vector<1x160xf32>,
    %c7_241 = arith.constant 7 : index
    %c0_242 = arith.constant 0 : index
    %197 = vector.load %arg20[%c7_241, %c0_242] : memref<10x160xf32, #tpu.memory_space<vmem>>, vector<1x160xf32>
    %c9_243 = arith.constant 9 : index
    %c0_244 = arith.constant 0 : index
    %198 = vector.load %arg20[%c9_243, %c0_244] : memref<10x160xf32, #tpu.memory_space<vmem>>, vector<1x160xf32>
    tpu.vector_store %arg20[%c9_243, %c0_244], %197 {strides = array<i32>} : memref<10x160xf32, #tpu.memory_space<vmem>>, vector<1x160xf32>,
    %c0_245 = arith.constant 0 : index
    %c0_246 = arith.constant 0 : index
    %199 = vector.load %arg20[%c0_245, %c0_246] : memref<10x160xf32, #tpu.memory_space<vmem>>, vector<8x160xf32>
    %c0_247 = arith.constant 0 : index
    %c0_248 = arith.constant 0 : index
    %c0_249 = arith.constant 0 : index
    %200 = vector.load %arg8[%c0_247, %c0_248, %c0_249] : memref<3x160x128xf32, #tpu.memory_space<vmem>>, vector<1x160x128xf32>
    %201 = vector.shape_cast %200 : vector<1x160x128xf32> to vector<160x128xf32>
    %cst_250 = arith.constant dense<0.000000e+00> : vector<8x128xf32>
    %202 = tpu.matmul %199, %201, %cst_250 {dimension_numbers = #tpu.dot_dimension_numbers<[1], [0], [0], [1], [0, 0, 1, 1], [], []>} : vector<8x160xf32>, vector<160x128xf32>, vector<8x128xf32> -> vector<8x128xf32>
    %c1_251 = arith.constant 1 : index
    %c0_252 = arith.constant 0 : index
    %203 = vector.load %arg20[%c1_251, %c0_252] : memref<10x160xf32, #tpu.memory_space<vmem>>, vector<8x160xf32>
    %c1_253 = arith.constant 1 : index
    %c0_254 = arith.constant 0 : index
    %c0_255 = arith.constant 0 : index
    %204 = vector.load %arg8[%c1_253, %c0_254, %c0_255] : memref<3x160x128xf32, #tpu.memory_space<vmem>>, vector<1x160x128xf32>
    %205 = vector.shape_cast %204 : vector<1x160x128xf32> to vector<160x128xf32>
    %cst_256 = arith.constant dense<0.000000e+00> : vector<8x128xf32>
    %206 = tpu.matmul %203, %205, %cst_256 {dimension_numbers = #tpu.dot_dimension_numbers<[1], [0], [0], [1], [0, 0, 1, 1], [], []>} : vector<8x160xf32>, vector<160x128xf32>, vector<8x128xf32> -> vector<8x128xf32>
    %207 = arith.addf %202, %206 : vector<8x128xf32>
    %c2_257 = arith.constant 2 : index
    %c0_258 = arith.constant 0 : index
    %208 = vector.load %arg20[%c2_257, %c0_258] : memref<10x160xf32, #tpu.memory_space<vmem>>, vector<8x160xf32>
    %c2_259 = arith.constant 2 : index
    %c0_260 = arith.constant 0 : index
    %c0_261 = arith.constant 0 : index
    %209 = vector.load %arg8[%c2_259, %c0_260, %c0_261] : memref<3x160x128xf32, #tpu.memory_space<vmem>>, vector<1x160x128xf32>
    %210 = vector.shape_cast %209 : vector<1x160x128xf32> to vector<160x128xf32>
    %cst_262 = arith.constant dense<0.000000e+00> : vector<8x128xf32>
    %211 = tpu.matmul %208, %210, %cst_262 {dimension_numbers = #tpu.dot_dimension_numbers<[1], [0], [0], [1], [0, 0, 1, 1], [], []>} : vector<8x160xf32>, vector<160x128xf32>, vector<8x128xf32> -> vector<8x128xf32>
    %212 = arith.addf %207, %211 : vector<8x128xf32>
    %c0_263 = arith.constant 0 : index
    %c0_264 = arith.constant 0 : index
    %213 = vector.load %arg9[%c0_263, %c0_264] : memref<1x128xf32, #tpu.memory_space<vmem>>, vector<1x128xf32>
    %214 = vector.broadcast %213 : vector<1x128xf32> to vector<8x128xf32>
    %215 = arith.addf %212, %214 : vector<8x128xf32>
    %cst_265 = arith.constant 0.000000e+00 : f32
    %216 = vector.broadcast %cst_265 : f32 to vector<8x128xf32>
    %217 = arith.maximumf %215, %216 : vector<8x128xf32>
    %c0_266 = arith.constant 0 : index
    %c0_267 = arith.constant 0 : index
    %218 = vector.load %arg21[%c0_266, %c0_267] : memref<8x128xf32, #tpu.memory_space<vmem>>, vector<8x128xf32>
    tpu.vector_store %arg21[%c0_266, %c0_267], %217 {strides = array<i32>} : memref<8x128xf32, #tpu.memory_space<vmem>>, vector<8x128xf32>,
    %c0_268 = arith.constant 0 : index
    %c0_269 = arith.constant 0 : index
    %219 = vector.load %arg21[%c0_268, %c0_269] : memref<8x128xf32, #tpu.memory_space<vmem>>, vector<1x128xf32>
    %c0_270 = arith.constant 0 : index
    %c0_271 = arith.constant 0 : index
    %220 = vector.load %arg21[%c0_270, %c0_271] : memref<8x128xf32, #tpu.memory_space<vmem>>, vector<1x128xf32>
    %cst_272 = arith.constant 2.500000e-01 : f32
    %221 = vector.broadcast %cst_272 : f32 to vector<1x128xf32>
    %222 = arith.mulf %221, %220 : vector<1x128xf32>
    %cst_273 = arith.constant 7.500000e-01 : f32
    %223 = vector.broadcast %cst_273 : f32 to vector<1x128xf32>
    %224 = arith.mulf %223, %219 : vector<1x128xf32>
    %225 = arith.addf %222, %224 : vector<1x128xf32>
    %c0_274 = arith.constant 0 : index
    %c0_275 = arith.constant 0 : index
    %226 = vector.load %arg22[%c0_274, %c0_275] : memref<16x128xf32, #tpu.memory_space<vmem>>, vector<1x128xf32>
    tpu.vector_store %arg22[%c0_274, %c0_275], %225 {strides = array<i32>} : memref<16x128xf32, #tpu.memory_space<vmem>>, vector<1x128xf32>,
    %cst_276 = arith.constant 7.500000e-01 : f32
    %227 = vector.broadcast %cst_276 : f32 to vector<1x128xf32>
    %228 = arith.mulf %227, %219 : vector<1x128xf32>
    %c1_277 = arith.constant 1 : index
    %c0_278 = arith.constant 0 : index
    %229 = vector.load %arg21[%c1_277, %c0_278] : memref<8x128xf32, #tpu.memory_space<vmem>>, vector<1x128xf32>
    %cst_279 = arith.constant 2.500000e-01 : f32
    %230 = vector.broadcast %cst_279 : f32 to vector<1x128xf32>
    %231 = arith.mulf %230, %229 : vector<1x128xf32>
    %232 = arith.addf %228, %231 : vector<1x128xf32>
    %c1_280 = arith.constant 1 : index
    %c0_281 = arith.constant 0 : index
    %233 = vector.load %arg22[%c1_280, %c0_281] : memref<16x128xf32, #tpu.memory_space<vmem>>, vector<1x128xf32>
    tpu.vector_store %arg22[%c1_280, %c0_281], %232 {strides = array<i32>} : memref<16x128xf32, #tpu.memory_space<vmem>>, vector<1x128xf32>,
    %c1_282 = arith.constant 1 : index
    %c0_283 = arith.constant 0 : index
    %234 = vector.load %arg21[%c1_282, %c0_283] : memref<8x128xf32, #tpu.memory_space<vmem>>, vector<1x128xf32>
    %c0_284 = arith.constant 0 : index
    %c0_285 = arith.constant 0 : index
    %235 = vector.load %arg21[%c0_284, %c0_285] : memref<8x128xf32, #tpu.memory_space<vmem>>, vector<1x128xf32>
    %cst_286 = arith.constant 2.500000e-01 : f32
    %236 = vector.broadcast %cst_286 : f32 to vector<1x128xf32>
    %237 = arith.mulf %236, %235 : vector<1x128xf32>
    %cst_287 = arith.constant 7.500000e-01 : f32
    %238 = vector.broadcast %cst_287 : f32 to vector<1x128xf32>
    %239 = arith.mulf %238, %234 : vector<1x128xf32>
    %240 = arith.addf %237, %239 : vector<1x128xf32>
    %c2_288 = arith.constant 2 : index
    %c0_289 = arith.constant 0 : index
    %241 = vector.load %arg22[%c2_288, %c0_289] : memref<16x128xf32, #tpu.memory_space<vmem>>, vector<1x128xf32>
    tpu.vector_store %arg22[%c2_288, %c0_289], %240 {strides = array<i32>} : memref<16x128xf32, #tpu.memory_space<vmem>>, vector<1x128xf32>,
    %cst_290 = arith.constant 7.500000e-01 : f32
    %242 = vector.broadcast %cst_290 : f32 to vector<1x128xf32>
    %243 = arith.mulf %242, %234 : vector<1x128xf32>
    %c2_291 = arith.constant 2 : index
    %c0_292 = arith.constant 0 : index
    %244 = vector.load %arg21[%c2_291, %c0_292] : memref<8x128xf32, #tpu.memory_space<vmem>>, vector<1x128xf32>
    %cst_293 = arith.constant 2.500000e-01 : f32
    %245 = vector.broadcast %cst_293 : f32 to vector<1x128xf32>
    %246 = arith.mulf %245, %244 : vector<1x128xf32>
    %247 = arith.addf %243, %246 : vector<1x128xf32>
    %c3_294 = arith.constant 3 : index
    %c0_295 = arith.constant 0 : index
    %248 = vector.load %arg22[%c3_294, %c0_295] : memref<16x128xf32, #tpu.memory_space<vmem>>, vector<1x128xf32>
    tpu.vector_store %arg22[%c3_294, %c0_295], %247 {strides = array<i32>} : memref<16x128xf32, #tpu.memory_space<vmem>>, vector<1x128xf32>,
    %c2_296 = arith.constant 2 : index
    %c0_297 = arith.constant 0 : index
    %249 = vector.load %arg21[%c2_296, %c0_297] : memref<8x128xf32, #tpu.memory_space<vmem>>, vector<1x128xf32>
    %c1_298 = arith.constant 1 : index
    %c0_299 = arith.constant 0 : index
    %250 = vector.load %arg21[%c1_298, %c0_299] : memref<8x128xf32, #tpu.memory_space<vmem>>, vector<1x128xf32>
    %cst_300 = arith.constant 2.500000e-01 : f32
    %251 = vector.broadcast %cst_300 : f32 to vector<1x128xf32>
    %252 = arith.mulf %251, %250 : vector<1x128xf32>
    %cst_301 = arith.constant 7.500000e-01 : f32
    %253 = vector.broadcast %cst_301 : f32 to vector<1x128xf32>
    %254 = arith.mulf %253, %249 : vector<1x128xf32>
    %255 = arith.addf %252, %254 : vector<1x128xf32>
    %c4_302 = arith.constant 4 : index
    %c0_303 = arith.constant 0 : index
    %256 = vector.load %arg22[%c4_302, %c0_303] : memref<16x128xf32, #tpu.memory_space<vmem>>, vector<1x128xf32>
    tpu.vector_store %arg22[%c4_302, %c0_303], %255 {strides = array<i32>} : memref<16x128xf32, #tpu.memory_space<vmem>>, vector<1x128xf32>,
    %cst_304 = arith.constant 7.500000e-01 : f32
    %257 = vector.broadcast %cst_304 : f32 to vector<1x128xf32>
    %258 = arith.mulf %257, %249 : vector<1x128xf32>
    %c3_305 = arith.constant 3 : index
    %c0_306 = arith.constant 0 : index
    %259 = vector.load %arg21[%c3_305, %c0_306] : memref<8x128xf32, #tpu.memory_space<vmem>>, vector<1x128xf32>
    %cst_307 = arith.constant 2.500000e-01 : f32
    %260 = vector.broadcast %cst_307 : f32 to vector<1x128xf32>
    %261 = arith.mulf %260, %259 : vector<1x128xf32>
    %262 = arith.addf %258, %261 : vector<1x128xf32>
    %c5_308 = arith.constant 5 : index
    %c0_309 = arith.constant 0 : index
    %263 = vector.load %arg22[%c5_308, %c0_309] : memref<16x128xf32, #tpu.memory_space<vmem>>, vector<1x128xf32>
    tpu.vector_store %arg22[%c5_308, %c0_309], %262 {strides = array<i32>} : memref<16x128xf32, #tpu.memory_space<vmem>>, vector<1x128xf32>,
    %c3_310 = arith.constant 3 : index
    %c0_311 = arith.constant 0 : index
    %264 = vector.load %arg21[%c3_310, %c0_311] : memref<8x128xf32, #tpu.memory_space<vmem>>, vector<1x128xf32>
    %c2_312 = arith.constant 2 : index
    %c0_313 = arith.constant 0 : index
    %265 = vector.load %arg21[%c2_312, %c0_313] : memref<8x128xf32, #tpu.memory_space<vmem>>, vector<1x128xf32>
    %cst_314 = arith.constant 2.500000e-01 : f32
    %266 = vector.broadcast %cst_314 : f32 to vector<1x128xf32>
    %267 = arith.mulf %266, %265 : vector<1x128xf32>
    %cst_315 = arith.constant 7.500000e-01 : f32
    %268 = vector.broadcast %cst_315 : f32 to vector<1x128xf32>
    %269 = arith.mulf %268, %264 : vector<1x128xf32>
    %270 = arith.addf %267, %269 : vector<1x128xf32>
    %c6_316 = arith.constant 6 : index
    %c0_317 = arith.constant 0 : index
    %271 = vector.load %arg22[%c6_316, %c0_317] : memref<16x128xf32, #tpu.memory_space<vmem>>, vector<1x128xf32>
    tpu.vector_store %arg22[%c6_316, %c0_317], %270 {strides = array<i32>} : memref<16x128xf32, #tpu.memory_space<vmem>>, vector<1x128xf32>,
    %cst_318 = arith.constant 7.500000e-01 : f32
    %272 = vector.broadcast %cst_318 : f32 to vector<1x128xf32>
    %273 = arith.mulf %272, %264 : vector<1x128xf32>
    %c4_319 = arith.constant 4 : index
    %c0_320 = arith.constant 0 : index
    %274 = vector.load %arg21[%c4_319, %c0_320] : memref<8x128xf32, #tpu.memory_space<vmem>>, vector<1x128xf32>
    %cst_321 = arith.constant 2.500000e-01 : f32
    %275 = vector.broadcast %cst_321 : f32 to vector<1x128xf32>
    %276 = arith.mulf %275, %274 : vector<1x128xf32>
    %277 = arith.addf %273, %276 : vector<1x128xf32>
    %c7_322 = arith.constant 7 : index
    %c0_323 = arith.constant 0 : index
    %278 = vector.load %arg22[%c7_322, %c0_323] : memref<16x128xf32, #tpu.memory_space<vmem>>, vector<1x128xf32>
    tpu.vector_store %arg22[%c7_322, %c0_323], %277 {strides = array<i32>} : memref<16x128xf32, #tpu.memory_space<vmem>>, vector<1x128xf32>,
    %c4_324 = arith.constant 4 : index
    %c0_325 = arith.constant 0 : index
    %279 = vector.load %arg21[%c4_324, %c0_325] : memref<8x128xf32, #tpu.memory_space<vmem>>, vector<1x128xf32>
    %c3_326 = arith.constant 3 : index
    %c0_327 = arith.constant 0 : index
    %280 = vector.load %arg21[%c3_326, %c0_327] : memref<8x128xf32, #tpu.memory_space<vmem>>, vector<1x128xf32>
    %cst_328 = arith.constant 2.500000e-01 : f32
    %281 = vector.broadcast %cst_328 : f32 to vector<1x128xf32>
    %282 = arith.mulf %281, %280 : vector<1x128xf32>
    %cst_329 = arith.constant 7.500000e-01 : f32
    %283 = vector.broadcast %cst_329 : f32 to vector<1x128xf32>
    %284 = arith.mulf %283, %279 : vector<1x128xf32>
    %285 = arith.addf %282, %284 : vector<1x128xf32>
    %c8_330 = arith.constant 8 : index
    %c0_331 = arith.constant 0 : index
    %286 = vector.load %arg22[%c8_330, %c0_331] : memref<16x128xf32, #tpu.memory_space<vmem>>, vector<1x128xf32>
    tpu.vector_store %arg22[%c8_330, %c0_331], %285 {strides = array<i32>} : memref<16x128xf32, #tpu.memory_space<vmem>>, vector<1x128xf32>,
    %cst_332 = arith.constant 7.500000e-01 : f32
    %287 = vector.broadcast %cst_332 : f32 to vector<1x128xf32>
    %288 = arith.mulf %287, %279 : vector<1x128xf32>
    %c5_333 = arith.constant 5 : index
    %c0_334 = arith.constant 0 : index
    %289 = vector.load %arg21[%c5_333, %c0_334] : memref<8x128xf32, #tpu.memory_space<vmem>>, vector<1x128xf32>
    %cst_335 = arith.constant 2.500000e-01 : f32
    %290 = vector.broadcast %cst_335 : f32 to vector<1x128xf32>
    %291 = arith.mulf %290, %289 : vector<1x128xf32>
    %292 = arith.addf %288, %291 : vector<1x128xf32>
    %c9_336 = arith.constant 9 : index
    %c0_337 = arith.constant 0 : index
    %293 = vector.load %arg22[%c9_336, %c0_337] : memref<16x128xf32, #tpu.memory_space<vmem>>, vector<1x128xf32>
    tpu.vector_store %arg22[%c9_336, %c0_337], %292 {strides = array<i32>} : memref<16x128xf32, #tpu.memory_space<vmem>>, vector<1x128xf32>,
    %c5_338 = arith.constant 5 : index
    %c0_339 = arith.constant 0 : index
    %294 = vector.load %arg21[%c5_338, %c0_339] : memref<8x128xf32, #tpu.memory_space<vmem>>, vector<1x128xf32>
    %c4_340 = arith.constant 4 : index
    %c0_341 = arith.constant 0 : index
    %295 = vector.load %arg21[%c4_340, %c0_341] : memref<8x128xf32, #tpu.memory_space<vmem>>, vector<1x128xf32>
    %cst_342 = arith.constant 2.500000e-01 : f32
    %296 = vector.broadcast %cst_342 : f32 to vector<1x128xf32>
    %297 = arith.mulf %296, %295 : vector<1x128xf32>
    %cst_343 = arith.constant 7.500000e-01 : f32
    %298 = vector.broadcast %cst_343 : f32 to vector<1x128xf32>
    %299 = arith.mulf %298, %294 : vector<1x128xf32>
    %300 = arith.addf %297, %299 : vector<1x128xf32>
    %c10_344 = arith.constant 10 : index
    %c0_345 = arith.constant 0 : index
    %301 = vector.load %arg22[%c10_344, %c0_345] : memref<16x128xf32, #tpu.memory_space<vmem>>, vector<1x128xf32>
    tpu.vector_store %arg22[%c10_344, %c0_345], %300 {strides = array<i32>} : memref<16x128xf32, #tpu.memory_space<vmem>>, vector<1x128xf32>,
    %cst_346 = arith.constant 7.500000e-01 : f32
    %302 = vector.broadcast %cst_346 : f32 to vector<1x128xf32>
    %303 = arith.mulf %302, %294 : vector<1x128xf32>
    %c6_347 = arith.constant 6 : index
    %c0_348 = arith.constant 0 : index
    %304 = vector.load %arg21[%c6_347, %c0_348] : memref<8x128xf32, #tpu.memory_space<vmem>>, vector<1x128xf32>
    %cst_349 = arith.constant 2.500000e-01 : f32
    %305 = vector.broadcast %cst_349 : f32 to vector<1x128xf32>
    %306 = arith.mulf %305, %304 : vector<1x128xf32>
    %307 = arith.addf %303, %306 : vector<1x128xf32>
    %c11_350 = arith.constant 11 : index
    %c0_351 = arith.constant 0 : index
    %308 = vector.load %arg22[%c11_350, %c0_351] : memref<16x128xf32, #tpu.memory_space<vmem>>, vector<1x128xf32>
    tpu.vector_store %arg22[%c11_350, %c0_351], %307 {strides = array<i32>} : memref<16x128xf32, #tpu.memory_space<vmem>>, vector<1x128xf32>,
    %c6_352 = arith.constant 6 : index
    %c0_353 = arith.constant 0 : index
    %309 = vector.load %arg21[%c6_352, %c0_353] : memref<8x128xf32, #tpu.memory_space<vmem>>, vector<1x128xf32>
    %c5_354 = arith.constant 5 : index
    %c0_355 = arith.constant 0 : index
    %310 = vector.load %arg21[%c5_354, %c0_355] : memref<8x128xf32, #tpu.memory_space<vmem>>, vector<1x128xf32>
    %cst_356 = arith.constant 2.500000e-01 : f32
    %311 = vector.broadcast %cst_356 : f32 to vector<1x128xf32>
    %312 = arith.mulf %311, %310 : vector<1x128xf32>
    %cst_357 = arith.constant 7.500000e-01 : f32
    %313 = vector.broadcast %cst_357 : f32 to vector<1x128xf32>
    %314 = arith.mulf %313, %309 : vector<1x128xf32>
    %315 = arith.addf %312, %314 : vector<1x128xf32>
    %c12_358 = arith.constant 12 : index
    %c0_359 = arith.constant 0 : index
    %316 = vector.load %arg22[%c12_358, %c0_359] : memref<16x128xf32, #tpu.memory_space<vmem>>, vector<1x128xf32>
    tpu.vector_store %arg22[%c12_358, %c0_359], %315 {strides = array<i32>} : memref<16x128xf32, #tpu.memory_space<vmem>>, vector<1x128xf32>,
    %cst_360 = arith.constant 7.500000e-01 : f32
    %317 = vector.broadcast %cst_360 : f32 to vector<1x128xf32>
    %318 = arith.mulf %317, %309 : vector<1x128xf32>
    %c7_361 = arith.constant 7 : index
    %c0_362 = arith.constant 0 : index
    %319 = vector.load %arg21[%c7_361, %c0_362] : memref<8x128xf32, #tpu.memory_space<vmem>>, vector<1x128xf32>
    %cst_363 = arith.constant 2.500000e-01 : f32
    %320 = vector.broadcast %cst_363 : f32 to vector<1x128xf32>
    %321 = arith.mulf %320, %319 : vector<1x128xf32>
    %322 = arith.addf %318, %321 : vector<1x128xf32>
    %c13_364 = arith.constant 13 : index
    %c0_365 = arith.constant 0 : index
    %323 = vector.load %arg22[%c13_364, %c0_365] : memref<16x128xf32, #tpu.memory_space<vmem>>, vector<1x128xf32>
    tpu.vector_store %arg22[%c13_364, %c0_365], %322 {strides = array<i32>} : memref<16x128xf32, #tpu.memory_space<vmem>>, vector<1x128xf32>,
    %c7_366 = arith.constant 7 : index
    %c0_367 = arith.constant 0 : index
    %324 = vector.load %arg21[%c7_366, %c0_367] : memref<8x128xf32, #tpu.memory_space<vmem>>, vector<1x128xf32>
    %c6_368 = arith.constant 6 : index
    %c0_369 = arith.constant 0 : index
    %325 = vector.load %arg21[%c6_368, %c0_369] : memref<8x128xf32, #tpu.memory_space<vmem>>, vector<1x128xf32>
    %cst_370 = arith.constant 2.500000e-01 : f32
    %326 = vector.broadcast %cst_370 : f32 to vector<1x128xf32>
    %327 = arith.mulf %326, %325 : vector<1x128xf32>
    %cst_371 = arith.constant 7.500000e-01 : f32
    %328 = vector.broadcast %cst_371 : f32 to vector<1x128xf32>
    %329 = arith.mulf %328, %324 : vector<1x128xf32>
    %330 = arith.addf %327, %329 : vector<1x128xf32>
    %c14_372 = arith.constant 14 : index
    %c0_373 = arith.constant 0 : index
    %331 = vector.load %arg22[%c14_372, %c0_373] : memref<16x128xf32, #tpu.memory_space<vmem>>, vector<1x128xf32>
    tpu.vector_store %arg22[%c14_372, %c0_373], %330 {strides = array<i32>} : memref<16x128xf32, #tpu.memory_space<vmem>>, vector<1x128xf32>,
    %cst_374 = arith.constant 7.500000e-01 : f32
    %332 = vector.broadcast %cst_374 : f32 to vector<1x128xf32>
    %333 = arith.mulf %332, %324 : vector<1x128xf32>
    %c7_375 = arith.constant 7 : index
    %c0_376 = arith.constant 0 : index
    %334 = vector.load %arg21[%c7_375, %c0_376] : memref<8x128xf32, #tpu.memory_space<vmem>>, vector<1x128xf32>
    %cst_377 = arith.constant 2.500000e-01 : f32
    %335 = vector.broadcast %cst_377 : f32 to vector<1x128xf32>
    %336 = arith.mulf %335, %334 : vector<1x128xf32>
    %337 = arith.addf %333, %336 : vector<1x128xf32>
    %c15_378 = arith.constant 15 : index
    %c0_379 = arith.constant 0 : index
    %338 = vector.load %arg22[%c15_378, %c0_379] : memref<16x128xf32, #tpu.memory_space<vmem>>, vector<1x128xf32>
    tpu.vector_store %arg22[%c15_378, %c0_379], %337 {strides = array<i32>} : memref<16x128xf32, #tpu.memory_space<vmem>>, vector<1x128xf32>,
    %c1_380 = arith.constant 1 : index
    %c8_381 = arith.constant 8 : index
    %339 = vector.load %arg17[%c1_380, %c8_381] : memref<18x144xf32, #tpu.memory_space<vmem>>, vector<16x8xf32>
    %c1_382 = arith.constant 1 : index
    %c24_383 = arith.constant 24 : index
    %340 = vector.load %arg23[%c1_382, %c24_383] : memref<18x432xf32, #tpu.memory_space<vmem>>, vector<16x8xf32>
    tpu.vector_store %arg23[%c1_382, %c24_383], %339 {strides = array<i32>} : memref<18x432xf32, #tpu.memory_space<vmem>>, vector<16x8xf32>,
    %c0_384 = arith.constant 0 : index
    %c0_385 = arith.constant 0 : index
    %341 = vector.load %arg22[%c0_384, %c0_385] : memref<16x128xf32, #tpu.memory_space<vmem>>, vector<16x16xf32>
    %cst_386 = arith.constant 2.500000e-01 : f32
    %342 = vector.broadcast %cst_386 : f32 to vector<16x16xf32>
    %343 = arith.mulf %342, %341 : vector<16x16xf32>
    %c0_387 = arith.constant 0 : index
    %c0_388 = arith.constant 0 : index
    %344 = vector.load %arg22[%c0_387, %c0_388] : memref<16x128xf32, #tpu.memory_space<vmem>>, vector<16x16xf32>
    %cst_389 = arith.constant 7.500000e-01 : f32
    %345 = vector.broadcast %cst_389 : f32 to vector<16x16xf32>
    %346 = arith.mulf %345, %344 : vector<16x16xf32>
    %347 = arith.addf %343, %346 : vector<16x16xf32>
    %c1_390 = arith.constant 1 : index
    %c32_391 = arith.constant 32 : index
    %348 = vector.load %arg23[%c1_390, %c32_391] : memref<18x432xf32, #tpu.memory_space<vmem>>, vector<16x16xf32>
    tpu.vector_store %arg23[%c1_390, %c32_391], %347 {strides = array<i32>} : memref<18x432xf32, #tpu.memory_space<vmem>>, vector<16x16xf32>,
    %c1_392 = arith.constant 1 : index
    %c16_393 = arith.constant 16 : index
    %349 = vector.load %arg17[%c1_392, %c16_393] : memref<18x144xf32, #tpu.memory_space<vmem>>, vector<16x8xf32>
    %c1_394 = arith.constant 1 : index
    %c48_395 = arith.constant 48 : index
    %350 = vector.load %arg23[%c1_394, %c48_395] : memref<18x432xf32, #tpu.memory_space<vmem>>, vector<16x8xf32>
    tpu.vector_store %arg23[%c1_394, %c48_395], %349 {strides = array<i32>} : memref<18x432xf32, #tpu.memory_space<vmem>>, vector<16x8xf32>,
    %c0_396 = arith.constant 0 : index
    %c0_397 = arith.constant 0 : index
    %351 = vector.load %arg22[%c0_396, %c0_397] : memref<16x128xf32, #tpu.memory_space<vmem>>, vector<16x16xf32>
    %cst_398 = arith.constant 7.500000e-01 : f32
    %352 = vector.broadcast %cst_398 : f32 to vector<16x16xf32>
    %353 = arith.mulf %352, %351 : vector<16x16xf32>
    %c0_399 = arith.constant 0 : index
    %c16_400 = arith.constant 16 : index
    %354 = vector.load %arg22[%c0_399, %c16_400] : memref<16x128xf32, #tpu.memory_space<vmem>>, vector<16x16xf32>
    %cst_401 = arith.constant 2.500000e-01 : f32
    %355 = vector.broadcast %cst_401 : f32 to vector<16x16xf32>
    %356 = arith.mulf %355, %354 : vector<16x16xf32>
    %357 = arith.addf %353, %356 : vector<16x16xf32>
    %c1_402 = arith.constant 1 : index
    %c56_403 = arith.constant 56 : index
    %358 = vector.load %arg23[%c1_402, %c56_403] : memref<18x432xf32, #tpu.memory_space<vmem>>, vector<16x16xf32>
    tpu.vector_store %arg23[%c1_402, %c56_403], %357 {strides = array<i32>} : memref<18x432xf32, #tpu.memory_space<vmem>>, vector<16x16xf32>,
    %c1_404 = arith.constant 1 : index
    %c24_405 = arith.constant 24 : index
    %359 = vector.load %arg17[%c1_404, %c24_405] : memref<18x144xf32, #tpu.memory_space<vmem>>, vector<16x8xf32>
    %c1_406 = arith.constant 1 : index
    %c72_407 = arith.constant 72 : index
    %360 = vector.load %arg23[%c1_406, %c72_407] : memref<18x432xf32, #tpu.memory_space<vmem>>, vector<16x8xf32>
    tpu.vector_store %arg23[%c1_406, %c72_407], %359 {strides = array<i32>} : memref<18x432xf32, #tpu.memory_space<vmem>>, vector<16x8xf32>,
    %c0_408 = arith.constant 0 : index
    %c0_409 = arith.constant 0 : index
    %361 = vector.load %arg22[%c0_408, %c0_409] : memref<16x128xf32, #tpu.memory_space<vmem>>, vector<16x16xf32>
    %cst_410 = arith.constant 2.500000e-01 : f32
    %362 = vector.broadcast %cst_410 : f32 to vector<16x16xf32>
    %363 = arith.mulf %362, %361 : vector<16x16xf32>
    %c0_411 = arith.constant 0 : index
    %c16_412 = arith.constant 16 : index
    %364 = vector.load %arg22[%c0_411, %c16_412] : memref<16x128xf32, #tpu.memory_space<vmem>>, vector<16x16xf32>
    %cst_413 = arith.constant 7.500000e-01 : f32
    %365 = vector.broadcast %cst_413 : f32 to vector<16x16xf32>
    %366 = arith.mulf %365, %364 : vector<16x16xf32>
    %367 = arith.addf %363, %366 : vector<16x16xf32>
    %c1_414 = arith.constant 1 : index
    %c80_415 = arith.constant 80 : index
    %368 = vector.load %arg23[%c1_414, %c80_415] : memref<18x432xf32, #tpu.memory_space<vmem>>, vector<16x16xf32>
    tpu.vector_store %arg23[%c1_414, %c80_415], %367 {strides = array<i32>} : memref<18x432xf32, #tpu.memory_space<vmem>>, vector<16x16xf32>,
    %c1_416 = arith.constant 1 : index
    %c32_417 = arith.constant 32 : index
    %369 = vector.load %arg17[%c1_416, %c32_417] : memref<18x144xf32, #tpu.memory_space<vmem>>, vector<16x8xf32>
    %c1_418 = arith.constant 1 : index
    %c96_419 = arith.constant 96 : index
    %370 = vector.load %arg23[%c1_418, %c96_419] : memref<18x432xf32, #tpu.memory_space<vmem>>, vector<16x8xf32>
    tpu.vector_store %arg23[%c1_418, %c96_419], %369 {strides = array<i32>} : memref<18x432xf32, #tpu.memory_space<vmem>>, vector<16x8xf32>,
    %c0_420 = arith.constant 0 : index
    %c16_421 = arith.constant 16 : index
    %371 = vector.load %arg22[%c0_420, %c16_421] : memref<16x128xf32, #tpu.memory_space<vmem>>, vector<16x16xf32>
    %cst_422 = arith.constant 7.500000e-01 : f32
    %372 = vector.broadcast %cst_422 : f32 to vector<16x16xf32>
    %373 = arith.mulf %372, %371 : vector<16x16xf32>
    %c0_423 = arith.constant 0 : index
    %c32_424 = arith.constant 32 : index
    %374 = vector.load %arg22[%c0_423, %c32_424] : memref<16x128xf32, #tpu.memory_space<vmem>>, vector<16x16xf32>
    %cst_425 = arith.constant 2.500000e-01 : f32
    %375 = vector.broadcast %cst_425 : f32 to vector<16x16xf32>
    %376 = arith.mulf %375, %374 : vector<16x16xf32>
    %377 = arith.addf %373, %376 : vector<16x16xf32>
    %c1_426 = arith.constant 1 : index
    %c104_427 = arith.constant 104 : index
    %378 = vector.load %arg23[%c1_426, %c104_427] : memref<18x432xf32, #tpu.memory_space<vmem>>, vector<16x16xf32>
    tpu.vector_store %arg23[%c1_426, %c104_427], %377 {strides = array<i32>} : memref<18x432xf32, #tpu.memory_space<vmem>>, vector<16x16xf32>,
    %c1_428 = arith.constant 1 : index
    %c40_429 = arith.constant 40 : index
    %379 = vector.load %arg17[%c1_428, %c40_429] : memref<18x144xf32, #tpu.memory_space<vmem>>, vector<16x8xf32>
    %c1_430 = arith.constant 1 : index
    %c120_431 = arith.constant 120 : index
    %380 = vector.load %arg23[%c1_430, %c120_431] : memref<18x432xf32, #tpu.memory_space<vmem>>, vector<16x8xf32>
    tpu.vector_store %arg23[%c1_430, %c120_431], %379 {strides = array<i32>} : memref<18x432xf32, #tpu.memory_space<vmem>>, vector<16x8xf32>,
    %c0_432 = arith.constant 0 : index
    %c16_433 = arith.constant 16 : index
    %381 = vector.load %arg22[%c0_432, %c16_433] : memref<16x128xf32, #tpu.memory_space<vmem>>, vector<16x16xf32>
    %cst_434 = arith.constant 2.500000e-01 : f32
    %382 = vector.broadcast %cst_434 : f32 to vector<16x16xf32>
    %383 = arith.mulf %382, %381 : vector<16x16xf32>
    %c0_435 = arith.constant 0 : index
    %c32_436 = arith.constant 32 : index
    %384 = vector.load %arg22[%c0_435, %c32_436] : memref<16x128xf32, #tpu.memory_space<vmem>>, vector<16x16xf32>
    %cst_437 = arith.constant 7.500000e-01 : f32
    %385 = vector.broadcast %cst_437 : f32 to vector<16x16xf32>
    %386 = arith.mulf %385, %384 : vector<16x16xf32>
    %387 = arith.addf %383, %386 : vector<16x16xf32>
    %c1_438 = arith.constant 1 : index
    %c128_439 = arith.constant 128 : index
    %388 = vector.load %arg23[%c1_438, %c128_439] : memref<18x432xf32, #tpu.memory_space<vmem>>, vector<16x16xf32>
    tpu.vector_store %arg23[%c1_438, %c128_439], %387 {strides = array<i32>} : memref<18x432xf32, #tpu.memory_space<vmem>>, vector<16x16xf32>,
    %c1_440 = arith.constant 1 : index
    %c48_441 = arith.constant 48 : index
    %389 = vector.load %arg17[%c1_440, %c48_441] : memref<18x144xf32, #tpu.memory_space<vmem>>, vector<16x8xf32>
    %c1_442 = arith.constant 1 : index
    %c144_443 = arith.constant 144 : index
    %390 = vector.load %arg23[%c1_442, %c144_443] : memref<18x432xf32, #tpu.memory_space<vmem>>, vector<16x8xf32>
    tpu.vector_store %arg23[%c1_442, %c144_443], %389 {strides = array<i32>} : memref<18x432xf32, #tpu.memory_space<vmem>>, vector<16x8xf32>,
    %c0_444 = arith.constant 0 : index
    %c32_445 = arith.constant 32 : index
    %391 = vector.load %arg22[%c0_444, %c32_445] : memref<16x128xf32, #tpu.memory_space<vmem>>, vector<16x16xf32>
    %cst_446 = arith.constant 7.500000e-01 : f32
    %392 = vector.broadcast %cst_446 : f32 to vector<16x16xf32>
    %393 = arith.mulf %392, %391 : vector<16x16xf32>
    %c0_447 = arith.constant 0 : index
    %c48_448 = arith.constant 48 : index
    %394 = vector.load %arg22[%c0_447, %c48_448] : memref<16x128xf32, #tpu.memory_space<vmem>>, vector<16x16xf32>
    %cst_449 = arith.constant 2.500000e-01 : f32
    %395 = vector.broadcast %cst_449 : f32 to vector<16x16xf32>
    %396 = arith.mulf %395, %394 : vector<16x16xf32>
    %397 = arith.addf %393, %396 : vector<16x16xf32>
    %c1_450 = arith.constant 1 : index
    %c152 = arith.constant 152 : index
    %398 = vector.load %arg23[%c1_450, %c152] : memref<18x432xf32, #tpu.memory_space<vmem>>, vector<16x16xf32>
    tpu.vector_store %arg23[%c1_450, %c152], %397 {strides = array<i32>} : memref<18x432xf32, #tpu.memory_space<vmem>>, vector<16x16xf32>,
    %c1_451 = arith.constant 1 : index
    %c56_452 = arith.constant 56 : index
    %399 = vector.load %arg17[%c1_451, %c56_452] : memref<18x144xf32, #tpu.memory_space<vmem>>, vector<16x8xf32>
    %c1_453 = arith.constant 1 : index
    %c168 = arith.constant 168 : index
    %400 = vector.load %arg23[%c1_453, %c168] : memref<18x432xf32, #tpu.memory_space<vmem>>, vector<16x8xf32>
    tpu.vector_store %arg23[%c1_453, %c168], %399 {strides = array<i32>} : memref<18x432xf32, #tpu.memory_space<vmem>>, vector<16x8xf32>,
    %c0_454 = arith.constant 0 : index
    %c32_455 = arith.constant 32 : index
    %401 = vector.load %arg22[%c0_454, %c32_455] : memref<16x128xf32, #tpu.memory_space<vmem>>, vector<16x16xf32>
    %cst_456 = arith.constant 2.500000e-01 : f32
    %402 = vector.broadcast %cst_456 : f32 to vector<16x16xf32>
    %403 = arith.mulf %402, %401 : vector<16x16xf32>
    %c0_457 = arith.constant 0 : index
    %c48_458 = arith.constant 48 : index
    %404 = vector.load %arg22[%c0_457, %c48_458] : memref<16x128xf32, #tpu.memory_space<vmem>>, vector<16x16xf32>
    %cst_459 = arith.constant 7.500000e-01 : f32
    %405 = vector.broadcast %cst_459 : f32 to vector<16x16xf32>
    %406 = arith.mulf %405, %404 : vector<16x16xf32>
    %407 = arith.addf %403, %406 : vector<16x16xf32>
    %c1_460 = arith.constant 1 : index
    %c176 = arith.constant 176 : index
    %408 = vector.load %arg23[%c1_460, %c176] : memref<18x432xf32, #tpu.memory_space<vmem>>, vector<16x16xf32>
    tpu.vector_store %arg23[%c1_460, %c176], %407 {strides = array<i32>} : memref<18x432xf32, #tpu.memory_space<vmem>>, vector<16x16xf32>,
    %c1_461 = arith.constant 1 : index
    %c64_462 = arith.constant 64 : index
    %409 = vector.load %arg17[%c1_461, %c64_462] : memref<18x144xf32, #tpu.memory_space<vmem>>, vector<16x8xf32>
    %c1_463 = arith.constant 1 : index
    %c192 = arith.constant 192 : index
    %410 = vector.load %arg23[%c1_463, %c192] : memref<18x432xf32, #tpu.memory_space<vmem>>, vector<16x8xf32>
    tpu.vector_store %arg23[%c1_463, %c192], %409 {strides = array<i32>} : memref<18x432xf32, #tpu.memory_space<vmem>>, vector<16x8xf32>,
    %c0_464 = arith.constant 0 : index
    %c48_465 = arith.constant 48 : index
    %411 = vector.load %arg22[%c0_464, %c48_465] : memref<16x128xf32, #tpu.memory_space<vmem>>, vector<16x16xf32>
    %cst_466 = arith.constant 7.500000e-01 : f32
    %412 = vector.broadcast %cst_466 : f32 to vector<16x16xf32>
    %413 = arith.mulf %412, %411 : vector<16x16xf32>
    %c0_467 = arith.constant 0 : index
    %c64_468 = arith.constant 64 : index
    %414 = vector.load %arg22[%c0_467, %c64_468] : memref<16x128xf32, #tpu.memory_space<vmem>>, vector<16x16xf32>
    %cst_469 = arith.constant 2.500000e-01 : f32
    %415 = vector.broadcast %cst_469 : f32 to vector<16x16xf32>
    %416 = arith.mulf %415, %414 : vector<16x16xf32>
    %417 = arith.addf %413, %416 : vector<16x16xf32>
    %c1_470 = arith.constant 1 : index
    %c200 = arith.constant 200 : index
    %418 = vector.load %arg23[%c1_470, %c200] : memref<18x432xf32, #tpu.memory_space<vmem>>, vector<16x16xf32>
    tpu.vector_store %arg23[%c1_470, %c200], %417 {strides = array<i32>} : memref<18x432xf32, #tpu.memory_space<vmem>>, vector<16x16xf32>,
    %c1_471 = arith.constant 1 : index
    %c72_472 = arith.constant 72 : index
    %419 = vector.load %arg17[%c1_471, %c72_472] : memref<18x144xf32, #tpu.memory_space<vmem>>, vector<16x8xf32>
    %c1_473 = arith.constant 1 : index
    %c216 = arith.constant 216 : index
    %420 = vector.load %arg23[%c1_473, %c216] : memref<18x432xf32, #tpu.memory_space<vmem>>, vector<16x8xf32>
    tpu.vector_store %arg23[%c1_473, %c216], %419 {strides = array<i32>} : memref<18x432xf32, #tpu.memory_space<vmem>>, vector<16x8xf32>,
    %c0_474 = arith.constant 0 : index
    %c48_475 = arith.constant 48 : index
    %421 = vector.load %arg22[%c0_474, %c48_475] : memref<16x128xf32, #tpu.memory_space<vmem>>, vector<16x16xf32>
    %cst_476 = arith.constant 2.500000e-01 : f32
    %422 = vector.broadcast %cst_476 : f32 to vector<16x16xf32>
    %423 = arith.mulf %422, %421 : vector<16x16xf32>
    %c0_477 = arith.constant 0 : index
    %c64_478 = arith.constant 64 : index
    %424 = vector.load %arg22[%c0_477, %c64_478] : memref<16x128xf32, #tpu.memory_space<vmem>>, vector<16x16xf32>
    %cst_479 = arith.constant 7.500000e-01 : f32
    %425 = vector.broadcast %cst_479 : f32 to vector<16x16xf32>
    %426 = arith.mulf %425, %424 : vector<16x16xf32>
    %427 = arith.addf %423, %426 : vector<16x16xf32>
    %c1_480 = arith.constant 1 : index
    %c224 = arith.constant 224 : index
    %428 = vector.load %arg23[%c1_480, %c224] : memref<18x432xf32, #tpu.memory_space<vmem>>, vector<16x16xf32>
    tpu.vector_store %arg23[%c1_480, %c224], %427 {strides = array<i32>} : memref<18x432xf32, #tpu.memory_space<vmem>>, vector<16x16xf32>,
    %c1_481 = arith.constant 1 : index
    %c80_482 = arith.constant 80 : index
    %429 = vector.load %arg17[%c1_481, %c80_482] : memref<18x144xf32, #tpu.memory_space<vmem>>, vector<16x8xf32>
    %c1_483 = arith.constant 1 : index
    %c240 = arith.constant 240 : index
    %430 = vector.load %arg23[%c1_483, %c240] : memref<18x432xf32, #tpu.memory_space<vmem>>, vector<16x8xf32>
    tpu.vector_store %arg23[%c1_483, %c240], %429 {strides = array<i32>} : memref<18x432xf32, #tpu.memory_space<vmem>>, vector<16x8xf32>,
    %c0_484 = arith.constant 0 : index
    %c64_485 = arith.constant 64 : index
    %431 = vector.load %arg22[%c0_484, %c64_485] : memref<16x128xf32, #tpu.memory_space<vmem>>, vector<16x16xf32>
    %cst_486 = arith.constant 7.500000e-01 : f32
    %432 = vector.broadcast %cst_486 : f32 to vector<16x16xf32>
    %433 = arith.mulf %432, %431 : vector<16x16xf32>
    %c0_487 = arith.constant 0 : index
    %c80_488 = arith.constant 80 : index
    %434 = vector.load %arg22[%c0_487, %c80_488] : memref<16x128xf32, #tpu.memory_space<vmem>>, vector<16x16xf32>
    %cst_489 = arith.constant 2.500000e-01 : f32
    %435 = vector.broadcast %cst_489 : f32 to vector<16x16xf32>
    %436 = arith.mulf %435, %434 : vector<16x16xf32>
    %437 = arith.addf %433, %436 : vector<16x16xf32>
    %c1_490 = arith.constant 1 : index
    %c248 = arith.constant 248 : index
    %438 = vector.load %arg23[%c1_490, %c248] : memref<18x432xf32, #tpu.memory_space<vmem>>, vector<16x16xf32>
    tpu.vector_store %arg23[%c1_490, %c248], %437 {strides = array<i32>} : memref<18x432xf32, #tpu.memory_space<vmem>>, vector<16x16xf32>,
    %c1_491 = arith.constant 1 : index
    %c88_492 = arith.constant 88 : index
    %439 = vector.load %arg17[%c1_491, %c88_492] : memref<18x144xf32, #tpu.memory_space<vmem>>, vector<16x8xf32>
    %c1_493 = arith.constant 1 : index
    %c264 = arith.constant 264 : index
    %440 = vector.load %arg23[%c1_493, %c264] : memref<18x432xf32, #tpu.memory_space<vmem>>, vector<16x8xf32>
    tpu.vector_store %arg23[%c1_493, %c264], %439 {strides = array<i32>} : memref<18x432xf32, #tpu.memory_space<vmem>>, vector<16x8xf32>,
    %c0_494 = arith.constant 0 : index
    %c64_495 = arith.constant 64 : index
    %441 = vector.load %arg22[%c0_494, %c64_495] : memref<16x128xf32, #tpu.memory_space<vmem>>, vector<16x16xf32>
    %cst_496 = arith.constant 2.500000e-01 : f32
    %442 = vector.broadcast %cst_496 : f32 to vector<16x16xf32>
    %443 = arith.mulf %442, %441 : vector<16x16xf32>
    %c0_497 = arith.constant 0 : index
    %c80_498 = arith.constant 80 : index
    %444 = vector.load %arg22[%c0_497, %c80_498] : memref<16x128xf32, #tpu.memory_space<vmem>>, vector<16x16xf32>
    %cst_499 = arith.constant 7.500000e-01 : f32
    %445 = vector.broadcast %cst_499 : f32 to vector<16x16xf32>
    %446 = arith.mulf %445, %444 : vector<16x16xf32>
    %447 = arith.addf %443, %446 : vector<16x16xf32>
    %c1_500 = arith.constant 1 : index
    %c272 = arith.constant 272 : index
    %448 = vector.load %arg23[%c1_500, %c272] : memref<18x432xf32, #tpu.memory_space<vmem>>, vector<16x16xf32>
    tpu.vector_store %arg23[%c1_500, %c272], %447 {strides = array<i32>} : memref<18x432xf32, #tpu.memory_space<vmem>>, vector<16x16xf32>,
    %c1_501 = arith.constant 1 : index
    %c96_502 = arith.constant 96 : index
    %449 = vector.load %arg17[%c1_501, %c96_502] : memref<18x144xf32, #tpu.memory_space<vmem>>, vector<16x8xf32>
    %c1_503 = arith.constant 1 : index
    %c288 = arith.constant 288 : index
    %450 = vector.load %arg23[%c1_503, %c288] : memref<18x432xf32, #tpu.memory_space<vmem>>, vector<16x8xf32>
    tpu.vector_store %arg23[%c1_503, %c288], %449 {strides = array<i32>} : memref<18x432xf32, #tpu.memory_space<vmem>>, vector<16x8xf32>,
    %c0_504 = arith.constant 0 : index
    %c80_505 = arith.constant 80 : index
    %451 = vector.load %arg22[%c0_504, %c80_505] : memref<16x128xf32, #tpu.memory_space<vmem>>, vector<16x16xf32>
    %cst_506 = arith.constant 7.500000e-01 : f32
    %452 = vector.broadcast %cst_506 : f32 to vector<16x16xf32>
    %453 = arith.mulf %452, %451 : vector<16x16xf32>
    %c0_507 = arith.constant 0 : index
    %c96_508 = arith.constant 96 : index
    %454 = vector.load %arg22[%c0_507, %c96_508] : memref<16x128xf32, #tpu.memory_space<vmem>>, vector<16x16xf32>
    %cst_509 = arith.constant 2.500000e-01 : f32
    %455 = vector.broadcast %cst_509 : f32 to vector<16x16xf32>
    %456 = arith.mulf %455, %454 : vector<16x16xf32>
    %457 = arith.addf %453, %456 : vector<16x16xf32>
    %c1_510 = arith.constant 1 : index
    %c296 = arith.constant 296 : index
    %458 = vector.load %arg23[%c1_510, %c296] : memref<18x432xf32, #tpu.memory_space<vmem>>, vector<16x16xf32>
    tpu.vector_store %arg23[%c1_510, %c296], %457 {strides = array<i32>} : memref<18x432xf32, #tpu.memory_space<vmem>>, vector<16x16xf32>,
    %c1_511 = arith.constant 1 : index
    %c104_512 = arith.constant 104 : index
    %459 = vector.load %arg17[%c1_511, %c104_512] : memref<18x144xf32, #tpu.memory_space<vmem>>, vector<16x8xf32>
    %c1_513 = arith.constant 1 : index
    %c312 = arith.constant 312 : index
    %460 = vector.load %arg23[%c1_513, %c312] : memref<18x432xf32, #tpu.memory_space<vmem>>, vector<16x8xf32>
    tpu.vector_store %arg23[%c1_513, %c312], %459 {strides = array<i32>} : memref<18x432xf32, #tpu.memory_space<vmem>>, vector<16x8xf32>,
    %c0_514 = arith.constant 0 : index
    %c80_515 = arith.constant 80 : index
    %461 = vector.load %arg22[%c0_514, %c80_515] : memref<16x128xf32, #tpu.memory_space<vmem>>, vector<16x16xf32>
    %cst_516 = arith.constant 2.500000e-01 : f32
    %462 = vector.broadcast %cst_516 : f32 to vector<16x16xf32>
    %463 = arith.mulf %462, %461 : vector<16x16xf32>
    %c0_517 = arith.constant 0 : index
    %c96_518 = arith.constant 96 : index
    %464 = vector.load %arg22[%c0_517, %c96_518] : memref<16x128xf32, #tpu.memory_space<vmem>>, vector<16x16xf32>
    %cst_519 = arith.constant 7.500000e-01 : f32
    %465 = vector.broadcast %cst_519 : f32 to vector<16x16xf32>
    %466 = arith.mulf %465, %464 : vector<16x16xf32>
    %467 = arith.addf %463, %466 : vector<16x16xf32>
    %c1_520 = arith.constant 1 : index
    %c320 = arith.constant 320 : index
    %468 = vector.load %arg23[%c1_520, %c320] : memref<18x432xf32, #tpu.memory_space<vmem>>, vector<16x16xf32>
    tpu.vector_store %arg23[%c1_520, %c320], %467 {strides = array<i32>} : memref<18x432xf32, #tpu.memory_space<vmem>>, vector<16x16xf32>,
    %c1_521 = arith.constant 1 : index
    %c112_522 = arith.constant 112 : index
    %469 = vector.load %arg17[%c1_521, %c112_522] : memref<18x144xf32, #tpu.memory_space<vmem>>, vector<16x8xf32>
    %c1_523 = arith.constant 1 : index
    %c336 = arith.constant 336 : index
    %470 = vector.load %arg23[%c1_523, %c336] : memref<18x432xf32, #tpu.memory_space<vmem>>, vector<16x8xf32>
    tpu.vector_store %arg23[%c1_523, %c336], %469 {strides = array<i32>} : memref<18x432xf32, #tpu.memory_space<vmem>>, vector<16x8xf32>,
    %c0_524 = arith.constant 0 : index
    %c96_525 = arith.constant 96 : index
    %471 = vector.load %arg22[%c0_524, %c96_525] : memref<16x128xf32, #tpu.memory_space<vmem>>, vector<16x16xf32>
    %cst_526 = arith.constant 7.500000e-01 : f32
    %472 = vector.broadcast %cst_526 : f32 to vector<16x16xf32>
    %473 = arith.mulf %472, %471 : vector<16x16xf32>
    %c0_527 = arith.constant 0 : index
    %c112_528 = arith.constant 112 : index
    %474 = vector.load %arg22[%c0_527, %c112_528] : memref<16x128xf32, #tpu.memory_space<vmem>>, vector<16x16xf32>
    %cst_529 = arith.constant 2.500000e-01 : f32
    %475 = vector.broadcast %cst_529 : f32 to vector<16x16xf32>
    %476 = arith.mulf %475, %474 : vector<16x16xf32>
    %477 = arith.addf %473, %476 : vector<16x16xf32>
    %c1_530 = arith.constant 1 : index
    %c344 = arith.constant 344 : index
    %478 = vector.load %arg23[%c1_530, %c344] : memref<18x432xf32, #tpu.memory_space<vmem>>, vector<16x16xf32>
    tpu.vector_store %arg23[%c1_530, %c344], %477 {strides = array<i32>} : memref<18x432xf32, #tpu.memory_space<vmem>>, vector<16x16xf32>,
    %c1_531 = arith.constant 1 : index
    %c120_532 = arith.constant 120 : index
    %479 = vector.load %arg17[%c1_531, %c120_532] : memref<18x144xf32, #tpu.memory_space<vmem>>, vector<16x8xf32>
    %c1_533 = arith.constant 1 : index
    %c360 = arith.constant 360 : index
    %480 = vector.load %arg23[%c1_533, %c360] : memref<18x432xf32, #tpu.memory_space<vmem>>, vector<16x8xf32>
    tpu.vector_store %arg23[%c1_533, %c360], %479 {strides = array<i32>} : memref<18x432xf32, #tpu.memory_space<vmem>>, vector<16x8xf32>,
    %c0_534 = arith.constant 0 : index
    %c96_535 = arith.constant 96 : index
    %481 = vector.load %arg22[%c0_534, %c96_535] : memref<16x128xf32, #tpu.memory_space<vmem>>, vector<16x16xf32>
    %cst_536 = arith.constant 2.500000e-01 : f32
    %482 = vector.broadcast %cst_536 : f32 to vector<16x16xf32>
    %483 = arith.mulf %482, %481 : vector<16x16xf32>
    %c0_537 = arith.constant 0 : index
    %c112_538 = arith.constant 112 : index
    %484 = vector.load %arg22[%c0_537, %c112_538] : memref<16x128xf32, #tpu.memory_space<vmem>>, vector<16x16xf32>
    %cst_539 = arith.constant 7.500000e-01 : f32
    %485 = vector.broadcast %cst_539 : f32 to vector<16x16xf32>
    %486 = arith.mulf %485, %484 : vector<16x16xf32>
    %487 = arith.addf %483, %486 : vector<16x16xf32>
    %c1_540 = arith.constant 1 : index
    %c368 = arith.constant 368 : index
    %488 = vector.load %arg23[%c1_540, %c368] : memref<18x432xf32, #tpu.memory_space<vmem>>, vector<16x16xf32>
    tpu.vector_store %arg23[%c1_540, %c368], %487 {strides = array<i32>} : memref<18x432xf32, #tpu.memory_space<vmem>>, vector<16x16xf32>,
    %c1_541 = arith.constant 1 : index
    %c128_542 = arith.constant 128 : index
    %489 = vector.load %arg17[%c1_541, %c128_542] : memref<18x144xf32, #tpu.memory_space<vmem>>, vector<16x8xf32>
    %c1_543 = arith.constant 1 : index
    %c384 = arith.constant 384 : index
    %490 = vector.load %arg23[%c1_543, %c384] : memref<18x432xf32, #tpu.memory_space<vmem>>, vector<16x8xf32>
    tpu.vector_store %arg23[%c1_543, %c384], %489 {strides = array<i32>} : memref<18x432xf32, #tpu.memory_space<vmem>>, vector<16x8xf32>,
    %c0_544 = arith.constant 0 : index
    %c112_545 = arith.constant 112 : index
    %491 = vector.load %arg22[%c0_544, %c112_545] : memref<16x128xf32, #tpu.memory_space<vmem>>, vector<16x16xf32>
    %cst_546 = arith.constant 7.500000e-01 : f32
    %492 = vector.broadcast %cst_546 : f32 to vector<16x16xf32>
    %493 = arith.mulf %492, %491 : vector<16x16xf32>
    %c0_547 = arith.constant 0 : index
    %c112_548 = arith.constant 112 : index
    %494 = vector.load %arg22[%c0_547, %c112_548] : memref<16x128xf32, #tpu.memory_space<vmem>>, vector<16x16xf32>
    %cst_549 = arith.constant 2.500000e-01 : f32
    %495 = vector.broadcast %cst_549 : f32 to vector<16x16xf32>
    %496 = arith.mulf %495, %494 : vector<16x16xf32>
    %497 = arith.addf %493, %496 : vector<16x16xf32>
    %c1_550 = arith.constant 1 : index
    %c392 = arith.constant 392 : index
    %498 = vector.load %arg23[%c1_550, %c392] : memref<18x432xf32, #tpu.memory_space<vmem>>, vector<16x16xf32>
    tpu.vector_store %arg23[%c1_550, %c392], %497 {strides = array<i32>} : memref<18x432xf32, #tpu.memory_space<vmem>>, vector<16x16xf32>,
    %c1_551 = arith.constant 1 : index
    %c48_552 = arith.constant 48 : index
    %499 = vector.load %arg23[%c1_551, %c48_552] : memref<18x432xf32, #tpu.memory_space<vmem>>, vector<16x24xf32>
    %c1_553 = arith.constant 1 : index
    %c0_554 = arith.constant 0 : index
    %500 = vector.load %arg23[%c1_553, %c0_554] : memref<18x432xf32, #tpu.memory_space<vmem>>, vector<16x24xf32>
    tpu.vector_store %arg23[%c1_553, %c0_554], %499 {strides = array<i32>} : memref<18x432xf32, #tpu.memory_space<vmem>>, vector<16x24xf32>,
    %c1_555 = arith.constant 1 : index
    %c360_556 = arith.constant 360 : index
    %501 = vector.load %arg23[%c1_555, %c360_556] : memref<18x432xf32, #tpu.memory_space<vmem>>, vector<16x24xf32>
    %c1_557 = arith.constant 1 : index
    %c408 = arith.constant 408 : index
    %502 = vector.load %arg23[%c1_557, %c408] : memref<18x432xf32, #tpu.memory_space<vmem>>, vector<16x24xf32>
    tpu.vector_store %arg23[%c1_557, %c408], %501 {strides = array<i32>} : memref<18x432xf32, #tpu.memory_space<vmem>>, vector<16x24xf32>,
    %c2_558 = arith.constant 2 : index
    %c0_559 = arith.constant 0 : index
    %503 = vector.load %arg23[%c2_558, %c0_559] : memref<18x432xf32, #tpu.memory_space<vmem>>, vector<1x432xf32>
    %c0_560 = arith.constant 0 : index
    %c0_561 = arith.constant 0 : index
    %504 = vector.load %arg23[%c0_560, %c0_561] : memref<18x432xf32, #tpu.memory_space<vmem>>, vector<1x432xf32>
    tpu.vector_store %arg23[%c0_560, %c0_561], %503 {strides = array<i32>} : memref<18x432xf32, #tpu.memory_space<vmem>>, vector<1x432xf32>,
    %c15_562 = arith.constant 15 : index
    %c0_563 = arith.constant 0 : index
    %505 = vector.load %arg23[%c15_562, %c0_563] : memref<18x432xf32, #tpu.memory_space<vmem>>, vector<1x432xf32>
    %c17_564 = arith.constant 17 : index
    %c0_565 = arith.constant 0 : index
    %506 = vector.load %arg23[%c17_564, %c0_565] : memref<18x432xf32, #tpu.memory_space<vmem>>, vector<1x432xf32>
    tpu.vector_store %arg23[%c17_564, %c0_565], %505 {strides = array<i32>} : memref<18x432xf32, #tpu.memory_space<vmem>>, vector<1x432xf32>,
    %c0_566 = arith.constant 0 : index
    %c0_567 = arith.constant 0 : index
    %507 = vector.load %arg23[%c0_566, %c0_567] : memref<18x432xf32, #tpu.memory_space<vmem>>, vector<16x432xf32>
    %c0_568 = arith.constant 0 : index
    %c0_569 = arith.constant 0 : index
    %c0_570 = arith.constant 0 : index
    %508 = vector.load %arg10[%c0_568, %c0_569, %c0_570] : memref<3x432x256xf32, #tpu.memory_space<vmem>>, vector<1x432x256xf32>
    %509 = vector.shape_cast %508 : vector<1x432x256xf32> to vector<432x256xf32>
    %cst_571 = arith.constant dense<0.000000e+00> : vector<16x256xf32>
    %510 = tpu.matmul %507, %509, %cst_571 {dimension_numbers = #tpu.dot_dimension_numbers<[1], [0], [0], [1], [0, 0, 1, 1], [], []>} : vector<16x432xf32>, vector<432x256xf32>, vector<16x256xf32> -> vector<16x256xf32>
    %c1_572 = arith.constant 1 : index
    %c0_573 = arith.constant 0 : index
    %511 = vector.load %arg23[%c1_572, %c0_573] : memref<18x432xf32, #tpu.memory_space<vmem>>, vector<16x432xf32>
    %c1_574 = arith.constant 1 : index
    %c0_575 = arith.constant 0 : index
    %c0_576 = arith.constant 0 : index
    %512 = vector.load %arg10[%c1_574, %c0_575, %c0_576] : memref<3x432x256xf32, #tpu.memory_space<vmem>>, vector<1x432x256xf32>
    %513 = vector.shape_cast %512 : vector<1x432x256xf32> to vector<432x256xf32>
    %cst_577 = arith.constant dense<0.000000e+00> : vector<16x256xf32>
    %514 = tpu.matmul %511, %513, %cst_577 {dimension_numbers = #tpu.dot_dimension_numbers<[1], [0], [0], [1], [0, 0, 1, 1], [], []>} : vector<16x432xf32>, vector<432x256xf32>, vector<16x256xf32> -> vector<16x256xf32>
    %515 = arith.addf %510, %514 : vector<16x256xf32>
    %c2_578 = arith.constant 2 : index
    %c0_579 = arith.constant 0 : index
    %516 = vector.load %arg23[%c2_578, %c0_579] : memref<18x432xf32, #tpu.memory_space<vmem>>, vector<16x432xf32>
    %c2_580 = arith.constant 2 : index
    %c0_581 = arith.constant 0 : index
    %c0_582 = arith.constant 0 : index
    %517 = vector.load %arg10[%c2_580, %c0_581, %c0_582] : memref<3x432x256xf32, #tpu.memory_space<vmem>>, vector<1x432x256xf32>
    %518 = vector.shape_cast %517 : vector<1x432x256xf32> to vector<432x256xf32>
    %cst_583 = arith.constant dense<0.000000e+00> : vector<16x256xf32>
    %519 = tpu.matmul %516, %518, %cst_583 {dimension_numbers = #tpu.dot_dimension_numbers<[1], [0], [0], [1], [0, 0, 1, 1], [], []>} : vector<16x432xf32>, vector<432x256xf32>, vector<16x256xf32> -> vector<16x256xf32>
    %520 = arith.addf %515, %519 : vector<16x256xf32>
    %c0_584 = arith.constant 0 : index
    %c0_585 = arith.constant 0 : index
    %521 = vector.load %arg11[%c0_584, %c0_585] : memref<1x256xf32, #tpu.memory_space<vmem>>, vector<1x256xf32>
    %522 = vector.broadcast %521 : vector<1x256xf32> to vector<16x256xf32>
    %523 = arith.addf %520, %522 : vector<16x256xf32>
    %cst_586 = arith.constant 0.000000e+00 : f32
    %524 = vector.broadcast %cst_586 : f32 to vector<16x256xf32>
    %525 = arith.maximumf %523, %524 : vector<16x256xf32>
    %c1_587 = arith.constant 1 : index
    %c16_588 = arith.constant 16 : index
    %526 = vector.load %arg24[%c1_587, %c16_588] : memref<18x288xf32, #tpu.memory_space<vmem>>, vector<16x256xf32>
    tpu.vector_store %arg24[%c1_587, %c16_588], %525 {strides = array<i32>} : memref<18x288xf32, #tpu.memory_space<vmem>>, vector<16x256xf32>,
    %c1_589 = arith.constant 1 : index
    %c32_590 = arith.constant 32 : index
    %527 = vector.load %arg24[%c1_589, %c32_590] : memref<18x288xf32, #tpu.memory_space<vmem>>, vector<16x16xf32>
    %c1_591 = arith.constant 1 : index
    %c0_592 = arith.constant 0 : index
    %528 = vector.load %arg24[%c1_591, %c0_592] : memref<18x288xf32, #tpu.memory_space<vmem>>, vector<16x16xf32>
    tpu.vector_store %arg24[%c1_591, %c0_592], %527 {strides = array<i32>} : memref<18x288xf32, #tpu.memory_space<vmem>>, vector<16x16xf32>,
    %c1_593 = arith.constant 1 : index
    %c240_594 = arith.constant 240 : index
    %529 = vector.load %arg24[%c1_593, %c240_594] : memref<18x288xf32, #tpu.memory_space<vmem>>, vector<16x16xf32>
    %c1_595 = arith.constant 1 : index
    %c272_596 = arith.constant 272 : index
    %530 = vector.load %arg24[%c1_595, %c272_596] : memref<18x288xf32, #tpu.memory_space<vmem>>, vector<16x16xf32>
    tpu.vector_store %arg24[%c1_595, %c272_596], %529 {strides = array<i32>} : memref<18x288xf32, #tpu.memory_space<vmem>>, vector<16x16xf32>,
    %c2_597 = arith.constant 2 : index
    %c0_598 = arith.constant 0 : index
    %531 = vector.load %arg24[%c2_597, %c0_598] : memref<18x288xf32, #tpu.memory_space<vmem>>, vector<1x288xf32>
    %c0_599 = arith.constant 0 : index
    %c0_600 = arith.constant 0 : index
    %532 = vector.load %arg24[%c0_599, %c0_600] : memref<18x288xf32, #tpu.memory_space<vmem>>, vector<1x288xf32>
    tpu.vector_store %arg24[%c0_599, %c0_600], %531 {strides = array<i32>} : memref<18x288xf32, #tpu.memory_space<vmem>>, vector<1x288xf32>,
    %c15_601 = arith.constant 15 : index
    %c0_602 = arith.constant 0 : index
    %533 = vector.load %arg24[%c15_601, %c0_602] : memref<18x288xf32, #tpu.memory_space<vmem>>, vector<1x288xf32>
    %c17_603 = arith.constant 17 : index
    %c0_604 = arith.constant 0 : index
    %534 = vector.load %arg24[%c17_603, %c0_604] : memref<18x288xf32, #tpu.memory_space<vmem>>, vector<1x288xf32>
    tpu.vector_store %arg24[%c17_603, %c0_604], %533 {strides = array<i32>} : memref<18x288xf32, #tpu.memory_space<vmem>>, vector<1x288xf32>,
    %c0_605 = arith.constant 0 : index
    %c0_606 = arith.constant 0 : index
    %535 = vector.load %arg24[%c0_605, %c0_606] : memref<18x288xf32, #tpu.memory_space<vmem>>, vector<16x288xf32>
    %c0_607 = arith.constant 0 : index
    %c0_608 = arith.constant 0 : index
    %c0_609 = arith.constant 0 : index
    %536 = vector.load %arg12[%c0_607, %c0_608, %c0_609] : memref<3x288x32xf32, #tpu.memory_space<vmem>>, vector<1x288x32xf32>
    %537 = vector.shape_cast %536 : vector<1x288x32xf32> to vector<288x32xf32>
    %cst_610 = arith.constant dense<0.000000e+00> : vector<16x32xf32>
    %538 = tpu.matmul %535, %537, %cst_610 {dimension_numbers = #tpu.dot_dimension_numbers<[1], [0], [0], [1], [0, 0, 1, 1], [], []>} : vector<16x288xf32>, vector<288x32xf32>, vector<16x32xf32> -> vector<16x32xf32>
    %c1_611 = arith.constant 1 : index
    %c0_612 = arith.constant 0 : index
    %539 = vector.load %arg24[%c1_611, %c0_612] : memref<18x288xf32, #tpu.memory_space<vmem>>, vector<16x288xf32>
    %c1_613 = arith.constant 1 : index
    %c0_614 = arith.constant 0 : index
    %c0_615 = arith.constant 0 : index
    %540 = vector.load %arg12[%c1_613, %c0_614, %c0_615] : memref<3x288x32xf32, #tpu.memory_space<vmem>>, vector<1x288x32xf32>
    %541 = vector.shape_cast %540 : vector<1x288x32xf32> to vector<288x32xf32>
    %cst_616 = arith.constant dense<0.000000e+00> : vector<16x32xf32>
    %542 = tpu.matmul %539, %541, %cst_616 {dimension_numbers = #tpu.dot_dimension_numbers<[1], [0], [0], [1], [0, 0, 1, 1], [], []>} : vector<16x288xf32>, vector<288x32xf32>, vector<16x32xf32> -> vector<16x32xf32>
    %543 = arith.addf %538, %542 : vector<16x32xf32>
    %c2_617 = arith.constant 2 : index
    %c0_618 = arith.constant 0 : index
    %544 = vector.load %arg24[%c2_617, %c0_618] : memref<18x288xf32, #tpu.memory_space<vmem>>, vector<16x288xf32>
    %c2_619 = arith.constant 2 : index
    %c0_620 = arith.constant 0 : index
    %c0_621 = arith.constant 0 : index
    %545 = vector.load %arg12[%c2_619, %c0_620, %c0_621] : memref<3x288x32xf32, #tpu.memory_space<vmem>>, vector<1x288x32xf32>
    %546 = vector.shape_cast %545 : vector<1x288x32xf32> to vector<288x32xf32>
    %cst_622 = arith.constant dense<0.000000e+00> : vector<16x32xf32>
    %547 = tpu.matmul %544, %546, %cst_622 {dimension_numbers = #tpu.dot_dimension_numbers<[1], [0], [0], [1], [0, 0, 1, 1], [], []>} : vector<16x288xf32>, vector<288x32xf32>, vector<16x32xf32> -> vector<16x32xf32>
    %548 = arith.addf %543, %547 : vector<16x32xf32>
    %c0_623 = arith.constant 0 : index
    %c0_624 = arith.constant 0 : index
    %549 = vector.load %arg13[%c0_623, %c0_624] : memref<1x32xf32, #tpu.memory_space<vmem>>, vector<1x32xf32>
    %550 = vector.broadcast %549 : vector<1x32xf32> to vector<16x32xf32>
    %551 = arith.addf %548, %550 : vector<16x32xf32>
    %cst_625 = arith.constant 0.000000e+00 : f32
    %552 = vector.broadcast %cst_625 : f32 to vector<16x32xf32>
    %553 = arith.maximumf %551, %552 : vector<16x32xf32>
    %c0_626 = arith.constant 0 : index
    %c0_627 = arith.constant 0 : index
    %c0_628 = arith.constant 0 : index
    %554 = vector.load %arg14[%c0_626, %c0_627, %c0_628] : memref<1x16x32xf32, #tpu.memory_space<vmem>>, vector<1x16x32xf32>
    %555 = vector.shape_cast %554 : vector<1x16x32xf32> to vector<16x32xf32>
    %556 = vector.shape_cast %553 : vector<16x32xf32> to vector<1x16x32xf32>
    tpu.vector_store %arg14[%c0_626, %c0_627, %c0_628], %556 {strides = array<i32>} : memref<1x16x32xf32, #tpu.memory_space<vmem>>, vector<1x16x32xf32>,
    return
  }
  func.func @transform_0(%arg0: i32) -> (i32, i32, i32) {
    %c0_i32 = arith.constant 0 : i32
    %c0_i32_0 = arith.constant 0 : i32
    %c0_i32_1 = arith.constant 0 : i32
    return %arg0, %c0_i32, %c0_i32_0 : i32, i32, i32
  }
  func.func @transform_1(%arg0: i32) -> (i32, i32, i32) {
    %c0_i32 = arith.constant 0 : i32
    %c0_i32_0 = arith.constant 0 : i32
    %c0_i32_1 = arith.constant 0 : i32
    %c0_i32_2 = arith.constant 0 : i32
    return %c0_i32, %c0_i32_0, %c0_i32_1 : i32, i32, i32
  }
  func.func @transform_2(%arg0: i32) -> (i32, i32) {
    %c0_i32 = arith.constant 0 : i32
    %c0_i32_0 = arith.constant 0 : i32
    %c0_i32_1 = arith.constant 0 : i32
    return %c0_i32, %c0_i32_0 : i32, i32
  }
  func.func @transform_3(%arg0: i32) -> (i32, i32, i32) {
    %c0_i32 = arith.constant 0 : i32
    %c0_i32_0 = arith.constant 0 : i32
    %c0_i32_1 = arith.constant 0 : i32
    %c0_i32_2 = arith.constant 0 : i32
    return %c0_i32, %c0_i32_0, %c0_i32_1 : i32, i32, i32
  }
  func.func @transform_4(%arg0: i32) -> (i32, i32) {
    %c0_i32 = arith.constant 0 : i32
    %c0_i32_0 = arith.constant 0 : i32
    %c0_i32_1 = arith.constant 0 : i32
    return %c0_i32, %c0_i32_0 : i32, i32
  }
  func.func @transform_5(%arg0: i32) -> (i32, i32, i32) {
    %c0_i32 = arith.constant 0 : i32
    %c0_i32_0 = arith.constant 0 : i32
    %c0_i32_1 = arith.constant 0 : i32
    %c0_i32_2 = arith.constant 0 : i32
    return %c0_i32, %c0_i32_0, %c0_i32_1 : i32, i32, i32
  }
  func.func @transform_6(%arg0: i32) -> (i32, i32) {
    %c0_i32 = arith.constant 0 : i32
    %c0_i32_0 = arith.constant 0 : i32
    %c0_i32_1 = arith.constant 0 : i32
    return %c0_i32, %c0_i32_0 : i32, i32
  }
  func.func @transform_7(%arg0: i32) -> (i32, i32, i32) {
    %c0_i32 = arith.constant 0 : i32
    %c0_i32_0 = arith.constant 0 : i32
    %c0_i32_1 = arith.constant 0 : i32
    %c0_i32_2 = arith.constant 0 : i32
    return %c0_i32, %c0_i32_0, %c0_i32_1 : i32, i32, i32
  }
  func.func @transform_8(%arg0: i32) -> (i32, i32) {
    %c0_i32 = arith.constant 0 : i32
    %c0_i32_0 = arith.constant 0 : i32
    %c0_i32_1 = arith.constant 0 : i32
    return %c0_i32, %c0_i32_0 : i32, i32
  }
  func.func @transform_9(%arg0: i32) -> (i32, i32, i32) {
    %c0_i32 = arith.constant 0 : i32
    %c0_i32_0 = arith.constant 0 : i32
    %c0_i32_1 = arith.constant 0 : i32
    %c0_i32_2 = arith.constant 0 : i32
    return %c0_i32, %c0_i32_0, %c0_i32_1 : i32, i32, i32
  }
  func.func @transform_10(%arg0: i32) -> (i32, i32) {
    %c0_i32 = arith.constant 0 : i32
    %c0_i32_0 = arith.constant 0 : i32
    %c0_i32_1 = arith.constant 0 : i32
    return %c0_i32, %c0_i32_0 : i32, i32
  }
  func.func @transform_11(%arg0: i32) -> (i32, i32, i32) {
    %c0_i32 = arith.constant 0 : i32
    %c0_i32_0 = arith.constant 0 : i32
    %c0_i32_1 = arith.constant 0 : i32
    %c0_i32_2 = arith.constant 0 : i32
    return %c0_i32, %c0_i32_0, %c0_i32_1 : i32, i32, i32
  }
  func.func @transform_12(%arg0: i32) -> (i32, i32) {
    %c0_i32 = arith.constant 0 : i32
    %c0_i32_0 = arith.constant 0 : i32
    %c0_i32_1 = arith.constant 0 : i32
    return %c0_i32, %c0_i32_0 : i32, i32
  }
  func.func @transform_13(%arg0: i32) -> (i32, i32, i32) {
    %c0_i32 = arith.constant 0 : i32
    %c0_i32_0 = arith.constant 0 : i32
    %c0_i32_1 = arith.constant 0 : i32
    return %arg0, %c0_i32, %c0_i32_0 : i32, i32, i32
  }
}

</mosaic_0001>

<bundles_post_ra>
// kernel: confidence_routing_forward.1
= control target key start
LH: loop header
LB: loop body
LE: loop exit
PB: predicated region body
PF: predicated region fallthrough
CT: control target
= control target key end

     0   :  { %s6542_s0 = inlined_call_operand.vmem [shape: f32[2,16,64], index: 0, kind: input, shape index: {}]   ;;  %s6543_s1 = inlined_call_operand.hbm [shape: f32[3,72,128], index: 1, kind: input, shape index: {}]   ;;  %s6544_s2 = inlined_call_operand.hbm [shape: f32[1,128], index: 2, kind: input, shape index: {}]   ;;  %s6545_s3 = inlined_call_operand.hbm [shape: f32[3,144,128], index: 3, kind: input, shape index: {}]   ;;  %s6546_s4 = inlined_call_operand.hbm [shape: f32[1,128], index: 4, kind: input, shape index: {}]   ;;  %s6547_s5 = inlined_call_operand.hbm [shape: f32[3,80,128], index: 5, kind: input, shape index: {}]   ;;  %s6548_s6 = inlined_call_operand.hbm [shape: f32[1,128], index: 6, kind: input, shape index: {}]   ;;  %s6549_s7 = inlined_call_operand.hbm [shape: f32[3,160,128], index: 7, kind: input, shape index: {}]   ;;  %s6550_s8 = inlined_call_operand.hbm [shape: f32[1,128], index: 8, kind: input, shape index: {}]   ;;  %s6551_s9 = inlined_call_operand.hbm [shape: f32[3,432,256], index: 9, kind: input, shape index: {}]   ;;  %s6552_s10 = inlined_call_operand.hbm [shape: f32[1,256], index: 10, kind: input, shape index: {}]   ;;  %s6553_s11 = inlined_call_operand.vmem [shape: f32[3,288,32], index: 11, kind: input, shape index: {}]   ;;  %s6554_s12 = inlined_call_operand.hbm [shape: f32[1,32], index: 12, kind: input, shape index: {}]   ;;  %s6555_s13 = inlined_call_operand.vmem [shape: f32[2,16,32], index: 13, kind: output, shape index: {}]  }
   0x1   :  { %6585 = sst [smem:[#allocation44_spill]] %s6543_s1 }
   0x2   :  { %6586 = sst [smem:[#allocation45_spill]] %s6544_s2 }
   0x3   :  { %6587 = sst [smem:[#allocation46_spill]] %s6546_s4 }
   0x4   :  { %18 = vsyncpa [#allocation13], 0 }
   0x5   :  { %19 = vsyncpa [#allocation15], 0 }
   0x6   :  { %20 = vsyncpa [#allocation18], 0 }
   0x7   :  { %21 = vsyncpa [#allocation21], 0 }
   0x8   :  { %22 = vsyncpa [#allocation24], 0 }
   0x9   :  { %23 = vsyncpa [#allocation27], 0  ;;  %s5216_s25 = smov 0  }
   0xa LB: > { %s6588_s2 = sld [smem:[#allocation45_spill]]  ;;  %s5225_s29 = sadd.s32 4294967295, %s5115_s25   ;;  %s5115_s25 = sphi %s5216_s25, %s29_s25  }
   0xb   : > { %p4469_p0 = scmp.ge.s32.totalorder %s5115_s25, 1  ;;  %p338_p1 = scmp.lt.s32.totalorder %s5115_s25, 3 }
   0xc   : > { %p4690_p2 = scmp.eq.s32.totalorder %s5225_s29, 0  ;;  %s5117_s14 = smov [#allocation14]  }
   0xd   : > { %p5230_p3 = pnand %p4469_p0, %p338_p1  ;;  %s366_s15 = sshll.u32 %s5117_s14, 4  ;;  %s367_s15 = int_to_ptr.vmem [resolvable:$true] %s366_s15 }
   0xe   : > { %s6590_s4 = sld [smem:[#allocation46_spill]]  ;;  %s416_s21 = sshll.u32 %s6548_s6, 4  ;;  %s417_s21 = int_to_ptr.hbm [resolvable:$true] %s416_s21 }
   0xf   : > { %p4656_p4 = pneg %p5230_p3  ;;  %s5118_s23 = smov [#allocation17]  }
  0x10   : > { %s364_s28 = sshll.u32 %s6588_s2, 4  ;;  %s392_s24 = sshll.u32 %s5118_s23, 4  ;;  %s365_s28 = int_to_ptr.hbm [resolvable:$true] %s364_s28  ;;  %s393_s24 = int_to_ptr.vmem [resolvable:$true] %s392_s24 }
  0x11   : > { %p5244_p5 = pnand %p4690_p2, %p4656_p4  ;;  %s5119_s26 = smov [#allocation20]  }
  0x12   : > { %s418_s27 = sshll.u32 %s5119_s26, 4  ;;  %s442_s17 = sshll.u32 %s6550_s8, 4  ;;  %s419_s27 = int_to_ptr.vmem [resolvable:$true] %s418_s27  ;;  %s443_s17 = int_to_ptr.hbm [resolvable:$true] %s442_s17 }
  0x13   : > { %4662 = dma.hbm_to_vmem [thread:$0]  (!%p5244_p5), %s365_s28, 16, %s367_s15, [#allocation15]  }
  0x14   : > { %s390_s18 = sshll.u32 %s6590_s4, 4  ;;  %s468_s23 = sshll.u32 %s6552_s10, 4  ;;  %s391_s18 = int_to_ptr.hbm [resolvable:$true] %s390_s18  ;;  %s469_s23 = int_to_ptr.hbm [resolvable:$true] %s468_s23 }
  0x15   : > { %4668 = dma.hbm_to_vmem [thread:$0]  (!%p5244_p5), %s391_s18, 16, %s393_s24, [#allocation18]  }
  0x16   : > { %4674 = dma.hbm_to_vmem [thread:$0]  (!%p5244_p5), %s417_s21, 16, %s419_s27, [#allocation21]  }
  0x17   : > { %s5120_s2 = smov [#allocation23]   ;;  %s5121_s28 = smov [#allocation26]  }
  0x18   : > { %s444_s4 = sshll.u32 %s5120_s2, 4  ;;  %s470_s15 = sshll.u32 %s5121_s28, 4  ;;  %s445_s4 = int_to_ptr.vmem [resolvable:$true] %s444_s4  ;;  %s471_s15 = int_to_ptr.vmem [resolvable:$true] %s470_s15 }
  0x19   : > { %4680 = dma.hbm_to_vmem [thread:$0]  (!%p5244_p5), %s443_s17, 16, %s445_s4, [#allocation24]  }
  0x1a   : > { %s6592_s1 = sld [smem:[#allocation44_spill]]  ;;  %s5122_s21 = smov [#allocation12]  }
  0x1b   : > { %4686 = dma.hbm_to_vmem [thread:$0]  (!%p5244_p5), %s469_s23, 32, %s471_s15, [#allocation27]  }
  0x1c   : > { %s351_s27 = sshll.u32 %s5122_s21, 4  ;;  %s375_s16 = sshll.u32 %s6545_s3, 4  ;;  %s352_s27 = int_to_ptr.vmem [resolvable:$true] %s351_s27  ;;  %s376_s16 = int_to_ptr.hbm [resolvable:$true] %s375_s16 }
  0x1d   : > { %s5123_s4 = smov 128   ;;  %s5124_s17 = smov 8  }
  0x1e   : > { %s5125_s19 = smov [#allocation16]   ;;  %s401_s23 = sshll.u32 %s6547_s5, 4  ;;  %s402_s23 = int_to_ptr.hbm [resolvable:$true] %s401_s23 }
  0x1f   : > { %s377_s20 = sshll.u32 %s5125_s19, 4  ;;  %s427_s21 = sshll.u32 %s6549_s7, 4  ;;  %s378_s20 = int_to_ptr.vmem [resolvable:$true] %s377_s20  ;;  %s428_s21 = int_to_ptr.hbm [resolvable:$true] %s427_s21 }
  0x20   : > { %s349_s26 = sshll.u32 %s6592_s1, 4  ;;  %s5126_s2 = smov [#allocation19]   ;;  %s350_s26 = int_to_ptr.hbm [resolvable:$true] %s349_s26 }
  0x21   : > { %4659 = dma.hbm_to_vmem [thread:$0]  (!%p5244_p5), %s350_s26, 3456, %s352_s27, [#allocation13], %s5123_s4, %s5123_s4, %s5124_s17  }
  0x22   : > { %4665 = dma.hbm_to_vmem [thread:$0]  (!%p5244_p5), %s376_s16, 6912, %s378_s20, [#allocation15], %s5123_s4, %s5123_s4, %s5124_s17  }
  0x23   : > { %s403_s14 = sshll.u32 %s5126_s2, 4  ;;  %s5127_s26 = smov [#allocation22]   ;;  %s404_s14 = int_to_ptr.vmem [resolvable:$true] %s403_s14 }
  0x24   : > { %4671 = dma.hbm_to_vmem [thread:$0]  (!%p5244_p5), %s402_s23, 3840, %s404_s14, [#allocation18], %s5123_s4, %s5123_s4, %s5124_s17  }
  0x25   : > { %s429_s27 = sshll.u32 %s5127_s26, 4  ;;  %s453_s18 = sshll.u32 %s6551_s9, 4  ;;  %s430_s27 = int_to_ptr.vmem [resolvable:$true] %s429_s27  ;;  %s454_s18 = int_to_ptr.hbm [resolvable:$true] %s453_s18 }
  0x26   : > { %4677 = dma.hbm_to_vmem [thread:$0]  (!%p5244_p5), %s428_s21, 7680, %s430_s27, [#allocation21], %s5123_s4, %s5123_s4, %s5124_s17  }
  0x27   : > { %s5128_s16 = smov [#allocation25]   ;;  %s483_s2 = sshll.u32 %s6554_s12, 4  ;;  %s484_s2 = int_to_ptr.hbm [resolvable:$true] %s483_s2 }
  0x28   : > { %s455_s20 = sshll.u32 %s5128_s16, 4  ;;  %s5129_s1 = smov 256   ;;  %s456_s20 = int_to_ptr.vmem [resolvable:$true] %s455_s20 }
  0x29   : > { %s5130_s23 = smov 16   ;;  %s5131_s14 = smov [#allocation28]  }
  0x2a   : > { %4683 = dma.hbm_to_vmem [thread:$0]  (!%p5244_p5), %s454_s18, 41472, %s456_s20, [#allocation24], %s5129_s1, %s5129_s1, %s5130_s23  }
  0x2b   : > { %s485_s26 = sshll.u32 %s5131_s14, 4  ;;  %506 = sbr.rel (%p5230_p3) target bundleno = 3811 (0xee3), region = 72  ;;  %s486_s26 = int_to_ptr.vmem [resolvable:$true] %s485_s26 }
  0x2c   : > { %4689 = dma.hbm_to_vmem [thread:$0]  (!%p5244_p5), %s484_s2, 16, %s486_s26, [#allocation27]  }
  0x30   : > { %5090 = dma.done.wait (%p4690_p2), [#allocation13], 3456  }
  0x31   : > { %5092 = vsyncadd (%p4690_p2), [#allocation13], 4294963840 }
  0x32   : > { %5094 = dma.done.wait (%p4690_p2), [#allocation15], 6928  }
  0x33   : > { %5096 = vsyncadd (%p4690_p2), [#allocation15], 4294960368 }
  0x34   : > { %5098 = dma.done.wait (%p4690_p2), [#allocation18], 3856  }
  0x35   : > { %5100 = vsyncadd (%p4690_p2), [#allocation18], 4294963440 }
  0x36   : > { %5102 = dma.done.wait (%p4690_p2), [#allocation21], 7696  }
  0x37   : > { %5104 = vsyncadd (%p4690_p2), [#allocation21], 4294959600 }
  0x38   : > { %5106 = dma.done.wait (%p4690_p2), [#allocation24], 41488  }
  0x39   : > { %5108 = vsyncadd (%p4690_p2), [#allocation24], 4294925808 }
  0x3a   : > { %5110 = dma.done.wait (%p4690_p2), [#allocation27], 48  }
  0x3b   : > { %5112 = vsyncadd (%p4690_p2), [#allocation27], 4294967248  ;;  %p601_p6 = scmp.lt.s32.totalorder %s5225_s29, 1  ;;  %s5132_s17 = smov 4   ;;  %vm621_vm0 = vcmask 556064   ;;  %v677_v6 = vld [vmem:[#allocation12 + $0x88] sm:$0xff] }
  0x3c   : > { %s5133_s21 = smov 120   ;;  %v676_v7 = vld [vmem:[#allocation12 + $0x80] sm:$0xff]  ;;  %692 = vmatpush.msra.mxu0 %v677_v6  ;;  %v675_v9 = vld [vmem:[#allocation12 + $0x78] sm:$0xff]  ;;  %v748_v10 = vld [vmem:[#allocation12 + $0xd0] sm:$0xff]  ;;  %vm634_vm1 = vcmask 31744   ;;  %s5134_s27 = smov 8  }
  0x3d   : > { %s6658_s29 = smov (!%p601_p6, %s5225_s29), 1  ;;  %v665_v8 = vld [vmem:[#allocation12 + $0x40] sm:$0xff]  ;;  %762 = vmatpush.msra.mxu2 %v748_v10  ;;  %v674_v11 = vld [vmem:[#allocation12 + $0x70] sm:$0xff]  ;;  %v673_v12 = vld [vmem:[#allocation12 + $0x68] sm:$0xff]  ;;  %vm647_vm2 = vcmask 589344   ;;  %vm678_vm3 = vcmask 588800  }
  0x3e   : > { %s4608_s1 = sshll.u32 %s6658_s29, 4  ;;  %721 = vmatpush.msra.mxu1 %v665_v8  ;;  %693 = vmatpush.msra.mxu0 %v676_v7  ;;  %v672_v17 = vld [vmem:[#allocation12 + $0x60] sm:$0xff]  ;;  %v664_v18 = vld [vmem:[#allocation12 + $0x38] sm:$0xff]  ;;  %v747_v19 = vld [vmem:[#allocation12 + $0xc8] sm:$0xff]  ;;  %vm651_vm4 = vcmask 581632   ;;  %vm790_vm5 = vcmask 1040384  }
  0x3f   : > { %s605_s4 = scalar_lea.vmem %s6542_s0, %s4608_s1  ;;  %v671_v20 = vld [vmem:[#allocation12 + $0x58] sm:$0xff]  ;;  %v663_v21 = vld [vmem:[#allocation12 + $0x30] sm:$0xff]  ;;  %v746_v22 = vld [vmem:[#allocation12 + $0xc0] sm:$0xff]  ;;  %763 = vmatpush.msra.mxu2 %v747_v19  ;;  %vm803_vm6 = vcmask 1047617   ;;  %vm805_vm7 = vcmask 64513   ;;  %s5135_s19 = smov 112  }
  0x40   : > { %v611_v0 = vld [vmem:[%s605_s4] sm:$0xff]  ;;  %v612_v1 = vld [vmem:[%s605_s4 + $0x8] sm:$0xff]  ;;  %694 = vmatpush.msra.mxu0 %v675_v9  ;;  %722 = vmatpush.msra.mxu1 %v664_v18  ;;  %v745_v25 = vld [vmem:[#allocation12 + $0xb8] sm:$0xff]  ;;  %vm811_vm8 = vcmask 1040448   ;;  %vm813_vm9 = vcmask 57344   ;;  %vm807_vm10 = vcmask 1047616   ;;  %s610_s22 = scalar_lea.vmem %s6555_s13, %s4608_s1 }
  0x41   : > { %615 = vrot.lane.b32.xlu0 %v611_v0, %s5132_s17  ;;  %v670_v23 = vld [vmem:[#allocation12 + $0x50] sm:$0xff]  ;;  %v662_v24 = vld [vmem:[#allocation12 + $0x28] sm:$0xff]  ;;  %764 = vmatpush.msra.mxu2 %v746_v22  ;;  %v661_v27 = vld [vmem:[#allocation12 + $0x20] sm:$0xff]  ;;  %vm809_vm11 = vcmask 64512   ;;  %s5136_s28 = smov 16   ;;  %vm918_vm12 = vcmask 1046528  }
  0x42   : > { %695 = vmatpush.msra.mxu0 %v674_v11  ;;  %723 = vmatpush.msra.mxu1 %v663_v21  ;;  %v669_v26 = vld [vmem:[#allocation12 + $0x48] sm:$0xff]  ;;  %v744_v28 = vld [vmem:[#allocation12 + $0xb0] sm:$0xff]  ;;  %v660_v29 = vld [vmem:[#allocation12 + $0x18] sm:$0xff]  ;;  %vm1060_vm13 = vcmask 1045504   ;;  %vm848_vm14 = vcmask 130113   ;;  %s5137_s18 = smov 104  }
  0x43   : > { %765 = vmatpush.msra.mxu2 %v745_v25  ;;  %v743_v30 = vld [vmem:[#allocation12 + $0xa8] sm:$0xff]  ;;  %v659_v31 = vld [vmem:[#allocation12 + $0x10] sm:$0xff]  ;;  %v742_v32 = vld [vmem:[#allocation12 + $0xa0] sm:$0xff]  ;;  %s5138_s16 = smov 96   ;;  %s5139_s20 = smov 80  }
  0x44   : > { %696 = vmatpush.msra.mxu0 %v673_v12  ;;  %724 = vmatpush.msra.mxu1 %v662_v24  ;;  %v658_v33 = vld [vmem:[#allocation12 + $0x8] sm:$0xff]  ;;  %v741_v34 = vld [vmem:[#allocation12 + $0x98] sm:$0xff]  ;;  %v657_v35 = vld [vmem:[#allocation12] sm:$0xff]  ;;  %s5140_s15 = smov 88   ;;  %s5141_s24 = smov 48  }
  0x45   : > { %766 = vmatpush.msra.mxu2 %v744_v28  ;;  %v740_v36 = vld [vmem:[#allocation12 + $0x90] sm:$0xff]  ;;  %v4749_v50 = vld [vmem:[#allocation14] ss:$0 sm:$0xff]  ;;  %v909_v7 = vld [vmem:[#allocation16 + $0x108] sm:$0xff]  ;;  %s5142_s2 = smov 64   ;;  %s5143_s23 = smov 32  }
  0x46   : > { %697 = vmatpush.msra.mxu0 %v672_v17  ;;  %725 = vmatpush.msra.mxu1 %v661_v27  ;;  %v908_v8 = vld [vmem:[#allocation16 + $0x100] sm:$0xff]  ;;  %v907_v9 = vld [vmem:[#allocation16 + $0xf8] sm:$0xff]  ;;  %v906_v10 = vld [vmem:[#allocation16 + $0xf0] sm:$0xff]  ;;  %s5144_s14 = smov 56   ;;  %s5145_s26 = smov 24  }
  0x47   : > { %767 = vmatpush.msra.mxu2 %v743_v30  ;;  %936 = vmatpush.msra.mxu3 %v909_v7  ;;  %v905_v11 = vld [vmem:[#allocation16 + $0xe8] sm:$0xff]  ;;  %v904_v12 = vld [vmem:[#allocation16 + $0xe0] sm:$0xff]  ;;  %v899_v17 = vld [vmem:[#allocation16 + $0xb8] sm:$0xff] }
  0x48   : > { %698 = vmatpush.msra.mxu0 %v671_v20  ;;  %726 = vmatpush.msra.mxu1 %v660_v29  ;;  %v898_v18 = vld [vmem:[#allocation16 + $0xb0] sm:$0xff]  ;;  %v897_v19 = vld [vmem:[#allocation16 + $0xa8] sm:$0xff]  ;;  %v896_v21 = vld [vmem:[#allocation16 + $0xa0] sm:$0xff] }
  0x49   : > { %617 = vrot.lane.b32.xlu0 %v612_v1, %s5132_s17  ;;  %768 = vmatpush.msra.mxu2 %v742_v32  ;;  %v895_v22 = vld [vmem:[#allocation16 + $0x98] sm:$0xff]  ;;  %v1051_v27 = vld [vmem:[#allocation16 + $0x188] sm:$0xff]  ;;  %v1050_v28 = vld [vmem:[#allocation16 + $0x180] sm:$0xff] }
  0x4a   : > { %699 = vmatpush.msra.mxu0 %v670_v23  ;;  %727 = vmatpush.msra.mxu1 %v659_v31  ;;  %v894_v23 = vld [vmem:[#allocation16 + $0x90] sm:$0xff]  ;;  %v1053_v24 = vld [vmem:[#allocation16 + $0x198] sm:$0xff]  ;;  %v1047_v31 = vld [vmem:[#allocation16 + $0x168] sm:$0xff] }
  0x4b   : > { %769 = vmatpush.msra.mxu2 %v741_v34  ;;  %937 = vmatpush.msra.mxu3 %v908_v8  ;;  %v1049_v29 = vld [vmem:[#allocation16 + $0x178] sm:$0xff]  ;;  %v1048_v30 = vld [vmem:[#allocation16 + $0x170] sm:$0xff]  ;;  %v1046_v32 = vld [vmem:[#allocation16 + $0x160] sm:$0xff] }
  0x4c   : > { %700 = vmatpush.msra.mxu0 %v669_v26  ;;  %728 = vmatpush.msra.mxu1 %v658_v33  ;;  %v1052_v26 = vld [vmem:[#allocation16 + $0x190] sm:$0xff]  ;;  %v1045_v33 = vld [vmem:[#allocation16 + $0x158] sm:$0xff] }
  0x4d   : > { %770 = vmatpush.msra.mxu2 %v740_v36  ;;  %938 = vmatpush.msra.mxu3 %v907_v9  ;;  %v1044_v34 = vld [vmem:[#allocation16 + $0x150] sm:$0xff]  ;;  %v1042_v36 = vld [vmem:[#allocation16 + $0x140] sm:$0xff]  ;;  %v6566_v9 = vlaneseq }
  0x4e   : > { %729 = vmatpush.msra.mxu1 %v657_v35  ;;  %v1043_v35 = vld [vmem:[#allocation16 + $0x148] sm:$0xff] }
  0x4f   : > { %939 = vmatpush.msra.mxu3 %v906_v10  ;;  %vm5369_vm15 = vcmp.lt.s32.totalorder %v6566_v9, 144 }
  0x51   : > { %940 = vmatpush.msra.mxu3 %v905_v11 }
  0x53   : > { %941 = vmatpush.msra.mxu3 %v904_v12 }
  0xb3   : > { %v616_v2 = vpop.permute.xlu0 %615 }
  0xb4   : > { %622 = vst.msk [vmem:[#allocation2 + $0x1] sm:$0xff] %vm621_vm0, %v616_v2 }
  0xbb   : > { %v618_v3 = vpop.permute.xlu0 %617  ;;  %v624_v4 = vld [vmem:[#allocation2 + $0x1] sm:$0xff] }
  0xbc   : > { %623 = vst.msk [vmem:[#allocation2 + $0x9] sm:$0xff] %vm621_vm0, %v618_v3  ;;  %628 = vrot.lane.b32.xlu1 %v624_v4, %s5133_s21  ;;  %vm852_vm0 = vcmask 122944  }
  0xc3   : > { %v625_v5 = vld [vmem:[#allocation2 + $0x9] sm:$0xff] }
  0xc4   : > { %630 = vrot.lane.b32.xlu1 %v625_v5, %s5133_s21 }
 0x12e   : > { %v629_v13 = vpop.permute.xlu1 %628 }
 0x12f   : > { %635 = vst.msk [vmem:[#allocation2 + $0x1] sm:$0xff] %vm634_vm1, %v629_v13  ;;  %v903_v13 = vld [vmem:[#allocation16 + $0xd8] sm:$0xff] }
 0x130   : > { %942 = vmatpush.msra.mxu3 %v903_v13  ;;  %v911_v13 = vld [vmem:[#allocation16 + $0x118] sm:$0xff] }
 0x131   : > { %973 = vmatpush.msrb.mxu0 %v911_v13  ;;  %4610 = vmatpush.msrb.mxu2 %v911_v13 }
 0x136   : > { %v631_v14 = vpop.permute.xlu1 %630  ;;  %v637_v15 = vld [vmem:[#allocation2 + $0x1] sm:$0xff] }
 0x137   : > { %636 = vst.msk [vmem:[#allocation2 + $0x9] sm:$0xff] %vm634_vm1, %v631_v14  ;;  %641 = vrot.lane.b32.xlu2 %v637_v15, %s5134_s27  ;;  %v902_v14 = vld [vmem:[#allocation16 + $0xd0] sm:$0xff]  ;;  %v901_v15 = vld [vmem:[#allocation16 + $0xc8] sm:$0xff]  ;;  %vm6565_vm1 = vcmask 130112  }
 0x138   : > { %943 = vmatpush.msra.mxu3 %v902_v14  ;;  %v910_v14 = vld [vmem:[#allocation16 + $0x110] sm:$0xff] }
 0x139   : > { %974 = vmatpush.msrb.mxu0 %v910_v14  ;;  %4611 = vmatpush.msrb.mxu2 %v910_v14 }
 0x13a   : > { %944 = vmatpush.msra.mxu3 %v901_v15  ;;  %v888_v15 = vld [vmem:[#allocation16 + $0x88] sm:$0xff] }
 0x13e   : > { %v638_v16 = vld [vmem:[#allocation2 + $0x9] sm:$0xff] }
 0x13f   : > { %643 = vrot.lane.b32.xlu2 %v638_v16, %s5134_s27  ;;  %v900_v16 = vld [vmem:[#allocation16 + $0xc0] sm:$0xff] }
 0x140   : > { %945 = vmatpush.msra.mxu3 %v900_v16  ;;  %v1055_v16 = vld [vmem:[#allocation16 + $0x1a8] sm:$0xff] }
 0x142   : > { %946 = vmatpush.msra.mxu3 %v899_v17  ;;  %v887_v17 = vld [vmem:[#allocation16 + $0x80] sm:$0xff] }
 0x144   : > { %947 = vmatpush.msra.mxu3 %v898_v18  ;;  %v1054_v18 = vld [vmem:[#allocation16 + $0x1a0] sm:$0xff] }
 0x146   : > { %948 = vmatpush.msra.mxu3 %v897_v19 }
 0x148   : > { %949 = vmatpush.msra.mxu3 %v896_v21 }
 0x14a   : > { %950 = vmatpush.msra.mxu3 %v895_v22 }
 0x14c   : > { %951 = vmatpush.msra.mxu3 %v894_v23 }
 0x14e   : > { %1077 = vmatpush.msrb.mxu3 %v1053_v24 }
 0x150   : > { %1078 = vmatpush.msrb.mxu3 %v1052_v26 }
 0x152   : > { %1079 = vmatpush.msrb.mxu3 %v1051_v27 }
 0x154   : > { %1080 = vmatpush.msrb.mxu3 %v1050_v28 }
 0x156   : > { %1081 = vmatpush.msrb.mxu3 %v1049_v29 }
 0x158   : > { %1082 = vmatpush.msrb.mxu3 %v1048_v30 }
 0x15a   : > { %1083 = vmatpush.msrb.mxu3 %v1047_v31 }
 0x15c   : > { %1084 = vmatpush.msrb.mxu3 %v1046_v32 }
 0x15e   : > { %1085 = vmatpush.msrb.mxu3 %v1045_v33 }
 0x160   : > { %1086 = vmatpush.msrb.mxu3 %v1044_v34 }
 0x162   : > { %1087 = vmatpush.msrb.mxu3 %v1043_v35 }
 0x164   : > { %1088 = vmatpush.msrb.mxu3 %v1042_v36 }
 0x191   : > { %v642_v37 = vpop.permute.xlu2 %641 }
 0x192   : > { %648 = vst.msk [vmem:[#allocation2 + $0x1] sm:$0xff] %vm647_vm2, %v642_v37  ;;  %v1041_v37 = vld [vmem:[#allocation16 + $0x138] sm:$0xff] }
 0x193   : > { %1089 = vmatpush.msrb.mxu3 %v1041_v37 }
 0x199   : > { %v644_v38 = vpop.permute.xlu2 %643  ;;  %v666_v39 = vld [vmem:[#allocation2 + $0x1] sm:$0xff] }
 0x19a   : > { %v650_v40 = vld [vmem:[#allocation2 + $0x2] sm:$0x1]  ;;  %649 = vst.msk [vmem:[#allocation2 + $0x9] sm:$0xff] %vm647_vm2, %v644_v38  ;;  %4498 = vmatmul.msk.f32.vlgmr.msra.gmra.mxu0 %vm678_vm3, %v666_v39  ;;  %v886_v39 = vld [vmem:[#allocation16 + $0x78] sm:$0xff]  ;;  %vm6556_vm2 = vcmask 130048  }
 0x19b   : > { %652 = vst.msk [vmem:[#allocation2] sm:$0x1] %vm651_vm4, %v650_v40  ;;  %v1040_v38 = vld [vmem:[#allocation16 + $0x130] sm:$0xff]  ;;  %987 = vmatpush.msrb.mxu1 %v886_v39  ;;  %v1039_v40 = vld [vmem:[#allocation16 + $0x128] sm:$0xff]  ;;  %1114 = vmatpush.msra.mxu0 %v1055_v16 }
 0x19c   : > { %1090 = vmatpush.msrb.mxu3 %v1040_v38 }
 0x19d   : > { %1115 = vmatpush.msra.mxu0 %v1054_v18 }
 0x19e   : > { %1091 = vmatpush.msrb.mxu3 %v1039_v40 }
 0x1a1   : > { %v667_v41 = vld [vmem:[#allocation2 + $0x9] sm:$0xff] }
 0x1a2   : > { %v737_v42 = vld [vmem:[#allocation2 + $0x2] sm:$0xff]  ;;  %4499 = vmatmul.msk.f32.gmra.mxu0 %vm678_vm3, %v667_v41  ;;  %v653_v44 = vld [vmem:[#allocation2 + $0xf] sm:$0x1]  ;;  %v1038_v41 = vld [vmem:[#allocation16 + $0x120] sm:$0xff] }
 0x1a3   : > { %v655_v43 = vld [vmem:[#allocation2] sm:$0xff]  ;;  %4502 = vmatmul.msk.f32.vlgmr.msra.gmra.mxu2 %vm678_vm3, %v737_v42  ;;  %654 = vst.msk [vmem:[#allocation2 + $0x11] sm:$0x1] %vm651_vm4, %v653_v44  ;;  %v656_v45 = vld [vmem:[#allocation2 + $0x8] sm:$0xff]  ;;  %1092 = vmatpush.msrb.mxu3 %v1038_v41  ;;  %vm1316_vm4 = vcmask 261312  }
 0x1a4   : > { %4500 = vmatmul.msk.f32.vlgmr.msra.gmra.mxu1 %vm678_vm3, %v655_v43  ;;  %v885_v42 = vld [vmem:[#allocation16 + $0x70] sm:$0xff]  ;;  %v884_v43 = vld [vmem:[#allocation16 + $0x68] sm:$0xff]  ;;  %1024 = vmatpush.msra.mxu2 %v888_v15 }
 0x1a5   : > { %988 = vmatpush.msrb.mxu1 %v885_v42 }
 0x1a6   : > { %1025 = vmatpush.msra.mxu2 %v887_v17 }
 0x1a7   : > { %989 = vmatpush.msrb.mxu1 %v884_v43 }
 0x1aa   : > { %v738_v46 = vld [vmem:[#allocation2 + $0xa] sm:$0xff] }
 0x1ab   : > { %4503 = vmatmul.msk.f32.gmra.mxu2 %vm678_vm3, %v738_v46 }
 0x1ac   : > { %4501 = vmatmul.msk.f32.gmra.mxu1 %vm678_vm3, %v656_v45  ;;  %v883_v45 = vld [vmem:[#allocation16 + $0x60] sm:$0xff]  ;;  %vm6559_vm3 = vcmask 195712  }
 0x1ad   : > { %990 = vmatpush.msrb.mxu1 %v883_v45 }
 0x217   : > { %v702_v48 = vpop.f32.mrf.mxu0 }
 0x21f   : > { %v705_v56 = vpop.f32.mrf.mxu0 }
 0x221   : > { %v731_v47 = vpop.f32.mrf.mxu1 }
 0x222   : > { %v732_v49 = vadd.f32 %v731_v47, %v702_v48  ;;  %v882_v47 = vld [vmem:[#allocation16 + $0x58] sm:$0xff]  ;;  %v881_v48 = vld [vmem:[#allocation16 + $0x50] sm:$0xff] }
 0x223   : > { %991 = vmatpush.msrb.mxu1 %v882_v47 }
 0x225   : > { %992 = vmatpush.msrb.mxu1 %v881_v48 }
 0x226   : > { %v772_v51 = vpop.f32.mrf.mxu2 }
 0x227   : > { %v778_v52 = vadd.f32 %v772_v51, %v732_v49  ;;  %v880_v49 = vld [vmem:[#allocation16 + $0x48] sm:$0xff] }
 0x228   : > { %993 = vmatpush.msrb.mxu1 %v880_v49 }
 0x229   : > { %v784_v53 = vadd.f32 %v4749_v50, %v778_v52  ;;  %v734_v55 = vpop.f32.mrf.mxu1  ;;  %v879_v52 = vld [vmem:[#allocation16 + $0x40] sm:$0xff] }
 0x22a   : > { %v735_v58 = vadd.f32 %v734_v55, %v705_v56  ;;  %994 = vmatpush.msrb.mxu1 %v879_v52 }
 0x22b   : > { %v786_v54 = vmax.f32 %v784_v53, 0.0 }
 0x22d   : > { %v791_v57 = vrot.slane %v786_v54, 7 }
 0x22e   : > { %v775_v59 = vpop.f32.mrf.mxu2 }
 0x22f   : > { %794 = vrot.lane.b32.xlu2 %v791_v57, %s5134_s27  ;;  %v779_v60 = vadd.f32 %v775_v59, %v735_v58  ;;  %v878_v58 = vld [vmem:[#allocation16 + $0x38] sm:$0xff]  ;;  %v877_v59 = vld [vmem:[#allocation16 + $0x30] sm:$0xff] }
 0x230   : > { %995 = vmatpush.msrb.mxu1 %v878_v58 }
 0x231   : > { %v785_v61 = vadd.f32 %v4749_v50, %v779_v60 }
 0x232   : > { %996 = vmatpush.msrb.mxu1 %v877_v59 }
 0x233   : > { %v787_v62 = vmax.f32 %v785_v61, 0.0  ;;  %v876_v61 = vld [vmem:[#allocation16 + $0x28] sm:$0xff] }
 0x234   : > { %997 = vmatpush.msrb.mxu1 %v876_v61 }
 0x235   : > { %v792_v63 = vrot.slane %v787_v62, 7  ;;  %v875_v62 = vld [vmem:[#allocation16 + $0x20] sm:$0xff] }
 0x236   : > { %998 = vmatpush.msrb.mxu1 %v875_v62 }
 0x237   : > { %798 = vrot.lane.b32.xlu1 %v792_v63, %s5134_s27  ;;  %v793_v0 = vsel %vm790_vm5, %v791_v57, %v792_v63  ;;  %v874_v63 = vld [vmem:[#allocation16 + $0x18] sm:$0xff] }
 0x238   : > { %796 = vrot.lane.b32.xlu0 %v793_v0, %s5134_s27  ;;  %999 = vmatpush.msrb.mxu1 %v874_v63 }
 0x289   : > { %v795_v1 = vpop.permute.xlu2 %794 }
 0x28a   : > { %804 = vst.msk [vmem:[#allocation3] sm:$0xfe] %vm803_vm6, %v795_v1 }
 0x28b   : > { %806 = vst.msk [vmem:[#allocation3 + $0x8] sm:$0xfe] %vm805_vm7, %v795_v1  ;;  %v873_v1 = vld [vmem:[#allocation16 + $0x10] sm:$0xff] }
 0x28c   : > { %1000 = vmatpush.msrb.mxu1 %v873_v1 }
 0x291   : > { %v815_v2 = vld [vmem:[#allocation3] sm:$0xfe] }
 0x292   : > { %821 = vrot.lane.b32.xlu2 %v815_v2, %s5135_s19 }
 0x2a9   : > { %v799_v3 = vpop.permute.xlu1 %798 }
 0x2aa   : > { %812 = vst.msk [vmem:[#allocation3 + $0x20] sm:$0x1] %vm811_vm8, %v799_v3  ;;  %v797_v4 = vpop.permute.xlu0 %796 }
 0x2ab   : > { %814 = vst.msk [vmem:[#allocation3 + $0x28] sm:$0x1] %vm813_vm9, %v799_v3  ;;  %v872_v3 = vld [vmem:[#allocation16 + $0x8] sm:$0xff] }
 0x2ac   : > { %808 = vst.msk [vmem:[#allocation3 + $0x10] sm:$0xff] %vm807_vm10, %v797_v4  ;;  %1001 = vmatpush.msrb.mxu1 %v872_v3 }
 0x2ad   : > { %810 = vst.msk [vmem:[#allocation3 + $0x18] sm:$0xff] %vm809_vm11, %v797_v4 }
 0x2b1   : > { %v817_v5 = vld [vmem:[#allocation3 + $0x20] sm:$0x1] }
 0x2b2   : > { %825 = vrot.lane.b32.xlu1 %v817_v5, %s5135_s19  ;;  %v871_v5 = vld [vmem:[#allocation16] sm:$0xff] }
 0x2b3   : > { %v816_v6 = vld [vmem:[#allocation3 + $0x10] sm:$0xff]  ;;  %1002 = vmatpush.msrb.mxu1 %v871_v5 }
 0x2b4   : > { %823 = vrot.lane.b32.xlu0 %v816_v6, %s5135_s19 }
 0x2ec   : > { %v822_v20 = vpop.permute.xlu2 %821 }
 0x2ed   : > { %830 = vst.msk [vmem:[#allocation3] sm:$0xfe] %vm805_vm7, %v822_v20 }
 0x2f4   : > { %v833_v25 = vld [vmem:[#allocation3] sm:$0xfe] }
 0x2f5   : > { %839 = vrot.lane.b32.xlu2 %v833_v25, %s5136_s28  ;;  %v889_v51 = vld [vmem:[#allocation3] sm:$0xfe] }
 0x2f6   : > { %v919_v54 = vrot.slane %v889_v51, 1  ;;  %v1033_v2 = vld [vmem:[#allocation3] sm:$0xfc] }
 0x2f7   : > { %v1061_v6 = vrot.slane %v1033_v2, 2 }
 0x324   : > { %v826_v44 = vpop.permute.xlu1 %825 }
 0x325   : > { %832 = vst.msk [vmem:[#allocation3 + $0x20] sm:$0x1] %vm813_vm9, %v826_v44 }
 0x326   : > { %v824_v46 = vpop.permute.xlu0 %823 }
 0x327   : > { %831 = vst.msk [vmem:[#allocation3 + $0x10] sm:$0xff] %vm809_vm11, %v824_v46 }
 0x32c   : > { %v835_v50 = vld [vmem:[#allocation3 + $0x20] sm:$0x1] }
 0x32d   : > { %843 = vrot.lane.b32.xlu1 %v835_v50, %s5136_s28  ;;  %v891_v57 = vld [vmem:[#allocation3 + $0x20] sm:$0x1] }
 0x32e   : > { %v5358_v53 = vld [vmem:[#allocation3 + $0x10] sm:$0xff]  ;;  %v925_v60 = vrot.slane %v891_v57, 1 }
 0x32f   : > { %841 = vrot.lane.b32.xlu0 %v5358_v53, %s5136_s28  ;;  %v920_v55 = vrot.slane %v5358_v53, 1  ;;  %v1062_v4 = vrot.slane %v5358_v53, 2 }
 0x331   : > { %v921_v56 = vsel %vm918_vm12, %v919_v54, %v920_v55  ;;  %v926_v0 = vsel %vm918_vm12, %v920_v55, %v925_v60  ;;  %v1063_v7 = vsel %vm1060_vm13, %v1061_v6, %v1062_v4 }
 0x332   : > { %952 = vmatmul.f32.vlgmr.msra.gmra.mxu3 %v921_v56 }
 0x33a   : > { %955 = vmatmul.f32.gmra.mxu3 %v926_v0 }
 0x342   : > { %1093 = vmatmul.f32.vlgmr.msrb.gmra.mxu3 %v1063_v7 }
 0x34f   : > { %v840_v8 = vpop.permute.xlu2 %839 }
 0x350   : > { %849 = vst.msk [vmem:[#allocation3 + $0x8] sm:$0xfe] %vm848_vm14, %v840_v8 }
 0x357   : > { %v855_v11 = vld [vmem:[#allocation3 + $0x2] ss:$8 sm:$0x3] }
 0x358   : > { %860 = vst.msk [vmem:[#allocation3] ss:$8 sm:$0x3] %vm5369_vm15, %v855_v11  ;;  %v890_v21 = vld [vmem:[#allocation3 + $0x8] sm:$0xfe] }
 0x359   : > { %v922_v26 = vrot.slane %v890_v21, 1  ;;  %v1034_v30 = vld [vmem:[#allocation3 + $0x8] sm:$0xfc] }
 0x35a   : > { %v1064_v34 = vrot.slane %v1034_v30, 2 }
 0x35f   : > { %v867_v12 = vld [vmem:[#allocation3] sm:$0xff]  ;;  %v868_v35 = vld [vmem:[#allocation3 + $0x8] sm:$0xff] }
 0x360   : > { %1003 = vmatmul.f32.vlgmr.msrb.gmra.mxu1 %v867_v12 }
 0x368   : > { %1006 = vmatmul.f32.gmra.mxu1 %v5358_v53  ;;  %v4750_v53 = vld [vmem:[#allocation17] ss:$0 sm:$0xff] }
 0x39f   : > { %v844_v19 = vpop.permute.xlu1 %843 }
 0x3a0   : > { %853 = vst.msk [vmem:[#allocation3 + $0x28] sm:$0x1] %vm852_vm0, %v844_v19 }
 0x3a1   : > { %v842_v20 = vpop.permute.xlu0 %841 }
 0x3a2   : > { %851 = vst.msk [vmem:[#allocation3 + $0x18] sm:$0xff] %vm6565_vm1, %v842_v20 }
 0x3a7   : > { %v892_v22 = vld [vmem:[#allocation3 + $0x28] sm:$0x1] }
 0x3a8   : > { %v927_v23 = vrot.slane %v892_v22, 1 }
 0x3a9   : > { %v863_v24 = vld [vmem:[#allocation3 + $0x17] ss:$8 sm:$0x3] }
 0x3aa   : > { %v870_v25 = vld [vmem:[#allocation3 + $0x18] sm:$0xff]  ;;  %865 = vst.msk [vmem:[#allocation3 + $0x21] ss:$8 sm:$0x3] %vm5369_vm15, %v863_v24 }
 0x3ab   : > { %v923_v27 = vrot.slane %v870_v25, 1  ;;  %v1065_v32 = vrot.slane %v870_v25, 2 }
 0x3ad   : > { %v924_v28 = vsel %vm918_vm12, %v922_v26, %v923_v27  ;;  %v928_v29 = vsel %vm918_vm12, %v923_v27, %v927_v23  ;;  %v1066_v37 = vsel %vm1060_vm13, %v1064_v34, %v1065_v32 }
 0x3ae   : > { %4504 = vmatmul.msk.f32.vlgmr.msrb.gmra.mxu0 %vm6556_vm2, %v924_v28  ;;  %4505 = vmatmul.msk.f32.vlgmr.msrb.gmra.mxu2 %vm6556_vm2, %v928_v29 }
 0x3b1   : > { %v1035_v31 = vld [vmem:[#allocation3 + $0x20] sm:$0x3]  ;;  %v1036_v38 = vld [vmem:[#allocation3 + $0x28] sm:$0x3] }
 0x3b2   : > { %v1067_v33 = vrot.slane %v1035_v31, 2  ;;  %v1069_v39 = vrot.slane %v1036_v38, 2 }
 0x3b4   : > { %v1068_v36 = vsel %vm1060_vm13, %v1062_v4, %v1067_v33  ;;  %v1070_v40 = vsel %vm1060_vm13, %v1065_v32, %v1069_v39 }
 0x3b5   : > { %1096 = vmatmul.f32.gmra.mxu3 %v1068_v36  ;;  %v953_v41 = vpop.f32.mrf.mxu3 }
 0x3b6   : > { %4506 = vmatmul.msk.f32.vlgmr.msra.gmra.mxu2 %vm6556_vm2, %v868_v35  ;;  %4508 = vmatmul.msk.f32.vlgmr.msra.gmra.mxu0 %vm6556_vm2, %v1066_v37 }
 0x3bd   : > { %v956_v43 = vpop.f32.mrf.mxu3 }
 0x3be   : > { %4507 = vmatmul.msk.f32.gmra.mxu2 %vm6556_vm2, %v870_v25  ;;  %4509 = vmatmul.msk.f32.gmra.mxu0 %vm6556_vm2, %v1070_v40  ;;  %vm6557_vm2 = vcmask 589312  }
 0x3c5   : > { %v1094_v49 = vpop.f32.mrf.mxu3 }
 0x3dd   : > { %v1004_v46 = vpop.f32.mrf.mxu1 }
 0x3e5   : > { %v1007_v57 = vpop.f32.mrf.mxu1 }
 0x42b   : > { %v976_v42 = vpop.f32.mrf.mxu0 }
 0x42c   : > { %v977_v45 = vadd.f32 %v976_v42, %v953_v41 }
 0x42e   : > { %v1005_v48 = vadd.f32 %v1004_v46, %v977_v45 }
 0x431   : > { %v979_v44 = vpop.f32.mrf.mxu2 }
 0x432   : > { %v980_v54 = vadd.f32 %v979_v44, %v956_v43 }
 0x433   : > { %v1117_v47 = vpop.f32.mrf.mxu0 }
 0x434   : > { %v1118_v51 = vadd.f32 %v1117_v47, %v1094_v49  ;;  %v1008_v59 = vadd.f32 %v1007_v57, %v980_v54 }
 0x438   : > { %v1097_v61 = vpop.f32.mrf.mxu3 }
 0x439   : > { %v1027_v50 = vpop.f32.mrf.mxu2 }
 0x43a   : > { %v1028_v52 = vadd.f32 %v1027_v50, %v1005_v48 }
 0x43b   : > { %v1120_v58 = vpop.f32.mrf.mxu0 }
 0x43c   : > { %v1123_v55 = vadd.f32 %v1118_v51, %v1028_v52  ;;  %v1121_v63 = vadd.f32 %v1120_v58, %v1097_v61 }
 0x43e   : > { %v1129_v56 = vadd.f32 %v4750_v53, %v1123_v55 }
 0x440   : > { %v1131_v60 = vmax.f32 %v1129_v56, 0.0 }
 0x441   : > { %v1030_v62 = vpop.f32.mrf.mxu2 }
 0x442   : > { %v1031_v0 = vadd.f32 %v1030_v62, %v1008_v59  ;;  %v1135_v1 = vrot.slane %v1131_v60, 7 }
 0x444   : > { %v1124_v2 = vadd.f32 %v1121_v63, %v1031_v0  ;;  %1138 = vrot.lane.b32.xlu0 %v1135_v1, %s5134_s27 }
 0x446   : > { %v1130_v3 = vadd.f32 %v4750_v53, %v1124_v2 }
 0x448   : > { %v1132_v4 = vmax.f32 %v1130_v3, 0.0 }
 0x44a   : > { %v1136_v5 = vrot.slane %v1132_v4, 7 }
 0x44c   : > { %1142 = vrot.lane.b32.xlu2 %v1136_v5, %s5134_s27  ;;  %v1137_v6 = vsel %vm790_vm5, %v1135_v1, %v1136_v5 }
 0x44d   : > { %1140 = vrot.lane.b32.xlu1 %v1137_v6, %s5134_s27 }
 0x4a6   : > { %v1143_v7 = vpop.permute.xlu2 %1142 }
 0x4a7   : > { %1151 = vst.msk [vmem:[#allocation4 + $0x20] sm:$0x1] %vm811_vm8, %v1143_v7  ;;  %vm6558_vm8 = vcmask 392512  }
 0x4a8   : > { %1152 = vst.msk [vmem:[#allocation4 + $0x28] sm:$0x1] %vm813_vm9, %v1143_v7 }
 0x4ae   : > { %v1155_v8 = vld [vmem:[#allocation4 + $0x20] sm:$0x1] }
 0x4af   : > { %1163 = vrot.lane.b32.xlu2 %v1155_v8, %s5135_s19 }
 0x4b6   : > { %v1139_v11 = vpop.permute.xlu0 %1138 }
 0x4b7   : > { %1147 = vst.msk [vmem:[#allocation4] sm:$0xfe] %vm803_vm6, %v1139_v11  ;;  %vm6562_vm6 = vcmask 326912  }
 0x4b8   : > { %1148 = vst.msk [vmem:[#allocation4 + $0x8] sm:$0xfe] %vm805_vm7, %v1139_v11 }
 0x4be   : > { %v1153_v12 = vld [vmem:[#allocation4] sm:$0xfe] }
 0x4bf   : > { %1159 = vrot.lane.b32.xlu0 %v1153_v12, %s5135_s19  ;;  %v1141_v13 = vpop.permute.xlu1 %1140 }
 0x4c0   : > { %1149 = vst.msk [vmem:[#allocation4 + $0x10] sm:$0xff] %vm807_vm10, %v1141_v13  ;;  %vm1364_vm10 = vcmask 458112  }
 0x4c1   : > { %1150 = vst.msk [vmem:[#allocation4 + $0x18] sm:$0xff] %vm809_vm11, %v1141_v13 }
 0x4c7   : > { %v1154_v14 = vld [vmem:[#allocation4 + $0x10] sm:$0xff] }
 0x4c8   : > { %1161 = vrot.lane.b32.xlu1 %v1154_v14, %s5135_s19 }
 0x509   : > { %v1164_v15 = vpop.permute.xlu2 %1163 }
 0x50a   : > { %1170 = vst.msk [vmem:[#allocation4 + $0x20] sm:$0x1] %vm813_vm9, %v1164_v15 }
 0x511   : > { %v1173_v16 = vld [vmem:[#allocation4 + $0x20] sm:$0x1] }
 0x512   : > { %1181 = vrot.lane.b32.xlu2 %v1173_v16, %s5136_s28 }
 0x531   : > { %v1160_v17 = vpop.permute.xlu0 %1159 }
 0x532   : > { %1168 = vst.msk [vmem:[#allocation4] sm:$0xfe] %vm805_vm7, %v1160_v17 }
 0x539   : > { %v1171_v18 = vld [vmem:[#allocation4] sm:$0xfe] }
 0x53a   : > { %1177 = vrot.lane.b32.xlu0 %v1171_v18, %s5136_s28  ;;  %v1162_v19 = vpop.permute.xlu1 %1161 }
 0x53b   : > { %1169 = vst.msk [vmem:[#allocation4 + $0x10] sm:$0xff] %vm809_vm11, %v1162_v19 }
 0x542   : > { %v5409_v20 = vld [vmem:[#allocation4 + $0x10] sm:$0xff] }
 0x543   : > { %1179 = vrot.lane.b32.xlu1 %v5409_v20, %s5136_s28 }
 0x56c   : > { %v1182_v21 = vpop.permute.xlu2 %1181 }
 0x56d   : > { %1188 = vst.msk [vmem:[#allocation4 + $0x28] sm:$0x1] %vm852_vm0, %v1182_v21 }
 0x574   : > { %v2710_v22 = vld [vmem:[#allocation4 + $0x28] sm:$0x1] }
 0x575   : > { %2713 = vst.msk [vmem:[#allocation10 + $0x58] sm:$0x1] %vm813_vm9, %v2710_v22  ;;  %v1270_v2 = vld [vmem:[#allocation4 + $0x20] ss:$8 sm:$0x3] }
 0x5ac   : > { %v1178_v23 = vpop.permute.xlu0 %1177 }
 0x5ad   : > { %1186 = vst.msk [vmem:[#allocation4 + $0x8] sm:$0xfe] %vm848_vm14, %v1178_v23 }
 0x5b4   : > { %v1190_v24 = vld [vmem:[#allocation4 + $0x2] ss:$8 sm:$0x3]  ;;  %v1208_v26 = vld [vmem:[#allocation4 + $0x3] ss:$8 sm:$0x3] }
 0x5b5   : > { %1191 = vst.msk [vmem:[#allocation4] ss:$8 sm:$0x3] %vm5369_vm15, %v1190_v24  ;;  %v1206_v25 = vld [vmem:[#allocation4 + $0x2] ss:$8 sm:$0x3]  ;;  %v1180_v29 = vpop.permute.xlu1 %1179 }
 0x5b6   : > { %v1209_v27 = vmax.f32 %v1206_v25, %v1208_v26  ;;  %v1216_v28 = vld [vmem:[#allocation4 + $0x4] ss:$8 sm:$0x3]  ;;  %v1218_v31 = vld [vmem:[#allocation4 + $0x5] ss:$8 sm:$0x3] }
 0x5b7   : > { %v1211_v30 = vld [vmem:[#allocation4 + $0x4] ss:$8 sm:$0x3]  ;;  %v1219_v33 = vmax.f32 %v1216_v28, %v1218_v31  ;;  %v1221_v34 = vld [vmem:[#allocation4 + $0x6] ss:$8 sm:$0x3] }
 0x5b8   : > { %v1212_v32 = vmax.f32 %v1209_v27, %v1211_v30  ;;  %1187 = vst.msk [vmem:[#allocation4 + $0x18] sm:$0xff] %vm6565_vm1, %v1180_v29  ;;  %v1200_v35 = vld [vmem:[#allocation4 + $0x1] ss:$8 sm:$0x3] }
 0x5b9   : > { %v1222_v36 = vmax.f32 %v1219_v33, %v1221_v34  ;;  %v2708_v38 = vld [vmem:[#allocation4 + $0x8] sm:$0xfe] }
 0x5ba   : > { %1214 = vst.msk [vmem:[#allocation5 + $0x1] ss:$8 sm:$0x3] %vm5369_vm15, %v1212_v32  ;;  %v1202_v40 = vld [vmem:[#allocation4 + $0x2] ss:$8 sm:$0x3] }
 0x5bb   : > { %1224 = vst.msk [vmem:[#allocation5 + $0x2] ss:$8 sm:$0x3] %vm5369_vm15, %v1222_v36  ;;  %v1226_v42 = vld [vmem:[#allocation4 + $0x6] ss:$8 sm:$0x3] }
 0x5bc   : > { %v1198_v37 = vld [vmem:[#allocation4] ss:$8 sm:$0x3]  ;;  %2711 = vst.msk [vmem:[#allocation10 + $0x18] sm:$0xfe] %vm805_vm7, %v2708_v38 }
 0x5bd   : > { %v1201_v39 = vmax.f32 %v1198_v37, %v1200_v35  ;;  %v1228_v43 = vld [vmem:[#allocation4 + $0x7] ss:$8 sm:$0x3] }
 0x5be   : > { %v1229_v44 = vmax.f32 %v1226_v42, %v1228_v43 }
 0x5bf   : > { %v1203_v41 = vmax.f32 %v1201_v39, %v1202_v40  ;;  %v1231_v45 = vld [vmem:[#allocation4 + $0x10] ss:$8 sm:$0x3]  ;;  %v1238_v47 = vld [vmem:[#allocation4 + $0x11] ss:$8 sm:$0x3] }
 0x5c0   : > { %v1236_v46 = vld [vmem:[#allocation4 + $0x10] ss:$8 sm:$0x3]  ;;  %v1232_v48 = vmax.f32 %v1229_v44, %v1231_v45  ;;  %v1241_v50 = vld [vmem:[#allocation4 + $0x12] ss:$8 sm:$0x3] }
 0x5c1   : > { %1204 = vst.msk [vmem:[#allocation5] ss:$8 sm:$0x3] %vm5369_vm15, %v1203_v41  ;;  %v1239_v49 = vmax.f32 %v1236_v46, %v1238_v47  ;;  %v1246_v51 = vld [vmem:[#allocation4 + $0x12] ss:$8 sm:$0x3] }
 0x5c2   : > { %v1248_v52 = vld [vmem:[#allocation4 + $0x13] ss:$8 sm:$0x3]  ;;  %v1251_v53 = vld [vmem:[#allocation4 + $0x14] ss:$8 sm:$0x3] }
 0x5c3   : > { %v1242_v54 = vmax.f32 %v1239_v49, %v1241_v50  ;;  %v1249_v55 = vmax.f32 %v1246_v51, %v1248_v52  ;;  %v1256_v56 = vld [vmem:[#allocation4 + $0x14] ss:$8 sm:$0x3]  ;;  %v1258_v57 = vld [vmem:[#allocation4 + $0x15] ss:$8 sm:$0x3] }
 0x5c4   : > { %v1259_v58 = vmax.f32 %v1256_v56, %v1258_v57  ;;  %v1261_v59 = vld [vmem:[#allocation4 + $0x16] ss:$8 sm:$0x3]  ;;  %v1267_v62 = vld [vmem:[#allocation4 + $0x17] ss:$8 sm:$0x3] }
 0x5c5   : > { %v1266_v60 = vld [vmem:[#allocation4 + $0x16] ss:$8 sm:$0x3]  ;;  %v1252_v61 = vmax.f32 %v1249_v55, %v1251_v53  ;;  %1234 = vst.msk [vmem:[#allocation5 + $0x3] ss:$8 sm:$0x3] %vm5369_vm15, %v1232_v48 }
 0x5c6   : > { %v1262_v63 = vmax.f32 %v1259_v58, %v1261_v59  ;;  %v1268_v0 = vmax.f32 %v1266_v60, %v1267_v62  ;;  %1244 = vst.msk [vmem:[#allocation5 + $0x4] ss:$8 sm:$0x3] %vm5369_vm15, %v1242_v54  ;;  %v2709_v1 = vld [vmem:[#allocation4 + $0x18] sm:$0xff]  ;;  %v1439_v49 = vld [vmem:[#allocation19 + $0x90] sm:$0xff]  ;;  %v1428_v50 = vld [vmem:[#allocation19 + $0x48] sm:$0xff] }
 0x5c7   : > { %1254 = vst.msk [vmem:[#allocation5 + $0x5] ss:$8 sm:$0x3] %vm5369_vm15, %v1252_v61  ;;  %v1440_v48 = vld [vmem:[#allocation19 + $0x98] sm:$0xff]  ;;  %v1438_v51 = vld [vmem:[#allocation19 + $0x88] sm:$0xff]  ;;  %1474 = vmatpush.msrb.mxu0 %v1428_v50  ;;  %v1427_v53 = vld [vmem:[#allocation19 + $0x40] sm:$0xff] }
 0x5c8   : > { %1264 = vst.msk [vmem:[#allocation5 + $0x6] ss:$8 sm:$0x3] %vm5369_vm15, %v1262_v63  ;;  %v1271_v3 = vmax.f32 %v1268_v0, %v1270_v2  ;;  %1451 = vmatpush.msrb.mxu2 %v1440_v48  ;;  %v1499_v52 = vld [vmem:[#allocation19 + $0xe8] sm:$0xff]  ;;  %v1498_v54 = vld [vmem:[#allocation19 + $0xe0] sm:$0xff]  ;;  %v1436_v56 = vld [vmem:[#allocation19 + $0x78] sm:$0xff] }
 0x5c9   : > { %2712 = vst.msk [vmem:[#allocation10 + $0x38] sm:$0xff] %vm809_vm11, %v2709_v1  ;;  %1509 = vmatpush.msra.mxu1 %v1499_v52  ;;  %v1437_v55 = vld [vmem:[#allocation19 + $0x80] sm:$0xff]  ;;  %1475 = vmatpush.msrb.mxu0 %v1427_v53  ;;  %v1435_v57 = vld [vmem:[#allocation19 + $0x70] sm:$0xff]  ;;  %v1434_v60 = vld [vmem:[#allocation19 + $0x68] sm:$0xff] }
 0x5ca   : > { %1273 = vst.msk [vmem:[#allocation5 + $0x7] ss:$8 sm:$0x3] %vm5369_vm15, %v1271_v3  ;;  %vm6561_vm15 = vcmask 523712   ;;  %1452 = vmatpush.msrb.mxu2 %v1439_v49  ;;  %v1426_v61 = vld [vmem:[#allocation19 + $0x38] sm:$0xff]  ;;  %v1433_v63 = vld [vmem:[#allocation19 + $0x60] sm:$0xff] }
 0x5cb   : > { %1510 = vmatpush.msra.mxu1 %v1498_v54  ;;  %v1497_v62 = vld [vmem:[#allocation19 + $0xd8] sm:$0xff]  ;;  %1476 = vmatpush.msrb.mxu0 %v1426_v61  ;;  %v1425_v0 = vld [vmem:[#allocation19 + $0x30] sm:$0xff]  ;;  %v1424_v3 = vld [vmem:[#allocation19 + $0x28] sm:$0xff] }
 0x5cc   : > { %1453 = vmatpush.msrb.mxu2 %v1438_v51  ;;  %v1496_v1 = vld [vmem:[#allocation19 + $0xd0] sm:$0xff]  ;;  %v1432_v2 = vld [vmem:[#allocation19 + $0x58] sm:$0xff]  ;;  %v1613_v50 = vld [vmem:[#allocation22 + $0xd0] sm:$0xff] }
 0x5cd   : > { %1511 = vmatpush.msra.mxu1 %v1497_v62  ;;  %1477 = vmatpush.msrb.mxu0 %v1425_v0  ;;  %v1615_v48 = vld [vmem:[#allocation22 + $0xe0] sm:$0xff]  ;;  %v1614_v49 = vld [vmem:[#allocation22 + $0xd8] sm:$0xff]  ;;  %v1612_v52 = vld [vmem:[#allocation22 + $0xc8] sm:$0xff] }
 0x5ce   : > { %1454 = vmatpush.msrb.mxu2 %v1437_v55  ;;  %v2160_v51 = vld [vmem:[#allocation4] sm:$0xfe]  ;;  %v1611_v53 = vld [vmem:[#allocation22 + $0xc0] sm:$0xff]  ;;  %v2162_v55 = vld [vmem:[#allocation4 + $0x20] sm:$0x1] }
 0x5cf   : > { %1512 = vmatpush.msra.mxu1 %v1496_v1  ;;  %1478 = vmatpush.msrb.mxu0 %v1424_v3  ;;  %v1610_v54 = vld [vmem:[#allocation22 + $0xb8] sm:$0xff] }
 0x5d0   : > { %1455 = vmatpush.msrb.mxu2 %v1436_v56  ;;  %v1609_v56 = vld [vmem:[#allocation22 + $0xb0] sm:$0xff] }
 0x5d1   : > { %v1302_v4 = vld [vmem:[#allocation5] sm:$0xff]  ;;  %v1383_v10 = vld [vmem:[#allocation5 + $0x8] sm:$0xff]  ;;  %v1937_v61 = vld [vmem:[#allocation4] sm:$0xfe] }
 0x5d2   : > { %1304 = vrot.lane.b32.xlu2 %v1302_v4, %s5133_s21  ;;  %1281 = vrot.lane.b32.xlu1 %v1302_v4, %s5135_s19 }
 0x5d3   : > { %1277 = vrot.lane.b32.xlu0 %v1302_v4, %s5133_s21  ;;  %1456 = vmatpush.msrb.mxu2 %v1435_v57 }
 0x5d5   : > { %1457 = vmatpush.msrb.mxu2 %v1434_v60 }
 0x5d7   : > { %1458 = vmatpush.msrb.mxu2 %v1433_v63 }
 0x5d9   : > { %1459 = vmatpush.msrb.mxu2 %v1432_v2 }
 0x5da   : > { %1336 = vrot.lane.b32.xlu2 %v1302_v4, %s5133_s21  ;;  %1308 = vrot.lane.b32.xlu1 %v1302_v4, %s5135_s19 }
 0x5db   : > { %1320 = vrot.lane.b32.xlu0 %v1302_v4, %s5133_s21 }
 0x5e2   : > { %1340 = vrot.lane.b32.xlu2 %v1302_v4, %s5135_s19  ;;  %1352 = vrot.lane.b32.xlu1 %v1302_v4, %s5133_s21 }
 0x5e3   : > { %1324 = vrot.lane.b32.xlu0 %v1302_v4, %s5135_s19 }
 0x5ea   : > { %1385 = vrot.lane.b32.xlu2 %v1302_v4, %s5133_s21  ;;  %1356 = vrot.lane.b32.xlu1 %v1302_v4, %s5135_s19 }
 0x5eb   : > { %1368 = vrot.lane.b32.xlu0 %v1302_v4, %s5133_s21 }
 0x5f2   : > { %1292 = vrot.lane.b32.xlu2 %v1302_v4, %s5133_s21  ;;  %1390 = vrot.lane.b32.xlu1 %v1383_v10, %s5135_s19  ;;  %v1431_v10 = vld [vmem:[#allocation19 + $0x50] sm:$0xff] }
 0x5f3   : > { %1372 = vrot.lane.b32.xlu0 %v1302_v4, %s5135_s19  ;;  %1460 = vmatpush.msrb.mxu2 %v1431_v10 }
 0x5fb   : > { %1296 = vrot.lane.b32.xlu0 %v1302_v4, %s5135_s19 }
 0x62c   : > { %v1305_v5 = vpop.permute.xlu2 %1304 }
 0x62d   : > { %v1307_v13 = vmax.f32 %v1302_v4, %v1305_v5  ;;  %v1423_v5 = vld [vmem:[#allocation19 + $0x20] sm:$0xff] }
 0x62e   : > { %1479 = vmatpush.msrb.mxu0 %v1423_v5  ;;  %v2049_v5 = vld [vmem:[#allocation4] sm:$0xfe] }
 0x634   : > { %v1337_v6 = vpop.permute.xlu2 %1336 }
 0x635   : > { %v1339_v18 = vmax.f32 %v1302_v4, %v1337_v6  ;;  %v1494_v6 = vld [vmem:[#allocation19 + $0xc0] sm:$0xff] }
 0x63c   : > { %v1341_v15 = vpop.permute.xlu2 %1340 }
 0x63d   : > { %v1343_v19 = vmax.f32 %v1339_v18, %v1341_v15  ;;  %v1419_v15 = vld [vmem:[#allocation19] sm:$0xff] }
 0x644   : > { %v1282_v7 = vpop.permute.xlu1 %1281  ;;  %v1386_v29 = vpop.permute.xlu2 %1385 }
 0x645   : > { %v1278_v8 = vpop.permute.xlu0 %1277  ;;  %v1388_v30 = vmax.f32 %v1302_v4, %v1386_v29 }
 0x646   : > { %v1280_v11 = vmax.f32 %v1302_v4, %v1278_v8  ;;  %v1493_v8 = vld [vmem:[#allocation19 + $0xb8] sm:$0xff] }
 0x648   : > { %v1284_v12 = vmax.f32 %v1280_v11, %v1282_v7  ;;  %v1422_v7 = vld [vmem:[#allocation19 + $0x18] sm:$0xff]  ;;  %v1421_v11 = vld [vmem:[#allocation19 + $0x10] sm:$0xff] }
 0x649   : > { %1480 = vmatpush.msrb.mxu0 %v1422_v7  ;;  %v2430_v7 = vld [vmem:[#allocation4] sm:$0xfe] }
 0x64a   : > { %1286 = vrot.lane.b32.xlu1 %v1284_v12, %s5134_s27  ;;  %v1492_v12 = vld [vmem:[#allocation19 + $0xb0] sm:$0xff] }
 0x64b   : > { %1481 = vmatpush.msrb.mxu0 %v1421_v11 }
 0x64c   : > { %v1309_v14 = vpop.permute.xlu1 %1308  ;;  %v1293_v36 = vpop.permute.xlu2 %1292 }
 0x64d   : > { %v1311_v16 = vmax.f32 %v1307_v13, %v1309_v14  ;;  %v1321_v17 = vpop.permute.xlu0 %1320  ;;  %v1295_v38 = vmax.f32 %v1302_v4, %v1293_v36  ;;  %v1420_v13 = vld [vmem:[#allocation19 + $0x8] sm:$0xff] }
 0x64e   : > { %v1323_v21 = vmax.f32 %v1302_v4, %v1321_v17  ;;  %v1491_v14 = vld [vmem:[#allocation19 + $0xa8] sm:$0xff]  ;;  %1482 = vmatpush.msrb.mxu0 %v1420_v13 }
 0x64f   : > { %1313 = vrot.lane.b32.xlu2 %v1311_v16, %s5133_s21  ;;  %v1490_v16 = vld [vmem:[#allocation19 + $0xa0] sm:$0xff] }
 0x650   : > { %1483 = vmatpush.msrb.mxu0 %v1419_v15  ;;  %v1889_v36 = vld [vmem:[#allocation4] sm:$0xfe]  ;;  %v2432_v15 = vld [vmem:[#allocation4 + $0x20] sm:$0x1] }
 0x652   : > { %1345 = vrot.lane.b32.xlu1 %v1343_v19, %s5137_s18 }
 0x654   : > { %v1353_v22 = vpop.permute.xlu1 %1352 }
 0x655   : > { %v1325_v23 = vpop.permute.xlu0 %1324  ;;  %v1355_v25 = vmax.f32 %v1302_v4, %v1353_v22 }
 0x656   : > { %v1327_v24 = vmax.f32 %v1323_v21, %v1325_v23 }
 0x658   : > { %1329 = vrot.lane.b32.xlu0 %v1327_v24, %s5135_s19 }
 0x65c   : > { %v1357_v26 = vpop.permute.xlu1 %1356 }
 0x65d   : > { %v1359_v27 = vmax.f32 %v1355_v25, %v1357_v26  ;;  %v1369_v28 = vpop.permute.xlu0 %1368 }
 0x65e   : > { %v1371_v31 = vmax.f32 %v1302_v4, %v1369_v28  ;;  %v1495_v4 = vld [vmem:[#allocation19 + $0xc8] sm:$0xff] }
 0x65f   : > { %1361 = vrot.lane.b32.xlu2 %v1359_v27, %s5138_s16  ;;  %1513 = vmatpush.msra.mxu1 %v1495_v4  ;;  %v4751_v27 = vld [vmem:[#allocation20] ss:$0 sm:$0xff] }
 0x661   : > { %1514 = vmatpush.msra.mxu1 %v1494_v6 }
 0x663   : > { %1515 = vmatpush.msra.mxu1 %v1493_v8  ;;  %v2594_v8 = vld [vmem:[#allocation4] sm:$0xfe] }
 0x664   : > { %v1391_v32 = vpop.permute.xlu1 %1390 }
 0x665   : > { %v1393_v33 = vmax.f32 %v1388_v30, %v1391_v32  ;;  %v1373_v34 = vpop.permute.xlu0 %1372  ;;  %1516 = vmatpush.msra.mxu1 %v1492_v12  ;;  %v2106_v12 = vld [vmem:[#allocation4] sm:$0xfe] }
 0x666   : > { %v1375_v35 = vmax.f32 %v1371_v31, %v1373_v34 }
 0x667   : > { %1395 = vrot.lane.b32.xlu1 %v1393_v33, %s5139_s20  ;;  %1517 = vmatpush.msra.mxu1 %v1491_v14  ;;  %v1993_v14 = vld [vmem:[#allocation4] sm:$0xfe] }
 0x668   : > { %1377 = vrot.lane.b32.xlu0 %v1375_v35, %s5140_s15 }
 0x669   : > { %1518 = vmatpush.msra.mxu1 %v1490_v16 }
 0x66d   : > { %v1297_v37 = vpop.permute.xlu0 %1296 }
 0x66e   : > { %v1299_v39 = vmax.f32 %v1295_v38, %v1297_v37  ;;  %v2482_v37 = vld [vmem:[#allocation4] sm:$0xfe]  ;;  %v1891_v38 = vld [vmem:[#allocation4 + $0x20] sm:$0x1] }
 0x6a9   : > { %v1314_v41 = vpop.permute.xlu2 %1313 }
 0x6b9   : > { %v1362_v44 = vpop.permute.xlu2 %1361 }
 0x6bc   : > { %v1287_v40 = vpop.permute.xlu1 %1286 }
 0x6bd   : > { %1289 = vst.msk [vmem:[#allocation6 + $0x1] sm:$0xff] %vm6565_vm1, %v1287_v40  ;;  %v1621_v40 = vld [vmem:[#allocation22 + $0x110] sm:$0xff]  ;;  %vm6580_vm1 = vcmask 261120  }
 0x6be   : > { %1301 = vst.msk [vmem:[#allocation6 + $0x1] sm:$0xff] %vm6559_vm3, %v1299_v39  ;;  %vm1414_vm3 = vcmask 647168   ;;  %v1622_v39 = vld [vmem:[#allocation22 + $0x118] sm:$0xff] }
 0x6bf   : > { %1317 = vst.msk [vmem:[#allocation6 + $0x1] sm:$0xff] %vm1316_vm4, %v1314_v41  ;;  %1641 = vmatpush.msra.mxu2 %v1622_v39  ;;  %v1620_v41 = vld [vmem:[#allocation22 + $0x108] sm:$0xff]  ;;  %v1739_v39 = vld [vmem:[#allocation22 + $0x190] sm:$0xff] }
 0x6c1   : > { %1642 = vmatpush.msra.mxu2 %v1621_v40  ;;  %v1590_v40 = vld [vmem:[#allocation22 + $0x40] sm:$0xff] }
 0x6c3   : > { %1643 = vmatpush.msra.mxu2 %v1620_v41  ;;  %v1738_v41 = vld [vmem:[#allocation22 + $0x188] sm:$0xff] }
 0x6c4   : > { %v1346_v43 = vpop.permute.xlu1 %1345 }
 0x6ca   : > { %v1330_v42 = vpop.permute.xlu0 %1329 }
 0x6cb   : > { %1333 = vst.msk [vmem:[#allocation6 + $0x1] sm:$0xff] %vm6562_vm6, %v1330_v42  ;;  %vm6563_vm6 = vcmask 1040512   ;;  %v2484_v42 = vld [vmem:[#allocation4 + $0x20] sm:$0x1] }
 0x6cc   : > { %1349 = vst.msk [vmem:[#allocation6 + $0x1] sm:$0xff] %vm6558_vm8, %v1346_v43  ;;  %vm1441_vm8 = vcmask 654336   ;;  %v1619_v43 = vld [vmem:[#allocation22 + $0x100] sm:$0xff] }
 0x6cd   : > { %1365 = vst.msk [vmem:[#allocation6 + $0x1] sm:$0xff] %vm1364_vm10, %v1362_v44  ;;  %v1618_v44 = vld [vmem:[#allocation22 + $0xf8] sm:$0xff]  ;;  %1644 = vmatpush.msra.mxu2 %v1619_v43  ;;  %v1737_v43 = vld [vmem:[#allocation22 + $0x180] sm:$0xff] }
 0x6cf   : > { %1645 = vmatpush.msra.mxu2 %v1618_v44  ;;  %v1588_v44 = vld [vmem:[#allocation22 + $0x30] sm:$0xff] }
 0x6d9   : > { %v1396_v45 = vpop.permute.xlu1 %1395 }
 0x6da   : > { %v1378_v46 = vpop.permute.xlu0 %1377 }
 0x6db   : > { %1381 = vst.msk [vmem:[#allocation6 + $0x1] sm:$0xff] %vm6561_vm15, %v1378_v46  ;;  %vm1537_vm15 = vcmask 130049   ;;  %v1616_v46 = vld [vmem:[#allocation22 + $0xe8] sm:$0xff] }
 0x6dc   : > { %1399 = vst.msk [vmem:[#allocation6 + $0x1] sm:$0xff] %vm6557_vm2, %v1396_v45  ;;  %vm6560_vm2 = vcmask 654912   ;;  %v1617_v45 = vld [vmem:[#allocation22 + $0xf0] sm:$0xff] }
 0x6dd   : > { %1646 = vmatpush.msra.mxu2 %v1617_v45  ;;  %v2651_v45 = vld [vmem:[#allocation4] sm:$0xfe] }
 0x6df   : > { %1647 = vmatpush.msra.mxu2 %v1616_v46  ;;  %v1736_v46 = vld [vmem:[#allocation22 + $0x178] sm:$0xff] }
 0x6e1   : > { %1648 = vmatpush.msra.mxu2 %v1615_v48  ;;  %v1735_v48 = vld [vmem:[#allocation22 + $0x170] sm:$0xff] }
 0x6e3   : > { %v1400_v47 = vld [vmem:[#allocation6 + $0x1] sm:$0xff]  ;;  %1649 = vmatpush.msra.mxu2 %v1614_v49  ;;  %v1586_v49 = vld [vmem:[#allocation22 + $0x20] sm:$0xff] }
 0x6e4   : > { %1402 = vrot.lane.b32.xlu2 %v1400_v47, %s5135_s19  ;;  %v2108_v47 = vld [vmem:[#allocation4 + $0x20] sm:$0x1] }
 0x6e5   : > { %1650 = vmatpush.msra.mxu2 %v1613_v50  ;;  %v1734_v50 = vld [vmem:[#allocation22 + $0x168] sm:$0xff] }
 0x6e7   : > { %1651 = vmatpush.msra.mxu2 %v1612_v52  ;;  %v1601_v52 = vld [vmem:[#allocation22 + $0x98] sm:$0xff] }
 0x6e8   : > { %1716 = vmatpush.msrb.mxu1 %v1601_v52 }
 0x6e9   : > { %1652 = vmatpush.msra.mxu2 %v1611_v53  ;;  %v1733_v53 = vld [vmem:[#allocation22 + $0x160] sm:$0xff] }
 0x6eb   : > { %1653 = vmatpush.msra.mxu2 %v1610_v54  ;;  %v2216_v54 = vld [vmem:[#allocation4] sm:$0xfe] }
 0x6ed   : > { %1654 = vmatpush.msra.mxu2 %v1609_v56  ;;  %v1600_v56 = vld [vmem:[#allocation22 + $0x90] sm:$0xff] }
 0x6ee   : > { %1717 = vmatpush.msrb.mxu1 %v1600_v56 }
 0x73e   : > { %v1403_v58 = vpop.permute.xlu2 %1402 }
 0x73f   : > { %1405 = vst.msk [vmem:[#allocation6 + $0x1] sm:$0xff] %vm809_vm11, %v1403_v58  ;;  %v1608_v58 = vld [vmem:[#allocation22 + $0xa8] sm:$0xff] }
 0x740   : > { %1655 = vmatpush.msra.mxu2 %v1608_v58  ;;  %v2051_v58 = vld [vmem:[#allocation4 + $0x20] sm:$0x1] }
 0x746   : > { %v1406_v59 = vld [vmem:[#allocation6 + $0x1] sm:$0xff] }
 0x747   : > { %1408 = vrot.lane.b32.xlu0 %v1406_v59, %s5136_s28  ;;  %v1607_v59 = vld [vmem:[#allocation22 + $0xa0] sm:$0xff] }
 0x748   : > { %1656 = vmatpush.msra.mxu2 %v1607_v59  ;;  %v1583_v59 = vld [vmem:[#allocation22 + $0x8] sm:$0xff] }
 0x7b9   : > { %v1409_v17 = vpop.permute.xlu0 %1408 }
 0x7ba   : > { %1412 = vst.msk [vmem:[#allocation6 + $0x1] sm:$0xff] %vm6560_vm2, %v1409_v17  ;;  %vm6564_vm2 = vcmask 1047681   ;;  %v2538_v17 = vld [vmem:[#allocation4] sm:$0xfe] }
 0x7c1   : > { %v1413_v18 = vld [vmem:[#allocation6 + $0x2] sm:$0x1]  ;;  %v1416_v19 = vld [vmem:[#allocation6 + $0x7] sm:$0x1] }
 0x7c2   : > { %v1429_v21 = vld [vmem:[#allocation6 + $0x1] sm:$0xff]  ;;  %1415 = vst.msk [vmem:[#allocation6] sm:$0x1] %vm1414_vm3, %v1413_v18  ;;  %v1939_v18 = vld [vmem:[#allocation4 + $0x20] sm:$0x1] }
 0x7c3   : > { %4510 = vmatmul.msk.f32.vlgmr.msrb.gmra.mxu2 %vm1441_vm8, %v1429_v21  ;;  %1417 = vst.msk [vmem:[#allocation6 + $0x9] sm:$0x1] %vm1414_vm3, %v1416_v19  ;;  %vm1541_vm3 = vcmask 122880   ;;  %v1626_v21 = vld [vmem:[#allocation22 + $0x138] sm:$0xff] }
 0x7c4   : > { %1673 = vmatpush.msra.mxu0 %v1626_v21 }
 0x7c9   : > { %v1418_v22 = vld [vmem:[#allocation6] sm:$0xff] }
 0x7ca   : > { %4511 = vmatmul.msk.f32.vlgmr.msrb.gmra.mxu0 %vm1441_vm8, %v1418_v22  ;;  %v1488_v23 = vld [vmem:[#allocation6 + $0x2] sm:$0xff] }
 0x7cb   : > { %4512 = vmatmul.msk.f32.vlgmr.msra.gmra.mxu1 %vm1441_vm8, %v1488_v23  ;;  %vm1904_vm8 = vcmask 261313   ;;  %v1625_v22 = vld [vmem:[#allocation22 + $0x130] sm:$0xff]  ;;  %v1597_v23 = vld [vmem:[#allocation22 + $0x78] sm:$0xff] }
 0x7cc   : > { %1684 = vmatpush.msra.mxu3 %v1597_v23  ;;  %1674 = vmatpush.msra.mxu0 %v1625_v22 }
 0x846   : > { %v1462_v24 = vpop.f32.mrf.mxu2 }
 0x847   : > { %v1485_v25 = vpop.f32.mrf.mxu0 }
 0x848   : > { %v1486_v26 = vadd.f32 %v1485_v25, %v1462_v24  ;;  %v1520_v28 = vpop.f32.mrf.mxu1  ;;  %v1624_v24 = vld [vmem:[#allocation22 + $0x128] sm:$0xff]  ;;  %v1596_v25 = vld [vmem:[#allocation22 + $0x70] sm:$0xff] }
 0x849   : > { %1685 = vmatpush.msra.mxu3 %v1596_v25  ;;  %1675 = vmatpush.msra.mxu0 %v1624_v24 }
 0x84a   : > { %v1523_v29 = vadd.f32 %v1520_v28, %v1486_v26  ;;  %v1623_v26 = vld [vmem:[#allocation22 + $0x120] sm:$0xff]  ;;  %v1995_v28 = vld [vmem:[#allocation4 + $0x20] sm:$0x1] }
 0x84b   : > { %1676 = vmatpush.msra.mxu0 %v1623_v26 }
 0x84c   : > { %v1528_v30 = vadd.f32 %v4751_v27, %v1523_v29  ;;  %v1744_v27 = vld [vmem:[#allocation22 + $0x1b8] sm:$0xff]  ;;  %v1595_v29 = vld [vmem:[#allocation22 + $0x68] sm:$0xff] }
 0x84d   : > { %1762 = vmatpush.msrb.mxu0 %v1744_v27  ;;  %1686 = vmatpush.msra.mxu3 %v1595_v29 }
 0x84e   : > { %v1529_v31 = vmax.f32 %v1528_v30, 0.0  ;;  %v1743_v30 = vld [vmem:[#allocation22 + $0x1b0] sm:$0xff] }
 0x84f   : > { %1763 = vmatpush.msrb.mxu0 %v1743_v30 }
 0x850   : > { %v1531_v32 = vrot.slane %v1529_v31, 7  ;;  %v1594_v31 = vld [vmem:[#allocation22 + $0x60] sm:$0xff] }
 0x851   : > { %1687 = vmatpush.msra.mxu3 %v1594_v31 }
 0x852   : > { %1532 = vrot.lane.b32.xlu1 %v1531_v32, %s5136_s28  ;;  %v1742_v32 = vld [vmem:[#allocation22 + $0x1a8] sm:$0xff] }
 0x853   : > { %1764 = vmatpush.msrb.mxu0 %v1742_v32 }
 0x8c4   : > { %v1533_v33 = vpop.permute.xlu1 %1532 }
 0x8c5   : > { %1536 = vst.msk [vmem:[#allocation7] sm:$0xfe] %vm6564_vm2, %v1533_v33  ;;  %vm1571_vm2 = vcmp.lt.s32.totalorder %v6566_v9, 160 }
 0x8c6   : > { %1538 = vst.msk [vmem:[#allocation7 + $0x8] sm:$0xfe] %vm1537_vm15, %v1533_v33 }
 0x8c7   : > { %1540 = vst.msk [vmem:[#allocation7 + $0x10] sm:$0x1] %vm6563_vm6, %v1533_v33  ;;  %vm6583_vm6 = vcmask 254080  }
 0x8c8   : > { %1542 = vst.msk [vmem:[#allocation7 + $0x18] sm:$0x1] %vm1541_vm3, %v1533_v33  ;;  %v1593_v33 = vld [vmem:[#allocation22 + $0x58] sm:$0xff] }
 0x8c9   : > { %1688 = vmatpush.msra.mxu3 %v1593_v33 }
 0x8cc   : > { %v1543_v34 = vld [vmem:[#allocation7] sm:$0xfe] }
 0x8cd   : > { %1547 = vrot.lane.b32.xlu2 %v1543_v34, %s5138_s16  ;;  %v1741_v34 = vld [vmem:[#allocation22 + $0x1a0] sm:$0xff] }
 0x8ce   : > { %v1544_v35 = vld [vmem:[#allocation7 + $0x10] sm:$0x1]  ;;  %1765 = vmatpush.msrb.mxu0 %v1741_v34 }
 0x8cf   : > { %1549 = vrot.lane.b32.xlu0 %v1544_v35, %s5138_s16  ;;  %v1592_v35 = vld [vmem:[#allocation22 + $0x50] sm:$0xff] }
 0x8d0   : > { %1689 = vmatpush.msra.mxu3 %v1592_v35 }
 0x8d7   : > { %1895 = vrot.lane.b32.xlu0 %v1889_v36, %s5136_s28  ;;  %v1740_v36 = vld [vmem:[#allocation22 + $0x198] sm:$0xff] }
 0x8d8   : > { %1766 = vmatpush.msrb.mxu0 %v1740_v36 }
 0x8da   : > { %1767 = vmatpush.msrb.mxu0 %v1739_v39 }
 0x8dc   : > { %1768 = vmatpush.msrb.mxu0 %v1738_v41 }
 0x8de   : > { %1769 = vmatpush.msrb.mxu0 %v1737_v43 }
 0x8df   : > { %2438 = vrot.lane.b32.xlu0 %v5409_v20, %s5141_s24 }
 0x8e0   : > { %1770 = vmatpush.msrb.mxu0 %v1736_v46  ;;  %v4752_v46 = vld [vmem:[#allocation23] ss:$0 sm:$0xff] }
 0x8e2   : > { %1771 = vmatpush.msrb.mxu0 %v1735_v48 }
 0x8e4   : > { %1772 = vmatpush.msrb.mxu0 %v1734_v50 }
 0x8e6   : > { %1773 = vmatpush.msrb.mxu0 %v1733_v53 }
 0x8e7   : > { %2488 = vrot.lane.b32.xlu0 %v2482_v37, %s5142_s2  ;;  %v2540_v37 = vld [vmem:[#allocation4 + $0x20] sm:$0x1] }
 0x8ef   : > { %2001 = vrot.lane.b32.xlu0 %v5409_v20, %s5141_s24 }
 0x8f7   : > { %2546 = vrot.lane.b32.xlu0 %v5409_v20, %s5139_s20 }
 0x8ff   : > { %1899 = vrot.lane.b32.xlu0 %v1891_v38, %s5136_s28  ;;  %v1591_v38 = vld [vmem:[#allocation22 + $0x48] sm:$0xff] }
 0x900   : > { %1690 = vmatpush.msra.mxu3 %v1591_v38 }
 0x902   : > { %1691 = vmatpush.msra.mxu3 %v1590_v40 }
 0x907   : > { %2659 = vrot.lane.b32.xlu0 %v5409_v20, %s5135_s19 }
 0x90f   : > { %2492 = vrot.lane.b32.xlu0 %v2484_v42, %s5142_s2  ;;  %v1589_v42 = vld [vmem:[#allocation22 + $0x38] sm:$0xff] }
 0x910   : > { %1692 = vmatpush.msra.mxu3 %v1589_v42 }
 0x912   : > { %1693 = vmatpush.msra.mxu3 %v1588_v44 }
 0x917   : > { %2116 = vrot.lane.b32.xlu0 %v2108_v47, %s5139_s20  ;;  %v1587_v47 = vld [vmem:[#allocation22 + $0x28] sm:$0xff] }
 0x918   : > { %1694 = vmatpush.msra.mxu3 %v1587_v47 }
 0x91a   : > { %1695 = vmatpush.msra.mxu3 %v1586_v49 }
 0x91f   : > { %2166 = vrot.lane.b32.xlu0 %v2160_v51, %s5138_s16  ;;  %v1585_v51 = vld [vmem:[#allocation22 + $0x18] sm:$0xff] }
 0x920   : > { %1696 = vmatpush.msra.mxu3 %v1585_v51 }
 0x927   : > { %2170 = vrot.lane.b32.xlu0 %v2162_v55, %s5138_s16  ;;  %v1548_v57 = vpop.permute.xlu2 %1547  ;;  %v1584_v55 = vld [vmem:[#allocation22 + $0x10] sm:$0xff] }
 0x928   : > { %1553 = vst.msk [vmem:[#allocation7] sm:$0xfe] %vm1537_vm15, %v1548_v57  ;;  %v1732_v57 = vld [vmem:[#allocation22 + $0x158] sm:$0xff]  ;;  %1697 = vmatpush.msra.mxu3 %v1584_v55 }
 0x929   : > { %1774 = vmatpush.msrb.mxu0 %v1732_v57 }
 0x92a   : > { %1698 = vmatpush.msra.mxu3 %v1583_v59 }
 0x92f   : > { %v1555_v60 = vld [vmem:[#allocation7] sm:$0xfe] }
 0x930   : > { %1559 = vrot.lane.b32.xlu1 %v1555_v60, %s5143_s23  ;;  %v1602_v63 = vld [vmem:[#allocation7] sm:$0xfe] }
 0x931   : > { %v1631_v3 = vrot.slane %v1602_v63, 1  ;;  %v1599_v60 = vld [vmem:[#allocation22 + $0x88] sm:$0xff]  ;;  %v1598_v63 = vld [vmem:[#allocation22 + $0x80] sm:$0xff] }
 0x932   : > { %1718 = vmatpush.msrb.mxu1 %v1599_v60  ;;  %v1724_v25 = vld [vmem:[#allocation7] sm:$0xfc] }
 0x933   : > { %v1753_v29 = vrot.slane %v1724_v25, 2 }
 0x934   : > { %1719 = vmatpush.msrb.mxu1 %v1598_v63 }
 0x938   : > { %1897 = vrot.lane.b32.xlu1 %v5409_v20, %s5136_s28 }
 0x940   : > { %1943 = vrot.lane.b32.xlu1 %v1937_v61, %s5143_s23  ;;  %v1731_v61 = vld [vmem:[#allocation22 + $0x150] sm:$0xff] }
 0x941   : > { %v1550_v62 = vpop.permute.xlu0 %1549  ;;  %1775 = vmatpush.msrb.mxu0 %v1731_v61 }
 0x942   : > { %1554 = vst.msk [vmem:[#allocation7 + $0x10] sm:$0x1] %vm1541_vm3, %v1550_v62  ;;  %v1582_v62 = vld [vmem:[#allocation22] sm:$0xff] }
 0x943   : > { %1699 = vmatpush.msra.mxu3 %v1582_v62 }
 0x948   : > { %2490 = vrot.lane.b32.xlu1 %v5409_v20, %s5142_s2 }
 0x949   : > { %v1896_v0 = vpop.permute.xlu0 %1895  ;;  %v1556_v1 = vld [vmem:[#allocation7 + $0x10] sm:$0x1] }
 0x94a   : > { %v1604_v2 = vld [vmem:[#allocation7 + $0x10] sm:$0x1]  ;;  %1905 = vst.msk [vmem:[#allocation10] sm:$0xfe] %vm1904_vm8, %v1896_v0  ;;  %1561 = vrot.lane.b32.xlu2 %v1556_v1, %s5143_s23  ;;  %vm1907_vm8 = vcmask 254144   ;;  %v1730_v0 = vld [vmem:[#allocation22 + $0x148] sm:$0xff] }
 0x94b   : > { %v1632_v4 = vrot.slane %v1604_v2, 1  ;;  %v1748_v1 = vld [vmem:[#allocation22 + $0x1d8] sm:$0xff]  ;;  %v1729_v2 = vld [vmem:[#allocation22 + $0x140] sm:$0xff]  ;;  %1776 = vmatpush.msrb.mxu0 %v1730_v0 }
 0x94c   : > { %1794 = vmatpush.msra.mxu1 %v1748_v1 }
 0x94d   : > { %v1633_v10 = vsel %vm918_vm12, %v1631_v3, %v1632_v4  ;;  %v2316_v3 = vld [vmem:[#allocation4] sm:$0xfe]  ;;  %1777 = vmatpush.msrb.mxu0 %v1729_v2 }
 0x94e   : > { %1657 = vmatmul.f32.vlgmr.msra.gmra.mxu2 %v1633_v10  ;;  %v1747_v4 = vld [vmem:[#allocation22 + $0x1d0] sm:$0xff]  ;;  %v1746_v10 = vld [vmem:[#allocation22 + $0x1c8] sm:$0xff] }
 0x94f   : > { %1795 = vmatpush.msra.mxu1 %v1747_v4 }
 0x950   : > { %2055 = vrot.lane.b32.xlu1 %v2049_v5, %s5142_s2  ;;  %v2596_v5 = vld [vmem:[#allocation4 + $0x20] sm:$0x1] }
 0x951   : > { %v5504_v6 = vpop.permute.xlu0 %2438  ;;  %1796 = vmatpush.msra.mxu1 %v1746_v10 }
 0x952   : > { %2436 = vrot.lane.b32.xlu2 %v2430_v7, %s5141_s24  ;;  %v1745_v7 = vld [vmem:[#allocation22 + $0x1c0] sm:$0xff] }
 0x953   : > { %1797 = vmatpush.msra.mxu1 %v1745_v7 }
 0x958   : > { %2600 = vrot.lane.b32.xlu1 %v2594_v8, %s5138_s16  ;;  %v2653_v8 = vld [vmem:[#allocation4 + $0x20] sm:$0x1] }
 0x959   : > { %v5508_v11 = vpop.permute.xlu0 %2488 }
 0x95a   : > { %1945 = vrot.lane.b32.xlu2 %v5409_v20, %s5143_s23 }
 0x960   : > { %2112 = vrot.lane.b32.xlu1 %v2106_v12, %s5139_s20 }
 0x961   : > { %v5513_v13 = vpop.permute.xlu0 %2001 }
 0x962   : > { %6595 = vst [vmem:[#allocation35_spill] sm:$0xff] %v5513_v13  ;;  %1999 = vrot.lane.b32.xlu2 %v1993_v14, %s5141_s24 }
 0x968   : > { %2440 = vrot.lane.b32.xlu1 %v2432_v15, %s5141_s24 }
 0x969   : > { %v5517_v16 = vpop.permute.xlu0 %2546 }
 0x96a   : > { %6596 = vst [vmem:[#allocation36_spill] sm:$0xff] %v5517_v16  ;;  %2544 = vrot.lane.b32.xlu2 %v2538_v17, %s5139_s20 }
 0x970   : > { %1947 = vrot.lane.b32.xlu1 %v1939_v18, %s5143_s23 }
 0x971   : > { %v1900_v19 = vpop.permute.xlu0 %1899 }
 0x972   : > { %1908 = vst.msk [vmem:[#allocation10 + $0x40] sm:$0x1] %vm1907_vm8, %v1900_v19  ;;  %2057 = vrot.lane.b32.xlu2 %v5409_v20, %s5142_s2  ;;  %vm6582_vm8 = vcmask 261249  }
 0x978   : > { %2003 = vrot.lane.b32.xlu1 %v1995_v28, %s5141_s24 }
 0x97a   : > { %2602 = vrot.lane.b32.xlu2 %v5409_v20, %s5138_s16 }
 0x980   : > { %2548 = vrot.lane.b32.xlu1 %v2540_v37, %s5139_s20 }
 0x982   : > { %2114 = vrot.lane.b32.xlu2 %v5409_v20, %s5139_s20 }
 0x988   : > { %2168 = vrot.lane.b32.xlu1 %v5409_v20, %s5138_s16 }
 0x98a   : > { %2657 = vrot.lane.b32.xlu2 %v2651_v45, %s5135_s19 }
 0x990   : > { %2222 = vrot.lane.b32.xlu1 %v2216_v54, %s5135_s19 }
 0x992   : > { %2059 = vrot.lane.b32.xlu2 %v2051_v58, %s5142_s2 }
 0x998   : > { %2322 = vrot.lane.b32.xlu1 %v2316_v3, %s5136_s28 }
 0x99a   : > { %2604 = vrot.lane.b32.xlu2 %v2596_v5, %s5138_s16 }
 0x9a2   : > { %2661 = vrot.lane.b32.xlu2 %v2653_v8, %s5135_s19  ;;  %v1560_v12 = vpop.permute.xlu1 %1559 }
 0x9a3   : > { %1566 = vst.msk [vmem:[#allocation7 + $0x8] sm:$0xfe] %vm6582_vm8, %v1560_v12 }
 0x9a4   : > { %v1562_v14 = vpop.permute.xlu2 %1561 }
 0x9a5   : > { %1568 = vst.msk [vmem:[#allocation7 + $0x18] sm:$0x1] %vm6583_vm6, %v1562_v14 }
 0x9aa   : > { %v1570_v15 = vld [vmem:[#allocation7 + $0x2] ss:$8 sm:$0x3]  ;;  %v1576_v17 = vld [vmem:[#allocation7 + $0x7] ss:$8 sm:$0x3]  ;;  %2224 = vrot.lane.b32.xlu2 %v5409_v20, %s5135_s19  ;;  %v1898_v18 = vpop.permute.xlu1 %1897 }
 0x9ab   : > { %1578 = vst.msk [vmem:[#allocation7 + $0x11] ss:$8 sm:$0x3] %vm1571_vm2, %v1576_v17  ;;  %v1603_v19 = vld [vmem:[#allocation7 + $0x8] sm:$0xfe] }
 0x9ac   : > { %1573 = vst.msk [vmem:[#allocation7] ss:$8 sm:$0x3] %vm1571_vm2, %v1570_v15  ;;  %v1605_v21 = vld [vmem:[#allocation7 + $0x18] sm:$0x1]  ;;  %v1634_v22 = vrot.slane %v1603_v19, 1  ;;  %v5551_v50 = vpop.permute.xlu2 %2436 }
 0x9ad   : > { %1906 = vst.msk [vmem:[#allocation10 + $0x20] sm:$0xff] %vm1316_vm4, %v1898_v18  ;;  %v1635_v23 = vrot.slane %v1605_v21, 1  ;;  %v1725_v33 = vld [vmem:[#allocation7 + $0x8] sm:$0xfc]  ;;  %vm1933_vm2 = vcmask 392448   ;;  %vm1935_vm4 = vcmask 385280  }
 0x9ae   : > { %v1756_v35 = vrot.slane %v1725_v33, 2 }
 0x9af   : > { %v1636_v24 = vsel %vm918_vm12, %v1634_v22, %v1635_v23 }
 0x9b0   : > { %4513 = vmatmul.msk.f32.vlgmr.msra.gmra.mxu0 %vm6580_vm1, %v1636_v24 }
 0x9b2   : > { %2324 = vrot.lane.b32.xlu2 %v5409_v20, %s5136_s28  ;;  %v1726_v26 = vld [vmem:[#allocation7 + $0x10] sm:$0x3]  ;;  %v1727_v31 = vld [vmem:[#allocation7 + $0x18] sm:$0x3] }
 0x9b3   : > { %v1580_v27 = vld [vmem:[#allocation7] sm:$0xff]  ;;  %v1581_v28 = vld [vmem:[#allocation7 + $0x8] sm:$0xff]  ;;  %v1754_v30 = vrot.slane %v1726_v26, 2  ;;  %v1757_v34 = vrot.slane %v1727_v31, 2 }
 0x9b4   : > { %1700 = vmatmul.f32.vlgmr.msra.gmra.mxu3 %v1580_v27  ;;  %4514 = vmatmul.msk.f32.vlgmr.msrb.gmra.mxu1 %vm6580_vm1, %v1581_v28  ;;  %v5553_v1 = vpop.permute.xlu2 %1945 }
 0x9b5   : > { %v1755_v32 = vsel %vm1060_vm13, %v1753_v29, %v1754_v30  ;;  %v1758_v36 = vsel %vm1060_vm13, %v1756_v35, %v1757_v34 }
 0x9b8   : > { %1778 = vmatmul.f32.vlgmr.msrb.gmra.mxu0 %v1755_v32 }
 0x9bc   : > { %4515 = vmatmul.msk.f32.vlgmr.msra.gmra.mxu1 %vm6580_vm1, %v1758_v36  ;;  %vm1955_vm1 = vcmask 450944  }
 0x9d1   : > { %v1658_v38 = vpop.f32.mrf.mxu2 }
 0xa2d   : > { %v1678_v20 = vpop.f32.mrf.mxu0 }
 0xa2e   : > { %v1679_v39 = vadd.f32 %v1678_v20, %v1658_v38 }
 0xa31   : > { %v1721_v37 = vpop.f32.mrf.mxu1 }
 0xa35   : > { %v1779_v42 = vpop.f32.mrf.mxu0 }
 0xa37   : > { %v1701_v40 = vpop.f32.mrf.mxu3 }
 0xa38   : > { %v1702_v41 = vadd.f32 %v1701_v40, %v1679_v39 }
 0xa39   : > { %v1799_v43 = vpop.f32.mrf.mxu1 }
 0xa3a   : > { %v1722_v44 = vadd.f32 %v1721_v37, %v1702_v41  ;;  %v1800_v45 = vadd.f32 %v1799_v43, %v1779_v42 }
 0xa3c   : > { %v1802_v47 = vadd.f32 %v1800_v45, %v1722_v44 }
 0xa3e   : > { %v1807_v48 = vadd.f32 %v4752_v46, %v1802_v47 }
 0xa40   : > { %v1808_v49 = vmax.f32 %v1807_v48, 0.0 }
 0xa42   : > { %1809 = vst [vmem:[#allocation8] sm:$0xff] %v1808_v49 }
 0xa49   : > { %v1810_v51 = vld [vmem:[#allocation8] sm:$0x1]  ;;  %v1815_v52 = vld [vmem:[#allocation8 + $0x1] sm:$0x1]  ;;  %v1849_v55 = vld [vmem:[#allocation8 + $0x4] sm:$0x1] }
 0xa4a   : > { %v1811_v53 = vmul.f32 0.25, %v1810_v51  ;;  %v1812_v54 = vmul.f32 0.75, %v1810_v51  ;;  %v1816_v56 = vmul.f32 0.25, %v1815_v52  ;;  %v1850_v57 = vld [vmem:[#allocation8 + $0x3] sm:$0x1]  ;;  %v1852_v58 = vmul.f32 0.75, %v1849_v55  ;;  %v5555_v51 = vpop.permute.xlu2 %1999 }
 0xa4b   : > { %v1855_v59 = vld [vmem:[#allocation8 + $0x5] sm:$0x1]  ;;  %v1819_v60 = vld [vmem:[#allocation8 + $0x1] sm:$0x1]  ;;  %v1851_v61 = vmul.f32 0.25, %v1850_v57 }
 0xa4c   : > { %v1856_v62 = vmul.f32 0.25, %v1855_v59  ;;  %v1859_v63 = vld [vmem:[#allocation8 + $0x5] sm:$0x1]  ;;  %v1860_v0 = vld [vmem:[#allocation8 + $0x4] sm:$0x1]  ;;  %v1822_v30 = vmul.f32 0.75, %v1819_v60  ;;  %v1813_v44 = vadd.f32 %v1812_v54, %v1811_v53  ;;  %v1817_v46 = vadd.f32 %v1816_v56, %v1812_v54  ;;  %v5557_v60 = vpop.permute.xlu1 %1943 }
 0xa4d   : > { %v1820_v2 = vld [vmem:[#allocation8] sm:$0x1]  ;;  %v1825_v3 = vld [vmem:[#allocation8 + $0x2] sm:$0x1]  ;;  %v1861_v4 = vmul.f32 0.25, %v1860_v0  ;;  %v1862_v10 = vmul.f32 0.75, %v1859_v63  ;;  %v1853_v17 = vadd.f32 %v1852_v58, %v1851_v61 }
 0xa4e   : > { %v1865_v5 = vld [vmem:[#allocation8 + $0x6] sm:$0x1]  ;;  %v1870_v12 = vld [vmem:[#allocation8 + $0x5] sm:$0x1]  ;;  %v1875_v15 = vld [vmem:[#allocation8 + $0x7] sm:$0x1]  ;;  %v1857_v18 = vadd.f32 %v1856_v62, %v1852_v58 }
 0xa4f   : > { %v1869_v7 = vld [vmem:[#allocation8 + $0x6] sm:$0x1]  ;;  %v1866_v8 = vmul.f32 0.25, %v1865_v5  ;;  %v1829_v19 = vld [vmem:[#allocation8 + $0x2] sm:$0x1]  ;;  %v1871_v21 = vmul.f32 0.25, %v1870_v12  ;;  %v1863_v25 = vadd.f32 %v1862_v10, %v1861_v4 }
 0xa50   : > { %v1872_v14 = vmul.f32 0.75, %v1869_v7  ;;  %v1876_v22 = vmul.f32 0.25, %v1875_v15  ;;  %v1879_v23 = vld [vmem:[#allocation8 + $0x7] sm:$0x1]  ;;  %v1880_v24 = vld [vmem:[#allocation8 + $0x6] sm:$0x1] }
 0xa51   : > { %v1881_v26 = vmul.f32 0.25, %v1880_v24  ;;  %v1882_v27 = vmul.f32 0.75, %v1879_v23  ;;  %v1885_v28 = vld [vmem:[#allocation8 + $0x7] sm:$0x1]  ;;  %1854 = vst [vmem:[#allocation9 + $0x8] sm:$0x1] %v1853_v17  ;;  %v1867_v29 = vadd.f32 %v1866_v8, %v1862_v10 }
 0xa52   : > { %v1830_v31 = vld [vmem:[#allocation8 + $0x1] sm:$0x1]  ;;  %v1886_v32 = vmul.f32 0.25, %v1885_v28  ;;  %1858 = vst [vmem:[#allocation9 + $0x9] sm:$0x1] %v1857_v18  ;;  %v1873_v33 = vadd.f32 %v1872_v14, %v1871_v21  ;;  %v1877_v34 = vadd.f32 %v1876_v22, %v1872_v14  ;;  %v1821_v35 = vmul.f32 0.25, %v1820_v2  ;;  %v5561_v61 = vpop.permute.xlu2 %2544 }
 0xa53   : > { %v1826_v36 = vmul.f32 0.25, %v1825_v3  ;;  %v1835_v20 = vld [vmem:[#allocation8 + $0x3] sm:$0x1]  ;;  %1864 = vst [vmem:[#allocation9 + $0xa] sm:$0x1] %v1863_v25  ;;  %v1883_v37 = vadd.f32 %v1882_v27, %v1881_v26  ;;  %v1831_v41 = vmul.f32 0.25, %v1830_v31  ;;  %v5655_v25 = vpop.permute.xlu0 %2659 }
 0xa54   : > { %v1839_v38 = vld [vmem:[#allocation8 + $0x3] sm:$0x1]  ;;  %v1840_v39 = vld [vmem:[#allocation8 + $0x2] sm:$0x1]  ;;  %1868 = vst [vmem:[#allocation9 + $0xb] sm:$0x1] %v1867_v29  ;;  %v1887_v40 = vadd.f32 %v1886_v32, %v1882_v27  ;;  %v1823_v49 = vadd.f32 %v1822_v30, %v1821_v35  ;;  %v5565_v63 = vpop.permute.xlu1 %2490 }
 0xa55   : > { %v1832_v42 = vmul.f32 0.75, %v1829_v19  ;;  %v1845_v43 = vld [vmem:[#allocation8 + $0x4] sm:$0x1]  ;;  %1874 = vst [vmem:[#allocation9 + $0xc] sm:$0x1] %v1873_v33  ;;  %v1836_v45 = vmul.f32 0.25, %v1835_v20  ;;  %v1827_v55 = vadd.f32 %v1826_v36, %v1822_v30 }
 0xa56   : > { %1878 = vst [vmem:[#allocation9 + $0xd] sm:$0x1] %v1877_v34  ;;  %v1841_v47 = vmul.f32 0.25, %v1840_v39  ;;  %v1842_v48 = vmul.f32 0.75, %v1839_v38  ;;  %v1846_v52 = vmul.f32 0.25, %v1845_v43 }
 0xa57   : > { %1884 = vst [vmem:[#allocation9 + $0xe] sm:$0x1] %v1883_v37  ;;  %v1833_v57 = vadd.f32 %v1832_v42, %v1831_v41  ;;  %v1837_v58 = vadd.f32 %v1836_v45, %v1832_v42 }
 0xa58   : > { %1888 = vst [vmem:[#allocation9 + $0xf] sm:$0x1] %v1887_v40  ;;  %v1843_v59 = vadd.f32 %v1842_v48, %v1841_v47  ;;  %v1847_v53 = vadd.f32 %v1846_v52, %v1842_v48 }
 0xa59   : > { %1814 = vst [vmem:[#allocation9] sm:$0x1] %v1813_v44 }
 0xa5a   : > { %1818 = vst [vmem:[#allocation9 + $0x1] sm:$0x1] %v1817_v46  ;;  %v5577_v3 = vpop.permute.xlu2 %2057 }
 0xa5b   : > { %1824 = vst [vmem:[#allocation9 + $0x2] sm:$0x1] %v1823_v49  ;;  %v5678_v31 = vpop.permute.xlu0 %2492 }
 0xa5c   : > { %1828 = vst [vmem:[#allocation9 + $0x3] sm:$0x1] %v1827_v55  ;;  %v5581_v10 = vpop.permute.xlu1 %2055 }
 0xa5d   : > { %1834 = vst [vmem:[#allocation9 + $0x4] sm:$0x1] %v1833_v57 }
 0xa5e   : > { %1838 = vst [vmem:[#allocation9 + $0x5] sm:$0x1] %v1837_v58 }
 0xa5f   : > { %v2395_v54 = vld [vmem:[#allocation9 + $0x8] sm:$0xff]  ;;  %1844 = vst [vmem:[#allocation9 + $0x6] sm:$0x1] %v1843_v59 }
 0xa60   : > { %v5559_v56 = vmul.f32 0.25, %v2395_v54  ;;  %1848 = vst [vmem:[#allocation9 + $0x7] sm:$0x1] %v1847_v53  ;;  %v5579_v4 = vmul.f32 0.75, %v2395_v54 }
 0xa61   : > { %6597 = vst [vmem:[#allocation37_spill] sm:$0xff] %v5577_v3 }
 0xa62   : > { %2404 = vrot.lane.b32.xlu1 %v5559_v56, %s5135_s19  ;;  %v5589_v5 = vpop.permute.xlu2 %2602  ;;  %v1916_v23 = vadd.f32 %v5579_v4, %v5559_v56  ;;  %6600 = vst [vmem:[#allocation40_spill] sm:$0xff] %v5655_v25 }
 0xa63   : > { %6598 = vst [vmem:[#allocation38_spill] sm:$0xff] %v5589_v5  ;;  %v5684_v34 = vpop.permute.xlu0 %2116 }
 0xa64   : > { %v5597_v7 = vpop.permute.xlu1 %2600  ;;  %v5659_v26 = vrot.slane %v1916_v23, 7 }
 0xa67   : > { %v2448_v62 = vld [vmem:[#allocation9] sm:$0xff] }
 0xa68   : > { %v5567_v0 = vmul.f32 0.75, %v2448_v62  ;;  %v5569_v2 = vmul.f32 0.25, %v2448_v62 }
 0xa6a   : > { %2456 = vrot.lane.b32.xlu2 %v5567_v0, %s5135_s19  ;;  %2402 = vrot.lane.b32.xlu0 %v5569_v2, %s5135_s19  ;;  %v5599_v8 = vpop.permute.xlu2 %2114  ;;  %v1915_v24 = vadd.f32 %v5567_v0, %v5569_v2 }
 0xa6b   : > { %1965 = vrot.lane.b32.xlu1 %v5569_v2, %s5135_s19  ;;  %6599 = vst [vmem:[#allocation39_spill] sm:$0xff] %v5599_v8  ;;  %v5692_v38 = vpop.permute.xlu0 %2166 }
 0xa6c   : > { %v5607_v12 = vpop.permute.xlu1 %2112  ;;  %v5661_v27 = vrot.slane %v1915_v24, 7 }
 0xa6e   : > { %v5668_v29 = vsel %vm790_vm5, %v5661_v27, %v5659_v26 }
 0xa72   : > { %1967 = vrot.lane.b32.xlu2 %v5559_v56, %s5135_s19  ;;  %2458 = vrot.lane.b32.xlu0 %v5579_v4, %s5135_s19  ;;  %v5609_v14 = vpop.permute.xlu2 %2657 }
 0xa73   : > { %2512 = vrot.lane.b32.xlu1 %v5559_v56, %s5135_s19  ;;  %v5699_v41 = vpop.permute.xlu0 %2170 }
 0xa74   : > { %v5617_v15 = vpop.permute.xlu1 %2440 }
 0xa7a   : > { %2510 = vrot.lane.b32.xlu0 %v5569_v2, %s5135_s19  ;;  %2021 = vrot.lane.b32.xlu2 %v5567_v0, %s5135_s19  ;;  %v5625_v17 = vpop.permute.xlu2 %2059 }
 0xa7b   : > { %2566 = vrot.lane.b32.xlu1 %v5567_v0, %s5135_s19 }
 0xa7c   : > { %v5627_v18 = vpop.permute.xlu1 %1947 }
 0xa82   : > { %2023 = vrot.lane.b32.xlu0 %v5579_v4, %s5135_s19  ;;  %2568 = vrot.lane.b32.xlu2 %v5579_v4, %s5135_s19  ;;  %v5635_v19 = vpop.permute.xlu2 %2604 }
 0xa83   : > { %2080 = vrot.lane.b32.xlu1 %v5559_v56, %s5135_s19 }
 0xa84   : > { %v5643_v21 = vpop.permute.xlu1 %2003 }
 0xa8a   : > { %2078 = vrot.lane.b32.xlu0 %v5569_v2, %s5135_s19  ;;  %2623 = vrot.lane.b32.xlu2 %v5569_v2, %s5135_s19  ;;  %v5645_v22 = vpop.permute.xlu2 %2661 }
 0xa8b   : > { %2680 = vrot.lane.b32.xlu1 %v5567_v0, %s5135_s19 }
 0xa8c   : > { %v5663_v28 = vpop.permute.xlu1 %2548 }
 0xa92   : > { %2625 = vrot.lane.b32.xlu0 %v5559_v56, %s5135_s19  ;;  %2682 = vrot.lane.b32.xlu2 %v5579_v4, %s5135_s19  ;;  %v5670_v30 = vpop.permute.xlu2 %2224 }
 0xa93   : > { %2137 = vrot.lane.b32.xlu1 %v5579_v4, %s5135_s19  ;;  %6601 = vst [vmem:[#allocation41_spill] sm:$0xff] %v5670_v30 }
 0xa94   : > { %v5680_v32 = vpop.permute.xlu1 %2168 }
 0xa95   : > { %6602 = vst [vmem:[#allocation42_spill] sm:$0xff] %v5680_v32 }
 0xa9a   : > { %2135 = vrot.lane.b32.xlu0 %v5567_v0, %s5135_s19  ;;  %2188 = vrot.lane.b32.xlu2 %v5569_v2, %s5135_s19  ;;  %v5682_v33 = vpop.permute.xlu2 %2324 }
 0xa9b   : > { %2244 = vrot.lane.b32.xlu1 %v5567_v0, %s5135_s19  ;;  %6603 = vst [vmem:[#allocation43_spill] sm:$0xff] %v5682_v33 }
 0xa9c   : > { %v5686_v35 = vpop.permute.xlu1 %2222 }
 0xaa2   : > { %2190 = vrot.lane.b32.xlu0 %v5559_v56, %s5135_s19  ;;  %2246 = vrot.lane.b32.xlu2 %v5579_v4, %s5135_s19 }
 0xaa3   : > { %2290 = vrot.lane.b32.xlu1 %v5559_v56, %s5135_s19 }
 0xaa4   : > { %v5697_v39 = vpop.permute.xlu1 %2322 }
 0xaaa   : > { %2288 = vrot.lane.b32.xlu0 %v5569_v2, %s5135_s19  ;;  %2347 = vrot.lane.b32.xlu2 %v5579_v4, %s5135_s19 }
 0xaab   : > { %2345 = vrot.lane.b32.xlu1 %v5567_v0, %s5135_s19 }
 0xab2   : > { %1926 = vrot.lane.b32.xlu0 %v5659_v26, %s5143_s23  ;;  %1924 = vrot.lane.b32.xlu2 %v5668_v29, %s5143_s23 }
 0xab3   : > { %1922 = vrot.lane.b32.xlu1 %v5661_v27, %s5143_s23 }
 0xac4   : > { %v2457_v36 = vpop.permute.xlu2 %2456 }
 0xac5   : > { %v5689_v20 = vadd.f32 %v2457_v36, %v5569_v2 }
 0xac7   : > { %v6570_v37 = vrot.slane %v5689_v20, 7 }
 0xac9   : > { %2469 = vrot.lane.b32.xlu0 %v6570_v37, %s5139_s20 }
 0xacc   : > { %v1968_v40 = vpop.permute.xlu2 %1967 }
 0xacd   : > { %v5709_v46 = vadd.f32 %v5579_v4, %v1968_v40 }
 0xacf   : > { %v6573_v58 = vrot.slane %v5709_v46, 7  ;;  %v6604_v5 = vrot.slane %v5709_v46, 7 }
 0xad4   : > { %v2022_v42 = vpop.permute.xlu2 %2021  ;;  %v2405_v43 = vpop.permute.xlu1 %2404 }
 0xad5   : > { %v5702_v44 = vadd.f32 %v5569_v2, %v2022_v42 }
 0xad7   : > { %v6569_v45 = vrot.slane %v5702_v44, 7 }
 0xad9   : > { %2034 = vrot.lane.b32.xlu0 %v6569_v45, %s5139_s20 }
 0xadc   : > { %v2403_v47 = vpop.permute.xlu0 %2402  ;;  %v2569_v48 = vpop.permute.xlu2 %2568 }
 0xadd   : > { %v5712_v49 = vadd.f32 %v5567_v0, %v2403_v47  ;;  %v1966_v52 = vpop.permute.xlu1 %1965 }
 0xade   : > { %v1971_v55 = vadd.f32 %v5567_v0, %v1966_v52 }
 0xadf   : > { %v6568_v57 = vrot.slane %v5712_v49, 7 }
 0xae0   : > { %v1975_v59 = vrot.slane %v1971_v55, 7 }
 0xae1   : > { %2415 = vrot.lane.b32.xlu2 %v6568_v57, %s5144_s14 }
 0xae2   : > { %v5723_v53 = vsel %vm790_vm5, %v1975_v59, %v6573_v58 }
 0xae4   : > { %v2459_v54 = vpop.permute.xlu0 %2458  ;;  %v2624_v62 = vpop.permute.xlu2 %2623 }
 0xae5   : > { %v5725_v23 = vpop.permute.xlu1 %2512 }
 0xae9   : > { %1978 = vrot.lane.b32.xlu2 %v1975_v59, %s5144_s14  ;;  %v5743_v59 = vadd.f32 %v2624_v62, %v5567_v0 }
 0xaeb   : > { %v6574_v45 = vrot.slane %v5743_v59, 7 }
 0xaec   : > { %v2511_v24 = vpop.permute.xlu0 %2510  ;;  %v2683_v36 = vpop.permute.xlu2 %2682 }
 0xaed   : > { %v5729_v40 = vadd.f32 %v2511_v24, %v5567_v0  ;;  %v2567_v42 = vpop.permute.xlu1 %2566  ;;  %v5746_v24 = vadd.f32 %v5579_v4, %v2405_v43 }
 0xaee   : > { %v5732_v47 = vadd.f32 %v2567_v42, %v5569_v2 }
 0xaef   : > { %v6571_v52 = vrot.slane %v5729_v40, 7  ;;  %v6575_v37 = vrot.slane %v5746_v24, 7 }
 0xaf0   : > { %v6572_v55 = vrot.slane %v5732_v47, 7 }
 0xaf1   : > { %2523 = vrot.lane.b32.xlu1 %v6571_v52, %s5140_s15 }
 0xaf2   : > { %2579 = vrot.lane.b32.xlu0 %v6572_v55, %s5135_s19 }
 0xaf4   : > { %v2024_v42 = vpop.permute.xlu0 %2023  ;;  %v2189_v9 = vpop.permute.xlu2 %2188 }
 0xaf5   : > { %v2081_v57 = vpop.permute.xlu1 %2080 }
 0xaf6   : > { %v2085_v52 = vadd.f32 %v5579_v4, %v2081_v57 }
 0xaf8   : > { %v2089_v58 = vrot.slane %v2085_v52, 7  ;;  %v5771_v52 = vadd.f32 %v2459_v54, %v5559_v56  ;;  %v5790_v54 = vadd.f32 %v2569_v48, %v5559_v56 }
 0xaf9   : > { %2636 = vrot.lane.b32.xlu1 %v6574_v45, %s5133_s21 }
 0xafa   : > { %2419 = vrot.lane.b32.xlu0 %v6575_v37, %s5144_s14  ;;  %v2577_v48 = vrot.slane %v5790_v54, 7  ;;  %v2517_v54 = vadd.f32 %v5725_v23, %v5579_v4 }
 0xafc   : > { %v2079_v62 = vpop.permute.xlu0 %2078  ;;  %v2247_v43 = vpop.permute.xlu2 %2246 }
 0xafd   : > { %v2084_v55 = vadd.f32 %v5567_v0, %v2079_v62  ;;  %v2681_v33 = vpop.permute.xlu1 %2680 }
 0xafe   : > { %v5759_v30 = vadd.f32 %v2681_v33, %v5569_v2  ;;  %v5774_v33 = vadd.f32 %v5559_v56, %v2024_v42  ;;  %v5793_v42 = vadd.f32 %v5559_v56, %v2247_v43 }
 0xaff   : > { %v2088_v25 = vrot.slane %v2084_v55, 7 }
 0xb00   : > { %v6576_v8 = vrot.slane %v5759_v30, 7  ;;  %v2032_v32 = vrot.slane %v5774_v33, 7  ;;  %v6579_v13 = vrot.slane %v5793_v42, 7 }
 0xb01   : > { %2091 = vrot.lane.b32.xlu2 %v2088_v25, %s5140_s15  ;;  %2095 = vrot.lane.b32.xlu1 %v2089_v58, %s5140_s15  ;;  %v5765_v57 = vsel %vm790_vm5, %v2088_v25, %v2089_v58  ;;  %v2467_v25 = vrot.slane %v5771_v52, 7 }
 0xb02   : > { %2693 = vrot.lane.b32.xlu0 %v6576_v8, %s5136_s28 }
 0xb04   : > { %v2626_v55 = vpop.permute.xlu0 %2625  ;;  %v5776_v62 = vpop.permute.xlu2 %2347 }
 0xb05   : > { %v5779_v45 = vadd.f32 %v2626_v55, %v5579_v4  ;;  %v2138_v37 = vpop.permute.xlu1 %2137 }
 0xb07   : > { %v6577_v58 = vrot.slane %v5779_v45, 7 }
 0xb09   : > { %2473 = vrot.lane.b32.xlu2 %v2467_v25, %s5139_s20  ;;  %2640 = vrot.lane.b32.xlu1 %v6577_v58, %s5133_s21 }
 0xb0a   : > { %2038 = vrot.lane.b32.xlu0 %v2032_v32, %s5139_s20 }
 0xb0c   : > { %v2136_v52 = vpop.permute.xlu0 %2135  ;;  %v1925_v55 = vpop.permute.xlu2 %1924 }
 0xb0d   : > { %v5796_v8 = vadd.f32 %v5569_v2, %v2136_v52  ;;  %1934 = vst.msk [vmem:[#allocation10 + $0x20] sm:$0xff] %vm1933_vm2, %v1925_v55  ;;  %v2245_v33 = vpop.permute.xlu1 %2244  ;;  %vm1952_vm2 = vcmask 458113  }
 0xb0e   : > { %1954 = vst.msk [vmem:[#allocation10 + $0x20] sm:$0xff] %vm1364_vm10, %v5553_v1  ;;  %v2250_v58 = vadd.f32 %v5569_v2, %v2245_v33  ;;  %v5824_v33 = vadd.f32 %v5567_v0, %v2189_v9  ;;  %vm1931_vm10 = vcmask 392449  }
 0xb0f   : > { %v6578_v3 = vrot.slane %v5796_v8, 7 }
 0xb10   : > { %v2254_v43 = vrot.slane %v2250_v58, 7  ;;  %v2687_v58 = vadd.f32 %v2683_v36, %v5559_v56  ;;  %v2198_v23 = vrot.slane %v5824_v33, 7 }
 0xb11   : > { %1982 = vrot.lane.b32.xlu2 %v6604_v5, %s5144_s14  ;;  %2148 = vrot.lane.b32.xlu1 %v6578_v3, %s5135_s19  ;;  %v2521_v5 = vrot.slane %v2517_v54, 7 }
 0xb12   : > { %2583 = vrot.lane.b32.xlu0 %v2577_v48, %s5135_s19  ;;  %v5814_v1 = vsel %vm790_vm5, %v2254_v43, %v6579_v13  ;;  %v2691_v46 = vrot.slane %v2687_v58, 7 }
 0xb14   : > { %v2191_v52 = vpop.permute.xlu0 %2190 }
 0xb15   : > { %v5819_v55 = vpop.permute.xlu1 %2290 }
 0xb19   : > { %2527 = vrot.lane.b32.xlu2 %v2521_v5, %s5140_s15 }
 0xb1a   : > { %2697 = vrot.lane.b32.xlu0 %v2691_v46, %s5136_s28 }
 0xb1c   : > { %v2289_v3 = vpop.permute.xlu0 %2288 }
 0xb1d   : > { %v2346_v13 = vpop.permute.xlu1 %2345  ;;  %v5839_v9 = vadd.f32 %v5567_v0, %v2289_v3  ;;  %v6605_v0 = vrot.slane %v5689_v20, 7  ;;  %v6609_v20 = vrot.slane %v5712_v49, 7 }
 0xb1e   : > { %v5827_v16 = vadd.f32 %v5569_v2, %v2346_v13  ;;  %v5842_v13 = vadd.f32 %v5559_v56, %v2138_v37  ;;  %v6606_v37 = vrot.slane %v5729_v40, 7  ;;  %v6610_v40 = vrot.slane %v5779_v45, 7 }
 0xb1f   : > { %v2298_v58 = vrot.slane %v5839_v9, 7  ;;  %v2468_v3 = vsel %vm790_vm5, %v6605_v0, %v2467_v25  ;;  %v6615_v0 = vrot.slane %v5796_v8, 7 }
 0xb20   : > { %v6581_v36 = vrot.slane %v5827_v16, 7  ;;  %v6616_v8 = vrot.slane %v5827_v16, 7 }
 0xb21   : > { %2201 = vrot.lane.b32.xlu2 %v2198_v23, %s5133_s21 }
 0xb22   : > { %2358 = vrot.lane.b32.xlu1 %v6581_v36, %s5141_s24  ;;  %2257 = vrot.lane.b32.xlu0 %v2254_v43, %s5136_s28  ;;  %v2146_v36 = vrot.slane %v5842_v13, 7  ;;  %v6608_v13 = vrot.slane %v5746_v24, 7  ;;  %v2195_v24 = vadd.f32 %v5579_v4, %v2191_v52  ;;  %v2295_v52 = vadd.f32 %v5579_v4, %v5819_v55  ;;  %v2318_v4 = vld [vmem:[#allocation4 + $0x20] sm:$0x1] }
 0xb24   : > { %v1927_v2 = vpop.permute.xlu0 %1926  ;;  %v2414_v25 = vsel %vm790_vm5, %v6609_v20, %v6608_v13  ;;  %v2980_v13 = vld [vmem:[#allocation25 + $0x540] sm:$0xff]  ;;  %v3006_v20 = vld [vmem:[#allocation25 + $0x610] sm:$0xff] }
 0xb25   : > { %1936 = vst.msk [vmem:[#allocation10 + $0x40] sm:$0x1] %vm1935_vm4, %v1927_v2  ;;  %v1923_v54 = vpop.permute.xlu1 %1922  ;;  %vm1987_vm4 = vcmask 589249  }
 0xb26   : > { %1932 = vst.msk [vmem:[#allocation10] sm:$0xfe] %vm1931_vm10, %v1923_v54  ;;  %vm2064_vm10 = vcmask 851713   ;;  %v2218_v54 = vld [vmem:[#allocation4 + $0x20] sm:$0x1] }
 0xb27   : > { %1953 = vst.msk [vmem:[#allocation10] sm:$0xfe] %vm1952_vm2, %v5557_v60  ;;  %v2522_v60 = vsel %vm790_vm5, %v6606_v37, %v2521_v5  ;;  %v6611_v5 = vrot.slane %v5743_v59, 7  ;;  %vm2100_vm2 = vcmask 982849  }
 0xb28   : > { %1956 = vst.msk [vmem:[#allocation10 + $0x40] sm:$0x1] %vm1955_vm1, %v5627_v18  ;;  %v6607_v18 = vrot.slane %v5702_v44, 7  ;;  %vm2497_vm1 = vcmask 326913  }
 0xb29   : > { %2301 = vrot.lane.b32.xlu2 %v2298_v58, %s5145_s26  ;;  %v2635_v2 = vsel %vm790_vm5, %v6611_v5, %v6610_v40  ;;  %v2978_v5 = vld [vmem:[#allocation25 + $0x530] sm:$0xff] }
 0xb2a   : > { %2471 = vrot.lane.b32.xlu1 %v2468_v3, %s5139_s20  ;;  %2152 = vrot.lane.b32.xlu0 %v2146_v36, %s5135_s19  ;;  %v2033_v43 = vsel %vm790_vm5, %v6607_v18, %v2032_v32  ;;  %v6612_v32 = vrot.slane %v5732_v47, 7  ;;  %v5890_v47 = vld [vmem:[#allocation4 + $0x10] sm:$0xff] }
 0xb2c   : > { %v2578_v44 = vsel %vm790_vm5, %v6612_v32, %v2577_v48  ;;  %v6614_v48 = vrot.slane %v5793_v42, 7  ;;  %v2299_v42 = vrot.slane %v2295_v52, 7  ;;  %v2976_v32 = vld [vmem:[#allocation25 + $0x520] sm:$0xff] }
 0xb2d   : > { %v2992_v52 = vld [vmem:[#allocation25 + $0x5a0] sm:$0xff] }
 0xb2e   : > { %v2300_v33 = vsel %vm790_vm5, %v2298_v58, %v2299_v42 }
 0xb31   : > { %2525 = vrot.lane.b32.xlu2 %v2522_v60, %s5140_s15  ;;  %v3012_v60 = vld [vmem:[#allocation25 + $0x640] sm:$0xff] }
 0xb32   : > { %2036 = vrot.lane.b32.xlu1 %v2033_v43, %s5139_s20  ;;  %2417 = vrot.lane.b32.xlu0 %v2414_v25, %s5144_s14  ;;  %v2982_v43 = vld [vmem:[#allocation25 + $0x550] sm:$0xff] }
 0xb33   : > { %3094 = vmatpush.msrb.mxu2 %v2982_v43  ;;  %v2969_v43 = vld [vmem:[#allocation25 + $0x4e8] sm:$0xff] }
 0xb35   : > { %3095 = vmatpush.msrb.mxu2 %v2980_v13 }
 0xb37   : > { %3096 = vmatpush.msrb.mxu2 %v2978_v5 }
 0xb39   : > { %2638 = vrot.lane.b32.xlu2 %v2635_v2, %s5133_s21  ;;  %v3002_v2 = vld [vmem:[#allocation25 + $0x5f0] sm:$0xff]  ;;  %3097 = vmatpush.msrb.mxu2 %v2976_v32 }
 0xb3a   : > { %2581 = vrot.lane.b32.xlu1 %v2578_v44, %s5135_s19  ;;  %1980 = vrot.lane.b32.xlu0 %v5723_v53, %s5144_s14  ;;  %v6613_v53 = vrot.slane %v5759_v30, 7  ;;  %v2373_v30 = vld [vmem:[#allocation4] sm:$0xfe]  ;;  %v3000_v44 = vld [vmem:[#allocation25 + $0x5e0] sm:$0xff] }
 0xb3b   : > { %v5882_v49 = vpop.permute.xlu2 %2415  ;;  %v2470_v45 = vpop.permute.xlu0 %2469 }
 0xb3c   : > { %2425 = vst.msk [vmem:[#allocation10 + $0x10] sm:$0xfe] %vm805_vm7, %v5882_v49  ;;  %v2692_v59 = vsel %vm790_vm5, %v6613_v53, %v2691_v46  ;;  %vm2008_vm7 = vcmask 654913   ;;  %v2998_v53 = vld [vmem:[#allocation25 + $0x5d0] sm:$0xff] }
 0xb3d   : > { %2445 = vst.msk [vmem:[#allocation10 + $0x10] sm:$0xfe] %vm848_vm14, %v5551_v50  ;;  %vm2043_vm14 = vcmask 786049  }
 0xb3e   : > { %2478 = vst.msk [vmem:[#allocation10 + $0x10] sm:$0xfe] %vm6582_vm8, %v2470_v45  ;;  %vm1991_vm8 = vcmask 582080   ;;  %v2974_v45 = vld [vmem:[#allocation25 + $0x510] sm:$0xff] }
 0xb3f   : > { %2498 = vst.msk [vmem:[#allocation10 + $0x10] sm:$0xfe] %vm2497_vm1, %v5508_v11  ;;  %v2199_v11 = vrot.slane %v2195_v24, 7  ;;  %vm2121_vm1 = vcmask 1048513   ;;  %3098 = vmatpush.msrb.mxu2 %v2974_v45  ;;  %v2961_v45 = vld [vmem:[#allocation25 + $0x4a8] sm:$0xff] }
 0xb41   : > { %2381 = vrot.lane.b32.xlu2 %v5890_v47, %s5143_s23 }
 0xb42   : > { %2093 = vrot.lane.b32.xlu0 %v5765_v57, %s5140_s15  ;;  %2695 = vrot.lane.b32.xlu1 %v2692_v59, %s5136_s28  ;;  %v2352_v57 = vadd.f32 %v5559_v56, %v5776_v62  ;;  %v2147_v56 = vsel %vm790_vm5, %v6615_v0, %v2146_v36  ;;  %v2972_v59 = vld [vmem:[#allocation25 + $0x500] sm:$0xff] }
 0xb43   : > { %v1979_v50 = vpop.permute.xlu2 %1978  ;;  %3099 = vmatpush.msrb.mxu2 %v2972_v59 }
 0xb44   : > { %1988 = vst.msk [vmem:[#allocation10] sm:$0xfe] %vm1987_vm4, %v1979_v50  ;;  %vm2532_vm4 = vcmask 458049   ;;  %v2996_v50 = vld [vmem:[#allocation25 + $0x5c0] sm:$0xff] }
 0xb45   : > { %2009 = vst.msk [vmem:[#allocation10] sm:$0xfe] %vm2008_vm7, %v5555_v51  ;;  %v2356_v51 = vrot.slane %v2352_v57, 7  ;;  %vm2553_vm7 = vcmask 523713  }
 0xb47   : > { %v2357_v55 = vsel %vm790_vm5, %v6616_v8, %v2356_v51  ;;  %v2984_v8 = vld [vmem:[#allocation25 + $0x560] sm:$0xff] }
 0xb49   : > { %2261 = vrot.lane.b32.xlu2 %v6614_v48, %s5136_s28  ;;  %v2994_v48 = vld [vmem:[#allocation25 + $0x5b0] sm:$0xff] }
 0xb4a   : > { %2205 = vrot.lane.b32.xlu0 %v2199_v11, %s5133_s21  ;;  %2379 = vrot.lane.b32.xlu1 %v2373_v30, %s5143_s23 }
 0xb4b   : > { %v2035_v46 = vpop.permute.xlu0 %2034 }
 0xb4c   : > { %2044 = vst.msk [vmem:[#allocation10] sm:$0xfe] %vm2043_vm14, %v2035_v46  ;;  %vm2588_vm14 = vcmask 654849   ;;  %v2968_v46 = vld [vmem:[#allocation25 + $0x4e0] sm:$0xff] }
 0xb4d   : > { %2065 = vst.msk [vmem:[#allocation10] sm:$0xfe] %vm2064_vm10, %v5581_v10  ;;  %v2200_v10 = vsel %vm790_vm5, %v2198_v23, %v2199_v11  ;;  %vm2609_vm10 = vcmask 720513   ;;  %v2970_v11 = vld [vmem:[#allocation25 + $0x4f0] sm:$0xff] }
 0xb4e   : > { %3100 = vmatpush.msrb.mxu2 %v2970_v11 }
 0xb50   : > { %3101 = vmatpush.msrb.mxu2 %v2968_v46 }
 0xb51   : > { %2362 = vrot.lane.b32.xlu2 %v2356_v51, %s5141_s24  ;;  %v2990_v51 = vld [vmem:[#allocation25 + $0x590] sm:$0xff] }
 0xb52   : > { %2305 = vrot.lane.b32.xlu0 %v2299_v42, %s5145_s26  ;;  %2226 = vrot.lane.b32.xlu1 %v2218_v54, %s5135_s19  ;;  %v2964_v42 = vld [vmem:[#allocation25 + $0x4c0] sm:$0xff] }
 0xb53   : > { %v2988_v54 = vld [vmem:[#allocation25 + $0x580] sm:$0xff] }
 0xb59   : > { %2150 = vrot.lane.b32.xlu2 %v2147_v56, %s5135_s19  ;;  %v2962_v56 = vld [vmem:[#allocation25 + $0x4b0] sm:$0xff] }
 0xb5a   : > { %2326 = vrot.lane.b32.xlu1 %v2318_v4, %s5136_s28  ;;  %2203 = vrot.lane.b32.xlu0 %v2200_v10, %s5133_s21  ;;  %v2986_v4 = vld [vmem:[#allocation25 + $0x570] sm:$0xff] }
 0xb5b   : > { %v2092_v62 = vpop.permute.xlu2 %2091 }
 0xb5c   : > { %2101 = vst.msk [vmem:[#allocation10] sm:$0xfe] %vm2100_vm2, %v2092_v62  ;;  %vm2645_vm2 = vcmask 851649  }
 0xb5d   : > { %2122 = vst.msk [vmem:[#allocation10] sm:$0xfe] %vm2121_vm1, %v5607_v12  ;;  %v2375_v12 = vld [vmem:[#allocation4 + $0x20] sm:$0x1] }
 0xb61   : > { %2360 = vrot.lane.b32.xlu2 %v2357_v55, %s5141_s24  ;;  %v2958_v55 = vld [vmem:[#allocation25 + $0x490] sm:$0xff] }
 0xb62   : > { %2303 = vrot.lane.b32.xlu0 %v2300_v33, %s5145_s26  ;;  %2259 = vrot.lane.b32.xlu1 %v5814_v1, %s5136_s28  ;;  %v2956_v33 = vld [vmem:[#allocation25 + $0x480] sm:$0xff] }
 0xb63   : > { %v2524_v23 = vpop.permute.xlu1 %2523  ;;  %v2474_v36 = vpop.permute.xlu2 %2473 }
 0xb64   : > { %2533 = vst.msk [vmem:[#allocation10 + $0x10] sm:$0xfe] %vm2532_vm4, %v2524_v23  ;;  %v2580_v16 = vpop.permute.xlu0 %2579  ;;  %vm2500_vm4 = vcmask 319744   ;;  %v6619_v23 = vld [vmem:[#allocation36_spill] sm:$0xff] }
 0xb65   : > { %2554 = vst.msk [vmem:[#allocation10 + $0x10] sm:$0xfe] %vm2553_vm7, %v5561_v61  ;;  %vm2666_vm7 = vcmask 917313   ;;  %v2742_v61 = vld [vmem:[#allocation10] sm:$0xfe] }
 0xb66   : > { %2589 = vst.msk [vmem:[#allocation10 + $0x10] sm:$0xfe] %vm2588_vm14, %v2580_v16  ;;  %vm2011_vm14 = vcmask 647744  }
 0xb67   : > { %2610 = vst.msk [vmem:[#allocation10 + $0x10] sm:$0xfe] %vm2609_vm10, %v5597_v7  ;;  %vm2536_vm10 = vcmask 450880  }
 0xb69   : > { %2383 = vrot.lane.b32.xlu2 %v2375_v12, %s5143_s23 }
 0xb6a   : > { %2727 = vrot.lane.b32.xlu0 %v5661_v27, %s5145_s26  ;;  %2729 = vrot.lane.b32.xlu1 %v5668_v29, %s5145_s26 }
 0xb6b   : > { %v2637_v1 = vpop.permute.xlu1 %2636  ;;  %v1983_v9 = vpop.permute.xlu2 %1982 }
 0xb6c   : > { %2646 = vst.msk [vmem:[#allocation10 + $0x10] sm:$0xfe] %vm2645_vm2, %v2637_v1  ;;  %v5943_v58 = vpop.permute.xlu0 %2419  ;;  %vm2702_vm2 = vcmask 1048449   ;;  %v6621_v1 = vld [vmem:[#allocation38_spill] sm:$0xff] }
 0xb6d   : > { %1992 = vst.msk [vmem:[#allocation10 + $0x40] sm:$0x1] %vm1991_vm8, %v1983_v9  ;;  %vm2068_vm8 = vcmask 844544   ;;  %v2983_v9 = vld [vmem:[#allocation25 + $0x558] sm:$0xff] }
 0xb6e   : > { %2429 = vst.msk [vmem:[#allocation10 + $0x50] sm:$0x1] %vm813_vm9, %v5943_v58  ;;  %vm2556_vm9 = vcmask 516544  }
 0xb6f   : > { %2447 = vst.msk [vmem:[#allocation10 + $0x50] sm:$0x1] %vm852_vm0, %v5617_v15  ;;  %vm2047_vm0 = vcmask 778880  }
 0xb70   : > { %2481 = vst.msk [vmem:[#allocation10 + $0x50] sm:$0x1] %vm6583_vm6, %v2474_v36  ;;  %vm2125_vm6 = vcmask 1041344   ;;  %v2954_v36 = vld [vmem:[#allocation25 + $0x470] sm:$0xff] }
 0xb71   : > { %2501 = vst.msk [vmem:[#allocation10 + $0x50] sm:$0x1] %vm2500_vm4, %v5678_v31  ;;  %vm2104_vm4 = vcmask 975680  }
 0xb72   : > { %2748 = vrot.lane.b32.xlu0 %v2742_v61, %s5139_s20  ;;  %2667 = vst.msk [vmem:[#allocation10 + $0x10] sm:$0xfe] %vm2666_vm7, %v5609_v14  ;;  %vm2175_vm7 = vcmask 195713   ;;  %v6622_v61 = vld [vmem:[#allocation35_spill] sm:$0xff] }
 0xb73   : > { %v2096_v7 = vpop.permute.xlu1 %2095  ;;  %v2528_v27 = vpop.permute.xlu2 %2527  ;;  %2012 = vst.msk [vmem:[#allocation10 + $0x40] sm:$0x1] %vm2011_vm14, %v5643_v21  ;;  %vm2210_vm14 = vcmask 326849  }
 0xb74   : > { %2537 = vst.msk [vmem:[#allocation10 + $0x50] sm:$0x1] %vm2536_vm10, %v2528_v27  ;;  %v2694_v15 = vpop.permute.xlu0 %2693  ;;  %vm2592_vm10 = vcmask 647680   ;;  %v6624_v27 = vld [vmem:[#allocation37_spill] sm:$0xff] }
 0xb75   : > { %2703 = vst.msk [vmem:[#allocation10 + $0x10] sm:$0xfe] %vm2702_vm2, %v2694_v15  ;;  %vm2613_vm2 = vcmask 713344   ;;  %v2979_v15 = vld [vmem:[#allocation25 + $0x538] sm:$0xff] }
 0xb76   : > { %2557 = vst.msk [vmem:[#allocation10 + $0x50] sm:$0x1] %vm2556_vm9, %v5663_v28  ;;  %v3014_v28 = vld [vmem:[#allocation25 + $0x650] sm:$0xff]  ;;  %vm2649_vm9 = vcmask 844480  }
 0xb77   : > { %3117 = vmatpush.msrb.mxu3 %v3014_v28  ;;  %v6628_v28 = vld [vmem:[#allocation39_spill] sm:$0xff] }
 0xb79   : > { %3118 = vmatpush.msrb.mxu3 %v3012_v60  ;;  %v6629_v60 = vld [vmem:[#allocation40_spill] sm:$0xff] }
 0xb7b   : > { %v2641_v29 = vpop.permute.xlu1 %2640  ;;  %v2202_v31 = vpop.permute.xlu2 %2201 }
 0xb7c   : > { %v2039_v3 = vpop.permute.xlu0 %2038  ;;  %v2763_v37 = vld [vmem:[#allocation10 + $0x10] sm:$0xfe] }
 0xb7d   : > { %2048 = vst.msk [vmem:[#allocation10 + $0x40] sm:$0x1] %vm2047_vm0, %v2039_v3  ;;  %2769 = vrot.lane.b32.xlu2 %v2763_v37, %s5141_s24  ;;  %vm2670_vm0 = vcmask 910144   ;;  %v2977_v37 = vld [vmem:[#allocation25 + $0x528] sm:$0xff] }
 0xb7e   : > { %2069 = vst.msk [vmem:[#allocation10 + $0x40] sm:$0x1] %vm2068_vm8, %v5625_v17  ;;  %vm2231_vm8 = vcmask 392513   ;;  %v2913_v13 = vld [vmem:[#allocation10 + $0x10] sm:$0xfe] }
 0xb7f   : > { %2105 = vst.msk [vmem:[#allocation10 + $0x40] sm:$0x1] %vm2104_vm4, %v2096_v7  ;;  %vm2706_vm4 = vcmask 1041280   ;;  %v2981_v7 = vld [vmem:[#allocation25 + $0x548] sm:$0xff] }
 0xb80   : > { %2126 = vst.msk [vmem:[#allocation10 + $0x40] sm:$0x1] %vm2125_vm6, %v5684_v34  ;;  %v3010_v34 = vld [vmem:[#allocation25 + $0x630] sm:$0xff] }
 0xb81   : > { %3119 = vmatpush.msrb.mxu3 %v3010_v34 }
 0xb83   : > { %v2149_v14 = vpop.permute.xlu1 %2148  ;;  %v2302_v21 = vpop.permute.xlu2 %2301 }
 0xb84   : > { %2157 = vst.msk [vmem:[#allocation10 + $0x8] sm:$0xfe] %vm1537_vm15, %v2149_v14  ;;  %v2584_v18 = vpop.permute.xlu0 %2583  ;;  %v6626_v14 = vld [vmem:[#allocation42_spill] sm:$0xff] }
 0xb85   : > { %2176 = vst.msk [vmem:[#allocation10 + $0x8] sm:$0xfe] %vm2175_vm7, %v5692_v38  ;;  %2731 = vrot.lane.b32.xlu2 %v5659_v26, %s5145_s26  ;;  %v3008_v38 = vld [vmem:[#allocation25 + $0x620] sm:$0xff]  ;;  %vm2266_vm7 = vcmask 523649  }
 0xb86   : > { %2211 = vst.msk [vmem:[#allocation10 + $0x8] sm:$0xfe] %vm2210_vm14, %v2202_v31  ;;  %3120 = vmatpush.msrb.mxu3 %v3008_v38  ;;  %vm2275_vm14 = vcmask 589313  }
 0xb87   : > { %2593 = vst.msk [vmem:[#allocation10 + $0x50] sm:$0x1] %vm2592_vm10, %v2584_v18  ;;  %vm2310_vm10 = vcmask 720449   ;;  %v2973_v18 = vld [vmem:[#allocation25 + $0x508] sm:$0xff] }
 0xb88   : > { %2614 = vst.msk [vmem:[#allocation10 + $0x50] sm:$0x1] %vm2613_vm2, %v5635_v19  ;;  %v3004_v19 = vld [vmem:[#allocation25 + $0x600] sm:$0xff]  ;;  %3121 = vmatpush.msrb.mxu3 %v3006_v20  ;;  %vm2331_vm2 = vcmask 786113   ;;  %v2967_v20 = vld [vmem:[#allocation25 + $0x4d8] sm:$0xff] }
 0xb89   : > { %2650 = vst.msk [vmem:[#allocation10 + $0x50] sm:$0x1] %vm2649_vm9, %v2641_v29  ;;  %vm2367_vm9 = vcmask 917249  }
 0xb8a   : > { %2671 = vst.msk [vmem:[#allocation10 + $0x50] sm:$0x1] %vm2670_vm0, %v5645_v22  ;;  %3122 = vmatpush.msrb.mxu3 %v3004_v19  ;;  %vm2178_vm0 = vcmask 188544  }
 0xb8b   : > { %v5965_v17 = vpop.permute.xlu2 %2525  ;;  %2232 = vst.msk [vmem:[#allocation10 + $0x8] sm:$0xfe] %vm2231_vm8, %v5686_v35  ;;  %v2272_v35 = vld [vmem:[#allocation4] sm:$0xfe]  ;;  %vm6584_vm8 = vcmask 261248  }
 0xb8c   : > { %v2698_v26 = vpop.permute.xlu0 %2697  ;;  %3123 = vmatpush.msrb.mxu3 %v3002_v2 }
 0xb8d   : > { %2707 = vst.msk [vmem:[#allocation10 + $0x50] sm:$0x1] %vm2706_vm4, %v2698_v26  ;;  %vm6617_vm4 = vcmask 130112  }
 0xb8e   : > { %3124 = vmatpush.msrb.mxu3 %v3000_v44  ;;  %v2274_v44 = vld [vmem:[#allocation4 + $0x20] sm:$0x1] }
 0xb90   : > { %3125 = vmatpush.msrb.mxu3 %v2998_v53  ;;  %v2744_v53 = vld [vmem:[#allocation10 + $0x40] sm:$0x1] }
 0xb92   : > { %3126 = vmatpush.msrb.mxu3 %v2996_v50  ;;  %v2959_v50 = vld [vmem:[#allocation25 + $0x498] sm:$0xff] }
 0xb93   : > { %v5968_v22 = vpop.permute.xlu2 %2638 }
 0xb94   : > { %v2359_v25 = vpop.permute.xlu1 %2358  ;;  %v2258_v40 = vpop.permute.xlu0 %2257  ;;  %3127 = vmatpush.msrb.mxu3 %v2994_v48  ;;  %v2917_v59 = vld [vmem:[#allocation10 + $0x50] sm:$0x1] }
 0xb95   : > { %2267 = vst.msk [vmem:[#allocation10 + $0x8] sm:$0xfe] %vm2266_vm7, %v2258_v40  ;;  %vm2534_vm7 = vcmask 458048   ;;  %v2963_v40 = vld [vmem:[#allocation25 + $0x4b8] sm:$0xff]  ;;  %v2765_v11 = vld [vmem:[#allocation10 + $0x50] sm:$0x1] }
 0xb96   : > { %2276 = vst.msk [vmem:[#allocation10 + $0x8] sm:$0xfe] %vm2275_vm14, %v2272_v35  ;;  %3128 = vmatpush.msrb.mxu3 %v2992_v52  ;;  %vm6618_vm14 = vcmask 326912   ;;  %v2957_v48 = vld [vmem:[#allocation25 + $0x488] sm:$0xff] }
 0xb97   : > { %2311 = vst.msk [vmem:[#allocation10 + $0x8] sm:$0xfe] %vm2310_vm10, %v2302_v21  ;;  %vm6620_vm10 = vcmask 523712   ;;  %v2975_v21 = vld [vmem:[#allocation25 + $0x518] sm:$0xff] }
 0xb98   : > { %2332 = vst.msk [vmem:[#allocation10 + $0x8] sm:$0xfe] %vm2331_vm2, %v5697_v39  ;;  %v2966_v39 = vld [vmem:[#allocation25 + $0x4d0] sm:$0xff]  ;;  %3129 = vmatpush.msrb.mxu3 %v2990_v51  ;;  %vm2611_vm2 = vcmask 720512   ;;  %v2953_v51 = vld [vmem:[#allocation25 + $0x468] sm:$0xff] }
 0xb99   : > { %2368 = vst.msk [vmem:[#allocation10 + $0x8] sm:$0xfe] %vm2367_vm9, %v2359_v25  ;;  %3102 = vmatpush.msrb.mxu2 %v2966_v39  ;;  %vm1989_vm9 = vcmask 589248   ;;  %v3046_v25 = vrot.slane %v2913_v13, 1  ;;  %v2883_v13 = vld [vmem:[#allocation25 + $0x280] sm:$0xff] }
 0xb9a   : > { %3130 = vmatpush.msrb.mxu3 %v2988_v54  ;;  %v6630_v54 = vld [vmem:[#allocation41_spill] sm:$0xff] }
 0xb9b   : > { %v5971_v24 = vpop.permute.xlu2 %2381  ;;  %3103 = vmatpush.msrb.mxu2 %v2964_v42 }
 0xb9c   : > { %v2472_v30 = vpop.permute.xlu1 %2471  ;;  %v2153_v57 = vpop.permute.xlu0 %2152  ;;  %3131 = vmatpush.msrb.mxu3 %v2986_v4 }
 0xb9d   : > { %2159 = vst.msk [vmem:[#allocation10 + $0x48] sm:$0x1] %vm1541_vm3, %v2153_v57  ;;  %3104 = vmatpush.msrb.mxu2 %v2962_v56  ;;  %v2955_v57 = vld [vmem:[#allocation25 + $0x478] sm:$0xff] }
 0xb9e   : > { %2179 = vst.msk [vmem:[#allocation10 + $0x48] sm:$0x1] %vm2178_vm0, %v5699_v41  ;;  %v2960_v41 = vld [vmem:[#allocation25 + $0x4a0] sm:$0xff]  ;;  %3132 = vmatpush.msrb.mxu3 %v2984_v8  ;;  %vm2045_vm0 = vcmask 786048   ;;  %v2950_v8 = vld [vmem:[#allocation25 + $0x450] sm:$0xff] }
 0xb9f   : > { %3105 = vmatpush.msrb.mxu2 %v2960_v41  ;;  %3071 = vmatpush.msrb.mxu1 %v2950_v8  ;;  %v2947_v8 = vld [vmem:[#allocation25 + $0x438] sm:$0xff] }
 0xba1   : > { %3106 = vmatpush.msrb.mxu2 %v2958_v55  ;;  %v2948_v55 = vld [vmem:[#allocation25 + $0x440] sm:$0xff] }
 0xba2   : > { %3072 = vmatpush.msrb.mxu1 %v2948_v55  ;;  %v2827_v55 = vld [vmem:[#allocation25 + $0xc0] sm:$0xff] }
 0xba3   : > { %v5975_v0 = vpop.permute.xlu2 %2261  ;;  %3107 = vmatpush.msrb.mxu2 %v2956_v33 }
 0xba4   : > { %v2037_v10 = vpop.permute.xlu1 %2036  ;;  %v5977_v62 = vpop.permute.xlu0 %2417 }
 0xba5   : > { %2427 = vst.msk [vmem:[#allocation10 + $0x30] sm:$0xff] %vm809_vm11, %v5977_v62  ;;  %vm2590_vm11 = vcmask 654848   ;;  %3108 = vmatpush.msrb.mxu2 %v2954_v36  ;;  %v2944_v36 = vld [vmem:[#allocation25 + $0x420] sm:$0xff] }
 0xba6   : > { %2446 = vst.msk [vmem:[#allocation10 + $0x30] sm:$0xff] %vm6617_vm4, %v5504_v6  ;;  %vm2066_vm4 = vcmask 851712  }
 0xba7   : > { %2480 = vst.msk [vmem:[#allocation10 + $0x30] sm:$0xff] %vm6584_vm8, %v2472_v30  ;;  %v3056_v30 = vrot.slane %v2917_v59, 1  ;;  %vm6632_vm8 = vcmask 589312   ;;  %v3019_v59 = vld [vmem:[#allocation25 + $0x678] sm:$0xff] }
 0xba8   : > { %2499 = vst.msk [vmem:[#allocation10 + $0x30] sm:$0xff] %vm6618_vm14, %v5565_v63  ;;  %v2952_v63 = vld [vmem:[#allocation25 + $0x460] sm:$0xff]  ;;  %vm2647_vm14 = vcmask 851648  }
 0xba9   : > { %2535 = vst.msk [vmem:[#allocation10 + $0x30] sm:$0xff] %vm2534_vm7, %v5965_v17  ;;  %vm6623_vm7 = vcmask 654912   ;;  %3109 = vmatpush.msrb.mxu2 %v2952_v63  ;;  %v2971_v17 = vld [vmem:[#allocation25 + $0x4f8] sm:$0xff] }
 0xbaa   : > { %2555 = vst.msk [vmem:[#allocation10 + $0x30] sm:$0xff] %vm6620_vm10, %v6619_v23  ;;  %vm6625_vm10 = vcmask 130048  }
 0xbab   : > { %v5989_v6 = vpop.permute.xlu2 %2362  ;;  %3186 = vmatpush.msra.mxu2 %v2983_v9  ;;  %v2895_v9 = vld [vmem:[#allocation25 + $0x2e0] sm:$0xff] }
 0xbac   : > { %v2582_v16 = vpop.permute.xlu1 %2581  ;;  %v1981_v12 = vpop.permute.xlu0 %1980 }
 0xbad   : > { %2591 = vst.msk [vmem:[#allocation10 + $0x30] sm:$0xff] %vm2590_vm11, %v2582_v16  ;;  %vm2102_vm11 = vcmask 982848   ;;  %3187 = vmatpush.msra.mxu2 %v2981_v7  ;;  %v2893_v7 = vld [vmem:[#allocation25 + $0x2d0] sm:$0xff] }
 0xbae   : > { %2612 = vst.msk [vmem:[#allocation10 + $0x30] sm:$0xff] %vm2611_vm2, %v6621_v1  ;;  %vm2123_vm2 = vcmask 1048512   ;;  %v2942_v1 = vld [vmem:[#allocation25 + $0x410] sm:$0xff] }
 0xbaf   : > { %1990 = vst.msk [vmem:[#allocation10 + $0x20] sm:$0xff] %vm1989_vm9, %v1981_v12  ;;  %vm6627_vm9 = vcmask 195712   ;;  %3188 = vmatpush.msra.mxu2 %v2979_v15  ;;  %v2897_v12 = vld [vmem:[#allocation25 + $0x2f0] sm:$0xff] }
 0xbb0   : > { %2010 = vst.msk [vmem:[#allocation10 + $0x20] sm:$0xff] %vm6623_vm7, %v6622_v61  ;;  %vm2668_vm7 = vcmask 917312   ;;  %v2940_v61 = vld [vmem:[#allocation25 + $0x400] sm:$0xff]  ;;  %v2938_v15 = vld [vmem:[#allocation25 + $0x3f0] sm:$0xff] }
 0xbb1   : > { %2046 = vst.msk [vmem:[#allocation10 + $0x20] sm:$0xff] %vm2045_vm0, %v2037_v10  ;;  %vm2704_vm0 = vcmask 1048448   ;;  %3189 = vmatpush.msra.mxu2 %v2977_v37  ;;  %v6633_v10 = vld [vmem:[#allocation43_spill] sm:$0xff] }
 0xbb2   : > { %2067 = vst.msk [vmem:[#allocation10 + $0x20] sm:$0xff] %vm2066_vm4, %v6624_v27  ;;  %vm2214_vm4 = vcmask 319680  }
 0xbb3   : > { %v2151_v29 = vpop.permute.xlu2 %2150  ;;  %2648 = vst.msk [vmem:[#allocation10 + $0x30] sm:$0xff] %vm2647_vm14, %v5968_v22  ;;  %3190 = vmatpush.msra.mxu2 %v2975_v21  ;;  %vm2388_vm14 = vcmask 982913   ;;  %v2965_v22 = vld [vmem:[#allocation25 + $0x4c8] sm:$0xff]  ;;  %v2889_v21 = vld [vmem:[#allocation25 + $0x2b0] sm:$0xff] }
 0xbb4   : > { %2158 = vst.msk [vmem:[#allocation10 + $0x28] sm:$0xff] %vm6625_vm10, %v2151_v29  ;;  %v2094_v31 = vpop.permute.xlu0 %2093  ;;  %v2696_v3 = vpop.permute.xlu1 %2695  ;;  %vm2278_vm10 = vcmask 582144   ;;  %v2891_v29 = vld [vmem:[#allocation25 + $0x2c0] sm:$0xff] }
 0xbb5   : > { %2177 = vst.msk [vmem:[#allocation10 + $0x28] sm:$0xff] %vm6627_vm9, %v6626_v14  ;;  %3191 = vmatpush.msra.mxu2 %v2973_v18  ;;  %vm2314_vm9 = vcmask 713280   ;;  %v2936_v14 = vld [vmem:[#allocation25 + $0x3e0] sm:$0xff]  ;;  %v2934_v18 = vld [vmem:[#allocation25 + $0x3d0] sm:$0xff] }
 0xbb6   : > { %2103 = vst.msk [vmem:[#allocation10 + $0x20] sm:$0xff] %vm2102_vm11, %v2094_v31  ;;  %vm2234_vm11 = vcmask 385344   ;;  %v6634_v31 = vlaneseq }
 0xbb7   : > { %2124 = vst.msk [vmem:[#allocation10 + $0x20] sm:$0xff] %vm2123_vm2, %v6628_v28  ;;  %3192 = vmatpush.msra.mxu2 %v2971_v17  ;;  %v2887_v17 = vld [vmem:[#allocation25 + $0x2a0] sm:$0xff] }
 0xbb8   : > { %2669 = vst.msk [vmem:[#allocation10 + $0x30] sm:$0xff] %vm2668_vm7, %v6629_v60  ;;  %vm2335_vm7 = vcmask 778944  }
 0xbb9   : > { %2705 = vst.msk [vmem:[#allocation10 + $0x30] sm:$0xff] %vm2704_vm0, %v2696_v3  ;;  %3193 = vmatpush.msra.mxu2 %v2969_v43  ;;  %vm2371_vm0 = vcmask 910080   ;;  %v2885_v43 = vld [vmem:[#allocation25 + $0x290] sm:$0xff]  ;;  %v2863_v3 = vld [vmem:[#allocation25 + $0x1e0] sm:$0xff] }
 0xbbb   : > { %3194 = vmatpush.msra.mxu2 %v2967_v20  ;;  %v2361_v5 = vpop.permute.xlu2 %2360  ;;  %v3025_v20 = vld [vmem:[#allocation25 + $0x6a8] sm:$0xff] }
 0xbbc   : > { %v2206_v34 = vpop.permute.xlu0 %2205  ;;  %v2380_v38 = vpop.permute.xlu1 %2379 }
 0xbbd   : > { %2215 = vst.msk [vmem:[#allocation10 + $0x48] sm:$0x1] %vm2214_vm4, %v2206_v34  ;;  %3195 = vmatpush.msra.mxu2 %v2965_v22  ;;  %vm2392_vm4 = vcmask 975744   ;;  %v2932_v34 = vld [vmem:[#allocation25 + $0x3c0] sm:$0xff] }
 0xbbe   : > { %2389 = vst.msk [vmem:[#allocation10 + $0x8] sm:$0xfe] %vm2388_vm14, %v2380_v38  ;;  %v2743_v26 = vld [vmem:[#allocation10 + $0x20] sm:$0xff]  ;;  %vm2212_vm14 = vcmask 326848   ;;  %v2928_v22 = vld [vmem:[#allocation25 + $0x3a0] sm:$0xff] }
 0xbbf   : > { %2424 = vst.msk [vmem:[#allocation10 + $0x8] sm:$0xfe] %vm2121_vm1, %v5882_v49  ;;  %2750 = vrot.lane.b32.xlu1 %v2743_v26, %s5139_s20  ;;  %vm2270_vm1 = vcmask 516480   ;;  %3196 = vmatpush.msra.mxu2 %v2963_v40  ;;  %v3027_v38 = vld [vmem:[#allocation25 + $0x6b8] sm:$0xff]  ;;  %v2930_v26 = vld [vmem:[#allocation25 + $0x3b0] sm:$0xff] }
 0xbc0   : > { %v6005_v19 = vld [vmem:[#allocation10 + $0x30] sm:$0xff]  ;;  %3242 = vmatpush.msra.mxu3 %v3027_v38  ;;  %v2926_v40 = vld [vmem:[#allocation25 + $0x390] sm:$0xff] }
 0xbc1   : > { %2771 = vrot.lane.b32.xlu0 %v6005_v19, %s5141_s24  ;;  %v3047_v35 = vrot.slane %v6005_v19, 1  ;;  %3197 = vmatpush.msra.mxu2 %v2961_v45  ;;  %v3024_v45 = vld [vmem:[#allocation25 + $0x6a0] sm:$0xff]  ;;  %v2900_v38 = vld [vmem:[#allocation25 + $0x308] sm:$0xff] }
 0xbc2   : > { %3243 = vmatpush.msra.mxu3 %v3025_v20  ;;  %v2933_v20 = vld [vmem:[#allocation25 + $0x3c8] sm:$0xff] }
 0xbc3   : > { %v6011_v2 = vsel %vm918_vm12, %v3046_v25, %v3047_v35  ;;  %3198 = vmatpush.msra.mxu2 %v2959_v50  ;;  %v6018_v46 = vsel %vm918_vm12, %v3047_v35, %v3056_v30  ;;  %v2384_v42 = vpop.permute.xlu2 %2383  ;;  %v2881_v25 = vld [vmem:[#allocation25 + $0x270] sm:$0xff]  ;;  %v3023_v35 = vld [vmem:[#allocation25 + $0x698] sm:$0xff]  ;;  %v3017_v30 = vld [vmem:[#allocation25 + $0x668] sm:$0xff] }
 0xbc4   : > { %3133 = vmatmul.f32.vlgmr.msrb.gmra.mxu3 %v6011_v2  ;;  %v2306_v49 = vpop.permute.xlu0 %2305  ;;  %v2227_v32 = vpop.permute.xlu1 %2226  ;;  %v2922_v50 = vld [vmem:[#allocation25 + $0x370] sm:$0xff] }
 0xbc5   : > { %2235 = vst.msk [vmem:[#allocation10 + $0x48] sm:$0x1] %vm2234_vm11, %v2227_v32  ;;  %3199 = vmatpush.msra.mxu2 %v2957_v48  ;;  %vm6631_vm11 = vcmask 392512   ;;  %3244 = vmatpush.msra.mxu3 %v3023_v35  ;;  %v3021_v32 = vld [vmem:[#allocation25 + $0x688] sm:$0xff]  ;;  %v2875_v48 = vld [vmem:[#allocation25 + $0x240] sm:$0xff] }
 0xbc6   : > { %2271 = vst.msk [vmem:[#allocation10 + $0x48] sm:$0x1] %vm2270_vm1, %v5975_v0  ;;  %vm2268_vm1 = vcmask 523648   ;;  %v2912_v33 = vld [vmem:[#allocation10 + $0x8] sm:$0xfe] }
 0xbc7   : > { %2752 = vrot.lane.b32.xlu1 %v2744_v53, %s5139_s20  ;;  %2279 = vst.msk [vmem:[#allocation10 + $0x48] sm:$0x1] %vm2278_vm10, %v2274_v44  ;;  %3200 = vmatpush.msra.mxu2 %v2955_v57  ;;  %vm2312_vm10 = vcmask 720448   ;;  %v2924_v44 = vld [vmem:[#allocation25 + $0x380] sm:$0xff]  ;;  %v2877_v53 = vld [vmem:[#allocation25 + $0x250] sm:$0xff] }
 0xbc8   : > { %2315 = vst.msk [vmem:[#allocation10 + $0x48] sm:$0x1] %vm2314_vm9, %v2306_v49  ;;  %vm2333_vm9 = vcmask 786112   ;;  %v2879_v49 = vld [vmem:[#allocation25 + $0x260] sm:$0xff]  ;;  %3245 = vmatpush.msra.mxu3 %v3021_v32  ;;  %v3471_v32 = vld [vmem:[#allocation25 + $0x750] sm:$0xff] }
 0xbc9   : > { %2773 = vrot.lane.b32.xlu0 %v2765_v11, %s5141_s24  ;;  %3201 = vmatpush.msra.mxu2 %v2953_v51  ;;  %v3022_v11 = vld [vmem:[#allocation25 + $0x690] sm:$0xff]  ;;  %v2920_v57 = vld [vmem:[#allocation25 + $0x360] sm:$0xff] }
 0xbca   : > { %3246 = vmatpush.msra.mxu3 %v3019_v59  ;;  %v2833_v51 = vld [vmem:[#allocation25 + $0xf0] sm:$0xff]  ;;  %v2811_v59 = vld [vmem:[#allocation25 + $0x40] sm:$0xff] }
 0xbcc   : > { %3136 = vmatmul.f32.gmra.mxu3 %v6018_v46  ;;  %v2327_v52 = vpop.permute.xlu1 %2326  ;;  %v2204_v39 = vpop.permute.xlu0 %2203 }
 0xbcd   : > { %2336 = vst.msk [vmem:[#allocation10 + $0x48] sm:$0x1] %vm2335_vm7, %v2327_v52  ;;  %vm2369_vm7 = vcmask 917248   ;;  %v3020_v52 = vld [vmem:[#allocation25 + $0x680] sm:$0xff]  ;;  %3247 = vmatpush.msra.mxu3 %v3017_v30  ;;  %v2809_v30 = vld [vmem:[#allocation25 + $0x30] sm:$0xff] }
 0xbce   : > { %2372 = vst.msk [vmem:[#allocation10 + $0x48] sm:$0x1] %vm2371_vm0, %v5989_v6  ;;  %vm2390_vm0 = vcmask 982912  }
 0xbcf   : > { %2393 = vst.msk [vmem:[#allocation10 + $0x48] sm:$0x1] %vm2392_vm4, %v2384_v42  ;;  %vm2778_vm4 = vcmask 392385   ;;  %v2951_v42 = vld [vmem:[#allocation25 + $0x458] sm:$0xff]  ;;  %3260 = vmatpush.msrb.mxu3 %v2833_v51  ;;  %v2807_v51 = vld [vmem:[#allocation25 + $0x20] sm:$0xff] }
 0xbd0   : > { %2428 = vst.msk [vmem:[#allocation10 + $0x48] sm:$0x1] %vm2125_vm6, %v5943_v58  ;;  %vm2736_vm6 = vcmask 195649  }
 0xbd1   : > { %2213 = vst.msk [vmem:[#allocation10 + $0x28] sm:$0xff] %vm2212_vm14, %v2204_v39  ;;  %vm2738_vm14 = vcmask 195648   ;;  %v2873_v39 = vld [vmem:[#allocation25 + $0x230] sm:$0xff] }
 0xbd2   : > { %2233 = vst.msk [vmem:[#allocation10 + $0x28] sm:$0xff] %vm6631_vm11, %v6630_v54  ;;  %vm2740_vm11 = vcmask 188480   ;;  %v3018_v54 = vld [vmem:[#allocation25 + $0x670] sm:$0xff] }
 0xbd4   : > { %v2304_v0 = vpop.permute.xlu0 %2303  ;;  %v2260_v56 = vpop.permute.xlu1 %2259 }
 0xbd5   : > { %2269 = vst.msk [vmem:[#allocation10 + $0x28] sm:$0xff] %vm2268_vm1, %v2260_v56  ;;  %v2871_v56 = vld [vmem:[#allocation25 + $0x220] sm:$0xff]  ;;  %vm3066_vm1 = vcmask 392192  }
 0xbd6   : > { %2277 = vst.msk [vmem:[#allocation10 + $0x28] sm:$0xff] %vm6632_vm8, %v5890_v47  ;;  %vm2757_vm8 = vcmask 195585  }
 0xbd7   : > { %2313 = vst.msk [vmem:[#allocation10 + $0x28] sm:$0xff] %vm2312_vm10, %v2304_v0  ;;  %v2770_v4 = vpop.permute.xlu2 %2769  ;;  %v2916_v27 = vld [vmem:[#allocation10 + $0x48] sm:$0x1]  ;;  %vm2759_vm10 = vcmask 195584  }
 0xbd8   : > { %2334 = vst.msk [vmem:[#allocation10 + $0x28] sm:$0xff] %vm2333_vm9, %v6633_v10  ;;  %v3054_v37 = vrot.slane %v2916_v27, 1  ;;  %v2831_v0 = vld [vmem:[#allocation25 + $0xe0] sm:$0xff]  ;;  %v2906_v27 = vld [vmem:[#allocation25 + $0x338] sm:$0xff]  ;;  %vm2780_vm9 = vcmask 392384  }
 0xbd9   : > { %2370 = vst.msk [vmem:[#allocation10 + $0x28] sm:$0xff] %vm2369_vm7, %v2361_v5  ;;  %v3026_v5 = vld [vmem:[#allocation25 + $0x6b0] sm:$0xff]  ;;  %v3016_v10 = vld [vmem:[#allocation25 + $0x660] sm:$0xff]  ;;  %3261 = vmatpush.msrb.mxu3 %v2831_v0  ;;  %vm2761_vm7 = vcmask 188416  }
 0xbda   : > { %2391 = vst.msk [vmem:[#allocation10 + $0x28] sm:$0xff] %vm2390_vm0, %v5971_v24  ;;  %v2946_v24 = vld [vmem:[#allocation25 + $0x430] sm:$0xff]  ;;  %3150 = vmatpush.msra.mxu0 %v3026_v5  ;;  %v3465_v0 = vld [vmem:[#allocation25 + $0x720] sm:$0xff]  ;;  %vm2782_vm0 = vcmask 385216  }
 0xbdb   : > { %2426 = vst.msk [vmem:[#allocation10 + $0x28] sm:$0xff] %vm2123_vm2, %v5977_v62  ;;  %3073 = vmatpush.msrb.mxu1 %v2946_v24  ;;  %v3043_v62 = vrot.slane %v2912_v33, 1  ;;  %vm6037_vm2 = vcmp.lt.s32.totalorder %v6634_v31, 432  ;;  %v2867_v33 = vld [vmem:[#allocation25 + $0x200] sm:$0xff]  ;;  %v2945_v24 = vld [vmem:[#allocation25 + $0x428] sm:$0xff]  ;;  %v3475_v5 = vld [vmem:[#allocation25 + $0x770] sm:$0xff] }
 0xbdc   : > { %v2728_v58 = vpop.permute.xlu0 %2727  ;;  %v2730_v41 = vpop.permute.xlu1 %2729  ;;  %3151 = vmatpush.msra.mxu0 %v3024_v45  ;;  %v2931_v45 = vld [vmem:[#allocation25 + $0x3b8] sm:$0xff] }
 0xbdd   : > { %2737 = vst.msk [vmem:[#allocation10 + $0x18] sm:$0xfe] %vm2736_vm6, %v2728_v58  ;;  %3074 = vmatpush.msrb.mxu1 %v2944_v36  ;;  %v2829_v58 = vld [vmem:[#allocation25 + $0xd0] sm:$0xff]  ;;  %vm3838_vm6 = vcmask 1047680  }
 0xbde   : > { %2779 = vst.msk [vmem:[#allocation10 + $0x18] sm:$0xfe] %vm2778_vm4, %v2770_v4  ;;  %3152 = vmatpush.msra.mxu0 %v3022_v11  ;;  %v2949_v4 = vld [vmem:[#allocation25 + $0x448] sm:$0xff]  ;;  %3262 = vmatpush.msrb.mxu3 %v2829_v58  ;;  %v2825_v36 = vld [vmem:[#allocation25 + $0xb0] sm:$0xff]  ;;  %vm6638_vm4 = vcmask 1040512  }
 0xbdf   : > { %2739 = vst.msk [vmem:[#allocation10 + $0x38] sm:$0xff] %vm2738_vm14, %v2730_v41  ;;  %v2732_v47 = vpop.permute.xlu2 %2731  ;;  %3075 = vmatpush.msrb.mxu1 %v2942_v1  ;;  %v2869_v41 = vld [vmem:[#allocation25 + $0x210] sm:$0xff]  ;;  %v2908_v1 = vld [vmem:[#allocation25 + $0x348] sm:$0xff]  ;;  %vm6639_vm14 = vcmask 130048  }
 0xbe0   : > { %2741 = vst.msk [vmem:[#allocation10 + $0x58] sm:$0x1] %vm2740_vm11, %v2732_v47  ;;  %3153 = vmatpush.msra.mxu0 %v3020_v52  ;;  %v3015_v47 = vld [vmem:[#allocation25 + $0x658] sm:$0xff]  ;;  %3263 = vmatpush.msrb.mxu3 %v2827_v55  ;;  %v2929_v11 = vld [vmem:[#allocation25 + $0x3a8] sm:$0xff]  ;;  %v3463_v58 = vld [vmem:[#allocation25 + $0x710] sm:$0xff] }
 0xbe1   : > { %3076 = vmatpush.msrb.mxu1 %v2940_v61  ;;  %v2941_v61 = vld [vmem:[#allocation25 + $0x408] sm:$0xff]  ;;  %v2995_v52 = vld [vmem:[#allocation25 + $0x5b8] sm:$0xff]  ;;  %v3461_v55 = vld [vmem:[#allocation25 + $0x700] sm:$0xff] }
 0xbe2   : > { %v6032_v23 = vld [vmem:[#allocation10 + $0x28] sm:$0xff]  ;;  %3154 = vmatpush.msra.mxu0 %v3018_v54  ;;  %3264 = vmatpush.msrb.mxu3 %v2825_v36  ;;  %v2993_v54 = vld [vmem:[#allocation25 + $0x5a8] sm:$0xff]  ;;  %v3455_v36 = vld [vmem:[#allocation25 + $0x6d0] sm:$0xff] }
 0xbe3   : > { %v3044_v6 = vrot.slane %v6032_v23, 1  ;;  %3077 = vmatpush.msrb.mxu1 %v2938_v15  ;;  %v2821_v15 = vld [vmem:[#allocation25 + $0x90] sm:$0xff]  ;;  %vm6640_vm11 = vmmov %vm6639_vm14 }
 0xbe4   : > { %v2749_v16 = vpop.permute.xlu0 %2748  ;;  %3155 = vmatpush.msra.mxu0 %v3016_v10  ;;  %v2991_v10 = vld [vmem:[#allocation25 + $0x598] sm:$0xff] }
 0xbe5   : > { %2758 = vst.msk [vmem:[#allocation10] sm:$0xfe] %vm2757_vm8, %v2749_v16  ;;  %v3045_v63 = vsel %vm918_vm12, %v3043_v62, %v3044_v6  ;;  %3078 = vmatpush.msrb.mxu1 %v2936_v14  ;;  %v3055_v60 = vsel %vm918_vm12, %v3044_v6, %v3054_v37  ;;  %v3013_v62 = vld [vmem:[#allocation25 + $0x648] sm:$0xff]  ;;  %v2910_v6 = vld [vmem:[#allocation25 + $0x358] sm:$0xff]  ;;  %vm6641_vm8 = vmmov %vm6640_vm11 }
 0xbe6   : > { %3110 = vmatmul.f32.vlgmr.msrb.gmra.mxu2 %v3045_v63  ;;  %3209 = vmatpush.msrb.mxu0 %v3015_v47  ;;  %v3007_v37 = vld [vmem:[#allocation25 + $0x618] sm:$0xff]  ;;  %v2904_v14 = vld [vmem:[#allocation25 + $0x328] sm:$0xff] }
 0xbe7   : > { %3306 = vmatpush.msrb.mxu2 %v2897_v12  ;;  %3079 = vmatpush.msrb.mxu1 %v2934_v18  ;;  %v2943_v12 = vld [vmem:[#allocation25 + $0x418] sm:$0xff]  ;;  %v3005_v18 = vld [vmem:[#allocation25 + $0x608] sm:$0xff] }
 0xbe8   : > { %3210 = vmatpush.msrb.mxu0 %v3013_v62  ;;  %v2989_v47 = vld [vmem:[#allocation25 + $0x588] sm:$0xff] }
 0xbe9   : > { %3307 = vmatpush.msrb.mxu2 %v2895_v9  ;;  %3080 = vmatpush.msrb.mxu1 %v2932_v34  ;;  %v2823_v9 = vld [vmem:[#allocation25 + $0xa0] sm:$0xff]  ;;  %v2935_v34 = vld [vmem:[#allocation25 + $0x3d8] sm:$0xff]  ;;  %v2985_v62 = vld [vmem:[#allocation25 + $0x568] sm:$0xff] }
 0xbea   : > { %3265 = vmatpush.msrb.mxu3 %v2823_v9  ;;  %v3514_v9 = vld [vmem:[#allocation25 + $0x8a8] sm:$0xff] }
 0xbeb   : > { %3308 = vmatpush.msrb.mxu2 %v2893_v7  ;;  %3081 = vmatpush.msrb.mxu1 %v2930_v26  ;;  %v3009_v7 = vld [vmem:[#allocation25 + $0x628] sm:$0xff]  ;;  %v3483_v26 = vld [vmem:[#allocation25 + $0x7b0] sm:$0xff] }
 0xbec   : > { %v2785_v28 = vld [vmem:[#allocation10 + $0x2] ss:$8 sm:$0xf]  ;;  %3266 = vmatpush.msrb.mxu3 %v2821_v15 }
 0xbed   : > { %3309 = vmatpush.msrb.mxu2 %v2891_v29  ;;  %2788 = vst.msk [vmem:[#allocation10] ss:$8 sm:$0xf] %vm6037_vm2, %v2785_v28  ;;  %3082 = vmatpush.msrb.mxu1 %v2928_v22  ;;  %v2939_v29 = vld [vmem:[#allocation25 + $0x3f8] sm:$0xff]  ;;  %v2937_v28 = vld [vmem:[#allocation25 + $0x3e8] sm:$0xff] }
 0xbee   : > { %3113 = vmatmul.f32.gmra.mxu2 %v3055_v60  ;;  %v3001_v22 = vld [vmem:[#allocation25 + $0x5e8] sm:$0xff]  ;;  %v3508_v15 = vld [vmem:[#allocation25 + $0x878] sm:$0xff] }
 0xbef   : > { %3310 = vmatpush.msrb.mxu2 %v2889_v21  ;;  %3083 = vmatpush.msrb.mxu1 %v2926_v40  ;;  %v2819_v21 = vld [vmem:[#allocation25 + $0x80] sm:$0xff] }
 0xbf0   : > { %3267 = vmatpush.msrb.mxu3 %v2819_v21  ;;  %v3477_v40 = vld [vmem:[#allocation25 + $0x780] sm:$0xff] }
 0xbf1   : > { %3311 = vmatpush.msrb.mxu2 %v2887_v17  ;;  %3084 = vmatpush.msrb.mxu1 %v2924_v44  ;;  %v2817_v17 = vld [vmem:[#allocation25 + $0x70] sm:$0xff] }
 0xbf2   : > { %3268 = vmatpush.msrb.mxu3 %v2817_v17  ;;  %v2813_v44 = vld [vmem:[#allocation25 + $0x50] sm:$0xff] }
 0xbf3   : > { %3312 = vmatpush.msrb.mxu2 %v2885_v43  ;;  %3085 = vmatpush.msrb.mxu1 %v2922_v50  ;;  %v3003_v43 = vld [vmem:[#allocation25 + $0x5f8] sm:$0xff]  ;;  %v3469_v50 = vld [vmem:[#allocation25 + $0x740] sm:$0xff] }
 0xbf4   : > { %v6044_v16 = vld [vmem:[#allocation10 + $0x10] sm:$0xff]  ;;  %v6048_v35 = vld [vmem:[#allocation10 + $0x18] sm:$0xff] }
 0xbf5   : > { %3313 = vmatpush.msrb.mxu2 %v2883_v13  ;;  %3086 = vmatpush.msrb.mxu1 %v2920_v57  ;;  %v2815_v13 = vld [vmem:[#allocation25 + $0x60] sm:$0xff]  ;;  %v2927_v57 = vld [vmem:[#allocation25 + $0x398] sm:$0xff] }
 0xbf6   : > { %3202 = vmatmul.f32.vlgmr.msra.gmra.mxu2 %v3045_v63  ;;  %v3011_v63 = vld [vmem:[#allocation25 + $0x638] sm:$0xff]  ;;  %3269 = vmatpush.msrb.mxu3 %v2815_v13 }
 0xbf7   : > { %3314 = vmatpush.msrb.mxu2 %v2881_v25  ;;  %3163 = vmatpush.msra.mxu1 %v2951_v42  ;;  %v3481_v25 = vld [vmem:[#allocation25 + $0x7a0] sm:$0xff]  ;;  %v2925_v42 = vld [vmem:[#allocation25 + $0x388] sm:$0xff] }
 0xbf8   : > { %3211 = vmatpush.msrb.mxu0 %v3011_v63  ;;  %3270 = vmatpush.msrb.mxu3 %v2813_v44  ;;  %v3516_v63 = vld [vmem:[#allocation25 + $0x8b8] sm:$0xff] }
 0xbf9   : > { %3315 = vmatpush.msrb.mxu2 %v2879_v49  ;;  %3164 = vmatpush.msra.mxu1 %v2949_v4  ;;  %v3473_v49 = vld [vmem:[#allocation25 + $0x760] sm:$0xff]  ;;  %v2923_v4 = vld [vmem:[#allocation25 + $0x378] sm:$0xff] }
 0xbfa   : > { %3212 = vmatpush.msrb.mxu0 %v3009_v7  ;;  %3271 = vmatpush.msrb.mxu3 %v2811_v59  ;;  %v3512_v7 = vld [vmem:[#allocation25 + $0x898] sm:$0xff] }
 0xbfb   : > { %3316 = vmatpush.msrb.mxu2 %v2877_v53  ;;  %3165 = vmatpush.msra.mxu1 %v2947_v8  ;;  %v2999_v53 = vld [vmem:[#allocation25 + $0x5d8] sm:$0xff]  ;;  %v2921_v8 = vld [vmem:[#allocation25 + $0x368] sm:$0xff] }
 0xbfc   : > { %3213 = vmatpush.msrb.mxu0 %v3007_v37  ;;  %3272 = vmatpush.msrb.mxu3 %v2809_v30  ;;  %v2862_v59 = vld [vmem:[#allocation25 + $0x1d8] sm:$0xff]  ;;  %v2859_v30 = vld [vmem:[#allocation25 + $0x1c0] sm:$0xff] }
 0xbfd   : > { %3317 = vmatpush.msrb.mxu2 %v2875_v48  ;;  %3166 = vmatpush.msra.mxu1 %v2945_v24  ;;  %v2997_v48 = vld [vmem:[#allocation25 + $0x5c8] sm:$0xff]  ;;  %v3459_v24 = vld [vmem:[#allocation25 + $0x6f0] sm:$0xff] }
 0xbfe   : > { %3205 = vmatmul.f32.gmra.mxu2 %v3055_v60  ;;  %v2902_v60 = vld [vmem:[#allocation25 + $0x318] sm:$0xff]  ;;  %3214 = vmatpush.msrb.mxu0 %v3005_v18 }
 0xbff   : > { %3318 = vmatpush.msrb.mxu2 %v2873_v39  ;;  %3167 = vmatpush.msra.mxu1 %v2943_v12  ;;  %v3467_v39 = vld [vmem:[#allocation25 + $0x730] sm:$0xff]  ;;  %v3453_v12 = vld [vmem:[#allocation25 + $0x6c0] sm:$0xff] }
 0xc00   : > { %3215 = vmatpush.msrb.mxu0 %v3003_v43  ;;  %3273 = vmatpush.msrb.mxu3 %v2807_v51  ;;  %v2865_v43 = vld [vmem:[#allocation25 + $0x1f0] sm:$0xff] }
 0xc01   : > { %3319 = vmatpush.msrb.mxu2 %v2871_v56  ;;  %3168 = vmatpush.msra.mxu1 %v2941_v61  ;;  %v2805_v56 = vld [vmem:[#allocation25 + $0x10] sm:$0xff] }
 0xc02   : > { %3216 = vmatpush.msrb.mxu0 %v3001_v22  ;;  %3274 = vmatpush.msrb.mxu3 %v2805_v56  ;;  %v2866_v22 = vld [vmem:[#allocation25 + $0x1f8] sm:$0xff] }
 0xc03   : > { %3320 = vmatpush.msrb.mxu2 %v2869_v41  ;;  %3169 = vmatpush.msra.mxu1 %v2939_v29  ;;  %v2803_v41 = vld [vmem:[#allocation25] sm:$0xff]  ;;  %v2911_v29 = vld [vmem:[#allocation10] sm:$0xfe] }
 0xc04   : > { %3217 = vmatpush.msrb.mxu0 %v2999_v53  ;;  %3275 = vmatpush.msrb.mxu3 %v2803_v41  ;;  %v2907_v53 = vld [vmem:[#allocation25 + $0x340] sm:$0xff] }
 0xc05   : > { %3321 = vmatpush.msrb.mxu2 %v2867_v33  ;;  %3170 = vmatpush.msra.mxu1 %v2937_v28  ;;  %v2987_v33 = vld [vmem:[#allocation25 + $0x578] sm:$0xff]  ;;  %v3506_v28 = vld [vmem:[#allocation25 + $0x868] sm:$0xff] }
 0xc06   : > { %3322 = vmatmul.f32.vlgmr.msrb.gmra.mxu2 %v6044_v16  ;;  %3218 = vmatpush.msrb.mxu0 %v2997_v48  ;;  %v3500_v48 = vld [vmem:[#allocation25 + $0x838] sm:$0xff] }
 0xc07   : > { %3431 = vmatpush.msra.mxu2 %v2910_v6  ;;  %3171 = vmatpush.msra.mxu1 %v2935_v34  ;;  %v3457_v6 = vld [vmem:[#allocation25 + $0x6e0] sm:$0xff] }
 0xc08   : > { %3219 = vmatpush.msrb.mxu0 %v2995_v52 }
 0xc09   : > { %3432 = vmatpush.msra.mxu2 %v2908_v1  ;;  %3172 = vmatpush.msra.mxu1 %v2933_v20 }
 0xc0a   : > { %3220 = vmatpush.msrb.mxu0 %v2993_v54 }
 0xc0b   : > { %3433 = vmatpush.msra.mxu2 %v2906_v27  ;;  %3173 = vmatpush.msra.mxu1 %v2931_v45  ;;  %v3510_v27 = vld [vmem:[#allocation25 + $0x888] sm:$0xff]  ;;  %v2861_v45 = vld [vmem:[#allocation25 + $0x1d0] sm:$0xff] }
 0xc0c   : > { %3221 = vmatpush.msrb.mxu0 %v2991_v10  ;;  %v2905_v10 = vld [vmem:[#allocation25 + $0x330] sm:$0xff] }
 0xc0d   : > { %3434 = vmatpush.msra.mxu2 %v2904_v14  ;;  %3174 = vmatpush.msra.mxu1 %v2929_v11  ;;  %v2914_v14 = vld [vmem:[#allocation10 + $0x18] sm:$0xfe] }
 0xc0e   : > { %3325 = vmatmul.f32.gmra.mxu2 %v6005_v19  ;;  %v3479_v19 = vld [vmem:[#allocation25 + $0x790] sm:$0xff]  ;;  %3222 = vmatpush.msrb.mxu0 %v2989_v47  ;;  %v3049_v13 = vrot.slane %v2914_v14, 1  ;;  %v2855_v47 = vld [vmem:[#allocation25 + $0x1a0] sm:$0xff]  ;;  %v2848_v14 = vld [vmem:[#allocation25 + $0x168] sm:$0xff] }
 0xc0f   : > { %3435 = vmatpush.msra.mxu2 %v2902_v60  ;;  %3175 = vmatpush.msra.mxu1 %v2927_v57  ;;  %v3040_v60 = vrot.slane %v2911_v29, 1  ;;  %v2834_v29 = vld [vmem:[#allocation25 + $0xf8] sm:$0xff] }
 0xc10   : > { %3223 = vmatpush.msrb.mxu0 %v2987_v33  ;;  %v2903_v33 = vld [vmem:[#allocation25 + $0x320] sm:$0xff] }
 0xc11   : > { %3436 = vmatpush.msra.mxu2 %v2900_v38  ;;  %3176 = vmatpush.msra.mxu1 %v2925_v42  ;;  %v3498_v42 = vld [vmem:[#allocation25 + $0x828] sm:$0xff] }
 0xc12   : > { %3224 = vmatpush.msrb.mxu0 %v2985_v62  ;;  %v2853_v62 = vld [vmem:[#allocation25 + $0x190] sm:$0xff] }
 0xc13   : > { %3599 = vmatpush.msrb.mxu2 %v3483_v26  ;;  %3177 = vmatpush.msra.mxu1 %v2923_v4  ;;  %v2858_v4 = vld [vmem:[#allocation25 + $0x1b8] sm:$0xff] }
 0xc15   : > { %3600 = vmatpush.msrb.mxu2 %v3481_v25  ;;  %3178 = vmatpush.msra.mxu1 %v2921_v8  ;;  %v3504_v25 = vld [vmem:[#allocation25 + $0x858] sm:$0xff] }
 0xc16   : > { %4522 = vmatmul.msk.f32.vlgmr.msra.gmra.mxu2 %vm3066_vm1, %v6048_v35  ;;  %v3496_v8 = vld [vmem:[#allocation25 + $0x818] sm:$0xff] }
 0xc17   : > { %3601 = vmatpush.msrb.mxu2 %v3479_v19 }
 0xc19   : > { %3602 = vmatpush.msrb.mxu2 %v3477_v40  ;;  %v2909_v40 = vld [vmem:[#allocation25 + $0x350] sm:$0xff] }
 0xc1b   : > { %3603 = vmatpush.msrb.mxu2 %v3475_v5  ;;  %v3444_v5 = vld [vmem:[#allocation10] sm:$0xfc] }
 0xc1d   : > { %3604 = vmatpush.msrb.mxu2 %v3473_v49  ;;  %v2864_v49 = vld [vmem:[#allocation25 + $0x1e8] sm:$0xff] }
 0xc1f   : > { %3605 = vmatpush.msrb.mxu2 %v3471_v32  ;;  %v3502_v32 = vld [vmem:[#allocation25 + $0x848] sm:$0xff] }
 0xc21   : > { %3606 = vmatpush.msrb.mxu2 %v3469_v50  ;;  %v3569_v50 = vrot.slane %v3444_v5, 2  ;;  %v2826_v5 = vld [vmem:[#allocation25 + $0xb8] sm:$0xff] }
 0xc23   : > { %3607 = vmatpush.msrb.mxu2 %v3467_v39  ;;  %v2860_v39 = vld [vmem:[#allocation25 + $0x1c8] sm:$0xff] }
 0xc25   : > { %3608 = vmatpush.msrb.mxu2 %v3465_v0  ;;  %v2857_v0 = vld [vmem:[#allocation25 + $0x1b0] sm:$0xff] }
 0xc27   : > { %3609 = vmatpush.msrb.mxu2 %v3463_v58 }
 0xc29   : > { %3610 = vmatpush.msrb.mxu2 %v3461_v55  ;;  %v2856_v55 = vld [vmem:[#allocation25 + $0x1a8] sm:$0xff] }
 0xc2b   : > { %3611 = vmatpush.msrb.mxu2 %v3459_v24  ;;  %v3494_v24 = vld [vmem:[#allocation25 + $0x808] sm:$0xff] }
 0xc2d   : > { %3612 = vmatpush.msrb.mxu2 %v3457_v6 }
 0xc2f   : > { %3613 = vmatpush.msrb.mxu2 %v3455_v36  ;;  %v2854_v36 = vld [vmem:[#allocation25 + $0x198] sm:$0xff] }
 0xc31   : > { %v2751_v1 = vpop.permute.xlu1 %2750  ;;  %3614 = vmatpush.msrb.mxu2 %v3453_v12  ;;  %v2901_v12 = vld [vmem:[#allocation25 + $0x310] sm:$0xff] }
 0xc32   : > { %2760 = vst.msk [vmem:[#allocation10 + $0x20] sm:$0xff] %vm2759_vm10, %v2751_v1  ;;  %v2852_v1 = vld [vmem:[#allocation25 + $0x188] sm:$0xff]  ;;  %vm6644_vm10 = vcmask 261248  }
 0xc33   : > { %3714 = vmatpush.msra.mxu2 %v3516_v63  ;;  %v2772_v61 = vpop.permute.xlu0 %2771  ;;  %v2851_v63 = vld [vmem:[#allocation25 + $0x180] sm:$0xff] }
 0xc34   : > { %2781 = vst.msk [vmem:[#allocation10 + $0x38] sm:$0xff] %vm2780_vm9, %v2772_v61  ;;  %vm6359_vm9 = vcmp.lt.s32.totalorder %v6634_v31, 288  ;;  %v3900_v31 = vld [vmem:[%s6553_s11 + $0x10] sm:$0xff] }
 0xc35   : > { %3715 = vmatpush.msra.mxu2 %v3514_v9  ;;  %v3492_v9 = vld [vmem:[#allocation25 + $0x7f8] sm:$0xff] }
 0xc37   : > { %3716 = vmatpush.msra.mxu2 %v3512_v7  ;;  %v2899_v7 = vld [vmem:[#allocation25 + $0x300] sm:$0xff] }
 0xc39   : > { %3717 = vmatpush.msra.mxu2 %v3510_v27  ;;  %v2753_v37 = vpop.permute.xlu1 %2752  ;;  %v6052_v21 = vld [vmem:[#allocation10 + $0x20] sm:$0xff] }
 0xc3a   : > { %2762 = vst.msk [vmem:[#allocation10 + $0x40] sm:$0x1] %vm2761_vm7, %v2753_v37  ;;  %v3041_v18 = vrot.slane %v6052_v21, 1  ;;  %v3570_v44 = vrot.slane %v6052_v21, 2  ;;  %v2850_v27 = vld [vmem:[#allocation25 + $0x178] sm:$0xff]  ;;  %v3490_v37 = vld [vmem:[#allocation25 + $0x7e8] sm:$0xff] }
 0xc3b   : > { %3718 = vmatpush.msra.mxu2 %v3508_v15  ;;  %v2791_v17 = vld [vmem:[#allocation10 + $0x27] ss:$8 sm:$0xf]  ;;  %v2774_v34 = vpop.permute.xlu0 %2773  ;;  %vm6649_vm7 = vcmask 261120  }
 0xc3c   : > { %v6055_v38 = vld [vmem:[#allocation10 + $0x38] sm:$0xff]  ;;  %2793 = vst.msk [vmem:[#allocation10 + $0x41] ss:$8 sm:$0xf] %vm6037_vm2, %v2791_v17  ;;  %v6063_v20 = vsel %vm918_vm12, %v3040_v60, %v3041_v18  ;;  %v6071_v52 = vsel %vm1060_vm13, %v3569_v50, %v3570_v44  ;;  %v6085_v15 = vld [vmem:[#allocation10] sm:$0xff]  ;;  %v2832_v60 = vld [vmem:[#allocation25 + $0xe8] sm:$0xff] }
 0xc3d   : > { %v3050_v26 = vrot.slane %v6055_v38, 1  ;;  %4523 = vmatmul.msk.f32.gmra.mxu2 %vm3066_vm1, %v6055_v38  ;;  %2783 = vst.msk [vmem:[#allocation10 + $0x58] sm:$0x1] %vm2782_vm0, %v2774_v34  ;;  %3087 = vmatmul.f32.vlgmr.msrb.gmra.mxu1 %v6063_v20  ;;  %v2846_v17 = vld [vmem:[#allocation25 + $0x158] sm:$0xff]  ;;  %v3445_v34 = vld [vmem:[#allocation10 + $0x8] sm:$0xfc]  ;;  %vm6642_vm2 = vmmov %vm6641_vm8 }
 0xc3e   : > { %3719 = vmatpush.msra.mxu2 %v3506_v28  ;;  %3283 = vmatpush.msrb.mxu1 %v2865_v43  ;;  %v2849_v28 = vld [vmem:[#allocation25 + $0x170] sm:$0xff]  ;;  %v2847_v43 = vld [vmem:[#allocation25 + $0x160] sm:$0xff]  ;;  %vm6650_vm0 = vmmov %vm6649_vm7 }
 0xc3f   : > { %v3051_v19 = vsel %vm918_vm12, %v3049_v13, %v3050_v26  ;;  %v3573_v13 = vrot.slane %v6032_v23, 2  ;;  %v2839_v50 = vld [vmem:[#allocation25 + $0x120] sm:$0xff] }
 0xc40   : > { %4516 = vmatmul.msk.f32.vlgmr.msra.gmra.mxu0 %vm3066_vm1, %v3051_v19  ;;  %4518 = vmatmul.msk.f32.vlgmr.msra.gmra.mxu3 %vm3066_vm1, %v3051_v19  ;;  %v3572_v19 = vrot.slane %v3445_v34, 2  ;;  %v3511_v34 = vld [vmem:[#allocation25 + $0x890] sm:$0xff] }
 0xc41   : > { %3375 = vmatpush.msra.mxu3 %v2866_v22  ;;  %3720 = vmatpush.msra.mxu2 %v3504_v25  ;;  %v2915_v11 = vld [vmem:[#allocation10 + $0x40] sm:$0x1]  ;;  %v3486_v22 = vld [vmem:[#allocation25 + $0x7c8] sm:$0xff] }
 0xc42   : > { %3284 = vmatpush.msrb.mxu1 %v2863_v3  ;;  %3339 = vmatpush.msra.mxu0 %v2909_v40  ;;  %v3052_v57 = vrot.slane %v2915_v11, 1  ;;  %v2844_v25 = vld [vmem:[#allocation25 + $0x148] sm:$0xff]  ;;  %v6092_v40 = vsel %vm1060_vm13, %v3572_v19, %v3573_v13  ;;  %v2822_v11 = vld [vmem:[#allocation25 + $0x98] sm:$0xff]  ;;  %v3523_v19 = vld [vmem:[#allocation25 + $0x8f0] sm:$0xff] }
 0xc43   : > { %3376 = vmatpush.msra.mxu3 %v2864_v49  ;;  %3721 = vmatpush.msra.mxu2 %v3502_v32  ;;  %v3448_v58 = vld [vmem:[#allocation10 + $0x40] sm:$0x3]  ;;  %v2828_v3 = vld [vmem:[#allocation25 + $0xc8] sm:$0xff]  ;;  %v3449_v32 = vld [vmem:[#allocation10 + $0x48] sm:$0x3] }
 0xc44   : > { %3285 = vmatpush.msrb.mxu1 %v2861_v45  ;;  %3340 = vmatpush.msra.mxu0 %v2907_v53  ;;  %v2918_v51 = vld [vmem:[#allocation10 + $0x58] sm:$0x1]  ;;  %v6075_v54 = vsel %vm918_vm12, %v3041_v18, %v3052_v57  ;;  %v3581_v6 = vrot.slane %v3448_v58, 2  ;;  %v3488_v18 = vld [vmem:[#allocation25 + $0x7d8] sm:$0xff]  ;;  %v2824_v45 = vld [vmem:[#allocation25 + $0xa8] sm:$0xff] }
 0xc45   : > { %3377 = vmatpush.msra.mxu3 %v2862_v59  ;;  %3615 = vmatmul.f32.vlgmr.msrb.gmra.mxu2 %v6071_v52  ;;  %v3058_v56 = vrot.slane %v2918_v51, 1  ;;  %v2842_v49 = vld [vmem:[#allocation25 + $0x138] sm:$0xff]  ;;  %v2840_v53 = vld [vmem:[#allocation25 + $0x128] sm:$0xff]  ;;  %v3583_v59 = vrot.slane %v3449_v32, 2  ;;  %v2835_v51 = vld [vmem:[#allocation25 + $0x100] sm:$0xff] }
 0xc46   : > { %3722 = vmatpush.msra.mxu2 %v3500_v48  ;;  %3286 = vmatpush.msrb.mxu1 %v2859_v30  ;;  %v6082_v61 = vsel %vm1060_vm13, %v3570_v44, %v3581_v6  ;;  %v2841_v44 = vld [vmem:[#allocation25 + $0x130] sm:$0xff]  ;;  %v2838_v48 = vld [vmem:[#allocation25 + $0x118] sm:$0xff]  ;;  %v2820_v57 = vld [vmem:[#allocation25 + $0x88] sm:$0xff] }
 0xc47   : > { %3378 = vmatpush.msra.mxu3 %v2860_v39  ;;  %3090 = vmatmul.f32.gmra.mxu1 %v6075_v54  ;;  %v3059_v41 = vsel %vm918_vm12, %v3050_v26, %v3058_v56  ;;  %v2830_v26 = vld [vmem:[#allocation25 + $0xd8] sm:$0xff]  ;;  %v2837_v30 = vld [vmem:[#allocation25 + $0x110] sm:$0xff]  ;;  %v2836_v39 = vld [vmem:[#allocation25 + $0x108] sm:$0xff] }
 0xc48   : > { %3723 = vmatpush.msra.mxu2 %v3498_v42  ;;  %3287 = vmatpush.msrb.mxu1 %v2857_v0  ;;  %v3547_v42 = vld [vmem:[#allocation25 + $0x9b0] sm:$0xff]  ;;  %v2898_v0 = vld [vmem:[#allocation25 + $0x2f8] sm:$0xff]  ;;  %v3545_v56 = vld [vmem:[#allocation25 + $0x9a0] sm:$0xff] }
 0xc49   : > { %4517 = vmatmul.msk.f32.gmra.mxu0 %vm3066_vm1, %v3059_v41  ;;  %4519 = vmatmul.msk.f32.gmra.mxu3 %vm3066_vm1, %v3059_v41  ;;  %v2896_v58 = vld [vmem:[#allocation25 + $0x2e8] sm:$0xff]  ;;  %v3543_v41 = vld [vmem:[#allocation25 + $0x990] sm:$0xff]  ;;  %v2890_v6 = vld [vmem:[#allocation25 + $0x2b8] sm:$0xff] }
 0xc4a   : > { %3379 = vmatpush.msra.mxu3 %v2858_v4  ;;  %3341 = vmatpush.msra.mxu0 %v2905_v10  ;;  %v2796_v4 = vld [vmem:[#allocation10 + $0x8] sm:$0xff]  ;;  %v2816_v10 = vld [vmem:[#allocation25 + $0x68] sm:$0xff]  ;;  %v3519_v32 = vld [vmem:[#allocation25 + $0x8d0] sm:$0xff] }
 0xc4b   : > { %3724 = vmatpush.msra.mxu2 %v3496_v8  ;;  %3288 = vmatpush.msrb.mxu1 %v2855_v47  ;;  %v2814_v8 = vld [vmem:[#allocation25 + $0x58] sm:$0xff] }
 0xc4c   : > { %3380 = vmatpush.msra.mxu3 %v2856_v55  ;;  %3342 = vmatpush.msra.mxu0 %v2903_v33  ;;  %v2894_v47 = vld [vmem:[#allocation25 + $0x2d8] sm:$0xff]  ;;  %v3541_v55 = vld [vmem:[#allocation25 + $0x980] sm:$0xff]  ;;  %v2892_v33 = vld [vmem:[#allocation25 + $0x2c8] sm:$0xff] }
 0xc4d   : > { %3725 = vmatpush.msra.mxu2 %v3494_v24  ;;  %3289 = vmatpush.msrb.mxu1 %v2853_v62  ;;  %v3539_v24 = vld [vmem:[#allocation25 + $0x970] sm:$0xff]  ;;  %v2810_v62 = vld [vmem:[#allocation25 + $0x38] sm:$0xff] }
 0xc4e   : > { %3381 = vmatpush.msra.mxu3 %v2854_v36  ;;  %3343 = vmatpush.msra.mxu0 %v2901_v12  ;;  %v3537_v36 = vld [vmem:[#allocation25 + $0x960] sm:$0xff]  ;;  %v2808_v12 = vld [vmem:[#allocation25 + $0x28] sm:$0xff] }
 0xc4f   : > { %3618 = vmatmul.f32.gmra.mxu2 %v6082_v61  ;;  %3290 = vmatpush.msrb.mxu1 %v2851_v63  ;;  %v2888_v63 = vld [vmem:[#allocation25 + $0x2a8] sm:$0xff] }
 0xc50   : > { %3382 = vmatpush.msra.mxu3 %v2852_v1  ;;  %3726 = vmatpush.msra.mxu2 %v3492_v9  ;;  %v3535_v1 = vld [vmem:[#allocation25 + $0x950] sm:$0xff]  ;;  %v2806_v9 = vld [vmem:[#allocation25 + $0x18] sm:$0xff] }
 0xc51   : > { %3344 = vmatpush.msra.mxu0 %v2899_v7  ;;  %3276 = vmatmul.f32.vlgmr.msrb.gmra.mxu3 %v6085_v15  ;;  %v2886_v7 = vld [vmem:[#allocation25 + $0x298] sm:$0xff] }
 0xc52   : > { %3225 = vmatmul.f32.vlgmr.msrb.gmra.mxu0 %v6011_v2  ;;  %3383 = vmatpush.msra.mxu3 %v2850_v27  ;;  %v2845_v2 = vld [vmem:[#allocation25 + $0x150] sm:$0xff]  ;;  %v3533_v27 = vld [vmem:[#allocation25 + $0x940] sm:$0xff] }
 0xc53   : > { %3352 = vmatpush.msrb.mxu0 %v2834_v29  ;;  %3727 = vmatpush.msra.mxu2 %v3490_v37  ;;  %v2804_v29 = vld [vmem:[#allocation25 + $0x8] sm:$0xff] }
 0xc54   : > { %3179 = vmatmul.f32.vlgmr.msra.gmra.mxu1 %v6063_v20  ;;  %3384 = vmatpush.msra.mxu3 %v2848_v14  ;;  %v2843_v20 = vld [vmem:[#allocation25 + $0x140] sm:$0xff]  ;;  %v2884_v37 = vld [vmem:[#allocation25 + $0x288] sm:$0xff]  ;;  %v3515_v14 = vld [vmem:[#allocation25 + $0x8b0] sm:$0xff] }
 0xc55   : > { %3291 = vmatpush.msrb.mxu1 %v2849_v28  ;;  %3353 = vmatpush.msrb.mxu0 %v2832_v60  ;;  %v3531_v28 = vld [vmem:[#allocation25 + $0x930] sm:$0xff]  ;;  %v2882_v60 = vld [vmem:[#allocation25 + $0x278] sm:$0xff] }
 0xc56   : > { %3728 = vmatpush.msra.mxu2 %v3488_v18  ;;  %3385 = vmatpush.msra.mxu3 %v2846_v17  ;;  %v3513_v18 = vld [vmem:[#allocation25 + $0x8a0] sm:$0xff] }
 0xc57   : > { %3292 = vmatpush.msrb.mxu1 %v2847_v43  ;;  %3354 = vmatpush.msrb.mxu0 %v2830_v26  ;;  %v3529_v17 = vld [vmem:[#allocation25 + $0x920] sm:$0xff]  ;;  %v3527_v43 = vld [vmem:[#allocation25 + $0x910] sm:$0xff]  ;;  %v2878_v26 = vld [vmem:[#allocation25 + $0x258] sm:$0xff] }
 0xc58   : > { %3729 = vmatpush.msra.mxu2 %v3486_v22  ;;  %3386 = vmatpush.msra.mxu3 %v2844_v25  ;;  %v3525_v22 = vld [vmem:[#allocation25 + $0x900] sm:$0xff]  ;;  %v2876_v25 = vld [vmem:[#allocation25 + $0x248] sm:$0xff] }
 0xc59   : > { %3293 = vmatpush.msrb.mxu1 %v2845_v2  ;;  %3730 = vmatmul.f32.vlgmr.msra.gmra.mxu2 %v6092_v40  ;;  %v3507_v2 = vld [vmem:[#allocation25 + $0x870] sm:$0xff] }
 0xc5a   : > { %3355 = vmatpush.msrb.mxu0 %v2828_v3  ;;  %3279 = vmatmul.f32.gmra.mxu3 %v6052_v21  ;;  %v2874_v3 = vld [vmem:[#allocation25 + $0x238] sm:$0xff] }
 0xc5b   : > { %3294 = vmatpush.msrb.mxu1 %v2843_v20  ;;  %3228 = vmatmul.f32.gmra.mxu0 %v6018_v46  ;;  %v6099_v46 = vsel %vm1060_vm13, %v3573_v13, %v3583_v59  ;;  %v3509_v13 = vld [vmem:[#allocation25 + $0x880] sm:$0xff] }
 0xc5c   : > { %3356 = vmatpush.msrb.mxu0 %v2826_v5  ;;  %3387 = vmatpush.msra.mxu3 %v2842_v49  ;;  %v3521_v20 = vld [vmem:[#allocation25 + $0x8e0] sm:$0xff]  ;;  %v2872_v5 = vld [vmem:[#allocation25 + $0x228] sm:$0xff]  ;;  %v3503_v49 = vld [vmem:[#allocation25 + $0x850] sm:$0xff] }
 0xc5d   : > { %3182 = vmatmul.f32.gmra.mxu1 %v6075_v54  ;;  %v2818_v54 = vld [vmem:[#allocation25 + $0x78] sm:$0xff] }
 0xc5e   : > { %3295 = vmatpush.msrb.mxu1 %v2841_v44  ;;  %3357 = vmatpush.msrb.mxu0 %v2824_v45  ;;  %v3446_v44 = vld [vmem:[#allocation10 + $0x10] sm:$0xfc]  ;;  %v2870_v45 = vld [vmem:[#allocation25 + $0x218] sm:$0xff] }
 0xc5f   : > { %3388 = vmatpush.msra.mxu3 %v2840_v53  ;;  %v4754_v53 = vld [vmem:[#allocation10 + $0x30] sm:$0xff] }
 0xc60   : > { %3296 = vmatpush.msrb.mxu1 %v2839_v50  ;;  %3358 = vmatpush.msrb.mxu0 %v2822_v11  ;;  %v3576_v59 = vrot.slane %v4754_v53, 2  ;;  %v3501_v50 = vld [vmem:[#allocation25 + $0x840] sm:$0xff] }
 0xc61   : > { %3389 = vmatpush.msra.mxu3 %v2838_v48  ;;  %3733 = vmatmul.f32.gmra.mxu2 %v6099_v46  ;;  %v3517_v11 = vld [vmem:[#allocation25 + $0x8c0] sm:$0xff]  ;;  %v2868_v48 = vld [vmem:[#allocation25 + $0x208] sm:$0xff] }
 0xc62   : > { %3297 = vmatpush.msrb.mxu1 %v2837_v30  ;;  %3359 = vmatpush.msrb.mxu0 %v2820_v57  ;;  %v3575_v30 = vrot.slane %v3446_v44, 2  ;;  %v3499_v57 = vld [vmem:[#allocation25 + $0x830] sm:$0xff]  ;;  %v3460_v44 = vld [vmem:[#allocation25 + $0x6f8] sm:$0xff] }
 0xc63   : > { %3390 = vmatpush.msra.mxu3 %v2836_v39  ;;  %4520 = vmatmul.msk.f32.vlgmr.msra.gmra.mxu0 %vm3066_vm1, %v6048_v35  ;;  %v2812_v35 = vld [vmem:[#allocation25 + $0x48] sm:$0xff]  ;;  %v3559_v39 = vld [vmem:[#allocation25 + $0xa10] sm:$0xff] }
 0xc64   : > { %3298 = vmatpush.msrb.mxu1 %v2835_v51  ;;  %3360 = vmatpush.msrb.mxu0 %v2818_v54  ;;  %v3560_v51 = vld [vmem:[#allocation25 + $0xa18] sm:$0xff]  ;;  %v3450_v54 = vld [vmem:[#allocation10 + $0x50] sm:$0x3] }
 0xc65   : > { %3645 = vmatpush.msrb.mxu3 %v3547_v42  ;;  %3299 = vmatmul.f32.vlgmr.msrb.gmra.mxu1 %v2796_v4  ;;  %v3497_v42 = vld [vmem:[#allocation25 + $0x820] sm:$0xff] }
 0xc66   : > { %3391 = vmatmul.f32.vlgmr.msra.gmra.mxu3 %v2796_v4  ;;  %3398 = vmatpush.msra.mxu1 %v2898_v0  ;;  %v3557_v0 = vld [vmem:[#allocation25 + $0xa00] sm:$0xff]  ;;  %v3495_v4 = vld [vmem:[#allocation25 + $0x810] sm:$0xff] }
 0xc67   : > { %3646 = vmatpush.msrb.mxu3 %v3545_v56  ;;  %3361 = vmatpush.msrb.mxu0 %v2816_v10  ;;  %v3558_v56 = vld [vmem:[#allocation25 + $0xa08] sm:$0xff]  ;;  %v3555_v10 = vld [vmem:[#allocation25 + $0x9f0] sm:$0xff] }
 0xc68   : > { %3399 = vmatpush.msra.mxu1 %v2896_v58  ;;  %v3585_v58 = vrot.slane %v3450_v54, 2 }
 0xc69   : > { %3647 = vmatpush.msrb.mxu3 %v3543_v41  ;;  %3362 = vmatpush.msrb.mxu0 %v2814_v8  ;;  %v3556_v41 = vld [vmem:[#allocation25 + $0x9f8] sm:$0xff]  ;;  %v3493_v8 = vld [vmem:[#allocation25 + $0x800] sm:$0xff] }
 0xc6a   : > { %3400 = vmatpush.msra.mxu1 %v2894_v47  ;;  %v3553_v47 = vld [vmem:[#allocation25 + $0x9e0] sm:$0xff] }
 0xc6b   : > { %3648 = vmatpush.msrb.mxu3 %v3541_v55  ;;  %3363 = vmatpush.msrb.mxu0 %v2812_v35  ;;  %v3491_v55 = vld [vmem:[#allocation25 + $0x7f0] sm:$0xff] }
 0xc6c   : > { %3401 = vmatpush.msra.mxu1 %v2892_v33  ;;  %4521 = vmatmul.msk.f32.gmra.mxu0 %vm3066_vm1, %v6055_v38  ;;  %v3551_v35 = vld [vmem:[#allocation25 + $0x9d0] sm:$0xff]  ;;  %v3554_v33 = vld [vmem:[#allocation25 + $0x9e8] sm:$0xff] }
 0xc6d   : > { %3649 = vmatpush.msrb.mxu3 %v3539_v24  ;;  %3364 = vmatpush.msrb.mxu0 %v2810_v62  ;;  %v3489_v24 = vld [vmem:[#allocation25 + $0x7e0] sm:$0xff] }
 0xc6e   : > { %3394 = vmatmul.f32.gmra.mxu3 %v6032_v23  ;;  %3402 = vmatpush.msra.mxu1 %v2890_v6  ;;  %v3549_v62 = vld [vmem:[#allocation25 + $0x9c0] sm:$0xff]  ;;  %v3552_v6 = vld [vmem:[#allocation25 + $0x9d8] sm:$0xff] }
 0xc6f   : > { %3302 = vmatmul.f32.gmra.mxu1 %v6032_v23  ;;  %3650 = vmatpush.msrb.mxu3 %v3537_v36  ;;  %v2880_v23 = vld [vmem:[#allocation25 + $0x268] sm:$0xff]  ;;  %v3484_v36 = vld [vmem:[#allocation25 + $0x7b8] sm:$0xff] }
 0xc70   : > { %3365 = vmatpush.msrb.mxu0 %v2808_v12  ;;  %3403 = vmatpush.msra.mxu1 %v2888_v63  ;;  %v3487_v12 = vld [vmem:[#allocation25 + $0x7d0] sm:$0xff] }
 0xc71   : > { %3651 = vmatpush.msrb.mxu3 %v3535_v1  ;;  %v3447_v63 = vld [vmem:[#allocation10 + $0x18] sm:$0xfc]  ;;  %v3579_v1 = vrot.slane %v6055_v38, 2  ;;  %v3478_v38 = vld [vmem:[#allocation25 + $0x788] sm:$0xff] }
 0xc72   : > { %3366 = vmatpush.msrb.mxu0 %v2806_v9  ;;  %3404 = vmatpush.msra.mxu1 %v2886_v7  ;;  %v3550_v9 = vld [vmem:[#allocation25 + $0x9c8] sm:$0xff] }
 0xc73   : > { %3652 = vmatpush.msrb.mxu3 %v3533_v27  ;;  %v3482_v7 = vld [vmem:[#allocation25 + $0x7a8] sm:$0xff]  ;;  %v3485_v27 = vld [vmem:[#allocation25 + $0x7c0] sm:$0xff] }
 0xc74   : > { %3367 = vmatpush.msrb.mxu0 %v2804_v29  ;;  %3405 = vmatpush.msra.mxu1 %v2884_v37  ;;  %v3578_v29 = vrot.slane %v3447_v63, 2  ;;  %v3480_v37 = vld [vmem:[#allocation25 + $0x798] sm:$0xff] }
 0xc75   : > { %3653 = vmatpush.msrb.mxu3 %v3531_v28  ;;  %3368 = vmatmul.f32.vlgmr.msrb.gmra.mxu0 %v6085_v15  ;;  %v3505_v15 = vld [vmem:[#allocation25 + $0x860] sm:$0xff] }
 0xc76   : > { %3622 = vmatpush.msra.mxu0 %v3515_v14  ;;  %3406 = vmatpush.msra.mxu1 %v2882_v60  ;;  %v3548_v14 = vld [vmem:[#allocation25 + $0x9b8] sm:$0xff]  ;;  %v3580_v28 = vsel %vm1060_vm13, %v3578_v29, %v3579_v1  ;;  %v3546_v60 = vld [vmem:[#allocation25 + $0x9a8] sm:$0xff] }
 0xc77   : > { %3654 = vmatpush.msrb.mxu3 %v3529_v17  ;;  %v3476_v17 = vld [vmem:[#allocation25 + $0x778] sm:$0xff] }
 0xc78   : > { %3623 = vmatpush.msra.mxu0 %v3513_v18  ;;  %3407 = vmatpush.msra.mxu1 %v2880_v23  ;;  %v3451_v18 = vld [vmem:[#allocation10 + $0x58] sm:$0x3]  ;;  %v3544_v23 = vld [vmem:[#allocation25 + $0x998] sm:$0xff] }
 0xc79   : > { %3655 = vmatpush.msrb.mxu3 %v3527_v43  ;;  %v3474_v43 = vld [vmem:[#allocation25 + $0x768] sm:$0xff] }
 0xc7a   : > { %3624 = vmatpush.msra.mxu0 %v3511_v34  ;;  %3408 = vmatpush.msra.mxu1 %v2878_v26  ;;  %v3587_v34 = vrot.slane %v3451_v18, 2  ;;  %v3542_v26 = vld [vmem:[#allocation25 + $0x988] sm:$0xff] }
 0xc7b   : > { %3656 = vmatpush.msrb.mxu3 %v3525_v22 }
 0xc7c   : > { %3625 = vmatpush.msra.mxu0 %v3509_v13  ;;  %3409 = vmatpush.msra.mxu1 %v2876_v25  ;;  %v3472_v13 = vld [vmem:[#allocation25 + $0x758] sm:$0xff]  ;;  %v3588_v22 = vsel %vm1060_vm13, %v3579_v1, %v3587_v34  ;;  %v3470_v25 = vld [vmem:[#allocation25 + $0x748] sm:$0xff] }
 0xc7d   : > { %3657 = vmatpush.msrb.mxu3 %v3523_v19  ;;  %3371 = vmatmul.f32.gmra.mxu0 %v6052_v21  ;;  %v6111_v21 = vsel %vm1060_vm13, %v3575_v30, %v3576_v59  ;;  %v3468_v19 = vld [vmem:[#allocation25 + $0x738] sm:$0xff]  ;;  %v3522_v30 = vld [vmem:[#allocation25 + $0x8e8] sm:$0xff] }
 0xc7e   : > { %3626 = vmatpush.msra.mxu0 %v3507_v2  ;;  %3410 = vmatpush.msra.mxu1 %v2874_v3  ;;  %v3538_v2 = vld [vmem:[#allocation25 + $0x968] sm:$0xff]  ;;  %v3536_v3 = vld [vmem:[#allocation25 + $0x958] sm:$0xff] }
 0xc7f   : > { %3658 = vmatpush.msrb.mxu3 %v3521_v20  ;;  %v3534_v20 = vld [vmem:[#allocation25 + $0x948] sm:$0xff] }
 0xc80   : > { %3627 = vmatpush.msra.mxu0 %v3505_v15  ;;  %3411 = vmatpush.msra.mxu1 %v2872_v5  ;;  %v3466_v15 = vld [vmem:[#allocation25 + $0x728] sm:$0xff]  ;;  %v3464_v5 = vld [vmem:[#allocation25 + $0x718] sm:$0xff] }
 0xc81   : > { %3659 = vmatpush.msrb.mxu3 %v3519_v32  ;;  %v3530_v32 = vld [vmem:[#allocation25 + $0x928] sm:$0xff] }
 0xc82   : > { %3628 = vmatpush.msra.mxu0 %v3503_v49  ;;  %3412 = vmatpush.msra.mxu1 %v2870_v45  ;;  %v3532_v49 = vld [vmem:[#allocation25 + $0x938] sm:$0xff] }
 0xc83   : > { %3660 = vmatpush.msrb.mxu3 %v3517_v11  ;;  %v3528_v45 = vld [vmem:[#allocation25 + $0x918] sm:$0xff] }
 0xc84   : > { %3629 = vmatpush.msra.mxu0 %v3501_v50  ;;  %3413 = vmatpush.msra.mxu1 %v2868_v48  ;;  %v3456_v50 = vld [vmem:[#allocation25 + $0x6d8] sm:$0xff]  ;;  %v3454_v48 = vld [vmem:[#allocation25 + $0x6c8] sm:$0xff] }
 0xc85   : > { %3661 = vmatmul.f32.vlgmr.msrb.gmra.mxu3 %v6111_v21  ;;  %3414 = vmatmul.f32.vlgmr.msra.gmra.mxu1 %v6044_v16  ;;  %v6116_v16 = vsel %vm1060_vm13, %v3576_v59, %v3585_v58  ;;  %v3526_v59 = vld [vmem:[#allocation25 + $0x908] sm:$0xff]  ;;  %v3524_v11 = vld [vmem:[#allocation25 + $0x8f8] sm:$0xff] }
 0xc86   : > { %3630 = vmatpush.msra.mxu0 %v3499_v57  ;;  %3678 = vmatpush.msrb.mxu1 %v3559_v39  ;;  %v3520_v57 = vld [vmem:[#allocation25 + $0x8d8] sm:$0xff]  ;;  %v3518_v39 = vld [vmem:[#allocation25 + $0x8c8] sm:$0xff] }
 0xc87   : > { %3770 = vmatpush.msra.mxu3 %v3560_v51  ;;  %v3111_v51 = vpop.f32.mrf.mxu2 }
 0xc88   : > { %3631 = vmatpush.msra.mxu0 %v3497_v42  ;;  %3679 = vmatpush.msrb.mxu1 %v3557_v0  ;;  %v3134_v0 = vpop.f32.mrf.mxu3 }
 0xc89   : > { %3771 = vmatpush.msra.mxu3 %v3558_v56 }
 0xc8a   : > { %3632 = vmatpush.msra.mxu0 %v3495_v4  ;;  %3680 = vmatpush.msrb.mxu1 %v3555_v10 }
 0xc8b   : > { %3772 = vmatpush.msra.mxu3 %v3556_v41 }
 0xc8c   : > { %3633 = vmatpush.msra.mxu0 %v3493_v8  ;;  %3681 = vmatpush.msrb.mxu1 %v3553_v47 }
 0xc8d   : > { %3664 = vmatmul.f32.gmra.mxu3 %v6116_v16  ;;  %3417 = vmatmul.f32.gmra.mxu1 %v4754_v53  ;;  %v3458_v53 = vld [vmem:[#allocation25 + $0x6e8] sm:$0xff] }
 0xc8e   : > { %3634 = vmatpush.msra.mxu0 %v3491_v55  ;;  %3682 = vmatpush.msrb.mxu1 %v3551_v35 }
 0xc8f   : > { %3773 = vmatpush.msra.mxu3 %v3554_v33  ;;  %v3114_v56 = vpop.f32.mrf.mxu2 }
 0xc90   : > { %3635 = vmatpush.msra.mxu0 %v3489_v24  ;;  %3683 = vmatpush.msrb.mxu1 %v3549_v62  ;;  %v3137_v58 = vpop.f32.mrf.mxu3 }
 0xc91   : > { %3774 = vmatpush.msra.mxu3 %v3552_v6 }
 0xc92   : > { %3691 = vmatpush.msra.mxu1 %v3484_v36  ;;  %3636 = vmatpush.msra.mxu0 %v3487_v12 }
 0xc93   : > { %3775 = vmatpush.msra.mxu3 %v3550_v9 }
 0xc94   : > { %3692 = vmatpush.msra.mxu1 %v3482_v7  ;;  %3637 = vmatpush.msra.mxu0 %v3485_v27 }
 0xc95   : > { %3638 = vmatmul.f32.vlgmr.msra.gmra.mxu0 %v6092_v40  ;;  %4526 = vmatmul.msk.f32.vlgmr.msra.gmra.mxu3 %vm3066_vm1, %v3580_v28  ;;  %v3540_v40 = vld [vmem:[#allocation25 + $0x978] sm:$0xff] }
 0xc96   : > { %3693 = vmatpush.msra.mxu1 %v3480_v37  ;;  %3737 = vmatpush.msrb.mxu0 %v3548_v14 }
 0xc97   : > { %4524 = vmatmul.msk.f32.vlgmr.msrb.gmra.mxu1 %vm3066_vm1, %v3580_v28  ;;  %v3203_v41 = vpop.f32.mrf.mxu2 }
 0xc98   : > { %3694 = vmatpush.msra.mxu1 %v3478_v38  ;;  %3738 = vmatpush.msrb.mxu0 %v3546_v60 }
 0xc9a   : > { %3695 = vmatpush.msra.mxu1 %v3476_v17  ;;  %3739 = vmatpush.msrb.mxu0 %v3544_v23 }
 0xc9c   : > { %3696 = vmatpush.msra.mxu1 %v3474_v43  ;;  %3740 = vmatpush.msrb.mxu0 %v3542_v26 }
 0xc9d   : > { %3641 = vmatmul.f32.gmra.mxu0 %v6099_v46  ;;  %4527 = vmatmul.msk.f32.gmra.mxu3 %vm3066_vm1, %v3588_v22  ;;  %v3462_v46 = vld [vmem:[#allocation25 + $0x708] sm:$0xff] }
 0xc9e   : > { %3697 = vmatpush.msra.mxu1 %v3472_v13  ;;  %3741 = vmatpush.msrb.mxu0 %v3540_v40 }
 0xc9f   : > { %4525 = vmatmul.msk.f32.gmra.mxu1 %vm3066_vm1, %v3588_v22  ;;  %vm6643_vm1 = vmmov %vm6642_vm2 }
 0xca0   : > { %3698 = vmatpush.msra.mxu1 %v3470_v25  ;;  %3742 = vmatpush.msrb.mxu0 %v3538_v2 }
 0xca2   : > { %3699 = vmatpush.msra.mxu1 %v3468_v19  ;;  %3743 = vmatpush.msrb.mxu0 %v3536_v3 }
 0xca4   : > { %3700 = vmatpush.msra.mxu1 %v3466_v15  ;;  %3744 = vmatpush.msrb.mxu0 %v3534_v20 }
 0xca6   : > { %3701 = vmatpush.msra.mxu1 %v3464_v5  ;;  %3745 = vmatpush.msrb.mxu0 %v3532_v49 }
 0xca8   : > { %3702 = vmatpush.msra.mxu1 %v3462_v46  ;;  %3746 = vmatpush.msrb.mxu0 %v3530_v32  ;;  %v3787_v32 = vld [vmem:[#allocation26] sm:$0x3] }
 0xcaa   : > { %3703 = vmatpush.msra.mxu1 %v3460_v44  ;;  %3747 = vmatpush.msrb.mxu0 %v3528_v45 }
 0xcac   : > { %3704 = vmatpush.msra.mxu1 %v3458_v53  ;;  %3748 = vmatpush.msrb.mxu0 %v3526_v59 }
 0xcae   : > { %3705 = vmatpush.msra.mxu1 %v3456_v50  ;;  %3749 = vmatpush.msrb.mxu0 %v3524_v11  ;;  %v3789_v11 = vperm.slane %v3787_v32, 0 }
 0xcb0   : > { %3706 = vmatpush.msra.mxu1 %v3454_v48  ;;  %3750 = vmatpush.msrb.mxu0 %v3522_v30 }
 0xcb1   : > { %3707 = vmatmul.f32.vlgmr.msra.gmra.mxu1 %v6071_v52 }
 0xcb2   : > { %3751 = vmatpush.msrb.mxu0 %v3520_v57 }
 0xcb4   : > { %3752 = vmatpush.msrb.mxu0 %v3518_v39 }
 0xcb5   : > { %3753 = vmatmul.f32.vlgmr.msrb.gmra.mxu0 %v6111_v21  ;;  %v3206_v21 = vpop.f32.mrf.mxu2 }
 0xcb9   : > { %3710 = vmatmul.f32.gmra.mxu1 %v6082_v61 }
 0xcba   : > { %v3088_v42 = vpop.f32.mrf.mxu1 }
 0xcbb   : > { %v3112_v60 = vadd.f32 %v3111_v51, %v3088_v42 }
 0xcbd   : > { %3756 = vmatmul.f32.gmra.mxu0 %v6116_v16  ;;  %v3157_v54 = vpop.f32.mrf.mxu0  ;;  %v3323_v12 = vpop.f32.mrf.mxu2  ;;  %v3135_v23 = vadd.f32 %v3134_v0, %v3112_v60 }
 0xcbf   : > { %v3158_v13 = vadd.f32 %v3157_v54, %v3135_v23 }
 0xcc3   : > { %v3249_v55 = vpop.f32.mrf.mxu3 }
 0xcc4   : > { %v3091_v4 = vpop.f32.mrf.mxu1 }
 0xcc5   : > { %v3326_v7 = vpop.f32.mrf.mxu2  ;;  %v3115_v26 = vadd.f32 %v3114_v56, %v3091_v4 }
 0xcc6   : > { %v3160_v10 = vpop.f32.mrf.mxu0 }
 0xcc7   : > { %v3138_v25 = vadd.f32 %v3137_v58, %v3115_v26 }
 0xcc9   : > { %v3161_v20 = vadd.f32 %v3160_v10, %v3138_v25 }
 0xccc   : > { %v3252_v6 = vpop.f32.mrf.mxu3 }
 0xccd   : > { %v3438_v14 = vpop.f32.mrf.mxu2 }
 0xccf   : > { %v3226_v52 = vpop.f32.mrf.mxu0 }
 0xcd1   : > { %v3180_v8 = vpop.f32.mrf.mxu1 }
 0xcd2   : > { %v3204_v47 = vadd.f32 %v3203_v41, %v3180_v8 }
 0xcd4   : > { %v3227_v35 = vadd.f32 %v3226_v52, %v3204_v47  ;;  %v3277_v63 = vpop.f32.mrf.mxu3 }
 0xcd5   : > { %v6136_v17 = vpop.f32.mrf.mxu2  ;;  %v3278_v22 = vadd.f32 %v3277_v63, %v3158_v13 }
 0xcd6   : > { %v6132_v33 = vadd.f32 %v3249_v55, %v3227_v35 }
 0xcd8   : > { %v3229_v62 = vpop.f32.mrf.mxu0 }
 0xcda   : > { %v3183_v61 = vpop.f32.mrf.mxu1 }
 0xcdb   : > { %v3207_v24 = vadd.f32 %v3206_v21, %v3183_v61 }
 0xcdd   : > { %v3230_v16 = vadd.f32 %v3229_v62, %v3207_v24  ;;  %v3280_v27 = vpop.f32.mrf.mxu3  ;;  %v3616_v19 = vpop.f32.mrf.mxu2 }
 0xcde   : > { %v3281_v44 = vadd.f32 %v3280_v27, %v3161_v20 }
 0xcdf   : > { %v6134_v36 = vadd.f32 %v3252_v6, %v3230_v16 }
 0xce0   : > { %v3346_v1 = vpop.f32.mrf.mxu0 }
 0xce2   : > { %v3300_v9 = vpop.f32.mrf.mxu1 }
 0xce3   : > { %v3301_v2 = vadd.f32 %v3300_v9, %v3278_v22 }
 0xce5   : > { %v3324_v5 = vadd.f32 %v3323_v12, %v3301_v2  ;;  %v3619_v30 = vpop.f32.mrf.mxu2 }
 0xce7   : > { %v3347_v59 = vadd.f32 %v3346_v1, %v3324_v5  ;;  %v4557_v5 = vld [vmem:[%s6553_s11 + $0x208] sm:$0xff] }
 0xce9   : > { %v3349_v29 = vpop.f32.mrf.mxu0  ;;  %v3392_v28 = vpop.f32.mrf.mxu3 }
 0xcec   : > { %v3303_v37 = vpop.f32.mrf.mxu1 }
 0xced   : > { %v3304_v53 = vadd.f32 %v3303_v37, %v3281_v44  ;;  %v3731_v61 = vpop.f32.mrf.mxu2  ;;  %v4553_v44 = vld [vmem:[%s6553_s11 + $0x1e8] sm:$0xff] }
 0xcef   : > { %v3327_v39 = vadd.f32 %v3326_v7, %v3304_v53  ;;  %v4552_v53 = vld [vmem:[%s6553_s11 + $0x1e0] sm:$0xff] }
 0xcf1   : > { %v3395_v34 = vpop.f32.mrf.mxu3  ;;  %v3350_v58 = vadd.f32 %v3349_v29, %v3327_v39  ;;  %v3790_v29 = vperm.slane %v3787_v32, 1  ;;  %v4554_v32 = vld [vmem:[%s6553_s11 + $0x1f0] sm:$0xff] }
 0xcf2   : > { %v3369_v38 = vpop.f32.mrf.mxu0  ;;  %v4546_v39 = vld [vmem:[%s6553_s11 + $0x1b0] sm:$0xff] }
 0xcf3   : > { %v3370_v21 = vadd.f32 %v3369_v38, %v6132_v33 }
 0xcf5   : > { %v3393_v62 = vadd.f32 %v3392_v28, %v3370_v21  ;;  %v3734_v26 = vpop.f32.mrf.mxu2 }
 0xcfa   : > { %v3372_v43 = vpop.f32.mrf.mxu0 }
 0xcfb   : > { %v3373_v1 = vadd.f32 %v3372_v43, %v6134_v36 }
 0xcfd   : > { %v3396_v60 = vadd.f32 %v3395_v34, %v3373_v1  ;;  %v4542_v1 = vld [vmem:[%s6553_s11 + $0x190] sm:$0xff] }
 0xd02   : > { %v3415_v18 = vpop.f32.mrf.mxu1 }
 0xd03   : > { %v3416_v16 = vadd.f32 %v3415_v18, %v3393_v62 }
 0xd05   : > { %v3439_v7 = vadd.f32 %v3438_v14, %v3416_v16 }
 0xd08   : > { %v3662_v3 = vpop.f32.mrf.mxu3 }
 0xd0a   : > { %v3418_v40 = vpop.f32.mrf.mxu1 }
 0xd0b   : > { %v3419_v13 = vadd.f32 %v3418_v40, %v3396_v60  ;;  %v4559_v40 = vld [vmem:[%s6553_s11 + $0x218] sm:$0xff] }
 0xd0c   : > { %4032 = vmatpush.msrb.mxu1 %v4559_v40  ;;  %v4539_v60 = vld [vmem:[%s6553_s11 + $0x178] sm:$0xff]  ;;  %v4572_v40 = vld [vmem:[%s6553_s11 + $0x260] sm:$0xff] }
 0xd0d   : > { %v3442_v2 = vadd.f32 %v6136_v17, %v3419_v13  ;;  %v4558_v17 = vld [vmem:[%s6553_s11 + $0x210] sm:$0xff] }
 0xd0e   : > { %4033 = vmatpush.msrb.mxu1 %v4558_v17  ;;  %v4578_v13 = vld [vmem:[%s6553_s11 + $0x290] sm:$0xff]  ;;  %v4531_v17 = vld [vmem:[%s6553_s11 + $0x138] sm:$0xff] }
 0xd10   : > { %v3665_v54 = vpop.f32.mrf.mxu3  ;;  %4034 = vmatpush.msrb.mxu1 %v4557_v5  ;;  %v4571_v5 = vld [vmem:[%s6553_s11 + $0x258] sm:$0xff] }
 0xd12   : > { %v3639_v15 = vpop.f32.mrf.mxu0 }
 0xd13   : > { %v3640_v49 = vadd.f32 %v3639_v15, %v3616_v19 }
 0xd14   : > { %v3685_v46 = vpop.f32.mrf.mxu1 }
 0xd15   : > { %v3663_v45 = vadd.f32 %v3662_v3, %v3640_v49  ;;  %v4556_v49 = vld [vmem:[%s6553_s11 + $0x200] sm:$0xff] }
 0xd16   : > { %4035 = vmatpush.msrb.mxu1 %v4556_v49  ;;  %v4530_v49 = vld [vmem:[%s6553_s11 + $0x130] sm:$0xff] }
 0xd17   : > { %v3686_v50 = vadd.f32 %v3685_v46, %v3663_v45  ;;  %v4555_v46 = vld [vmem:[%s6553_s11 + $0x1f8] sm:$0xff] }
 0xd18   : > { %v3777_v12 = vpop.f32.mrf.mxu3  ;;  %4036 = vmatpush.msrb.mxu1 %v4555_v46  ;;  %v3910_v46 = vld [vmem:[%s6553_s11 + $0x60] sm:$0xff] }
 0xd19   : > { %v3783_v48 = vadd.f32 %v3686_v50, %v3347_v59  ;;  %v4551_v59 = vld [vmem:[%s6553_s11 + $0x1d8] sm:$0xff]  ;;  %v4550_v50 = vld [vmem:[%s6553_s11 + $0x1d0] sm:$0xff] }
 0xd1a   : > { %v3642_v57 = vpop.f32.mrf.mxu0  ;;  %4037 = vmatpush.msrb.mxu1 %v4554_v32  ;;  %v4570_v32 = vld [vmem:[%s6553_s11 + $0x250] sm:$0xff] }
 0xd1b   : > { %v3793_v51 = vadd.f32 %v3789_v11, %v3783_v48  ;;  %v3643_v42 = vadd.f32 %v3642_v57, %v3619_v30  ;;  %v4549_v48 = vld [vmem:[%s6553_s11 + $0x1c8] sm:$0xff]  ;;  %v4548_v30 = vld [vmem:[%s6553_s11 + $0x1c0] sm:$0xff]  ;;  %v4547_v57 = vld [vmem:[%s6553_s11 + $0x1b8] sm:$0xff] }
 0xd1c   : > { %v3688_v4 = vpop.f32.mrf.mxu1  ;;  %4038 = vmatpush.msrb.mxu1 %v4553_v44  ;;  %v4529_v44 = vld [vmem:[%s6553_s11 + $0x128] sm:$0xff] }
 0xd1d   : > { %v3797_v0 = vmax.f32 %v3793_v51, 0.0  ;;  %v3666_v56 = vadd.f32 %v3665_v54, %v3643_v42  ;;  %v4545_v54 = vld [vmem:[%s6553_s11 + $0x1a8] sm:$0xff] }
 0xd1e   : > { %4039 = vmatpush.msrb.mxu1 %v4552_v53  ;;  %v4569_v53 = vld [vmem:[%s6553_s11 + $0x248] sm:$0xff] }
 0xd1f   : > { %v3805_v10 = vrot.slane %v3797_v0, 7  ;;  %v3689_v41 = vadd.f32 %v3688_v4, %v3666_v56  ;;  %v4544_v0 = vld [vmem:[%s6553_s11 + $0x1a0] sm:$0xff] }
 0xd20   : > { %v3780_v18 = vpop.f32.mrf.mxu3  ;;  %4040 = vmatpush.msrb.mxu1 %v4551_v59  ;;  %v4528_v59 = vld [vmem:[%s6553_s11 + $0x120] sm:$0xff] }
 0xd21   : > { %v3785_v8 = vadd.f32 %v3689_v41, %v3350_v58  ;;  %3811 = vrot.lane.b32.xlu1 %v3805_v10, %s5136_s28 }
 0xd22   : > { %4041 = vmatpush.msrb.mxu1 %v4550_v50  ;;  %v3908_v50 = vld [vmem:[%s6553_s11 + $0x50] sm:$0xff] }
 0xd23   : > { %v3795_v52 = vadd.f32 %v3789_v11, %v3785_v8 }
 0xd24   : > { %4042 = vmatpush.msrb.mxu1 %v4549_v48  ;;  %v3907_v48 = vld [vmem:[%s6553_s11 + $0x48] sm:$0xff] }
 0xd25   : > { %v3799_v47 = vmax.f32 %v3795_v52, 0.0 }
 0xd26   : > { %4043 = vmatpush.msrb.mxu1 %v4548_v30  ;;  %v3906_v30 = vld [vmem:[%s6553_s11 + $0x40] sm:$0xff] }
 0xd27   : > { %v3807_v55 = vrot.slane %v3799_v47, 7 }
 0xd28   : > { %4044 = vmatpush.msrb.mxu1 %v4547_v57  ;;  %v3905_v57 = vld [vmem:[%s6553_s11 + $0x38] sm:$0xff] }
 0xd29   : > { %3819 = vrot.lane.b32.xlu0 %v3807_v55, %s5136_s28  ;;  %v3808_v35 = vsel %vm790_vm5, %v3805_v10, %v3807_v55 }
 0xd2a   : > { %3815 = vrot.lane.b32.xlu2 %v3808_v35, %s5136_s28  ;;  %4045 = vmatpush.msrb.mxu1 %v4546_v39 }
 0xd2c   : > { %4046 = vmatpush.msrb.mxu1 %v4545_v54  ;;  %v3903_v54 = vld [vmem:[%s6553_s11 + $0x28] sm:$0xff] }
 0xd2e   : > { %v3708_v24 = vpop.f32.mrf.mxu1  ;;  %4047 = vmatpush.msrb.mxu1 %v4544_v0  ;;  %v4562_v0 = vld [vmem:[%s6553_s11 + $0x230] sm:$0xff] }
 0xd2f   : > { %v3732_v6 = vadd.f32 %v3731_v61, %v3708_v24 }
 0xd32   : > { %v3754_v63 = vpop.f32.mrf.mxu0 }
 0xd33   : > { %v3755_v9 = vadd.f32 %v3754_v63, %v3732_v6  ;;  %v4583_v63 = vld [vmem:[%s6553_s11 + $0x2b8] sm:$0xff] }
 0xd34   : > { %4224 = vmatpush.msra.mxu1 %v4583_v63  ;;  %v3925_v63 = vld [vmem:[%s6553_s11 + $0xd8] sm:$0xff] }
 0xd35   : > { %v3778_v27 = vadd.f32 %v3777_v12, %v3755_v9  ;;  %v4543_v12 = vld [vmem:[%s6553_s11 + $0x198] sm:$0xff]  ;;  %v4582_v9 = vld [vmem:[%s6553_s11 + $0x2b0] sm:$0xff] }
 0xd36   : > { %v3711_v37 = vpop.f32.mrf.mxu1  ;;  %4009 = vmatpush.msrb.mxu3 %v4543_v12  ;;  %4225 = vmatpush.msra.mxu1 %v4582_v9  ;;  %v4598_v12 = vld [vmem:[%s6553_s11 + $0x330] sm:$0xff]  ;;  %v4597_v9 = vld [vmem:[%s6553_s11 + $0x328] sm:$0xff] }
 0xd37   : > { %v3784_v23 = vadd.f32 %v3778_v27, %v3439_v7  ;;  %v3735_v33 = vadd.f32 %v3734_v26, %v3711_v37  ;;  %v4541_v7 = vld [vmem:[%s6553_s11 + $0x188] sm:$0xff]  ;;  %v4580_v37 = vld [vmem:[%s6553_s11 + $0x2a0] sm:$0xff]  ;;  %v4538_v26 = vld [vmem:[%s6553_s11 + $0x170] sm:$0xff] }
 0xd38   : > { %v4581_v27 = vld [vmem:[%s6553_s11 + $0x2a8] sm:$0xff]  ;;  %4010 = vmatpush.msrb.mxu3 %v4542_v1 }
 0xd39   : > { %v3794_v22 = vadd.f32 %v3790_v29, %v3784_v23  ;;  %4226 = vmatpush.msra.mxu1 %v4581_v27  ;;  %v4579_v23 = vld [vmem:[%s6553_s11 + $0x298] sm:$0xff] }
 0xd3a   : > { %v3757_v38 = vpop.f32.mrf.mxu0  ;;  %4011 = vmatpush.msrb.mxu3 %v4541_v7 }
 0xd3b   : > { %v3798_v25 = vmax.f32 %v3794_v22, 0.0  ;;  %v3758_v28 = vadd.f32 %v3757_v38, %v3735_v33  ;;  %4227 = vmatpush.msra.mxu1 %v4580_v37  ;;  %v4537_v22 = vld [vmem:[%s6553_s11 + $0x168] sm:$0xff]  ;;  %v4536_v38 = vld [vmem:[%s6553_s11 + $0x160] sm:$0xff] }
 0xd3c   : > { %v4577_v33 = vld [vmem:[%s6553_s11 + $0x288] sm:$0xff] }
 0xd3d   : > { %v3781_v19 = vadd.f32 %v3780_v18, %v3758_v28  ;;  %v3806_v3 = vrot.slane %v3798_v25, 7  ;;  %4228 = vmatpush.msra.mxu1 %v4579_v23  ;;  %v4576_v28 = vld [vmem:[%s6553_s11 + $0x280] sm:$0xff]  ;;  %v4535_v18 = vld [vmem:[%s6553_s11 + $0x158] sm:$0xff] }
 0xd3f   : > { %v3786_v36 = vadd.f32 %v3781_v19, %v3442_v2  ;;  %3813 = vrot.lane.b32.xlu1 %v3806_v3, %s5136_s28  ;;  %4229 = vmatpush.msra.mxu1 %v4578_v13  ;;  %v4575_v2 = vld [vmem:[%s6553_s11 + $0x278] sm:$0xff]  ;;  %v4534_v19 = vld [vmem:[%s6553_s11 + $0x150] sm:$0xff] }
 0xd40   : > { %v3932_v13 = vld [vmem:[%s6553_s11 + $0x110] sm:$0xff] }
 0xd41   : > { %v3796_v14 = vadd.f32 %v3790_v29, %v3786_v36  ;;  %v4540_v29 = vld [vmem:[%s6553_s11 + $0x180] sm:$0xff]  ;;  %4230 = vmatpush.msra.mxu1 %v4577_v33  ;;  %v4533_v36 = vld [vmem:[%s6553_s11 + $0x148] sm:$0xff] }
 0xd42   : > { %4012 = vmatpush.msrb.mxu3 %v4540_v29  ;;  %v4596_v33 = vld [vmem:[%s6553_s11 + $0x320] sm:$0xff] }
 0xd43   : > { %v3800_v43 = vmax.f32 %v3796_v14, 0.0  ;;  %4231 = vmatpush.msra.mxu1 %v4576_v28  ;;  %v3913_v14 = vld [vmem:[%s6553_s11 + $0x78] sm:$0xff] }
 0xd44   : > { %4013 = vmatpush.msrb.mxu3 %v4539_v60  ;;  %4083 = vmatpush.msra.mxu0 %v3913_v14  ;;  %v3933_v60 = vld [vmem:[%s6553_s11 + $0x118] sm:$0xff] }
 0xd45   : > { %v3809_v15 = vrot.slane %v3800_v43, 7  ;;  %4232 = vmatpush.msra.mxu1 %v4575_v2  ;;  %v4573_v43 = vld [vmem:[%s6553_s11 + $0x268] sm:$0xff]  ;;  %v4595_v2 = vld [vmem:[%s6553_s11 + $0x318] sm:$0xff] }
 0xd46   : > { %4014 = vmatpush.msrb.mxu3 %v4538_v26  ;;  %v3921_v14 = vld [vmem:[%s6553_s11 + $0xb8] sm:$0xff] }
 0xd47   : > { %3821 = vrot.lane.b32.xlu0 %v3809_v15, %s5136_s28  ;;  %v3810_v34 = vsel %vm790_vm5, %v3806_v3, %v3809_v15  ;;  %vm6637_vm5 = vcmask 1047681   ;;  %v4574_v3 = vld [vmem:[%s6553_s11 + $0x270] sm:$0xff]  ;;  %v4532_v15 = vld [vmem:[%s6553_s11 + $0x140] sm:$0xff] }
 0xd48   : > { %3817 = vrot.lane.b32.xlu2 %v3810_v34, %s5136_s28  ;;  %4015 = vmatpush.msrb.mxu3 %v4537_v22  ;;  %v3912_v34 = vld [vmem:[%s6553_s11 + $0x70] sm:$0xff] }
 0xd49   : > { %4233 = vmatpush.msra.mxu1 %v4574_v3  ;;  %4084 = vmatpush.msra.mxu0 %v3912_v34  ;;  %v3924_v22 = vld [vmem:[%s6553_s11 + $0xd0] sm:$0xff]  ;;  %v3930_v3 = vld [vmem:[%s6553_s11 + $0x100] sm:$0xff] }
 0xd4a   : > { %4016 = vmatpush.msrb.mxu3 %v4536_v38  ;;  %v3923_v38 = vld [vmem:[%s6553_s11 + $0xc8] sm:$0xff] }
 0xd4b   : > { %4234 = vmatpush.msra.mxu1 %v4573_v43  ;;  %v4593_v43 = vld [vmem:[%s6553_s11 + $0x308] sm:$0xff] }
 0xd4c   : > { %4017 = vmatpush.msrb.mxu3 %v4535_v18 }
 0xd4d   : > { %4235 = vmatpush.msra.mxu1 %v4572_v40  ;;  %v3920_v40 = vld [vmem:[%s6553_s11 + $0xb0] sm:$0xff] }
 0xd4e   : > { %4018 = vmatpush.msrb.mxu3 %v4534_v19  ;;  %v3922_v19 = vld [vmem:[%s6553_s11 + $0xc0] sm:$0xff] }
 0xd4f   : > { %4236 = vmatpush.msra.mxu1 %v4571_v5  ;;  %v4603_v5 = vld [vmem:[%s6553_s11 + $0x358] sm:$0xff] }
 0xd50   : > { %4019 = vmatpush.msrb.mxu3 %v4533_v36  ;;  %v4594_v36 = vld [vmem:[%s6553_s11 + $0x310] sm:$0xff] }
 0xd51   : > { %4237 = vmatpush.msra.mxu1 %v4570_v32 }
 0xd52   : > { %4020 = vmatpush.msrb.mxu3 %v4532_v15 }
 0xd53   : > { %4238 = vmatpush.msra.mxu1 %v4569_v53  ;;  %v3918_v53 = vld [vmem:[%s6553_s11 + $0xa0] sm:$0xff] }
 0xd54   : > { %4021 = vmatpush.msrb.mxu3 %v4531_v17 }
 0xd56   : > { %4022 = vmatpush.msrb.mxu3 %v4530_v49  ;;  %v4592_v49 = vld [vmem:[%s6553_s11 + $0x300] sm:$0xff] }
 0xd58   : > { %4023 = vmatpush.msrb.mxu3 %v4529_v44 }
 0xd5a   : > { %4024 = vmatpush.msrb.mxu3 %v4528_v59  ;;  %v4602_v59 = vld [vmem:[%s6553_s11 + $0x350] sm:$0xff] }
 0xd5c   : > { %4141 = vmatpush.msra.mxu3 %v3933_v60 }
 0xd5e   : > { %4142 = vmatpush.msra.mxu3 %v3932_v13 }
 0xd84   : > { %v3816_v20 = vpop.permute.xlu2 %3815 }
 0xd85   : > { %3839 = vst.msk [vmem:[#allocation11 + $0x18] sm:$0xff] %vm3838_vm6, %v3816_v20  ;;  %vm6651_vm6 = vmmov %vm6650_vm0 }
 0xd8c   : > { %v3846_v45 = vld [vmem:[#allocation11 + $0x18] sm:$0xff] }
 0xd8d   : > { %3853 = vrot.lane.b32.xlu2 %v3846_v45, %s5138_s16  ;;  %v3909_v45 = vld [vmem:[%s6553_s11 + $0x58] sm:$0xff] }
 0xd93   : > { %v3812_v11 = vpop.permute.xlu1 %3811 }
 0xd94   : > { %3835 = vst.msk [vmem:[#allocation11] sm:$0xfe] %vm6637_vm5, %v3812_v11  ;;  %vm6652_vm5 = vmmov %vm6650_vm0 }
 0xd9b   : > { %v3820_v51 = vpop.permute.xlu0 %3819  ;;  %v3845_v42 = vld [vmem:[#allocation11] sm:$0xfe] }
 0xd9c   : > { %3842 = vst.msk [vmem:[#allocation11 + $0x30] sm:$0x1] %vm6638_vm4, %v3820_v51  ;;  %3851 = vrot.lane.b32.xlu1 %v3845_v42, %s5138_s16  ;;  %v4563_v42 = vld [vmem:[%s6553_s11 + $0x238] sm:$0xff]  ;;  %vm6654_vm4 = vmmov %vm6650_vm0 }
 0xd9d   : > { %4067 = vmatpush.msrb.mxu2 %v4563_v42  ;;  %v4587_v42 = vld [vmem:[%s6553_s11 + $0x2d8] sm:$0xff] }
 0xd9f   : > { %4068 = vmatpush.msrb.mxu2 %v4562_v0  ;;  %v4600_v0 = vld [vmem:[%s6553_s11 + $0x340] sm:$0xff] }
 0xda2   : > { %v3818_v56 = vpop.permute.xlu2 %3817 }
 0xda3   : > { %v6202_v4 = vsel %vm6639_vm14, %v3816_v20, %v3818_v56  ;;  %3841 = vst.msk [vmem:[#allocation11 + $0x28] sm:$0xff] %vm6640_vm11, %v3818_v56  ;;  %v3847_v10 = vld [vmem:[#allocation11 + $0x30] sm:$0x1]  ;;  %v3911_v20 = vld [vmem:[%s6553_s11 + $0x68] sm:$0xff]  ;;  %vm6656_vm14 = vmmov %vm6650_vm0 }
 0xda4   : > { %3840 = vst [vmem:[#allocation11 + $0x20] sm:$0xff] %v6202_v4  ;;  %3855 = vrot.lane.b32.xlu0 %v3847_v10, %s5138_s16  ;;  %3871 = vrot.lane.b32.xlu2 %v6202_v4, %s5143_s23  ;;  %v3990_v21 = vrot.slane %v6202_v4, 1  ;;  %v3902_v56 = vld [vmem:[%s6553_s11 + $0x20] sm:$0xff] }
 0xda5   : > { %4085 = vmatpush.msra.mxu0 %v3911_v20 }
 0xda7   : > { %4086 = vmatpush.msra.mxu0 %v3910_v46  ;;  %v3919_v46 = vld [vmem:[%s6553_s11 + $0xa8] sm:$0xff] }
 0xda9   : > { %4087 = vmatpush.msra.mxu0 %v3909_v45  ;;  %v4591_v45 = vld [vmem:[%s6553_s11 + $0x2f8] sm:$0xff] }
 0xdab   : > { %4088 = vmatpush.msra.mxu0 %v3908_v50  ;;  %v4590_v50 = vld [vmem:[%s6553_s11 + $0x2f0] sm:$0xff] }
 0xdad   : > { %4089 = vmatpush.msra.mxu0 %v3907_v48  ;;  %v4589_v48 = vld [vmem:[%s6553_s11 + $0x2e8] sm:$0xff] }
 0xdaf   : > { %4090 = vmatpush.msra.mxu0 %v3906_v30  ;;  %v3916_v30 = vld [vmem:[%s6553_s11 + $0x90] sm:$0xff] }
 0xdb1   : > { %v3814_v58 = vpop.permute.xlu1 %3813  ;;  %4091 = vmatpush.msra.mxu0 %v3905_v57  ;;  %v4601_v57 = vld [vmem:[%s6553_s11 + $0x348] sm:$0xff] }
 0xdb2   : > { %v3823_v41 = vsel %vm6641_vm8, %v3812_v11, %v3814_v58  ;;  %3837 = vst.msk [vmem:[#allocation11 + $0x10] sm:$0xfe] %vm1537_vm15, %v3814_v58  ;;  %v4568_v11 = vld [vmem:[%s6553_s11 + $0x240] sm:$0xff]  ;;  %v4561_v58 = vld [vmem:[%s6553_s11 + $0x228] sm:$0xff] }
 0xdb3   : > { %3836 = vst [vmem:[#allocation11 + $0x8] sm:$0xfe] %v3823_v41  ;;  %4239 = vmatpush.msra.mxu1 %v4568_v11  ;;  %v3901_v41 = vld [vmem:[%s6553_s11 + $0x18] sm:$0xff]  ;;  %4069 = vmatpush.msrb.mxu2 %v4561_v58 }
 0xdb4   : > { %v3917_v11 = vld [vmem:[%s6553_s11 + $0x98] sm:$0xff] }
 0xdb9   : > { %v3822_v8 = vpop.permute.xlu0 %3821 }
 0xdba   : > { %v3825_v52 = vsel %vm6642_vm2, %v3820_v51, %v3822_v8  ;;  %3844 = vst.msk [vmem:[#allocation11 + $0x40] sm:$0x1] %vm1541_vm3, %v3822_v8  ;;  %v3863_v47 = vld [vmem:[#allocation11 + $0x8] sm:$0xfe]  ;;  %v3904_v51 = vld [vmem:[%s6553_s11 + $0x30] sm:$0xff] }
 0xdbb   : > { %v3935_v55 = vld [vmem:[#allocation11 + $0x8] sm:$0xfe]  ;;  %3843 = vst [vmem:[#allocation11 + $0x38] sm:$0x1] %v3825_v52  ;;  %3869 = vrot.lane.b32.xlu1 %v3863_v47, %s5143_s23  ;;  %4092 = vmatpush.msra.mxu0 %v3904_v51  ;;  %v4560_v52 = vld [vmem:[%s6553_s11 + $0x220] sm:$0xff]  ;;  %v3915_v51 = vld [vmem:[%s6553_s11 + $0x88] sm:$0xff] }
 0xdbc   : > { %v3989_v35 = vrot.slane %v3935_v55, 1  ;;  %v3929_v47 = vld [vmem:[%s6553_s11 + $0xf8] sm:$0xff]  ;;  %4070 = vmatpush.msrb.mxu2 %v4560_v52  ;;  %v3899_v55 = vld [vmem:[%s6553_s11 + $0x8] sm:$0xff] }
 0xdbd   : > { %4093 = vmatpush.msra.mxu0 %v3903_v54  ;;  %v3914_v54 = vld [vmem:[%s6553_s11 + $0x80] sm:$0xff]  ;;  %v4153_v10 = vld [vmem:[#allocation11 + $0x8] sm:$0xfc] }
 0xdbe   : > { %v3991_v61 = vsel %vm918_vm12, %v3989_v35, %v3990_v21  ;;  %v3928_v35 = vld [vmem:[%s6553_s11 + $0xf0] sm:$0xff]  ;;  %4106 = vmatpush.msra.mxu2 %v3929_v47 }
 0xdbf   : > { %4048 = vmatmul.f32.vlgmr.msrb.gmra.mxu1 %v3991_v61  ;;  %4094 = vmatpush.msra.mxu0 %v3902_v56  ;;  %v3898_v61 = vld [vmem:[%s6553_s11] sm:$0xff]  ;;  %v4586_v56 = vld [vmem:[%s6553_s11 + $0x2d0] sm:$0xff] }
 0xdc0   : > { %4107 = vmatpush.msra.mxu2 %v3928_v35 }
 0xdc1   : > { %4095 = vmatpush.msra.mxu0 %v3901_v41  ;;  %v4585_v41 = vld [vmem:[%s6553_s11 + $0x2c8] sm:$0xff] }
 0xdc2   : > { %v3865_v24 = vld [vmem:[#allocation11 + $0x38] sm:$0x1] }
 0xdc3   : > { %v3938_v62 = vld [vmem:[#allocation11 + $0x38] sm:$0x1]  ;;  %3873 = vrot.lane.b32.xlu0 %v3865_v24, %s5143_s23  ;;  %4096 = vmatpush.msra.mxu0 %v3900_v31 }
 0xdc4   : > { %v3997_v16 = vrot.slane %v3938_v62, 1  ;;  %v3927_v24 = vld [vmem:[%s6553_s11 + $0xe8] sm:$0xff]  ;;  %v4599_v62 = vld [vmem:[%s6553_s11 + $0x338] sm:$0xff] }
 0xdc5   : > { %4097 = vmatpush.msra.mxu0 %v3899_v55  ;;  %4108 = vmatpush.msra.mxu2 %v3927_v24 }
 0xdc6   : > { %v3998_v6 = vsel %vm918_vm12, %v3990_v21, %v3997_v16 }
 0xdc7   : > { %4051 = vmatmul.f32.gmra.mxu1 %v3998_v6  ;;  %4098 = vmatpush.msra.mxu0 %v3898_v61  ;;  %v3926_v6 = vld [vmem:[%s6553_s11 + $0xe0] sm:$0xff] }
 0xdc8   : > { %4109 = vmatpush.msra.mxu2 %v3926_v6 }
 0xdc9   : > { %4247 = vmatpush.msrb.mxu0 %v4599_v62 }
 0xdca   : > { %4110 = vmatpush.msra.mxu2 %v3925_v63 }
 0xdcb   : > { %4248 = vmatpush.msrb.mxu0 %v4598_v12 }
 0xdcc   : > { %4111 = vmatpush.msra.mxu2 %v3924_v22 }
 0xdcd   : > { %4249 = vmatpush.msrb.mxu0 %v4597_v9 }
 0xdce   : > { %4112 = vmatpush.msra.mxu2 %v3923_v38 }
 0xdcf   : > { %4250 = vmatpush.msrb.mxu0 %v4596_v33 }
 0xdd0   : > { %4113 = vmatpush.msra.mxu2 %v3922_v19 }
 0xdd1   : > { %4251 = vmatpush.msrb.mxu0 %v4595_v2 }
 0xdd2   : > { %4114 = vmatpush.msra.mxu2 %v3921_v14 }
 0xdd3   : > { %4252 = vmatpush.msrb.mxu0 %v4594_v36 }
 0xdd4   : > { %4115 = vmatpush.msra.mxu2 %v3920_v40 }
 0xdd5   : > { %4253 = vmatpush.msrb.mxu0 %v4593_v43 }
 0xdd6   : > { %4116 = vmatpush.msra.mxu2 %v3919_v46 }
 0xdd7   : > { %4254 = vmatpush.msrb.mxu0 %v4592_v49 }
 0xdd8   : > { %4117 = vmatpush.msra.mxu2 %v3918_v53 }
 0xdd9   : > { %4255 = vmatpush.msrb.mxu0 %v4591_v45 }
 0xdda   : > { %4118 = vmatpush.msra.mxu2 %v3917_v11 }
 0xddb   : > { %4256 = vmatpush.msrb.mxu0 %v4590_v50  ;;  %v4753_v50 = vld [vmem:[#allocation28] ss:$0 sm:$0xff] }
 0xddc   : > { %4119 = vmatpush.msra.mxu2 %v3916_v30 }
 0xddd   : > { %4257 = vmatpush.msrb.mxu0 %v4589_v48 }
 0xdde   : > { %4120 = vmatpush.msra.mxu2 %v3915_v51 }
 0xde0   : > { %4121 = vmatpush.msra.mxu2 %v3914_v54 }
 0xde7   : > { %v3854_v25 = vpop.permute.xlu2 %3853 }
 0xde8   : > { %3861 = vst.msk [vmem:[#allocation11 + $0x18] sm:$0xff] %vm6643_vm1, %v3854_v25  ;;  %v3931_v25 = vld [vmem:[%s6553_s11 + $0x108] sm:$0xff] }
 0xde9   : > { %4143 = vmatpush.msra.mxu3 %v3931_v25 }
 0xdeb   : > { %4144 = vmatpush.msra.mxu3 %v3930_v3 }
 0xdef   : > { %v6396_v16 = vld [vmem:[#allocation11 + $0x18] sm:$0xff] }
 0xdf0   : > { %v3987_v1 = vrot.slane %v6396_v16, 1  ;;  %v4202_v37 = vrot.slane %v6396_v16, 2 }
 0xdfe   : > { %v3872_v39 = vpop.permute.xlu2 %3871 }
 0xdff   : > { %3879 = vst.msk [vmem:[#allocation11 + $0x28] sm:$0xff] %vm6644_vm10, %v3872_v39  ;;  %v4588_v39 = vld [vmem:[%s6553_s11 + $0x2e0] sm:$0xff] }
 0xe00   : > { %4258 = vmatpush.msrb.mxu0 %v4588_v39 }
 0xe02   : > { %4259 = vmatpush.msrb.mxu0 %v4587_v42 }
 0xe04   : > { %4260 = vmatpush.msrb.mxu0 %v4586_v56 }
 0xe06   : > { %v3888_v8 = vld [vmem:[#allocation11 + $0x1f] ss:$8 sm:$0x7]  ;;  %4261 = vmatpush.msrb.mxu0 %v4585_v41 }
 0xe07   : > { %3890 = vst.msk [vmem:[#allocation11 + $0x31] ss:$8 sm:$0x7] %vm6359_vm9, %v3888_v8  ;;  %v4584_v8 = vld [vmem:[%s6553_s11 + $0x2c0] sm:$0xff]  ;;  %v3897_v52 = vld [vmem:[#allocation11 + $0x28] sm:$0xff] }
 0xe08   : > { %4262 = vmatpush.msrb.mxu0 %v4584_v8 }
 0xe0e   : > { %v3852_v21 = vpop.permute.xlu1 %3851 }
 0xe0f   : > { %3860 = vst.msk [vmem:[#allocation11] sm:$0xfe] %vm1537_vm15, %v3852_v21  ;;  %vm6647_vm15 = vcmask 261249   ;;  %v3993_v21 = vrot.slane %v3897_v52, 1 }
 0xe16   : > { %v3856_v7 = vpop.permute.xlu0 %3855  ;;  %v3934_v27 = vld [vmem:[#allocation11] sm:$0xfe] }
 0xe17   : > { %v4152_v29 = vld [vmem:[#allocation11] sm:$0xfc]  ;;  %3862 = vst.msk [vmem:[#allocation11 + $0x30] sm:$0x1] %vm1541_vm3, %v3856_v7  ;;  %v3986_v23 = vrot.slane %v3934_v27, 1  ;;  %vm6648_vm3 = vcmask 254080  }
 0xe18   : > { %v4201_v26 = vrot.slane %v4152_v29, 2  ;;  %v4204_v7 = vrot.slane %v4153_v10, 2  ;;  %v4205_v29 = vrot.slane %v6202_v4, 2 }
 0xe19   : > { %v3988_v28 = vsel %vm918_vm12, %v3986_v23, %v3987_v1 }
 0xe1a   : > { %v4203_v18 = vsel %vm1060_vm13, %v4201_v26, %v4202_v37  ;;  %4025 = vmatmul.f32.vlgmr.msrb.gmra.mxu3 %v3988_v28  ;;  %v4206_v60 = vsel %vm1060_vm13, %v4204_v7, %v4205_v29  ;;  %v4156_v26 = vld [vmem:[#allocation11 + $0x38] sm:$0x3] }
 0xe1b   : > { %4240 = vmatmul.f32.vlgmr.msra.gmra.mxu1 %v4203_v18  ;;  %4282 = vmatpush.msrb.mxu3 %v4603_v5  ;;  %v4212_v13 = vrot.slane %v4156_v26, 2 }
 0xe1d   : > { %4283 = vmatpush.msrb.mxu3 %v4602_v59  ;;  %v4213_v33 = vsel %vm1060_vm13, %v4205_v29, %v4212_v13 }
 0xe1e   : > { %v3937_v15 = vld [vmem:[#allocation11 + $0x30] sm:$0x1] }
 0xe1f   : > { %v4155_v34 = vld [vmem:[#allocation11 + $0x30] sm:$0x3]  ;;  %v3995_v17 = vrot.slane %v3937_v15, 1  ;;  %4284 = vmatpush.msrb.mxu3 %v4601_v57 }
 0xe20   : > { %v4210_v20 = vrot.slane %v4155_v34, 2 }
 0xe21   : > { %v3996_v32 = vsel %vm918_vm12, %v3987_v1, %v3995_v17  ;;  %4285 = vmatpush.msrb.mxu3 %v4600_v0 }
 0xe22   : > { %v4211_v44 = vsel %vm1060_vm13, %v4202_v37, %v4210_v20  ;;  %4028 = vmatmul.f32.gmra.mxu3 %v3996_v32  ;;  %v4208_v37 = vrot.slane %v3897_v52, 2 }
 0xe23   : > { %4243 = vmatmul.f32.gmra.mxu1 %v4211_v44 }
 0xe2d   : > { %v3870_v58 = vpop.permute.xlu1 %3869 }
 0xe2e   : > { %3878 = vst.msk [vmem:[#allocation11 + $0x10] sm:$0xfe] %vm6647_vm15, %v3870_v58 }
 0xe35   : > { %v3882_v31 = vld [vmem:[#allocation11 + $0x2] ss:$8 sm:$0x7]  ;;  %v3874_v47 = vpop.permute.xlu0 %3873 }
 0xe36   : > { %v3936_v55 = vld [vmem:[#allocation11 + $0x10] sm:$0xfe]  ;;  %3885 = vst.msk [vmem:[#allocation11] ss:$8 sm:$0x7] %vm6359_vm9, %v3882_v31 }
 0xe37   : > { %v3992_v35 = vrot.slane %v3936_v55, 1  ;;  %3880 = vst.msk [vmem:[#allocation11 + $0x40] sm:$0x1] %vm6648_vm3, %v3874_v47  ;;  %v4154_v1 = vld [vmem:[#allocation11 + $0x10] sm:$0xfc] }
 0xe38   : > { %v4207_v27 = vrot.slane %v4154_v1, 2 }
 0xe39   : > { %v3994_v61 = vsel %vm918_vm12, %v3992_v35, %v3993_v21 }
 0xe3a   : > { %4564 = vmatmul.msk.f32.vlgmr.msrb.gmra.mxu2 %vm6649_vm7, %v3994_v61  ;;  %v4209_v23 = vsel %vm1060_vm13, %v4207_v27, %v4208_v37 }
 0xe3c   : > { %v4049_v18 = vpop.f32.mrf.mxu1 }
 0xe3d   : > { %v3892_v24 = vld [vmem:[#allocation11] sm:$0xff]  ;;  %v3894_v62 = vld [vmem:[#allocation11 + $0x10] sm:$0xff]  ;;  %v3893_v9 = vld [vmem:[#allocation11 + $0x8] sm:$0xff] }
 0xe3e   : > { %4099 = vmatmul.f32.vlgmr.msra.gmra.mxu0 %v3892_v24  ;;  %4566 = vmatmul.msk.f32.vlgmr.msra.gmra.mxu3 %vm6650_vm0, %v3894_v62  ;;  %v3939_v6 = vld [vmem:[#allocation11 + $0x40] sm:$0x1] }
 0xe3f   : > { %v3999_v12 = vrot.slane %v3939_v6, 1 }
 0xe41   : > { %v4000_v63 = vsel %vm918_vm12, %v3993_v21, %v3999_v12  ;;  %vm6653_vm12 = vmmov %vm6650_vm0 }
 0xe42   : > { %4565 = vmatmul.msk.f32.gmra.mxu2 %vm6651_vm6, %v4000_v63 }
 0xe44   : > { %v4052_v14 = vpop.f32.mrf.mxu1 }
 0xe46   : > { %4102 = vmatmul.f32.gmra.mxu0 %v6396_v16  ;;  %4567 = vmatmul.msk.f32.gmra.mxu3 %vm6652_vm5, %v3897_v52  ;;  %v4157_v16 = vld [vmem:[#allocation11 + $0x40] sm:$0x3] }
 0xe47   : > { %v4214_v22 = vrot.slane %v4157_v16, 2 }
 0xe49   : > { %v4215_v38 = vsel %vm1060_vm13, %v4208_v37, %v4214_v22  ;;  %vm6655_vm13 = vmmov %vm6650_vm0 }
 0xe4a   : > { %4122 = vmatmul.f32.vlgmr.msra.gmra.mxu2 %v3893_v9 }
 0xe4e   : > { %4263 = vmatmul.f32.vlgmr.msrb.gmra.mxu0 %v4206_v60  ;;  %4604 = vmatmul.msk.f32.vlgmr.msrb.gmra.mxu3 %vm6653_vm12, %v4209_v23 }
 0xe52   : > { %4125 = vmatmul.f32.gmra.mxu2 %v6202_v4 }
 0xe56   : > { %4266 = vmatmul.f32.gmra.mxu0 %v4213_v33  ;;  %4605 = vmatmul.msk.f32.gmra.mxu3 %vm6654_vm4, %v4215_v38 }
 0xe98   : > { %v4241_v20 = vpop.f32.mrf.mxu1 }
 0xe9d   : > { %v4026_v25 = vpop.f32.mrf.mxu3 }
 0xe9e   : > { %v4050_v15 = vadd.f32 %v4049_v18, %v4026_v25 }
 0xea0   : > { %v4244_v42 = vpop.f32.mrf.mxu1 }
 0xea5   : > { %v4029_v28 = vpop.f32.mrf.mxu3 }
 0xea6   : > { %v4053_v49 = vadd.f32 %v4052_v14, %v4029_v28 }
 0xebb   : > { %v4100_v2 = vpop.f32.mrf.mxu0 }
 0xebd   : > { %v4072_v19 = vpop.f32.mrf.mxu2 }
 0xebe   : > { %v4073_v34 = vadd.f32 %v4072_v19, %v4050_v15 }
 0xec0   : > { %v4101_v17 = vadd.f32 %v4100_v2, %v4073_v34 }
 0xec1   : > { %v4146_v3 = vpop.f32.mrf.mxu3 }
 0xec3   : > { %v4103_v36 = vpop.f32.mrf.mxu0 }
 0xec5   : > { %v4075_v43 = vpop.f32.mrf.mxu2 }
 0xec6   : > { %v4076_v32 = vadd.f32 %v4075_v43, %v4053_v49 }
 0xec8   : > { %v4104_v48 = vadd.f32 %v4103_v36, %v4076_v32 }
 0xec9   : > { %v4149_v40 = vpop.f32.mrf.mxu3 }
 0xecb   : > { %v4264_v4 = vpop.f32.mrf.mxu0 }
 0xecc   : > { %v4265_v44 = vadd.f32 %v4264_v4, %v4241_v20 }
 0xecd   : > { %v4123_v5 = vpop.f32.mrf.mxu2 }
 0xece   : > { %v4124_v46 = vadd.f32 %v4123_v5, %v4101_v17 }
 0xed0   : > { %v4147_v53 = vadd.f32 %v4146_v3, %v4124_v46 }
 0xed1   : > { %v4287_v45 = vpop.f32.mrf.mxu3 }
 0xed2   : > { %v4288_v59 = vadd.f32 %v4287_v45, %v4265_v44 }
 0xed3   : > { %v4267_v30 = vpop.f32.mrf.mxu0 }
 0xed4   : > { %v4293_v11 = vadd.f32 %v4288_v59, %v4147_v53  ;;  %v4268_v0 = vadd.f32 %v4267_v30, %v4244_v42 }
 0xed5   : > { %v4126_v57 = vpop.f32.mrf.mxu2 }
 0xed6   : > { %v4299_v39 = vadd.f32 %v4753_v50, %v4293_v11  ;;  %v4127_v51 = vadd.f32 %v4126_v57, %v4104_v48 }
 0xed8   : > { %v4301_v54 = vmax.f32 %v4299_v39, 0.0  ;;  %v4150_v58 = vadd.f32 %v4149_v40, %v4127_v51 }
 0xed9   : > { %v4290_v56 = vpop.f32.mrf.mxu3 }
 0xeda   : > { %4303 = vst.msk [vmem:[%s610_s22] sm:$0xff] %vm6655_vm13, %v4301_v54  ;;  %v4291_v41 = vadd.f32 %v4290_v56, %v4268_v0 }
 0xedc   : > { %v4294_v8 = vadd.f32 %v4291_v41, %v4150_v58 }
 0xede   : > { %v4300_v52 = vadd.f32 %v4753_v50, %v4294_v8 }
 0xee0   : > { %v4302_v31 = vmax.f32 %v4300_v52, 0.0 }
 0xee2   : > { %4304 = vst.msk [vmem:[%s610_s22 + $0x8] sm:$0xff] %vm6656_vm14, %v4302_v31 }
 0xee3 PF: > { %s29_s25 = sadd.s32 1, %s5115_s25  }
 0xee4   : > { %p26_p7 = scmp.ge.s32.totalorder %s29_s25, 4  }
 0xee6   :  { %28 = sbr.rel (!%p26_p7) target bundleno = 10 (0xa), region = 195 }
 0xeeb   :  { %4326 = vsyncpa [#allocation13], 1 }
 0xeec   :  { %4328 = vsyncpa [#allocation13 + $0x1], 1 }
 0xeed   :  { %4329 = vsyncpa [#allocation15], 1 }
 0xeee   :  { %4330 = vsyncpa [#allocation18], 1 }
 0xeef   :  { %4331 = vsyncpa [#allocation21], 1 }
 0xef0   :  { %4332 = vsyncpa [#allocation24], 1 }
 0xef1   :  { %4333 = vsyncpa [#allocation27], 1 }

</bundles_post_ra>
